<compile_context>
chip_gen: v7x
topology: tpu7x:2x2x1
jax: 0.10.0
libtpu: 0.0.40
codegen_flags: <defaults>
</compile_context>

<pallas_src>
import numpy as np
import jax
import jax.numpy as jnp
from jax.experimental import pallas as pl
from jax.experimental.pallas import tpu as pltpu

N_EMBD = 384
BLOCK_SIZE = 8
NUM_LAYER = 6
VOCAB_SIZE = 65          # deterministic stand-in for len(set(text))
HIDDEN = 4 * N_EMBD
LM_PAD = 128             # lane-dense padded lm_head width (>= VOCAB_SIZE)
LN_EPS = 1e-5            # PyTorch nn.LayerNorm default

LAYERS_PER_STEP = 3      # layers fused per grid step
NUM_STEPS = NUM_LAYER // LAYERS_PER_STEP
assert NUM_LAYER % LAYERS_PER_STEP == 0


def _layernorm(x, g, b):
    mu = jnp.mean(x, axis=-1, keepdims=True)
    c = x - mu
    var = jnp.mean(c * c, axis=-1, keepdims=True)
    return c * jax.lax.rsqrt(var + LN_EPS) * g + b


def bigram_kernel(x0_ref, g1_ref, be1_ref, g2_ref, be2_ref, b1_ref, b2_ref,
                  w1_ref, w2_ref, gf_ref, bf_ref, wlm_ref, blm_ref,
                  logits_ref, x_sc):
    """Grid axis 0 iterates over groups of LAYERS_PER_STEP transformer blocks.

    Big bf16 MLP weights are streamed (double-buffered) through VMEM as fused
    (LAYERS_PER_STEP, ., .) blocks; all small LayerNorm/bias parameters are
    resident (constant index_map, fetched once) and indexed by the absolute
    layer id. The f32 residual-stream activation lives in a VMEM scratch that
    persists across grid steps. The final LayerNorm + lm_head matmul
    (lane-dense, 128-wide padded output) runs on the last grid step.
    """
    s = pl.program_id(0)

    @pl.when(s == 0)
    def _():
        x_sc[...] = x0_ref[...]

    x = x_sc[...]

    for j in range(LAYERS_PER_STEP):
        layer = s * LAYERS_PER_STEP + j    # absolute layer index (dynamic)

        # x = x + sa(ln1(x))  (sa == identity on its input in eval mode; see header)
        x = x + _layernorm(x, g1_ref[layer], be1_ref[layer])

        # x = x + MLP(ln2(x)) : Linear(D->4D) -> ReLU -> Linear(4D->D) -> Dropout(id)
        h = _layernorm(x, g2_ref[layer], be2_ref[layer])
        h = jnp.dot(h.astype(jnp.bfloat16), w1_ref[j],
                    preferred_element_type=jnp.float32) + b1_ref[layer]
        h = jnp.maximum(h, 0.0)
        x = x + (jnp.dot(h.astype(jnp.bfloat16), w2_ref[j],
                         preferred_element_type=jnp.float32) + b2_ref[layer])

    x_sc[...] = x

    @pl.when(s == pl.num_programs(0) - 1)
    def _():
        xf = _layernorm(x, gf_ref[...], bf_ref[...])
        logits_ref[...] = (
            jnp.dot(xf.astype(jnp.bfloat16), wlm_ref[...],
                    preferred_element_type=jnp.float32) + blm_ref[...])


def bigram_forward(idx, params):
    """idx: int32 [B, T] with T <= BLOCK_SIZE. Returns (logits [B,T,V], None)."""
    B, T = idx.shape
    # Embedding gather + positional add (glue, plain JAX).
    tok = jnp.take(params["tok_emb"], idx, axis=0)          # [B, T, D]
    pos = params["pos_emb"][:T]                             # [T, D]
    x0 = (tok + pos).reshape(B * T, N_EMBD).astype(jnp.float32)
    N = B * T
    assert N % 8 == 0, "B*T must stay a multiple of 8 (sublane tiling)"

    grid_spec = pltpu.PrefetchScalarGridSpec(
        num_scalar_prefetch=0,
        grid=(NUM_STEPS,),
        in_specs=[
            pl.BlockSpec((N, N_EMBD), lambda s: (0, 0)),                          # x0 (f32, resident)
            pl.BlockSpec((NUM_LAYER, 1, N_EMBD), lambda s: (0, 0, 0)),            # ln1 gamma (resident)
            pl.BlockSpec((NUM_LAYER, 1, N_EMBD), lambda s: (0, 0, 0)),            # ln1 beta  (resident)
            pl.BlockSpec((NUM_LAYER, 1, N_EMBD), lambda s: (0, 0, 0)),            # ln2 gamma (resident)
            pl.BlockSpec((NUM_LAYER, 1, N_EMBD), lambda s: (0, 0, 0)),            # ln2 beta  (resident)
            pl.BlockSpec((NUM_LAYER, 1, HIDDEN), lambda s: (0, 0, 0)),            # MLP b1    (resident)
            pl.BlockSpec((NUM_LAYER, 1, N_EMBD), lambda s: (0, 0, 0)),            # MLP b2    (resident)
            pl.BlockSpec((LAYERS_PER_STEP, N_EMBD, HIDDEN), lambda s: (s, 0, 0)),  # MLP W1 (bf16, streamed)
            pl.BlockSpec((LAYERS_PER_STEP, HIDDEN, N_EMBD), lambda s: (s, 0, 0)),  # MLP W2 (bf16, streamed)
            pl.BlockSpec((1, N_EMBD), lambda s: (0, 0)),                           # ln_f gamma (resident)
            pl.BlockSpec((1, N_EMBD), lambda s: (0, 0)),                           # ln_f beta  (resident)
            pl.BlockSpec((N_EMBD, LM_PAD), lambda s: (0, 0)),                      # lm_head W (bf16, padded, resident)
            pl.BlockSpec((1, LM_PAD), lambda s: (0, 0)),                           # lm_head b (padded, resident)
        ],
        out_specs=pl.BlockSpec((N, LM_PAD), lambda s: (0, 0)),
        scratch_shapes=[pltpu.VMEM((N, N_EMBD), jnp.float32)],
    )

    logits_padded = pl.pallas_call(
        bigram_kernel,
        out_shape=jax.ShapeDtypeStruct((N, LM_PAD), jnp.float32),
        grid_spec=grid_spec,
        compiler_params=pltpu.CompilerParams(
            dimension_semantics=("arbitrary",),      # serial layer loop (residual carried in scratch)
            vmem_limit_bytes=32 * 1024 * 1024),      # ~16 MB actual; v7x (64 MiB) headroom
    )(x0,
      params["ln1_g"], params["ln1_b"], params["ln2_g"], params["ln2_b"],
      params["b1"], params["b2"], params["w1"], params["w2"],
      params["lnf_g"], params["lnf_b"], params["wlm"], params["blm"])

    logits = logits_padded[:, :VOCAB_SIZE]
    return logits.reshape(B, T, VOCAB_SIZE), None


def reference_forward(idx, params):
    """Pure-JAX reference of the exact same (eval-mode, bf16-weight) forward."""
    B, T = idx.shape
    x = jnp.take(params["tok_emb"], idx, axis=0) + params["pos_emb"][:T]
    x = x.reshape(B * T, N_EMBD).astype(jnp.float32)
    for l in range(NUM_LAYER):
        x = x + _layernorm(x, params["ln1_g"][l], params["ln1_b"][l])
        h = _layernorm(x, params["ln2_g"][l], params["ln2_b"][l])
        h = jnp.maximum(
            jnp.dot(h.astype(jnp.bfloat16), params["w1"][l],
                    preferred_element_type=jnp.float32) + params["b1"][l], 0.0)
        x = x + (jnp.dot(h.astype(jnp.bfloat16), params["w2"][l],
                         preferred_element_type=jnp.float32) + params["b2"][l])
    x = _layernorm(x, params["lnf_g"], params["lnf_b"])
    logits = jnp.dot(x.astype(jnp.bfloat16), params["wlm"],
                     preferred_element_type=jnp.float32) + params["blm"]
    return logits[:, :VOCAB_SIZE].reshape(B, T, VOCAB_SIZE)


def init_params(key):
    ks = jax.random.split(key, 16)
    nrm = lambda k, shape, s: (s * jax.random.normal(k, shape)).astype(jnp.float32)
    # lm_head padded to a lane-dense 128-wide output (zeros beyond vocab).
    wlm = jnp.zeros((N_EMBD, LM_PAD), jnp.float32)
    wlm = wlm.at[:, :VOCAB_SIZE].set(nrm(ks[12], (N_EMBD, VOCAB_SIZE), 0.02))
    blm = jnp.zeros((1, LM_PAD), jnp.float32)
    blm = blm.at[:, :VOCAB_SIZE].set(nrm(ks[13], (1, VOCAB_SIZE), 0.01))
    return {
        "tok_emb": nrm(ks[0], (VOCAB_SIZE, N_EMBD), 1.0),
        "pos_emb": nrm(ks[1], (BLOCK_SIZE, N_EMBD), 1.0),
        # Small per-layer params kept [L, 1, D] so the kernel can index the
        # resident VMEM copy by (dynamic) layer id along the leading axis.
        "ln1_g": 1.0 + nrm(ks[2], (NUM_LAYER, 1, N_EMBD), 0.1),
        "ln1_b": nrm(ks[3], (NUM_LAYER, 1, N_EMBD), 0.1),
        "ln2_g": 1.0 + nrm(ks[4], (NUM_LAYER, 1, N_EMBD), 0.1),
        "ln2_b": nrm(ks[5], (NUM_LAYER, 1, N_EMBD), 0.1),
        "w1": nrm(ks[6], (NUM_LAYER, N_EMBD, HIDDEN), 0.02).astype(jnp.bfloat16),
        "b1": nrm(ks[7], (NUM_LAYER, 1, HIDDEN), 0.01),
        "w2": nrm(ks[8], (NUM_LAYER, HIDDEN, N_EMBD), 0.02).astype(jnp.bfloat16),
        "b2": nrm(ks[9], (NUM_LAYER, 1, N_EMBD), 0.01),
        "lnf_g": 1.0 + nrm(ks[10], (1, N_EMBD), 0.1),
        "lnf_b": nrm(ks[11], (1, N_EMBD), 0.1),
        "wlm": wlm.astype(jnp.bfloat16),
        "blm": blm,
    }


if __name__ == "__main__":
    key = jax.random.PRNGKey(0)
    pkey, ikey = jax.random.split(key)
    params = init_params(pkey)

    B, T = 2, BLOCK_SIZE
    idx = jax.random.randint(ikey, (B, T), 0, VOCAB_SIZE, dtype=jnp.int32)

    logits, loss = bigram_forward(idx, params)
    logits = jax.block_until_ready(logits)

    assert logits.shape == (B, T, VOCAB_SIZE) and loss is None
    ref = np.asarray(reference_forward(idx, params))
    np.testing.assert_allclose(np.asarray(logits), ref, rtol=1e-2, atol=1e-2)
    print("KERNEL_OK")
</pallas_src>

<mosaic_0001>
module attributes {stable_mosaic.version = 11 : i64} {
  func.func @bigram_kernel(%arg0: i32, %arg1: memref<16x384xf32, #tpu.memory_space<vmem>>, %arg2: memref<6x1x384xf32, #tpu.memory_space<vmem>>, %arg3: memref<6x1x384xf32, #tpu.memory_space<vmem>>, %arg4: memref<6x1x384xf32, #tpu.memory_space<vmem>>, %arg5: memref<6x1x384xf32, #tpu.memory_space<vmem>>, %arg6: memref<6x1x1536xf32, #tpu.memory_space<vmem>>, %arg7: memref<6x1x384xf32, #tpu.memory_space<vmem>>, %arg8: memref<3x384x1536xbf16, #tpu.memory_space<vmem>>, %arg9: memref<3x1536x384xbf16, #tpu.memory_space<vmem>>, %arg10: memref<1x384xf32, #tpu.memory_space<vmem>>, %arg11: memref<1x384xf32, #tpu.memory_space<vmem>>, %arg12: memref<384x128xbf16, #tpu.memory_space<vmem>>, %arg13: memref<1x128xf32, #tpu.memory_space<vmem>>, %arg14: memref<16x128xf32, #tpu.memory_space<vmem>>, %arg15: memref<16x384xf32, #tpu.memory_space<vmem>>) attributes {dimension_semantics = [#tpu.dimension_semantics<arbitrary>], iteration_bounds = array<i64: 2>, scalar_prefetch = 0 : i64, scratch_operands = 1 : i64, tpu.core_type = #tpu.core_type<tc>, window_params = [{pipeline_mode = #tpu.pipeline_mode<synchronous>, transform_indices = @transform_0, window_bounds = array<i64: 16, 384>}, {pipeline_mode = #tpu.pipeline_mode<synchronous>, transform_indices = @transform_1, window_bounds = array<i64: 6, 1, 384>}, {pipeline_mode = #tpu.pipeline_mode<synchronous>, transform_indices = @transform_2, window_bounds = array<i64: 6, 1, 384>}, {pipeline_mode = #tpu.pipeline_mode<synchronous>, transform_indices = @transform_3, window_bounds = array<i64: 6, 1, 384>}, {pipeline_mode = #tpu.pipeline_mode<synchronous>, transform_indices = @transform_4, window_bounds = array<i64: 6, 1, 384>}, {pipeline_mode = #tpu.pipeline_mode<synchronous>, transform_indices = @transform_5, window_bounds = array<i64: 6, 1, 1536>}, {pipeline_mode = #tpu.pipeline_mode<synchronous>, transform_indices = @transform_6, window_bounds = array<i64: 6, 1, 384>}, {transform_indices = @transform_7, window_bounds = array<i64: 3, 384, 1536>}, {transform_indices = @transform_8, window_bounds = array<i64: 3, 1536, 384>}, {pipeline_mode = #tpu.pipeline_mode<synchronous>, transform_indices = @transform_9, window_bounds = array<i64: 1, 384>}, {pipeline_mode = #tpu.pipeline_mode<synchronous>, transform_indices = @transform_10, window_bounds = array<i64: 1, 384>}, {pipeline_mode = #tpu.pipeline_mode<synchronous>, transform_indices = @transform_11, window_bounds = array<i64: 384, 128>}, {pipeline_mode = #tpu.pipeline_mode<synchronous>, transform_indices = @transform_12, window_bounds = array<i64: 1, 128>}, {pipeline_mode = #tpu.pipeline_mode<synchronous>, transform_indices = @transform_13, window_bounds = array<i64: 16, 128>}]} {
    %c0_i32 = arith.constant 0 : i32
    %0 = arith.cmpi eq, %arg0, %c0_i32 : i32
    %1 = arith.extui %0 : i1 to i32
    %c0_i32_0 = arith.constant 0 : i32
    %2 = arith.cmpi ne, %1, %c0_i32_0 : i32
    scf.if %2 {
      %c0_99 = arith.constant 0 : index
      %c0_100 = arith.constant 0 : index
      %236 = vector.load %arg1[%c0_99, %c0_100] : memref<16x384xf32, #tpu.memory_space<vmem>>, vector<16x384xf32>
      %c0_101 = arith.constant 0 : index
      %c0_102 = arith.constant 0 : index
      %237 = vector.load %arg15[%c0_101, %c0_102] : memref<16x384xf32, #tpu.memory_space<vmem>>, vector<16x384xf32>
      tpu.vector_store %arg15[%c0_101, %c0_102], %236 {strides = array<i32>} : memref<16x384xf32, #tpu.memory_space<vmem>>, vector<16x384xf32>,
    } else {
    }
    %c0 = arith.constant 0 : index
    %c0_1 = arith.constant 0 : index
    %3 = vector.load %arg15[%c0, %c0_1] : memref<16x384xf32, #tpu.memory_space<vmem>>, vector<16x384xf32>
    %c3_i32 = arith.constant 3 : i32
    %4 = arith.muli %arg0, %c3_i32 : i32
    %c0_i32_2 = arith.constant 0 : i32
    %5 = arith.addi %4, %c0_i32_2 : i32
    %6 = arith.index_cast %5 : i32 to index
    %c0_3 = arith.constant 0 : index
    %c0_4 = arith.constant 0 : index
    %7 = vector.load %arg2[%6, %c0_3, %c0_4] : memref<6x1x384xf32, #tpu.memory_space<vmem>>, vector<1x1x384xf32>
    %8 = vector.shape_cast %7 : vector<1x1x384xf32> to vector<1x384xf32>
    %9 = arith.index_cast %5 : i32 to index
    %c0_5 = arith.constant 0 : index
    %c0_6 = arith.constant 0 : index
    %10 = vector.load %arg3[%9, %c0_5, %c0_6] : memref<6x1x384xf32, #tpu.memory_space<vmem>>, vector<1x1x384xf32>
    %11 = vector.shape_cast %10 : vector<1x1x384xf32> to vector<1x384xf32>
    %cst = arith.constant dense<0.000000e+00> : vector<16xf32>
    %12 = vector.multi_reduction <add>, %3, %cst [1] : vector<16x384xf32> to vector<16xf32>
    %13 = vector.shape_cast %12 : vector<16xf32> to vector<16x1xf32>
    %cst_7 = arith.constant 3.840000e+02 : f32
    %14 = vector.broadcast %cst_7 : f32 to vector<16x1xf32>
    %15 = arith.divf %13, %14 : vector<16x1xf32>
    %16 = vector.broadcast %15 : vector<16x1xf32> to vector<16x384xf32>
    %17 = arith.subf %3, %16 : vector<16x384xf32>
    %18 = arith.mulf %17, %17 : vector<16x384xf32>
    %cst_8 = arith.constant dense<0.000000e+00> : vector<16xf32>
    %19 = vector.multi_reduction <add>, %18, %cst_8 [1] : vector<16x384xf32> to vector<16xf32>
    %20 = vector.shape_cast %19 : vector<16xf32> to vector<16x1xf32>
    %cst_9 = arith.constant 3.840000e+02 : f32
    %21 = vector.broadcast %cst_9 : f32 to vector<16x1xf32>
    %22 = arith.divf %20, %21 : vector<16x1xf32>
    %cst_10 = arith.constant 9.99999974E-6 : f32
    %23 = vector.broadcast %cst_10 : f32 to vector<16x1xf32>
    %24 = arith.addf %22, %23 : vector<16x1xf32>
    %25 = math.rsqrt %24 : vector<16x1xf32>
    %26 = vector.broadcast %25 : vector<16x1xf32> to vector<16x384xf32>
    %27 = arith.mulf %17, %26 : vector<16x384xf32>
    %28 = vector.broadcast %8 : vector<1x384xf32> to vector<16x384xf32>
    %29 = arith.mulf %27, %28 : vector<16x384xf32>
    %30 = vector.broadcast %11 : vector<1x384xf32> to vector<16x384xf32>
    %31 = arith.addf %29, %30 : vector<16x384xf32>
    %32 = arith.addf %3, %31 : vector<16x384xf32>
    %33 = arith.index_cast %5 : i32 to index
    %c0_11 = arith.constant 0 : index
    %c0_12 = arith.constant 0 : index
    %34 = vector.load %arg4[%33, %c0_11, %c0_12] : memref<6x1x384xf32, #tpu.memory_space<vmem>>, vector<1x1x384xf32>
    %35 = vector.shape_cast %34 : vector<1x1x384xf32> to vector<1x384xf32>
    %36 = arith.index_cast %5 : i32 to index
    %c0_13 = arith.constant 0 : index
    %c0_14 = arith.constant 0 : index
    %37 = vector.load %arg5[%36, %c0_13, %c0_14] : memref<6x1x384xf32, #tpu.memory_space<vmem>>, vector<1x1x384xf32>
    %38 = vector.shape_cast %37 : vector<1x1x384xf32> to vector<1x384xf32>
    %cst_15 = arith.constant dense<0.000000e+00> : vector<16xf32>
    %39 = vector.multi_reduction <add>, %32, %cst_15 [1] : vector<16x384xf32> to vector<16xf32>
    %40 = vector.shape_cast %39 : vector<16xf32> to vector<16x1xf32>
    %cst_16 = arith.constant 3.840000e+02 : f32
    %41 = vector.broadcast %cst_16 : f32 to vector<16x1xf32>
    %42 = arith.divf %40, %41 : vector<16x1xf32>
    %43 = vector.broadcast %42 : vector<16x1xf32> to vector<16x384xf32>
    %44 = arith.subf %32, %43 : vector<16x384xf32>
    %45 = arith.mulf %44, %44 : vector<16x384xf32>
    %cst_17 = arith.constant dense<0.000000e+00> : vector<16xf32>
    %46 = vector.multi_reduction <add>, %45, %cst_17 [1] : vector<16x384xf32> to vector<16xf32>
    %47 = vector.shape_cast %46 : vector<16xf32> to vector<16x1xf32>
    %cst_18 = arith.constant 3.840000e+02 : f32
    %48 = vector.broadcast %cst_18 : f32 to vector<16x1xf32>
    %49 = arith.divf %47, %48 : vector<16x1xf32>
    %cst_19 = arith.constant 9.99999974E-6 : f32
    %50 = vector.broadcast %cst_19 : f32 to vector<16x1xf32>
    %51 = arith.addf %49, %50 : vector<16x1xf32>
    %52 = math.rsqrt %51 : vector<16x1xf32>
    %53 = vector.broadcast %52 : vector<16x1xf32> to vector<16x384xf32>
    %54 = arith.mulf %44, %53 : vector<16x384xf32>
    %55 = vector.broadcast %35 : vector<1x384xf32> to vector<16x384xf32>
    %56 = arith.mulf %54, %55 : vector<16x384xf32>
    %57 = vector.broadcast %38 : vector<1x384xf32> to vector<16x384xf32>
    %58 = arith.addf %56, %57 : vector<16x384xf32>
    %59 = arith.truncf %58 : vector<16x384xf32> to vector<16x384xbf16>
    %c0_20 = arith.constant 0 : index
    %c0_21 = arith.constant 0 : index
    %c0_22 = arith.constant 0 : index
    %60 = vector.load %arg8[%c0_20, %c0_21, %c0_22] : memref<3x384x1536xbf16, #tpu.memory_space<vmem>>, vector<1x384x1536xbf16>
    %61 = vector.shape_cast %60 : vector<1x384x1536xbf16> to vector<384x1536xbf16>
    %cst_23 = arith.constant dense<0.000000e+00> : vector<16x1536xf32>
    %62 = tpu.matmul %59, %61, %cst_23 {dimension_numbers = #tpu.dot_dimension_numbers<[1], [0], [0], [1], [0, 0, 1, 1], [], []>} : vector<16x384xbf16>, vector<384x1536xbf16>, vector<16x1536xf32> -> vector<16x1536xf32>
    %63 = arith.index_cast %5 : i32 to index
    %c0_24 = arith.constant 0 : index
    %c0_25 = arith.constant 0 : index
    %64 = vector.load %arg6[%63, %c0_24, %c0_25] : memref<6x1x1536xf32, #tpu.memory_space<vmem>>, vector<1x1x1536xf32>
    %65 = vector.shape_cast %64 : vector<1x1x1536xf32> to vector<1x1536xf32>
    %66 = vector.broadcast %65 : vector<1x1536xf32> to vector<16x1536xf32>
    %67 = arith.addf %62, %66 : vector<16x1536xf32>
    %cst_26 = arith.constant 0.000000e+00 : f32
    %68 = vector.broadcast %cst_26 : f32 to vector<16x1536xf32>
    %69 = arith.maximumf %67, %68 : vector<16x1536xf32>
    %70 = arith.truncf %69 : vector<16x1536xf32> to vector<16x1536xbf16>
    %c0_27 = arith.constant 0 : index
    %c0_28 = arith.constant 0 : index
    %c0_29 = arith.constant 0 : index
    %71 = vector.load %arg9[%c0_27, %c0_28, %c0_29] : memref<3x1536x384xbf16, #tpu.memory_space<vmem>>, vector<1x1536x384xbf16>
    %72 = vector.shape_cast %71 : vector<1x1536x384xbf16> to vector<1536x384xbf16>
    %cst_30 = arith.constant dense<0.000000e+00> : vector<16x384xf32>
    %73 = tpu.matmul %70, %72, %cst_30 {dimension_numbers = #tpu.dot_dimension_numbers<[1], [0], [0], [1], [0, 0, 1, 1], [], []>} : vector<16x1536xbf16>, vector<1536x384xbf16>, vector<16x384xf32> -> vector<16x384xf32>
    %74 = arith.index_cast %5 : i32 to index
    %c0_31 = arith.constant 0 : index
    %c0_32 = arith.constant 0 : index
    %75 = vector.load %arg7[%74, %c0_31, %c0_32] : memref<6x1x384xf32, #tpu.memory_space<vmem>>, vector<1x1x384xf32>
    %76 = vector.shape_cast %75 : vector<1x1x384xf32> to vector<1x384xf32>
    %77 = vector.broadcast %76 : vector<1x384xf32> to vector<16x384xf32>
    %78 = arith.addf %73, %77 : vector<16x384xf32>
    %79 = arith.addf %32, %78 : vector<16x384xf32>
    %c3_i32_33 = arith.constant 3 : i32
    %80 = arith.muli %arg0, %c3_i32_33 : i32
    %c1_i32 = arith.constant 1 : i32
    %81 = arith.addi %80, %c1_i32 : i32
    %82 = arith.index_cast %81 : i32 to index
    %c0_34 = arith.constant 0 : index
    %c0_35 = arith.constant 0 : index
    %83 = vector.load %arg2[%82, %c0_34, %c0_35] : memref<6x1x384xf32, #tpu.memory_space<vmem>>, vector<1x1x384xf32>
    %84 = vector.shape_cast %83 : vector<1x1x384xf32> to vector<1x384xf32>
    %85 = arith.index_cast %81 : i32 to index
    %c0_36 = arith.constant 0 : index
    %c0_37 = arith.constant 0 : index
    %86 = vector.load %arg3[%85, %c0_36, %c0_37] : memref<6x1x384xf32, #tpu.memory_space<vmem>>, vector<1x1x384xf32>
    %87 = vector.shape_cast %86 : vector<1x1x384xf32> to vector<1x384xf32>
    %cst_38 = arith.constant dense<0.000000e+00> : vector<16xf32>
    %88 = vector.multi_reduction <add>, %79, %cst_38 [1] : vector<16x384xf32> to vector<16xf32>
    %89 = vector.shape_cast %88 : vector<16xf32> to vector<16x1xf32>
    %cst_39 = arith.constant 3.840000e+02 : f32
    %90 = vector.broadcast %cst_39 : f32 to vector<16x1xf32>
    %91 = arith.divf %89, %90 : vector<16x1xf32>
    %92 = vector.broadcast %91 : vector<16x1xf32> to vector<16x384xf32>
    %93 = arith.subf %79, %92 : vector<16x384xf32>
    %94 = arith.mulf %93, %93 : vector<16x384xf32>
    %cst_40 = arith.constant dense<0.000000e+00> : vector<16xf32>
    %95 = vector.multi_reduction <add>, %94, %cst_40 [1] : vector<16x384xf32> to vector<16xf32>
    %96 = vector.shape_cast %95 : vector<16xf32> to vector<16x1xf32>
    %cst_41 = arith.constant 3.840000e+02 : f32
    %97 = vector.broadcast %cst_41 : f32 to vector<16x1xf32>
    %98 = arith.divf %96, %97 : vector<16x1xf32>
    %cst_42 = arith.constant 9.99999974E-6 : f32
    %99 = vector.broadcast %cst_42 : f32 to vector<16x1xf32>
    %100 = arith.addf %98, %99 : vector<16x1xf32>
    %101 = math.rsqrt %100 : vector<16x1xf32>
    %102 = vector.broadcast %101 : vector<16x1xf32> to vector<16x384xf32>
    %103 = arith.mulf %93, %102 : vector<16x384xf32>
    %104 = vector.broadcast %84 : vector<1x384xf32> to vector<16x384xf32>
    %105 = arith.mulf %103, %104 : vector<16x384xf32>
    %106 = vector.broadcast %87 : vector<1x384xf32> to vector<16x384xf32>
    %107 = arith.addf %105, %106 : vector<16x384xf32>
    %108 = arith.addf %79, %107 : vector<16x384xf32>
    %109 = arith.index_cast %81 : i32 to index
    %c0_43 = arith.constant 0 : index
    %c0_44 = arith.constant 0 : index
    %110 = vector.load %arg4[%109, %c0_43, %c0_44] : memref<6x1x384xf32, #tpu.memory_space<vmem>>, vector<1x1x384xf32>
    %111 = vector.shape_cast %110 : vector<1x1x384xf32> to vector<1x384xf32>
    %112 = arith.index_cast %81 : i32 to index
    %c0_45 = arith.constant 0 : index
    %c0_46 = arith.constant 0 : index
    %113 = vector.load %arg5[%112, %c0_45, %c0_46] : memref<6x1x384xf32, #tpu.memory_space<vmem>>, vector<1x1x384xf32>
    %114 = vector.shape_cast %113 : vector<1x1x384xf32> to vector<1x384xf32>
    %cst_47 = arith.constant dense<0.000000e+00> : vector<16xf32>
    %115 = vector.multi_reduction <add>, %108, %cst_47 [1] : vector<16x384xf32> to vector<16xf32>
    %116 = vector.shape_cast %115 : vector<16xf32> to vector<16x1xf32>
    %cst_48 = arith.constant 3.840000e+02 : f32
    %117 = vector.broadcast %cst_48 : f32 to vector<16x1xf32>
    %118 = arith.divf %116, %117 : vector<16x1xf32>
    %119 = vector.broadcast %118 : vector<16x1xf32> to vector<16x384xf32>
    %120 = arith.subf %108, %119 : vector<16x384xf32>
    %121 = arith.mulf %120, %120 : vector<16x384xf32>
    %cst_49 = arith.constant dense<0.000000e+00> : vector<16xf32>
    %122 = vector.multi_reduction <add>, %121, %cst_49 [1] : vector<16x384xf32> to vector<16xf32>
    %123 = vector.shape_cast %122 : vector<16xf32> to vector<16x1xf32>
    %cst_50 = arith.constant 3.840000e+02 : f32
    %124 = vector.broadcast %cst_50 : f32 to vector<16x1xf32>
    %125 = arith.divf %123, %124 : vector<16x1xf32>
    %cst_51 = arith.constant 9.99999974E-6 : f32
    %126 = vector.broadcast %cst_51 : f32 to vector<16x1xf32>
    %127 = arith.addf %125, %126 : vector<16x1xf32>
    %128 = math.rsqrt %127 : vector<16x1xf32>
    %129 = vector.broadcast %128 : vector<16x1xf32> to vector<16x384xf32>
    %130 = arith.mulf %120, %129 : vector<16x384xf32>
    %131 = vector.broadcast %111 : vector<1x384xf32> to vector<16x384xf32>
    %132 = arith.mulf %130, %131 : vector<16x384xf32>
    %133 = vector.broadcast %114 : vector<1x384xf32> to vector<16x384xf32>
    %134 = arith.addf %132, %133 : vector<16x384xf32>
    %135 = arith.truncf %134 : vector<16x384xf32> to vector<16x384xbf16>
    %c1 = arith.constant 1 : index
    %c0_52 = arith.constant 0 : index
    %c0_53 = arith.constant 0 : index
    %136 = vector.load %arg8[%c1, %c0_52, %c0_53] : memref<3x384x1536xbf16, #tpu.memory_space<vmem>>, vector<1x384x1536xbf16>
    %137 = vector.shape_cast %136 : vector<1x384x1536xbf16> to vector<384x1536xbf16>
    %cst_54 = arith.constant dense<0.000000e+00> : vector<16x1536xf32>
    %138 = tpu.matmul %135, %137, %cst_54 {dimension_numbers = #tpu.dot_dimension_numbers<[1], [0], [0], [1], [0, 0, 1, 1], [], []>} : vector<16x384xbf16>, vector<384x1536xbf16>, vector<16x1536xf32> -> vector<16x1536xf32>
    %139 = arith.index_cast %81 : i32 to index
    %c0_55 = arith.constant 0 : index
    %c0_56 = arith.constant 0 : index
    %140 = vector.load %arg6[%139, %c0_55, %c0_56] : memref<6x1x1536xf32, #tpu.memory_space<vmem>>, vector<1x1x1536xf32>
    %141 = vector.shape_cast %140 : vector<1x1x1536xf32> to vector<1x1536xf32>
    %142 = vector.broadcast %141 : vector<1x1536xf32> to vector<16x1536xf32>
    %143 = arith.addf %138, %142 : vector<16x1536xf32>
    %cst_57 = arith.constant 0.000000e+00 : f32
    %144 = vector.broadcast %cst_57 : f32 to vector<16x1536xf32>
    %145 = arith.maximumf %143, %144 : vector<16x1536xf32>
    %146 = arith.truncf %145 : vector<16x1536xf32> to vector<16x1536xbf16>
    %c1_58 = arith.constant 1 : index
    %c0_59 = arith.constant 0 : index
    %c0_60 = arith.constant 0 : index
    %147 = vector.load %arg9[%c1_58, %c0_59, %c0_60] : memref<3x1536x384xbf16, #tpu.memory_space<vmem>>, vector<1x1536x384xbf16>
    %148 = vector.shape_cast %147 : vector<1x1536x384xbf16> to vector<1536x384xbf16>
    %cst_61 = arith.constant dense<0.000000e+00> : vector<16x384xf32>
    %149 = tpu.matmul %146, %148, %cst_61 {dimension_numbers = #tpu.dot_dimension_numbers<[1], [0], [0], [1], [0, 0, 1, 1], [], []>} : vector<16x1536xbf16>, vector<1536x384xbf16>, vector<16x384xf32> -> vector<16x384xf32>
    %150 = arith.index_cast %81 : i32 to index
    %c0_62 = arith.constant 0 : index
    %c0_63 = arith.constant 0 : index
    %151 = vector.load %arg7[%150, %c0_62, %c0_63] : memref<6x1x384xf32, #tpu.memory_space<vmem>>, vector<1x1x384xf32>
    %152 = vector.shape_cast %151 : vector<1x1x384xf32> to vector<1x384xf32>
    %153 = vector.broadcast %152 : vector<1x384xf32> to vector<16x384xf32>
    %154 = arith.addf %149, %153 : vector<16x384xf32>
    %155 = arith.addf %108, %154 : vector<16x384xf32>
    %c3_i32_64 = arith.constant 3 : i32
    %156 = arith.muli %arg0, %c3_i32_64 : i32
    %c2_i32 = arith.constant 2 : i32
    %157 = arith.addi %156, %c2_i32 : i32
    %158 = arith.index_cast %157 : i32 to index
    %c0_65 = arith.constant 0 : index
    %c0_66 = arith.constant 0 : index
    %159 = vector.load %arg2[%158, %c0_65, %c0_66] : memref<6x1x384xf32, #tpu.memory_space<vmem>>, vector<1x1x384xf32>
    %160 = vector.shape_cast %159 : vector<1x1x384xf32> to vector<1x384xf32>
    %161 = arith.index_cast %157 : i32 to index
    %c0_67 = arith.constant 0 : index
    %c0_68 = arith.constant 0 : index
    %162 = vector.load %arg3[%161, %c0_67, %c0_68] : memref<6x1x384xf32, #tpu.memory_space<vmem>>, vector<1x1x384xf32>
    %163 = vector.shape_cast %162 : vector<1x1x384xf32> to vector<1x384xf32>
    %cst_69 = arith.constant dense<0.000000e+00> : vector<16xf32>
    %164 = vector.multi_reduction <add>, %155, %cst_69 [1] : vector<16x384xf32> to vector<16xf32>
    %165 = vector.shape_cast %164 : vector<16xf32> to vector<16x1xf32>
    %cst_70 = arith.constant 3.840000e+02 : f32
    %166 = vector.broadcast %cst_70 : f32 to vector<16x1xf32>
    %167 = arith.divf %165, %166 : vector<16x1xf32>
    %168 = vector.broadcast %167 : vector<16x1xf32> to vector<16x384xf32>
    %169 = arith.subf %155, %168 : vector<16x384xf32>
    %170 = arith.mulf %169, %169 : vector<16x384xf32>
    %cst_71 = arith.constant dense<0.000000e+00> : vector<16xf32>
    %171 = vector.multi_reduction <add>, %170, %cst_71 [1] : vector<16x384xf32> to vector<16xf32>
    %172 = vector.shape_cast %171 : vector<16xf32> to vector<16x1xf32>
    %cst_72 = arith.constant 3.840000e+02 : f32
    %173 = vector.broadcast %cst_72 : f32 to vector<16x1xf32>
    %174 = arith.divf %172, %173 : vector<16x1xf32>
    %cst_73 = arith.constant 9.99999974E-6 : f32
    %175 = vector.broadcast %cst_73 : f32 to vector<16x1xf32>
    %176 = arith.addf %174, %175 : vector<16x1xf32>
    %177 = math.rsqrt %176 : vector<16x1xf32>
    %178 = vector.broadcast %177 : vector<16x1xf32> to vector<16x384xf32>
    %179 = arith.mulf %169, %178 : vector<16x384xf32>
    %180 = vector.broadcast %160 : vector<1x384xf32> to vector<16x384xf32>
    %181 = arith.mulf %179, %180 : vector<16x384xf32>
    %182 = vector.broadcast %163 : vector<1x384xf32> to vector<16x384xf32>
    %183 = arith.addf %181, %182 : vector<16x384xf32>
    %184 = arith.addf %155, %183 : vector<16x384xf32>
    %185 = arith.index_cast %157 : i32 to index
    %c0_74 = arith.constant 0 : index
    %c0_75 = arith.constant 0 : index
    %186 = vector.load %arg4[%185, %c0_74, %c0_75] : memref<6x1x384xf32, #tpu.memory_space<vmem>>, vector<1x1x384xf32>
    %187 = vector.shape_cast %186 : vector<1x1x384xf32> to vector<1x384xf32>
    %188 = arith.index_cast %157 : i32 to index
    %c0_76 = arith.constant 0 : index
    %c0_77 = arith.constant 0 : index
    %189 = vector.load %arg5[%188, %c0_76, %c0_77] : memref<6x1x384xf32, #tpu.memory_space<vmem>>, vector<1x1x384xf32>
    %190 = vector.shape_cast %189 : vector<1x1x384xf32> to vector<1x384xf32>
    %cst_78 = arith.constant dense<0.000000e+00> : vector<16xf32>
    %191 = vector.multi_reduction <add>, %184, %cst_78 [1] : vector<16x384xf32> to vector<16xf32>
    %192 = vector.shape_cast %191 : vector<16xf32> to vector<16x1xf32>
    %cst_79 = arith.constant 3.840000e+02 : f32
    %193 = vector.broadcast %cst_79 : f32 to vector<16x1xf32>
    %194 = arith.divf %192, %193 : vector<16x1xf32>
    %195 = vector.broadcast %194 : vector<16x1xf32> to vector<16x384xf32>
    %196 = arith.subf %184, %195 : vector<16x384xf32>
    %197 = arith.mulf %196, %196 : vector<16x384xf32>
    %cst_80 = arith.constant dense<0.000000e+00> : vector<16xf32>
    %198 = vector.multi_reduction <add>, %197, %cst_80 [1] : vector<16x384xf32> to vector<16xf32>
    %199 = vector.shape_cast %198 : vector<16xf32> to vector<16x1xf32>
    %cst_81 = arith.constant 3.840000e+02 : f32
    %200 = vector.broadcast %cst_81 : f32 to vector<16x1xf32>
    %201 = arith.divf %199, %200 : vector<16x1xf32>
    %cst_82 = arith.constant 9.99999974E-6 : f32
    %202 = vector.broadcast %cst_82 : f32 to vector<16x1xf32>
    %203 = arith.addf %201, %202 : vector<16x1xf32>
    %204 = math.rsqrt %203 : vector<16x1xf32>
    %205 = vector.broadcast %204 : vector<16x1xf32> to vector<16x384xf32>
    %206 = arith.mulf %196, %205 : vector<16x384xf32>
    %207 = vector.broadcast %187 : vector<1x384xf32> to vector<16x384xf32>
    %208 = arith.mulf %206, %207 : vector<16x384xf32>
    %209 = vector.broadcast %190 : vector<1x384xf32> to vector<16x384xf32>
    %210 = arith.addf %208, %209 : vector<16x384xf32>
    %211 = arith.truncf %210 : vector<16x384xf32> to vector<16x384xbf16>
    %c2 = arith.constant 2 : index
    %c0_83 = arith.constant 0 : index
    %c0_84 = arith.constant 0 : index
    %212 = vector.load %arg8[%c2, %c0_83, %c0_84] : memref<3x384x1536xbf16, #tpu.memory_space<vmem>>, vector<1x384x1536xbf16>
    %213 = vector.shape_cast %212 : vector<1x384x1536xbf16> to vector<384x1536xbf16>
    %cst_85 = arith.constant dense<0.000000e+00> : vector<16x1536xf32>
    %214 = tpu.matmul %211, %213, %cst_85 {dimension_numbers = #tpu.dot_dimension_numbers<[1], [0], [0], [1], [0, 0, 1, 1], [], []>} : vector<16x384xbf16>, vector<384x1536xbf16>, vector<16x1536xf32> -> vector<16x1536xf32>
    %215 = arith.index_cast %157 : i32 to index
    %c0_86 = arith.constant 0 : index
    %c0_87 = arith.constant 0 : index
    %216 = vector.load %arg6[%215, %c0_86, %c0_87] : memref<6x1x1536xf32, #tpu.memory_space<vmem>>, vector<1x1x1536xf32>
    %217 = vector.shape_cast %216 : vector<1x1x1536xf32> to vector<1x1536xf32>
    %218 = vector.broadcast %217 : vector<1x1536xf32> to vector<16x1536xf32>
    %219 = arith.addf %214, %218 : vector<16x1536xf32>
    %cst_88 = arith.constant 0.000000e+00 : f32
    %220 = vector.broadcast %cst_88 : f32 to vector<16x1536xf32>
    %221 = arith.maximumf %219, %220 : vector<16x1536xf32>
    %222 = arith.truncf %221 : vector<16x1536xf32> to vector<16x1536xbf16>
    %c2_89 = arith.constant 2 : index
    %c0_90 = arith.constant 0 : index
    %c0_91 = arith.constant 0 : index
    %223 = vector.load %arg9[%c2_89, %c0_90, %c0_91] : memref<3x1536x384xbf16, #tpu.memory_space<vmem>>, vector<1x1536x384xbf16>
    %224 = vector.shape_cast %223 : vector<1x1536x384xbf16> to vector<1536x384xbf16>
    %cst_92 = arith.constant dense<0.000000e+00> : vector<16x384xf32>
    %225 = tpu.matmul %222, %224, %cst_92 {dimension_numbers = #tpu.dot_dimension_numbers<[1], [0], [0], [1], [0, 0, 1, 1], [], []>} : vector<16x1536xbf16>, vector<1536x384xbf16>, vector<16x384xf32> -> vector<16x384xf32>
    %226 = arith.index_cast %157 : i32 to index
    %c0_93 = arith.constant 0 : index
    %c0_94 = arith.constant 0 : index
    %227 = vector.load %arg7[%226, %c0_93, %c0_94] : memref<6x1x384xf32, #tpu.memory_space<vmem>>, vector<1x1x384xf32>
    %228 = vector.shape_cast %227 : vector<1x1x384xf32> to vector<1x384xf32>
    %229 = vector.broadcast %228 : vector<1x384xf32> to vector<16x384xf32>
    %230 = arith.addf %225, %229 : vector<16x384xf32>
    %231 = arith.addf %184, %230 : vector<16x384xf32>
    %c0_95 = arith.constant 0 : index
    %c0_96 = arith.constant 0 : index
    %232 = vector.load %arg15[%c0_95, %c0_96] : memref<16x384xf32, #tpu.memory_space<vmem>>, vector<16x384xf32>
    tpu.vector_store %arg15[%c0_95, %c0_96], %231 {strides = array<i32>} : memref<16x384xf32, #tpu.memory_space<vmem>>, vector<16x384xf32>,
    %c1_i32_97 = arith.constant 1 : i32
    %233 = arith.cmpi eq, %arg0, %c1_i32_97 : i32
    %234 = arith.extui %233 : i1 to i32
    %c0_i32_98 = arith.constant 0 : i32
    %235 = arith.cmpi ne, %234, %c0_i32_98 : i32
    scf.if %235 {
      %c0_99 = arith.constant 0 : index
      %c0_100 = arith.constant 0 : index
      %236 = vector.load %arg10[%c0_99, %c0_100] : memref<1x384xf32, #tpu.memory_space<vmem>>, vector<1x384xf32>
      %c0_101 = arith.constant 0 : index
      %c0_102 = arith.constant 0 : index
      %237 = vector.load %arg11[%c0_101, %c0_102] : memref<1x384xf32, #tpu.memory_space<vmem>>, vector<1x384xf32>
      %cst_103 = arith.constant dense<0.000000e+00> : vector<16xf32>
      %238 = vector.multi_reduction <add>, %231, %cst_103 [1] : vector<16x384xf32> to vector<16xf32>
      %239 = vector.shape_cast %238 : vector<16xf32> to vector<16x1xf32>
      %cst_104 = arith.constant 3.840000e+02 : f32
      %240 = vector.broadcast %cst_104 : f32 to vector<16x1xf32>
      %241 = arith.divf %239, %240 : vector<16x1xf32>
      %242 = vector.broadcast %241 : vector<16x1xf32> to vector<16x384xf32>
      %243 = arith.subf %231, %242 : vector<16x384xf32>
      %244 = arith.mulf %243, %243 : vector<16x384xf32>
      %cst_105 = arith.constant dense<0.000000e+00> : vector<16xf32>
      %245 = vector.multi_reduction <add>, %244, %cst_105 [1] : vector<16x384xf32> to vector<16xf32>
      %246 = vector.shape_cast %245 : vector<16xf32> to vector<16x1xf32>
      %cst_106 = arith.constant 3.840000e+02 : f32
      %247 = vector.broadcast %cst_106 : f32 to vector<16x1xf32>
      %248 = arith.divf %246, %247 : vector<16x1xf32>
      %cst_107 = arith.constant 9.99999974E-6 : f32
      %249 = vector.broadcast %cst_107 : f32 to vector<16x1xf32>
      %250 = arith.addf %248, %249 : vector<16x1xf32>
      %251 = math.rsqrt %250 : vector<16x1xf32>
      %252 = vector.broadcast %251 : vector<16x1xf32> to vector<16x384xf32>
      %253 = arith.mulf %243, %252 : vector<16x384xf32>
      %254 = vector.broadcast %236 : vector<1x384xf32> to vector<16x384xf32>
      %255 = arith.mulf %253, %254 : vector<16x384xf32>
      %256 = vector.broadcast %237 : vector<1x384xf32> to vector<16x384xf32>
      %257 = arith.addf %255, %256 : vector<16x384xf32>
      %258 = arith.truncf %257 : vector<16x384xf32> to vector<16x384xbf16>
      %c0_108 = arith.constant 0 : index
      %c0_109 = arith.constant 0 : index
      %259 = vector.load %arg12[%c0_108, %c0_109] : memref<384x128xbf16, #tpu.memory_space<vmem>>, vector<384x128xbf16>
      %cst_110 = arith.constant dense<0.000000e+00> : vector<16x128xf32>
      %260 = tpu.matmul %258, %259, %cst_110 {dimension_numbers = #tpu.dot_dimension_numbers<[1], [0], [0], [1], [0, 0, 1, 1], [], []>} : vector<16x384xbf16>, vector<384x128xbf16>, vector<16x128xf32> -> vector<16x128xf32>
      %c0_111 = arith.constant 0 : index
      %c0_112 = arith.constant 0 : index
      %261 = vector.load %arg13[%c0_111, %c0_112] : memref<1x128xf32, #tpu.memory_space<vmem>>, vector<1x128xf32>
      %262 = vector.broadcast %261 : vector<1x128xf32> to vector<16x128xf32>
      %263 = arith.addf %260, %262 : vector<16x128xf32>
      %c0_113 = arith.constant 0 : index
      %c0_114 = arith.constant 0 : index
      %264 = vector.load %arg14[%c0_113, %c0_114] : memref<16x128xf32, #tpu.memory_space<vmem>>, vector<16x128xf32>
      tpu.vector_store %arg14[%c0_113, %c0_114], %263 {strides = array<i32>} : memref<16x128xf32, #tpu.memory_space<vmem>>, vector<16x128xf32>,
    } else {
    }
    return
  }
  func.func @transform_0(%arg0: i32) -> (i32, i32) {
    %c0_i32 = arith.constant 0 : i32
    %c0_i32_0 = arith.constant 0 : i32
    %c0_i32_1 = arith.constant 0 : i32
    return %c0_i32, %c0_i32_0 : i32, i32
  }
  func.func @transform_1(%arg0: i32) -> (i32, i32, i32) {
    %c0_i32 = arith.constant 0 : i32
    %c0_i32_0 = arith.constant 0 : i32
    %c0_i32_1 = arith.constant 0 : i32
    %c0_i32_2 = arith.constant 0 : i32
    return %c0_i32, %c0_i32_0, %c0_i32_1 : i32, i32, i32
  }
  func.func @transform_2(%arg0: i32) -> (i32, i32, i32) {
    %c0_i32 = arith.constant 0 : i32
    %c0_i32_0 = arith.constant 0 : i32
    %c0_i32_1 = arith.constant 0 : i32
    %c0_i32_2 = arith.constant 0 : i32
    return %c0_i32, %c0_i32_0, %c0_i32_1 : i32, i32, i32
  }
  func.func @transform_3(%arg0: i32) -> (i32, i32, i32) {
    %c0_i32 = arith.constant 0 : i32
    %c0_i32_0 = arith.constant 0 : i32
    %c0_i32_1 = arith.constant 0 : i32
    %c0_i32_2 = arith.constant 0 : i32
    return %c0_i32, %c0_i32_0, %c0_i32_1 : i32, i32, i32
  }
  func.func @transform_4(%arg0: i32) -> (i32, i32, i32) {
    %c0_i32 = arith.constant 0 : i32
    %c0_i32_0 = arith.constant 0 : i32
    %c0_i32_1 = arith.constant 0 : i32
    %c0_i32_2 = arith.constant 0 : i32
    return %c0_i32, %c0_i32_0, %c0_i32_1 : i32, i32, i32
  }
  func.func @transform_5(%arg0: i32) -> (i32, i32, i32) {
    %c0_i32 = arith.constant 0 : i32
    %c0_i32_0 = arith.constant 0 : i32
    %c0_i32_1 = arith.constant 0 : i32
    %c0_i32_2 = arith.constant 0 : i32
    return %c0_i32, %c0_i32_0, %c0_i32_1 : i32, i32, i32
  }
  func.func @transform_6(%arg0: i32) -> (i32, i32, i32) {
    %c0_i32 = arith.constant 0 : i32
    %c0_i32_0 = arith.constant 0 : i32
    %c0_i32_1 = arith.constant 0 : i32
    %c0_i32_2 = arith.constant 0 : i32
    return %c0_i32, %c0_i32_0, %c0_i32_1 : i32, i32, i32
  }
  func.func @transform_7(%arg0: i32) -> (i32, i32, i32) {
    %c0_i32 = arith.constant 0 : i32
    %c0_i32_0 = arith.constant 0 : i32
    %c0_i32_1 = arith.constant 0 : i32
    return %arg0, %c0_i32, %c0_i32_0 : i32, i32, i32
  }
  func.func @transform_8(%arg0: i32) -> (i32, i32, i32) {
    %c0_i32 = arith.constant 0 : i32
    %c0_i32_0 = arith.constant 0 : i32
    %c0_i32_1 = arith.constant 0 : i32
    return %arg0, %c0_i32, %c0_i32_0 : i32, i32, i32
  }
  func.func @transform_9(%arg0: i32) -> (i32, i32) {
    %c0_i32 = arith.constant 0 : i32
    %c0_i32_0 = arith.constant 0 : i32
    %c0_i32_1 = arith.constant 0 : i32
    return %c0_i32, %c0_i32_0 : i32, i32
  }
  func.func @transform_10(%arg0: i32) -> (i32, i32) {
    %c0_i32 = arith.constant 0 : i32
    %c0_i32_0 = arith.constant 0 : i32
    %c0_i32_1 = arith.constant 0 : i32
    return %c0_i32, %c0_i32_0 : i32, i32
  }
  func.func @transform_11(%arg0: i32) -> (i32, i32) {
    %c0_i32 = arith.constant 0 : i32
    %c0_i32_0 = arith.constant 0 : i32
    %c0_i32_1 = arith.constant 0 : i32
    return %c0_i32, %c0_i32_0 : i32, i32
  }
  func.func @transform_12(%arg0: i32) -> (i32, i32) {
    %c0_i32 = arith.constant 0 : i32
    %c0_i32_0 = arith.constant 0 : i32
    %c0_i32_1 = arith.constant 0 : i32
    return %c0_i32, %c0_i32_0 : i32, i32
  }
  func.func @transform_13(%arg0: i32) -> (i32, i32) {
    %c0_i32 = arith.constant 0 : i32
    %c0_i32_0 = arith.constant 0 : i32
    %c0_i32_1 = arith.constant 0 : i32
    return %c0_i32, %c0_i32_0 : i32, i32
  }
}

</mosaic_0001>

<bundles_post_ra>
// kernel: tpu_custom_call.1
= control target key start
LH: loop header
LB: loop body
LE: loop exit
PB: predicated region body
PF: predicated region fallthrough
CT: control target
= control target key end

     0   :  { %s26260_s0 = inlined_call_operand.hbm [shape: f32[16,384], index: 0, kind: input, shape index: {}]   ;;  %s26261_s1 = inlined_call_operand.hbm [shape: f32[6,1,384], index: 1, kind: input, shape index: {}]   ;;  %s26262_s2 = inlined_call_operand.hbm [shape: f32[6,1,384], index: 2, kind: input, shape index: {}]   ;;  %s26263_s3 = inlined_call_operand.hbm [shape: f32[6,1,384], index: 3, kind: input, shape index: {}]   ;;  %s26264_s4 = inlined_call_operand.hbm [shape: f32[6,1,384], index: 4, kind: input, shape index: {}]   ;;  %s26265_s5 = inlined_call_operand.hbm [shape: f32[6,1,1536], index: 5, kind: input, shape index: {}]   ;;  %s26266_s6 = inlined_call_operand.hbm [shape: f32[6,1,384], index: 6, kind: input, shape index: {}]   ;;  %s26267_s7 = inlined_call_operand.hbm [shape: bf16[6,384,1536], index: 7, kind: input, shape index: {}]   ;;  %s26268_s8 = inlined_call_operand.hbm [shape: bf16[6,1536,384], index: 8, kind: input, shape index: {}]   ;;  %s26269_s9 = inlined_call_operand.hbm [shape: f32[1,384], index: 9, kind: input, shape index: {}]   ;;  %s26270_s10 = inlined_call_operand.hbm [shape: f32[1,384], index: 10, kind: input, shape index: {}]   ;;  %s26271_s11 = inlined_call_operand.hbm [shape: bf16[384,128], index: 11, kind: input, shape index: {}]   ;;  %s26272_s12 = inlined_call_operand.hbm [shape: f32[1,128], index: 12, kind: input, shape index: {}]   ;;  %s26273_s13 = inlined_call_operand.hbm [shape: f32[16,128], index: 13, kind: output, shape index: {}]  }
   0x1   :  { %26295 = sst [smem:[#allocation36_spill]] %s26261_s1 }
   0x2   :  { %26296 = sst [smem:[#allocation37_spill]] %s26263_s3 }
   0x3   :  { %26297 = sst [smem:[#allocation38_spill]] %s26265_s5 }
   0x4   :  { %26298 = sst [smem:[#allocation39_spill]] %s26267_s7 }
   0x5   :  { %26299 = sst [smem:[#allocation40_spill]] %s26268_s8 }
   0x6   :  { %26300 = sst [smem:[#allocation41_spill]] %s26269_s9 }
   0x7   :  { %26301 = sst [smem:[#allocation42_spill]] %s26270_s10 }
   0x8   :  { %26302 = sst [smem:[#allocation43_spill]] %s26271_s11 }
   0x9   :  { %26303 = sst [smem:[#allocation44_spill]] %s26272_s12 }
   0xa   :  { %26304 = sst [smem:[#allocation45_spill]] %s26273_s13 }
   0xb   :  { %18 = vsyncpa [#allocation4], 0 }
   0xc   :  { %19 = vsyncpa [#allocation7], 0 }
   0xd   :  { %20 = vsyncpa [#allocation10], 0 }
   0xe   :  { %21 = vsyncpa [#allocation13], 0 }
   0xf   :  { %22 = vsyncpa [#allocation16], 0 }
  0x10   :  { %24 = vsyncpa [#allocation16 + $0x1], 0 }
  0x11   :  { %25 = vsyncpa [#allocation19], 0 }
  0x12   :  { %26 = vsyncpa [#allocation22], 0 }
  0x13   :  { %27 = vsyncpa [#allocation5], 0  ;;  %s23322_s25 = smov 0   ;;  %s23324_s26 = smov 0  }
  0x14   :  { %s23326_s27 = smov 0   ;;  %s23328_s28 = smov 0  }
  0x15 LB: > { %26305 = sst [smem:[#allocation33_spill]] %s23218_s27  ;;  %s23224_s29 = smov [#allocation6]   ;;  %s23222_s28 = sphi %s23328_s28, %s26354_s28   ;;  %s23218_s27 = sphi %s23326_s27, %s26351_s27   ;;  %s23214_s26 = sphi %s23324_s26, %s26353_s26   ;;  %s23210_s25 = sphi %s23322_s25, %s26352_s25  }
  0x16   : > { %s367_s30 = sshll.u32 %s23224_s29, 4  ;;  %s23343_s14 = sadd.s32 4294967295, %s23222_s28   ;;  %s23349_s30 = int_to_ptr.vmem [resolvable:$true] %s367_s30 }
  0x17   : > { %p16256_p0 = scmp.ge.s32.totalorder %s23222_s28, 1  ;;  %p26283_p1 = scmp.eq.s32.totalorder %s23343_s14, 0 }
  0x18   : > { %p342_p2 = scmp.lt.s32.totalorder %s23222_s28, 3  ;;  %s23225_s17 = smov [#allocation9]  }
  0x19   : > { %s393_s18 = sshll.u32 %s23225_s17, 4  ;;  %s23226_s19 = smov [#allocation12]   ;;  %s23363_s18 = int_to_ptr.vmem [resolvable:$true] %s393_s18 }
  0x1a   : > { %p23351_p4 = pnand %p16256_p0, %p342_p2  ;;  %s419_s20 = sshll.u32 %s23226_s19, 4  ;;  %s23365_s20 = int_to_ptr.vmem [resolvable:$true] %s419_s20 }
  0x1b   : > { %s26309_s1 = sld [smem:[#allocation36_spill]] }
  0x1c   : > { %s26306_s15 = scalar_select %p23351_p4, 1, 0 }
  0x1d   : > { %p20134_p5 = pneg %p23351_p4 }
  0x1e   : > { %26307 = sst [smem:[#allocation34_spill]] %s26306_s15 }
  0x1f   : > { %p23359_p6 = pnand %p20134_p5, %p26283_p1 }
  0x21   : > { %s26308_s16 = scalar_select %p23359_p6, 1, 0 }
  0x22   : > { %s22766_s23 = scalar_lea.hbm %s26309_s1, 288  ;;  %p23375_p8 = pneg %p23359_p6 }
  0x23   : > { %p22767_p7 = scmp.ne.s32.totalorder %s26309_s1, %s22766_s23  ;;  %p22773_p11 = scmp.lt.u32.totalorder %s22766_s23, %s26309_s1 }
  0x25   : > { %p22769_p9 = pnand %p23375_p8, %p22767_p7 }
  0x27   : > { %p22770_p10 = pneg %p22769_p9 }
  0x29   : > { %p22775_p12 = pnand %p22773_p11, %p22770_p10 }
  0x2b   : > { %22778 = shalt.err (!%p22775_p12)
}
  0x2c   : > { %s22779_s21 = scalar_lea.vmem %s23349_s30, 288  ;;  %p22787_p5 = scmp.lt.s32.totalorder %s23349_s30, %s23349_s30 }
  0x2d   : > { %p22780_p13 = scmp.ne.s32.totalorder %s23349_s30, %s22779_s21  ;;  %p22788_p3 = scmp.lt.s32.totalorder %s22779_s21, %s22779_s21 }
  0x2f   : > { %p22782_p0 = pnand %p22780_p13, %p23375_p8  ;;  %p22789_p7 = por %p22788_p3, %p22787_p5 }
  0x31   : > { %p22783_p2 = pneg %p22782_p0 }
  0x33   : > { %p22790_p9 = pnand %p22789_p7, %p22783_p2 }
  0x35   : > { %22793 = shalt.err (!%p22790_p9)
}
  0x36   : > { %s26281_s22 = smov 48   ;;  %s26279_s23 = smov 3  }
  0x37   : > { %20140 = dma.hbm_to_vmem [thread:$0]  (!%p23359_p6), %s26309_s1, 288, %s23349_s30, [#allocation7], %s26281_s22, %s26281_s22, %s26279_s23  }
  0x38   : > { %s26311_s3 = sld [smem:[#allocation37_spill]] }
  0x3e   : > { %s22794_s21 = scalar_lea.hbm %s26311_s3, 288 }
  0x3f   : > { %p22795_p3 = scmp.ne.s32.totalorder %s26311_s3, %s22794_s21  ;;  %p22801_p12 = scmp.lt.u32.totalorder %s22794_s21, %s26311_s3 }
  0x41   : > { %p22797_p10 = pnand %p22795_p3, %p23375_p8 }
  0x43   : > { %p22798_p11 = pneg %p22797_p10 }
  0x45   : > { %p22803_p13 = pnand %p22801_p12, %p22798_p11 }
  0x47   : > { %22806 = shalt.err (!%p22803_p13)
}
  0x48   : > { %s22807_s30 = scalar_lea.vmem %s23363_s18, 288  ;;  %p22815_p7 = scmp.lt.s32.totalorder %s23363_s18, %s23363_s18 }
  0x49   : > { %p22808_p0 = scmp.ne.s32.totalorder %s23363_s18, %s22807_s30  ;;  %p22816_p9 = scmp.lt.s32.totalorder %s22807_s30, %s22807_s30 }
  0x4b   : > { %p22810_p2 = pnand %p22808_p0, %p23375_p8  ;;  %p22817_p3 = por %p22816_p9, %p22815_p7 }
  0x4d   : > { %p22811_p5 = pneg %p22810_p2 }
  0x4f   : > { %p22818_p10 = pnand %p22817_p3, %p22811_p5 }
  0x51   : > { %22821 = shalt.err (!%p22818_p10)
}
  0x52   : > { %20146 = dma.hbm_to_vmem [thread:$0]  (!%p23359_p6), %s26311_s3, 288, %s23363_s18, [#allocation10], %s26281_s22, %s26281_s22, %s26279_s23  }
  0x53   : > { %s26312_s5 = sld [smem:[#allocation38_spill]] }
  0x59   : > { %s22822_s24 = scalar_lea.hbm %s26312_s5, 1152 }
  0x5a   : > { %p22823_p11 = scmp.ne.s32.totalorder %s26312_s5, %s22822_s24  ;;  %p22829_p0 = scmp.lt.u32.totalorder %s22822_s24, %s26312_s5 }
  0x5c   : > { %p22825_p12 = pnand %p22823_p11, %p23375_p8 }
  0x5e   : > { %p22826_p13 = pneg %p22825_p12 }
  0x60   : > { %p22831_p2 = pnand %p22829_p0, %p22826_p13 }
  0x62   : > { %22834 = shalt.err (!%p22831_p2)
}
  0x63   : > { %s22835_s18 = scalar_lea.vmem %s23365_s20, 1152  ;;  %p22843_p3 = scmp.lt.s32.totalorder %s23365_s20, %s23365_s20 }
  0x64   : > { %p22836_p5 = scmp.ne.s32.totalorder %s23365_s20, %s22835_s18  ;;  %p22844_p10 = scmp.lt.s32.totalorder %s22835_s18, %s22835_s18 }
  0x66   : > { %p22838_p7 = pnand %p22836_p5, %p23375_p8  ;;  %p22845_p11 = por %p22844_p10, %p22843_p3 }
  0x68   : > { %p22839_p9 = pneg %p22838_p7 }
  0x6a   : > { %p22846_p12 = pnand %p22845_p11, %p22839_p9 }
  0x6c   : > { %22849 = shalt.err (!%p22846_p12)
}
  0x6d   : > { %s26285_s30 = smov 192   ;;  %s26286_s8 = smov 12  }
  0x6e   : > { %20152 = dma.hbm_to_vmem [thread:$0]  (!%p23359_p6), %s26312_s5, 1152, %s23365_s20, [#allocation13], %s26285_s30, %s26285_s30, %s26286_s8  }
  0x6f   : > { %s23231_s15 = smov [#allocation18]   ;;  %s23232_s29 = smov [#allocation21]  }
  0x70   : > { %s446_s24 = sshll.u32 %s23231_s15, 4  ;;  %s467_s17 = sshll.u32 %s23232_s29, 4  ;;  %s447_s24 = int_to_ptr.vmem [resolvable:$true] %s446_s24  ;;  %s23451_s17 = int_to_ptr.vmem [resolvable:$true] %s467_s17 }
  0x71   : > { %s26313_s9 = sld [smem:[#allocation41_spill]] }
  0x77   : > { %s22850_s18 = scalar_lea.hbm %s26313_s9, 48 }
  0x78   : > { %p22851_p13 = scmp.ne.s32.totalorder %s26313_s9, %s22850_s18  ;;  %p22857_p5 = scmp.lt.u32.totalorder %s22850_s18, %s26313_s9 }
  0x7a   : > { %p22853_p0 = pnand %p22851_p13, %p23375_p8 }
  0x7c   : > { %p22854_p2 = pneg %p22853_p0 }
  0x7e   : > { %p22859_p7 = pnand %p22857_p5, %p22854_p2 }
  0x80   : > { %22862 = shalt.err (!%p22859_p7)
}
  0x81   : > { %s22863_s12 = scalar_lea.vmem %s447_s24, 48  ;;  %s22870_s15 = scalar_lea.vmem %s447_s24, 64 }
  0x82   : > { %p22864_p9 = scmp.ne.s32.totalorder %s447_s24, %s22863_s12  ;;  %p22871_p11 = scmp.lt.s32.totalorder %s447_s24, %s447_s24 }
  0x83   : > { %p22872_p12 = scmp.lt.s32.totalorder %s22870_s15, %s22863_s12 }
  0x84   : > { %p22866_p3 = pnand %p22864_p9, %p23375_p8 }
  0x85   : > { %p22873_p1 = por %p22872_p12, %p22871_p11 }
  0x86   : > { %p22867_p10 = pneg %p22866_p3 }
  0x88   : > { %p22874_p4 = pnand %p22873_p1, %p22867_p10 }
  0x8a   : > { %22877 = shalt.err (!%p22874_p4)
}
  0x8b   : > { %20158 = dma.hbm_to_vmem [thread:$0]  (!%p23359_p6), %s26313_s9, 48, %s447_s24, [#allocation19]  }
  0x8c   : > { %s26314_s11 = sld [smem:[#allocation43_spill]] }
  0x92   : > { %s22878_s21 = scalar_lea.hbm %s26314_s11, 3072 }
  0x93   : > { %p22879_p13 = scmp.ne.s32.totalorder %s26314_s11, %s22878_s21  ;;  %p22885_p1 = scmp.lt.u32.totalorder %s22878_s21, %s26314_s11 }
  0x95   : > { %p22881_p0 = pnand %p22879_p13, %p23375_p8 }
  0x97   : > { %p22882_p2 = pneg %p22881_p0 }
  0x99   : > { %p22887_p4 = pnand %p22885_p1, %p22882_p2 }
  0x9b   : > { %22890 = shalt.err (!%p22887_p4)
}
  0x9c   : > { %s22891_s24 = scalar_lea.vmem %s23451_s17, 3072  ;;  %p22899_p3 = scmp.lt.s32.totalorder %s23451_s17, %s23451_s17 }
  0x9d   : > { %p22892_p5 = scmp.ne.s32.totalorder %s23451_s17, %s22891_s24  ;;  %p22900_p10 = scmp.lt.s32.totalorder %s22891_s24, %s22891_s24 }
  0x9f   : > { %p22894_p7 = pnand %p22892_p5, %p23375_p8  ;;  %p22901_p11 = por %p22900_p10, %p22899_p3 }
  0xa1   : > { %p22895_p9 = pneg %p22894_p7 }
  0xa3   : > { %p22902_p12 = pnand %p22901_p11, %p22895_p9 }
  0xa5   : > { %22905 = shalt.err (!%p22902_p12)
}
  0xa6   : > { %s23233_s15 = smov 64   ;;  %s23234_s22 = smov 4  }
  0xa7   : > { %20164 = dma.hbm_to_vmem [thread:$0]  (!%p23359_p6), %s26314_s11, 3072, %s23451_s17, [#allocation22], %s23233_s15, %s23233_s15, %s23234_s22  }
  0xa8   : > { %s23495_s19 = sadd.s32 1, %s23222_s28   ;;  %s187_s21 = sadd.s32 1, %s23218_s27 }
  0xa9   : > { %s184_s18 = ssub.s32 %s23222_s28, %s23495_s19  ;;  %p194_p13 = scmp.ne.s32.totalorder %s23218_s27, %s23214_s26 }
  0xaa   : > { %p185_p0 = scmp.eq.s32.totalorder %s184_s18, 0  ;;  %p195_p2 = scmp.eq.s32.totalorder %s23222_s28, 0 }
  0xab   : > { %p200_p1 = scmp.ne.s32.totalorder %s23214_s26, %s23210_s25  ;;  %p20186_p4 = scmp.lt.s32.totalorder %s23222_s28, 2 }
  0xac   : > { %s23507_s10 = scalar_select %p185_p0, %s23218_s27, %s187_s21  }
  0xad   : > { %p196_p5 = por %p195_p2, %p194_p13  ;;  %p26316_p7 = scmp.eq.s32.totalorder %s23343_s14, 0 }
  0xae   : > { %26315 = sst [smem:[#allocation35_spill]] %s23507_s10  ;;  %s492_s17 = sand.u32 1, %s23222_s28  }
  0xaf   : > { %p23511_p9 = por %p26316_p7, %p200_p1  ;;  %s494_s12 = sand.u32 1, %s23218_s27  }
  0xb0   : > { %s23517_s24 = smul.u32 6912, %s494_s12  ;;  %p23520_p3 = pnand %p20186_p4, %p196_p5 }
  0xb1   : > { %s26317_s20 = scalar_select %p23511_p9, 1, 0 }
  0xb2   : > { %s26287_s15 = smul.u32 110592, %s23222_s28  ;;  %s26319_s7 = sld [smem:[#allocation39_spill]] }
  0xb3   : > { %s26318_s22 = scalar_select %p23520_p3, 1, 0 }
  0xb4   : > { %s496_s21 = scalar_lea.vmem [#allocation15], %s23517_s24  ;;  %s23534_s12 = scalar_lea.sflag [#allocation16], %s492_s17 }
  0xb5   : > { %s504_s18 = sshll.u32 %s496_s21, 4  ;;  %p26291_p11 = pneg %p23520_p3  ;;  %s23532_s18 = int_to_ptr.vmem [resolvable:$true] %s504_s18 }
  0xb8   : > { %s23529_s29 = scalar_lea.hbm %s26319_s7, %s26287_s15  ;;  %s22911_s8 = scalar_lea.hbm %s26319_s7, 221184 }
  0xb9   : > { %s22906_s30 = scalar_lea.hbm %s23529_s29, 110592  ;;  %p22912_p0 = scmp.lt.u32.totalorder %s23529_s29, %s26319_s7 }
  0xba   : > { %p22907_p10 = scmp.ne.s32.totalorder %s23529_s29, %s22906_s30  ;;  %p22913_p2 = scmp.lt.u32.totalorder %s22911_s8, %s22906_s30 }
  0xbb   : > { %p22915_p4 = scmp.lt.u32.totalorder %s22906_s30, %s23529_s29 }
  0xbc   : > { %p22909_p12 = pnand %p26291_p11, %p22907_p10  ;;  %p22914_p1 = por %p22913_p2, %p22912_p0 }
  0xbe   : > { %p22910_p13 = pneg %p22909_p12  ;;  %p22916_p5 = por %p22915_p4, %p22914_p1 }
  0xc0   : > { %p22917_p7 = pnand %p22916_p5, %p22910_p13 }
  0xc2   : > { %22920 = shalt.err (!%p22917_p7)
}
  0xc3   : > { %s22921_s17 = scalar_lea.vmem %s23532_s18, 110592  ;;  %s23235_s21 = smov [#allocation15]  }
  0xc4   : > { %p22922_p10 = scmp.ne.s32.totalorder %s23532_s18, %s22921_s17  ;;  %s22926_s25 = sshll.u32 %s23235_s21, 4  ;;  %s22927_s25 = int_to_ptr.vmem [resolvable:$false] %s22926_s25 }
  0xc5   : > { %s22928_s1 = scalar_lea.vmem %s22927_s25, 221184  ;;  %p22929_p6 = scmp.lt.s32.totalorder %s23532_s18, %s22927_s25 }
  0xc6   : > { %p22924_p12 = pnand %p22922_p10, %p26291_p11  ;;  %p22930_p0 = scmp.lt.s32.totalorder %s22928_s1, %s22921_s17 }
  0xc8   : > { %p22925_p9 = pneg %p22924_p12  ;;  %p22931_p2 = por %p22930_p0, %p22929_p6 }
  0xca   : > { %p22932_p1 = pnand %p22931_p2, %p22925_p9 }
  0xcc   : > { %22935 = shalt.err (!%p22932_p1)
}
  0xcd   : > { %s23236_s30 = smov 768   ;;  %s26320_s8 = smov 48  }
  0xce   : > { %20171 = dma.hbm_to_vmem [thread:$0]  (!%p23520_p3), %s23529_s29, 110592, %s23532_s18, %s23534_s12, %s23236_s30, %s23236_s30, %s26320_s8  }
  0xcf   : > { %s23237_s15 = smov [#allocation3]   ;;  %s22936_s25 = scalar_lea.hbm %s26260_s0, 768 }
  0xd0   : > { %s354_s23 = sshll.u32 %s23237_s15, 4  ;;  %p22937_p6 = scmp.ne.s32.totalorder %s26260_s0, %s22936_s25  ;;  %s355_s23 = int_to_ptr.vmem [resolvable:$true] %s354_s23 }
  0xd1   : > { %p22943_p4 = scmp.lt.u32.totalorder %s22936_s25, %s26260_s0 }
  0xd2   : > { %p22939_p9 = pnand %p22937_p6, %p23375_p8 }
  0xd4   : > { %p22940_p13 = pneg %p22939_p9 }
  0xd6   : > { %p22945_p5 = pnand %p22943_p4, %p22940_p13 }
  0xd8   : > { %22948 = shalt.err (!%p22945_p5)
}
  0xd9   : > { %s22949_s29 = scalar_lea.vmem %s355_s23, 768  ;;  %p22957_p0 = scmp.lt.s32.totalorder %s355_s23, %s355_s23 }
  0xda   : > { %p22950_p7 = scmp.ne.s32.totalorder %s355_s23, %s22949_s29  ;;  %p22958_p2 = scmp.lt.s32.totalorder %s22949_s29, %s22949_s29 }
  0xdc   : > { %p22952_p10 = pnand %p22950_p7, %p23375_p8  ;;  %p22959_p1 = por %p22958_p2, %p22957_p0 }
  0xde   : > { %p22953_p12 = pneg %p22952_p10 }
  0xe0   : > { %p22960_p11 = pnand %p22959_p1, %p22953_p12 }
  0xe2   : > { %22963 = shalt.err (!%p22960_p11)
}
  0xe3   : > { %s23238_s3 = smov 384   ;;  %s23239_s18 = smov 24  }
  0xe4   : > { %p26321_p6 = scmp.ne.s32.totalorder %s26308_s16, 0  ;;  %s23240_s30 = smov [#allocation8]  }
  0xe5   : > { %s380_s15 = sshll.u32 %s23240_s30, 4  ;;  %s23241_s21 = smov [#allocation11]   ;;  %s381_s15 = int_to_ptr.vmem [resolvable:$true] %s380_s15 }
  0xe6   : > { %20137 = dma.hbm_to_vmem [thread:$0]  (!%p26321_p6), %s26260_s0, 768, %s355_s23, [#allocation4], %s23238_s3, %s23238_s3, %s23239_s18  }
  0xe7   : > { %s406_s25 = sshll.u32 %s23241_s21, 4  ;;  %s22964_s29 = scalar_lea.hbm %s26262_s2, 288  ;;  %s407_s25 = int_to_ptr.vmem [resolvable:$true] %s406_s25 }
  0xe8   : > { %p22965_p11 = scmp.ne.s32.totalorder %s26262_s2, %s22964_s29  ;;  %p22971_p4 = scmp.lt.u32.totalorder %s22964_s29, %s26262_s2 }
  0xea   : > { %p22967_p9 = pnand %p22965_p11, %p23375_p8 }
  0xec   : > { %p22968_p13 = pneg %p22967_p9 }
  0xee   : > { %p22973_p5 = pnand %p22971_p4, %p22968_p13 }
  0xf0   : > { %22976 = shalt.err (!%p22973_p5)
}
  0xf1   : > { %s22977_s23 = scalar_lea.vmem %s381_s15, 288  ;;  %p22985_p0 = scmp.lt.s32.totalorder %s381_s15, %s381_s15 }
  0xf2   : > { %p22978_p7 = scmp.ne.s32.totalorder %s381_s15, %s22977_s23  ;;  %p22986_p2 = scmp.lt.s32.totalorder %s22977_s23, %s22977_s23 }
  0xf4   : > { %p22980_p10 = pnand %p22978_p7, %p23375_p8  ;;  %p22987_p1 = por %p22986_p2, %p22985_p0 }
  0xf6   : > { %p22981_p12 = pneg %p22980_p10 }
  0xf8   : > { %p22988_p3 = pnand %p22987_p1, %p22981_p12 }
  0xfa   : > { %22991 = shalt.err (!%p22988_p3)
}
  0xfb   : > { %s26322_s9 = smov 3   ;;  %s22992_s18 = scalar_lea.hbm %s26264_s4, 288 }
  0xfc   : > { %20143 = dma.hbm_to_vmem [thread:$0]  (!%p26321_p6), %s26262_s2, 288, %s381_s15, [#allocation7], %s26320_s8, %s26320_s8, %s26322_s9  }
  0xfd   : > { %p22993_p11 = scmp.ne.s32.totalorder %s26264_s4, %s22992_s18  ;;  %p22999_p13 = scmp.lt.u32.totalorder %s22992_s18, %s26264_s4 }
  0xff   : > { %p22995_p3 = pnand %p22993_p11, %p23375_p8 }
 0x101   : > { %p22996_p9 = pneg %p22995_p3 }
 0x103   : > { %p23001_p4 = pnand %p22999_p13, %p22996_p9 }
 0x105   : > { %23004 = shalt.err (!%p23001_p4)
}
 0x106   : > { %s23005_s17 = scalar_lea.vmem %s407_s25, 288  ;;  %p23013_p12 = scmp.lt.s32.totalorder %s407_s25, %s407_s25 }
 0x107   : > { %p23006_p5 = scmp.ne.s32.totalorder %s407_s25, %s23005_s17  ;;  %p23014_p0 = scmp.lt.s32.totalorder %s23005_s17, %s23005_s17 }
 0x109   : > { %p23008_p7 = pnand %p23006_p5, %p23375_p8  ;;  %p23015_p2 = por %p23014_p0, %p23013_p12 }
 0x10b   : > { %p23009_p10 = pneg %p23008_p7 }
 0x10d   : > { %p23016_p1 = pnand %p23015_p2, %p23009_p10 }
 0x10f   : > { %23019 = shalt.err (!%p23016_p1)
}
 0x110   : > { %20149 = dma.hbm_to_vmem [thread:$0]  (!%p26321_p6), %s26264_s4, 288, %s407_s25, [#allocation10], %s26320_s8, %s26320_s8, %s26322_s9  }
 0x111   : > { %s23242_s29 = smov [#allocation14]   ;;  %s23243_s11 = smov [#allocation20]  }
 0x112   : > { %s432_s23 = sshll.u32 %s23242_s29, 4  ;;  %s457_s27 = sshll.u32 %s23243_s11, 4  ;;  %s433_s23 = int_to_ptr.vmem [resolvable:$true] %s432_s23  ;;  %s458_s27 = int_to_ptr.vmem [resolvable:$true] %s457_s27 }
 0x113   : > { %s23020_s18 = scalar_lea.hbm %s26266_s6, 288 }
 0x114   : > { %p23021_p11 = scmp.ne.s32.totalorder %s26266_s6, %s23020_s18  ;;  %p23027_p13 = scmp.lt.u32.totalorder %s23020_s18, %s26266_s6 }
 0x116   : > { %p23023_p3 = pnand %p23021_p11, %p23375_p8 }
 0x118   : > { %p23024_p9 = pneg %p23023_p3 }
 0x11a   : > { %p23029_p4 = pnand %p23027_p13, %p23024_p9 }
 0x11c   : > { %23032 = shalt.err (!%p23029_p4)
}
 0x11d   : > { %s23033_s25 = scalar_lea.vmem %s433_s23, 288  ;;  %p23041_p12 = scmp.lt.s32.totalorder %s433_s23, %s433_s23 }
 0x11e   : > { %p23034_p5 = scmp.ne.s32.totalorder %s433_s23, %s23033_s25  ;;  %p23042_p0 = scmp.lt.s32.totalorder %s23033_s25, %s23033_s25 }
 0x120   : > { %p23036_p7 = pnand %p23034_p5, %p23375_p8  ;;  %p23043_p2 = por %p23042_p0, %p23041_p12 }
 0x122   : > { %p23037_p10 = pneg %p23036_p7 }
 0x124   : > { %p23044_p1 = pnand %p23043_p2, %p23037_p10 }
 0x126   : > { %23047 = shalt.err (!%p23044_p1)
}
 0x127   : > { %20155 = dma.hbm_to_vmem [thread:$0]  (!%p26321_p6), %s26266_s6, 288, %s433_s23, [#allocation13], %s26320_s8, %s26320_s8, %s26322_s9  }
 0x128   : > { %s26323_s11 = sld [smem:[#allocation42_spill]] }
 0x12e   : > { %s23048_s10 = scalar_lea.hbm %s26323_s11, 48 }
 0x12f   : > { %p23049_p11 = scmp.ne.s32.totalorder %s26323_s11, %s23048_s10  ;;  %p23055_p13 = scmp.lt.u32.totalorder %s23048_s10, %s26323_s11 }
 0x131   : > { %p23051_p3 = pnand %p23049_p11, %p23375_p8 }
 0x133   : > { %p23052_p9 = pneg %p23051_p3 }
 0x135   : > { %p23057_p4 = pnand %p23055_p13, %p23052_p9 }
 0x137   : > { %23060 = shalt.err (!%p23057_p4)
}
 0x138   : > { %s23061_s30 = scalar_lea.vmem %s458_s27, 48  ;;  %s23068_s8 = scalar_lea.vmem %s458_s27, 64 }
 0x139   : > { %p23062_p5 = scmp.ne.s32.totalorder %s458_s27, %s23061_s30  ;;  %p23069_p12 = scmp.lt.s32.totalorder %s458_s27, %s458_s27 }
 0x13a   : > { %p23070_p0 = scmp.lt.s32.totalorder %s23068_s8, %s23061_s30 }
 0x13b   : > { %p23064_p7 = pnand %p23062_p5, %p23375_p8 }
 0x13c   : > { %p23071_p2 = por %p23070_p0, %p23069_p12 }
 0x13d   : > { %p23065_p10 = pneg %p23064_p7 }
 0x13f   : > { %p23072_p1 = pnand %p23071_p2, %p23065_p10 }
 0x141   : > { %23075 = shalt.err (!%p23072_p1)
}
 0x142   : > { %20161 = dma.hbm_to_vmem [thread:$0]  (!%p26321_p6), %s26323_s11, 48, %s458_s27, [#allocation19]  }
 0x143   : > { %s23244_s21 = smov [#allocation23]   ;;  %s26324_s17 = smul.u32 110592, %s23222_s28 }
 0x144   : > { %s481_s25 = sshll.u32 %s23244_s21, 4  ;;  %s26325_s29 = sld [smem:[#allocation40_spill]]  ;;  %s482_s25 = int_to_ptr.vmem [resolvable:$true] %s481_s25 }
 0x145   : > { %s26326_s5 = sld [smem:[#allocation44_spill]] }
 0x14a   : > { %s23667_s10 = scalar_lea.hbm %s26325_s29, %s26324_s17 }
 0x14b   : > { %s23076_s7 = scalar_lea.hbm %s26326_s5, 16 }
 0x14c   : > { %p23077_p11 = scmp.ne.s32.totalorder %s26326_s5, %s23076_s7  ;;  %p23083_p13 = scmp.lt.u32.totalorder %s23076_s7, %s26326_s5 }
 0x14e   : > { %p23079_p3 = pnand %p23077_p11, %p23375_p8 }
 0x150   : > { %p23080_p9 = pneg %p23079_p3 }
 0x152   : > { %p23085_p4 = pnand %p23083_p13, %p23080_p9 }
 0x154   : > { %23088 = shalt.err (!%p23085_p4)
}
 0x155   : > { %s23089_s28 = scalar_lea.vmem %s482_s25, 16  ;;  %s23096_s23 = scalar_lea.vmem %s482_s25, 32 }
 0x156   : > { %p23090_p5 = scmp.ne.s32.totalorder %s482_s25, %s23089_s28  ;;  %p23097_p12 = scmp.lt.s32.totalorder %s482_s25, %s482_s25 }
 0x157   : > { %p23098_p0 = scmp.lt.s32.totalorder %s23096_s23, %s23089_s28 }
 0x158   : > { %p23092_p7 = pnand %p23090_p5, %p23375_p8 }
 0x159   : > { %p23099_p2 = por %p23098_p0, %p23097_p12 }
 0x15a   : > { %p23093_p10 = pneg %p23092_p7 }
 0x15c   : > { %p23100_p1 = pnand %p23099_p2, %p23093_p10 }
 0x15e   : > { %23103 = shalt.err (!%p23100_p1)
}
 0x15f   : > { %20167 = dma.hbm_to_vmem [thread:$0]  (!%p26321_p6), %s26326_s5, 16, %s482_s25, [#allocation22]  }
 0x160   : > { %s518_s13 = scalar_lea.vmem [#allocation17], %s23517_s24  ;;  %s23104_s1 = scalar_lea.hbm %s23667_s10, 110592 }
 0x161   : > { %s526_s15 = sshll.u32 %s518_s13, 4  ;;  %p23105_p8 = scmp.ne.s32.totalorder %s23667_s10, %s23104_s1  ;;  %s23688_s15 = int_to_ptr.vmem [resolvable:$true] %s526_s15 }
 0x162   : > { %p26327_p11 = scmp.ne.s32.totalorder %s26318_s22, 0  ;;  %s23109_s18 = scalar_lea.hbm %s26325_s29, 221184 }
 0x163   : > { %p23110_p4 = scmp.lt.u32.totalorder %s23667_s10, %s26325_s29  ;;  %p23111_p5 = scmp.lt.u32.totalorder %s23109_s18, %s23104_s1 }
 0x164   : > { %p26328_p3 = pneg %p26327_p11  ;;  %p23113_p7 = scmp.lt.u32.totalorder %s23104_s1, %s23667_s10 }
 0x165   : > { %p23112_p6 = por %p23111_p5, %p23110_p4 }
 0x166   : > { %p23107_p9 = pnand %p23105_p8, %p26328_p3 }
 0x167   : > { %p23114_p10 = por %p23113_p7, %p23112_p6 }
 0x168   : > { %p23108_p13 = pneg %p23107_p9 }
 0x16a   : > { %p23115_p12 = pnand %p23114_p10, %p23108_p13 }
 0x16c   : > { %23118 = shalt.err (!%p23115_p12)
}
 0x16d   : > { %s23119_s24 = scalar_lea.vmem %s23688_s15, 110592  ;;  %p26329_p2 = pmov %p26328_p3 }
 0x16e   : > { %p23120_p0 = scmp.ne.s32.totalorder %s23688_s15, %s23119_s24  ;;  %s23245_s25 = smov [#allocation17]  }
 0x16f   : > { %s23124_s8 = sshll.u32 %s23245_s25, 4  ;;  %s23125_s8 = int_to_ptr.vmem [resolvable:$false] %s23124_s8 }
 0x170   : > { %p23122_p1 = pnand %p23120_p0, %p26329_p2  ;;  %s23126_s27 = scalar_lea.vmem %s23125_s8, 221184 }
 0x171   : > { %p23127_p3 = scmp.lt.s32.totalorder %s23688_s15, %s23125_s8  ;;  %p23128_p9 = scmp.lt.s32.totalorder %s23126_s27, %s23119_s24 }
 0x172   : > { %p23123_p8 = pneg %p23122_p1 }
 0x173   : > { %p23129_p4 = por %p23128_p9, %p23127_p3 }
 0x175   : > { %p23130_p5 = pnand %p23129_p4, %p23123_p8 }
 0x177   : > { %23133 = shalt.err (!%p23130_p5)
}
 0x178   : > { %s26330_s9 = smov 12   ;;  %s26331_s28 = smov 192  }
 0x179   : > { %20174 = dma.hbm_to_vmem [thread:$0]  (!%p26327_p11), %s23667_s10, 110592, %s23688_s15, %s23534_s12, %s26331_s28, %s26331_s28, %s26330_s9  }
 0x17a   : > { %s26332_s23 = sld [smem:[#allocation34_spill]] }
 0x180   : > { %p26333_p13 = scmp.ne.s32.totalorder %s26332_s23, 0 }
 0x181   : > { %p26334_p6 = scmp.eq.s32.totalorder (!%p26333_p13), %s23343_s14, 0 }
 0x182   : > { %538 = sbr.rel (%p26333_p13) target bundleno = 5411 (0x1523), region = 72 }
 0x189   : > { %23177 = dma.done.wait (%p26334_p6), [#allocation4], 768   ;;  %p26335_p7 = pmov %p26334_p6 }
 0x18a   : > { %p26336_p10 = pmov %p26334_p6 }
 0x18b   : > { %23179 = vsyncadd (%p26335_p7), [#allocation4], 4294966528 }
 0x18c   : > { %23181 = dma.done.wait (%p26336_p10), [#allocation7], 576   ;;  %p26337_p12 = pmov %p26334_p6 }
 0x18d   : > { %p26338_p0 = pmov %p26334_p6 }
 0x18e   : > { %23183 = vsyncadd (%p26337_p12), [#allocation7], 4294966720 }
 0x18f   : > { %23185 = dma.done.wait (%p26338_p0), [#allocation10], 576   ;;  %p26339_p11 = pmov %p26338_p0 }
 0x190   : > { %p26340_p2 = pmov %p26338_p0 }
 0x191   : > { %23187 = vsyncadd (%p26339_p11), [#allocation10], 4294966720 }
 0x192   : > { %23189 = dma.done.wait (%p26340_p2), [#allocation13], 1440   ;;  %p26341_p1 = pmov %p26338_p0 }
 0x193   : > { %s568_s22 = sand.u32 1, %s23343_s14   ;;  %s570_s12 = sand.u32 1, %s23214_s26  }
 0x194   : > { %23191 = vsyncadd (%p26341_p1), [#allocation13], 4294965856  ;;  %s20081_s10 = smul.u32 6912, %s570_s12  ;;  %s569_s21 = scalar_lea.sflag [#allocation16], %s568_s22 }
 0x195   : > { %p26342_p8 = scmp.ne.s32.totalorder %s26317_s20, 0 }
 0x196   : > { %s23737_s17 = scalar_lea.vmem [#allocation15], %s20081_s10 }
 0x197   : > { %23193 = dma.done.wait (%p26342_p8), %s569_s21, 221184  }
 0x198   : > { %23195 = vsyncadd (%p26342_p8), %s569_s21, 4294746112  ;;  %s23743_s13 = scalar_lea.vmem [#allocation17], %s20081_s10  ;;  %p26343_p3 = pmov %p26338_p0 }
 0x199   : > { %p26344_p9 = pmov %p26338_p0 }
 0x19a   : > { %23197 = dma.done.wait (%p26343_p3), [#allocation19], 96  }
 0x19b   : > { %23199 = vsyncadd (%p26344_p9), [#allocation19], 4294967200  ;;  %p26345_p4 = pmov %p26338_p0 }
 0x19c   : > { %p26346_p5 = pmov %p26338_p0 }
 0x19d   : > { %23201 = dma.done.wait (%p26345_p4), [#allocation22], 3088  }
 0x19e   : > { %23203 = vsyncadd (%p26346_p5), [#allocation22], 4294964208  ;;  %p26347_p13 = scmp.ne.s32.totalorder %s23343_s14, 0 }
 0x19f   : > { %v647_v0 = vld [vmem:[#allocation3] sm:$0xff] (!%p26347_p13)  ;;  %v648_v1 = vld [vmem:[#allocation3 + $0x8] sm:$0xff] (!%p26347_p13)  ;;  %v649_v2 = vld [vmem:[#allocation3 + $0x10] sm:$0xff] (!%p26347_p13) }
 0x1a0   : > { %646 = sbr.rel (%p26347_p13) target bundleno = 423 (0x1a7), region = 128  ;;  %653 = vst [vmem:[#allocation2] sm:$0xff] (!%p26347_p13), %v647_v0  ;;  %654 = vst [vmem:[#allocation2 + $0x8] sm:$0xff] (!%p26347_p13), %v648_v1  ;;  %v650_v3 = vld [vmem:[#allocation3 + $0x18] sm:$0xff] (!%p26347_p13)  ;;  %v651_v4 = vld [vmem:[#allocation3 + $0x20] sm:$0xff] (!%p26347_p13) }
 0x1a1   : > { %655 = vst [vmem:[#allocation2 + $0x10] sm:$0xff] (!%p26347_p13), %v649_v2  ;;  %v652_v5 = vld [vmem:[#allocation3 + $0x28] sm:$0xff] (!%p26347_p13)  ;;  %656 = vst [vmem:[#allocation2 + $0x18] sm:$0xff] (!%p26347_p13), %v650_v3 }
 0x1a2   : > { %657 = vst [vmem:[#allocation2 + $0x20] sm:$0xff] (!%p26347_p13), %v651_v4  ;;  %658 = vst [vmem:[#allocation2 + $0x28] sm:$0xff] (!%p26347_p13), %v652_v5 }
 0x1a7 PF: > { %v659_v6 = vld [vmem:[#allocation2] sm:$0xff]  ;;  %v660_v7 = vld [vmem:[#allocation2 + $0x8] sm:$0xff]  ;;  %s23756_s20 = smul.u32 9, %s23343_s14  ;;  %v715_v38 = vlaneseq  ;;  %p19384_p6 = scmp.ne.s32.totalorder %s23343_s14, 1 }
 0x1a8   : > { %v661_v8 = vld [vmem:[#allocation2 + $0x10] sm:$0xff]  ;;  %v671_v9 = vadd.f32 %v660_v7, %v659_v6  ;;  %v662_v10 = vld [vmem:[#allocation2 + $0x18] sm:$0xff]  ;;  %v22732_v5 = vld [vmem:[#allocation2] sm:$0xff]  ;;  %s16285_s18 = smul.u32 36, %s23343_s14  ;;  %vm23248_vm0 = vmmov (!%p19384_p6), 0  }
 0x1a9   : > { %v663_v11 = vld [vmem:[#allocation2 + $0x20] sm:$0xff]  ;;  %v664_v12 = vld [vmem:[#allocation2 + $0x28] sm:$0xff]  ;;  %v23758_v42 = vshrl.u32 %v715_v38, 7  ;;  %s23761_s15 = scalar_lea.vmem [#allocation6], %s23756_s20  ;;  %s23765_s1 = scalar_lea.vmem [#allocation8], %s23756_s20 }
 0x1aa   : > { %v675_v13 = vadd.f32 %v663_v11, %v662_v10  ;;  %v672_v14 = vadd.f32 %v671_v9, %v661_v8  ;;  %v668_v44 = vld [vmem:[%s23761_s15] sm:$0x7]  ;;  %s23898_s16 = scalar_lea.vmem [#allocation9], %s23756_s20  ;;  %s23906_s3 = scalar_lea.vmem [#allocation11], %s23756_s20 }
 0x1ab   : > { %v670_v45 = vld [vmem:[%s23765_s1] sm:$0x7]  ;;  %v23769_v46 = vsub.s32 0, %v23758_v42  ;;  %v23772_v47 = vsub.s32 1, %v23758_v42  ;;  %v23775_v48 = vsub.s32 2, %v23758_v42  ;;  %s24185_s7 = scalar_lea.vmem [#allocation12], %s16285_s18 }
 0x1ac   : > { %673 = vadd.xlane.f32.xlu0 %v672_v14  ;;  %v676_v15 = vadd.f32 %v675_v13, %v664_v12  ;;  %v20277_v38 = vld [vmem:[%s23737_s17 + $0xd0] ss:$48 sps:$4 sm:$0xff]   ;;  %s24556_s30 = scalar_lea.vmem [#allocation14], %s23756_s20 }
 0x1ad   : > { %v718_v49 = vrot.slane %v668_v44, %v23769_v46  ;;  %v722_v50 = vrot.slane %v668_v44, %v23772_v47  ;;  %v726_v51 = vrot.slane %v668_v44, %v23775_v48  ;;  %v740_v53 = vrot.slane %v670_v45, %v23769_v46  ;;  %v20284_v44 = vld [vmem:[%s23737_s17 + $0x184] ss:$48 sps:$4 sm:$0xff]  }
 0x1ae   : > { %v744_v54 = vrot.slane %v670_v45, %v23772_v47  ;;  %v748_v58 = vrot.slane %v670_v45, %v23775_v48  ;;  %v20286_v45 = vld [vmem:[%s23737_s17 + $0x194] ss:$48 sps:$4 sm:$0xff]  }
 0x1b0   : > { %677 = vadd.xlane.f32.xlu0 %v676_v15 }
 0x239   : > { %v674_v16 = vpop.xlane.xlu0 %673 }
 0x23a   : > { %v680_v17 = vmul.f32 0.0026041667, %v674_v16 }
 0x23c   : > { %v682_v18 = vsub.f32 %v659_v6, %v680_v17  ;;  %v683_v19 = vsub.f32 %v660_v7, %v680_v17  ;;  %v684_v20 = vsub.f32 %v661_v8, %v680_v17  ;;  %v22733_v7 = vld [vmem:[#allocation2 + $0x8] sm:$0xff] }
 0x23d   : > { %v678_v21 = vpop.xlane.xlu0 %677 }
 0x23e   : > { %v681_v22 = vmul.f32 0.0026041667, %v678_v21  ;;  %v688_v23 = vmul.f32 %v682_v18, %v682_v18  ;;  %v689_v24 = vmul.f32 %v683_v19, %v683_v19  ;;  %v690_v25 = vmul.f32 %v684_v20, %v684_v20  ;;  %v22736_v21 = vld [vmem:[#allocation2 + $0x20] sm:$0xff] }
 0x240   : > { %v685_v26 = vsub.f32 %v662_v10, %v681_v22  ;;  %v686_v27 = vsub.f32 %v663_v11, %v681_v22  ;;  %v687_v28 = vsub.f32 %v664_v12, %v681_v22  ;;  %v694_v29 = vadd.f32 %v689_v24, %v688_v23  ;;  %v22734_v12 = vld [vmem:[#allocation2 + $0x10] sm:$0xff]  ;;  %v22737_v23 = vld [vmem:[#allocation2 + $0x28] sm:$0xff] }
 0x242   : > { %v695_v30 = vadd.f32 %v694_v29, %v690_v25  ;;  %v691_v31 = vmul.f32 %v685_v26, %v685_v26  ;;  %v692_v32 = vmul.f32 %v686_v27, %v686_v27  ;;  %v693_v33 = vmul.f32 %v687_v28, %v687_v28  ;;  %v20264_v29 = vld [vmem:[%s23737_s17] ss:$48 sps:$4 sm:$0xff]  }
 0x244   : > { %696 = vadd.xlane.f32.xlu1 %v695_v30  ;;  %v698_v34 = vadd.f32 %v692_v32, %v691_v31  ;;  %v20265_v30 = vld [vmem:[%s23737_s17 + $0x10] ss:$48 sps:$4 sm:$0xff]   ;;  %v20266_v31 = vld [vmem:[%s23737_s17 + $0x64] ss:$48 sps:$4 sm:$0xff]  }
 0x245   : > { %v20268_v32 = vld [vmem:[%s23737_s17 + $0x74] ss:$48 sps:$4 sm:$0xff]  }
 0x246   : > { %v699_v35 = vadd.f32 %v698_v34, %v693_v33  ;;  %v20270_v33 = vld [vmem:[%s23737_s17 + $0x60] ss:$48 sps:$4 sm:$0xff]  }
 0x247   : > { %v20271_v34 = vld [vmem:[%s23737_s17 + $0x70] ss:$48 sps:$4 sm:$0xff]  }
 0x248   : > { %700 = vadd.xlane.f32.xlu1 %v699_v35  ;;  %v20272_v35 = vld [vmem:[%s23737_s17 + $0xc4] ss:$48 sps:$4 sm:$0xff]  }
 0x2d1   : > { %v697_v36 = vpop.xlane.xlu1 %696 }
 0x2d2   : > { %v702_v37 = vmul.f32 0.0026041667, %v697_v36  ;;  %v20274_v36 = vld [vmem:[%s23737_s17 + $0xd4] ss:$48 sps:$4 sm:$0xff]  }
 0x2d4   : > { %v704_v39 = vadd.f32 1e-05, %v702_v37  ;;  %v20276_v37 = vld [vmem:[%s23737_s17 + $0xc0] ss:$48 sps:$4 sm:$0xff]  }
 0x2d5   : > { %v701_v40 = vpop.xlane.xlu1 %700 }
 0x2d6   : > { %22708 = vrsqrt.f32 %v704_v39  ;;  %v703_v41 = vmul.f32 0.0026041667, %v701_v40  ;;  %v20278_v39 = vld [vmem:[%s23737_s17 + $0x124] ss:$48 sps:$4 sm:$0xff]  }
 0x2d7   : > { %v20280_v40 = vld [vmem:[%s23737_s17 + $0x134] ss:$48 sps:$4 sm:$0xff]  }
 0x2d8   : > { %v705_v43 = vadd.f32 1e-05, %v703_v41  ;;  %v20282_v41 = vld [vmem:[%s23737_s17 + $0x120] ss:$48 sps:$4 sm:$0xff]  }
 0x2da   : > { %22710 = vrsqrt.f32 %v705_v43  ;;  %v20283_v43 = vld [vmem:[%s23737_s17 + $0x130] ss:$48 sps:$4 sm:$0xff]  }
 0x2e0   : > { %v22709_v52 = vpop.eup %22708 }
 0x2e1   : > { %v708_v55 = vmul.f32 %v22709_v52, %v682_v18  ;;  %v709_v56 = vmul.f32 %v22709_v52, %v683_v19  ;;  %v710_v57 = vmul.f32 %v22709_v52, %v684_v20  ;;  %v22735_v19 = vld [vmem:[#allocation2 + $0x18] sm:$0xff] }
 0x2e2   : > { %v20292_v52 = vld [vmem:[%s23737_s17 + $0x1f4] ss:$48 sps:$4 sm:$0xff]  }
 0x2e3   : > { %v730_v59 = vmul.f32 %v718_v49, %v708_v55  ;;  %v731_v60 = vmul.f32 %v722_v50, %v709_v56  ;;  %v732_v61 = vmul.f32 %v726_v51, %v710_v57  ;;  %v20296_v55 = vld [vmem:[%s23737_s17 + $0x244] ss:$48 sps:$4 sm:$0xff]   ;;  %v20300_v57 = vld [vmem:[%s23737_s17 + $0x240] ss:$48 sps:$4 sm:$0xff]  }
 0x2e4   : > { %v22711_v62 = vpop.eup %22710  ;;  %v20298_v56 = vld [vmem:[%s23737_s17 + $0x254] ss:$48 sps:$4 sm:$0xff]  }
 0x2e5   : > { %v752_v63 = vadd.f32 %v740_v53, %v730_v59  ;;  %v753_v0 = vadd.f32 %v744_v54, %v731_v60  ;;  %v754_v1 = vadd.f32 %v748_v58, %v732_v61  ;;  %v711_v2 = vmul.f32 %v22711_v62, %v685_v26  ;;  %v20302_v59 = vld [vmem:[%s23737_s17 + $0x2a4] ss:$48 sps:$4 sm:$0xff]   ;;  %v20306_v61 = vld [vmem:[%s23737_s17 + $0x2a0] ss:$48 sps:$4 sm:$0xff]  }
 0x2e6   : > { %v712_v3 = vmul.f32 %v22711_v62, %v686_v27  ;;  %v713_v4 = vmul.f32 %v22711_v62, %v687_v28  ;;  %v20260_v27 = vld [vmem:[%s23737_s17 + $0x4] ss:$48 sps:$4 sm:$0xff]   ;;  %v20307_v62 = vld [vmem:[%s23737_s17 + $0x2b0] ss:$48 sps:$4 sm:$0xff]  }
 0x2e7   : > { %v23783_v6 = vadd.f32 %v22732_v5, %v752_v63  ;;  %v23785_v8 = vadd.f32 %v22733_v7, %v753_v0  ;;  %v733_v9 = vmul.f32 %v718_v49, %v711_v2  ;;  %v23787_v13 = vadd.f32 %v22734_v12, %v754_v1  ;;  %v20262_v28 = vld [vmem:[%s23737_s17 + $0x14] ss:$48 sps:$4 sm:$0xff]   ;;  %2651 = vmatprep.subr.bf16.mxu1 %v20260_v27  ;;  %v20288_v49 = vld [vmem:[%s23737_s17 + $0x180] ss:$48 sps:$4 sm:$0xff]  }
 0x2e8   : > { %v734_v10 = vmul.f32 %v722_v50, %v712_v3  ;;  %v735_v11 = vmul.f32 %v726_v51, %v713_v4  ;;  %2823 = vmatprep.subr.bf16.mxu0 %v20262_v28  ;;  %2652 = vmatpush1.bf16.msra.mxu1 %v20264_v29  ;;  %v20289_v50 = vld [vmem:[%s23737_s17 + $0x190] ss:$48 sps:$4 sm:$0xff]   ;;  %v20290_v51 = vld [vmem:[%s23737_s17 + $0x1e4] ss:$48 sps:$4 sm:$0xff]  }
 0x2e9   : > { %v768_v14 = vadd.f32 %v23785_v8, %v23783_v6  ;;  %v755_v15 = vadd.f32 %v740_v53, %v733_v9  ;;  %2824 = vmatpush1.bf16.msra.mxu0 %v20265_v30  ;;  %2653 = vmatprep.subr.bf16.mxu1 %v20266_v31  ;;  %v20294_v53 = vld [vmem:[%s23737_s17 + $0x1e0] ss:$48 sps:$4 sm:$0xff]   ;;  %v20304_v60 = vld [vmem:[%s23737_s17 + $0x2b4] ss:$48 sps:$4 sm:$0xff]  }
 0x2ea   : > { %v756_v16 = vadd.f32 %v744_v54, %v734_v10  ;;  %v757_v17 = vadd.f32 %v748_v58, %v735_v11  ;;  %2825 = vmatprep.subr.bf16.mxu0 %v20268_v32  ;;  %v20295_v54 = vld [vmem:[%s23737_s17 + $0x1f0] ss:$48 sps:$4 sm:$0xff]   ;;  %v20308_v63 = vld [vmem:[%s23737_s17 + $0x304] ss:$48 sps:$4 sm:$0xff]  }
 0x2eb   : > { %v769_v18 = vadd.f32 %v768_v14, %v23787_v13  ;;  %v23792_v20 = vadd.f32 %v22735_v19, %v755_v15  ;;  %v20301_v58 = vld [vmem:[%s23737_s17 + $0x250] ss:$48 sps:$4 sm:$0xff]   ;;  %v20310_v0 = vld [vmem:[%s23737_s17 + $0x314] ss:$48 sps:$4 sm:$0xff]  }
 0x2ec   : > { %v23794_v22 = vadd.f32 %v22736_v21, %v756_v16  ;;  %v23796_v24 = vadd.f32 %v22737_v23, %v757_v17  ;;  %2654 = vmatpush1.bf16.msra.mxu1 %v20270_v33  ;;  %v20312_v1 = vld [vmem:[%s23737_s17 + $0x300] ss:$48 sps:$4 sm:$0xff]   ;;  %v20314_v3 = vld [vmem:[%s23737_s17 + $0x364] ss:$48 sps:$4 sm:$0xff]  }
 0x2ed   : > { %770 = vadd.xlane.f32.xlu0 %v769_v18  ;;  %2826 = vmatpush1.bf16.msra.mxu0 %v20271_v34  ;;  %v20313_v2 = vld [vmem:[%s23737_s17 + $0x310] ss:$48 sps:$4 sm:$0xff]   ;;  %v20316_v4 = vld [vmem:[%s23737_s17 + $0x374] ss:$48 sps:$4 sm:$0xff]  }
 0x2ee   : > { %v772_v25 = vadd.f32 %v23794_v22, %v23792_v20  ;;  %2655 = vmatprep.subr.bf16.mxu1 %v20272_v35  ;;  %2827 = vmatprep.subr.bf16.mxu0 %v20274_v36  ;;  %v20318_v31 = vld [vmem:[%s23737_s17 + $0x360] ss:$48 sps:$4 sm:$0xff]   ;;  %v20320_v33 = vld [vmem:[%s23737_s17 + $0x3c4] ss:$48 sps:$4 sm:$0xff]  }
 0x2ef   : > { %v20319_v32 = vld [vmem:[%s23737_s17 + $0x370] ss:$48 sps:$4 sm:$0xff]   ;;  %v20322_v34 = vld [vmem:[%s23737_s17 + $0x3d4] ss:$48 sps:$4 sm:$0xff]  }
 0x2f0   : > { %v773_v26 = vadd.f32 %v772_v25, %v23796_v24  ;;  %2656 = vmatpush1.bf16.msra.mxu1 %v20276_v37  ;;  %v20324_v35 = vld [vmem:[%s23737_s17 + $0x3c0] ss:$48 sps:$4 sm:$0xff]   ;;  %v20326_v37 = vld [vmem:[%s23737_s17 + $0x424] ss:$48 sps:$4 sm:$0xff]  }
 0x2f1   : > { %2828 = vmatpush1.bf16.msra.mxu0 %v20277_v38  ;;  %2657 = vmatprep.subr.bf16.mxu1 %v20278_v39  ;;  %v20325_v36 = vld [vmem:[%s23737_s17 + $0x3d0] ss:$48 sps:$4 sm:$0xff]   ;;  %v20328_v38 = vld [vmem:[%s23737_s17 + $0x434] ss:$48 sps:$4 sm:$0xff]  }
 0x2f2   : > { %774 = vadd.xlane.f32.xlu1 %v773_v26  ;;  %2829 = vmatprep.subr.bf16.mxu0 %v20280_v40  ;;  %v20330_v39 = vld [vmem:[%s23737_s17 + $0x420] ss:$48 sps:$4 sm:$0xff]  }
 0x2f3   : > { %v20331_v40 = vld [vmem:[%s23737_s17 + $0x430] ss:$48 sps:$4 sm:$0xff]  }
 0x2f4   : > { %2658 = vmatpush1.bf16.msra.mxu1 %v20282_v41  ;;  %v20332_v41 = vld [vmem:[%s23737_s17 + $0x484] ss:$48 sps:$4 sm:$0xff]  }
 0x2f5   : > { %2830 = vmatpush1.bf16.msra.mxu0 %v20283_v43  ;;  %2659 = vmatprep.subr.bf16.mxu1 %v20284_v44  ;;  %v20334_v43 = vld [vmem:[%s23737_s17 + $0x494] ss:$48 sps:$4 sm:$0xff]   ;;  %v20336_v44 = vld [vmem:[%s23737_s17 + $0x480] ss:$48 sps:$4 sm:$0xff]  }
 0x2f6   : > { %2831 = vmatprep.subr.bf16.mxu0 %v20286_v45  ;;  %v20337_v45 = vld [vmem:[%s23737_s17 + $0x490] ss:$48 sps:$4 sm:$0xff]  }
 0x2f8   : > { %2660 = vmatpush1.bf16.msra.mxu1 %v20288_v49  ;;  %v20338_v49 = vld [vmem:[%s23737_s17 + $0x4e4] ss:$48 sps:$4 sm:$0xff]  }
 0x2f9   : > { %2832 = vmatpush1.bf16.msra.mxu0 %v20289_v50  ;;  %2661 = vmatprep.subr.bf16.mxu1 %v20290_v51  ;;  %v20340_v50 = vld [vmem:[%s23737_s17 + $0x4f4] ss:$48 sps:$4 sm:$0xff]   ;;  %v20342_v51 = vld [vmem:[%s23737_s17 + $0x4e0] ss:$48 sps:$4 sm:$0xff]  }
 0x2fa   : > { %2833 = vmatprep.subr.bf16.mxu0 %v20292_v52  ;;  %v20343_v52 = vld [vmem:[%s23737_s17 + $0x4f0] ss:$48 sps:$4 sm:$0xff]  }
 0x2fc   : > { %2662 = vmatpush1.bf16.msra.mxu1 %v20294_v53  ;;  %v20344_v53 = vld [vmem:[%s23737_s17 + $0x544] ss:$48 sps:$4 sm:$0xff]  }
 0x2fd   : > { %2834 = vmatpush1.bf16.msra.mxu0 %v20295_v54  ;;  %2663 = vmatprep.subr.bf16.mxu1 %v20296_v55  ;;  %v20346_v54 = vld [vmem:[%s23737_s17 + $0x554] ss:$48 sps:$4 sm:$0xff]   ;;  %v20348_v55 = vld [vmem:[%s23737_s17 + $0x540] ss:$48 sps:$4 sm:$0xff]  }
 0x2fe   : > { %2835 = vmatprep.subr.bf16.mxu0 %v20298_v56  ;;  %v20349_v56 = vld [vmem:[%s23737_s17 + $0x550] ss:$48 sps:$4 sm:$0xff]  }
 0x300   : > { %2664 = vmatpush1.bf16.msra.mxu1 %v20300_v57  ;;  %v20350_v57 = vld [vmem:[%s23737_s17 + $0x5a4] ss:$48 sps:$4 sm:$0xff]  }
 0x301   : > { %2836 = vmatpush1.bf16.msra.mxu0 %v20301_v58  ;;  %2665 = vmatprep.subr.bf16.mxu1 %v20302_v59  ;;  %v20352_v58 = vld [vmem:[%s23737_s17 + $0x5b4] ss:$48 sps:$4 sm:$0xff]   ;;  %v20354_v59 = vld [vmem:[%s23737_s17 + $0x5a0] ss:$48 sps:$4 sm:$0xff]  }
 0x302   : > { %2837 = vmatprep.subr.bf16.mxu0 %v20304_v60  ;;  %v20355_v60 = vld [vmem:[%s23737_s17 + $0x5b0] ss:$48 sps:$4 sm:$0xff]  }
 0x304   : > { %2666 = vmatpush1.bf16.msra.mxu1 %v20306_v61  ;;  %v20358_v61 = vld [vmem:[%s23737_s17 + $0x604] ss:$48 sps:$4 sm:$0xff]  }
 0x305   : > { %2838 = vmatpush1.bf16.msra.mxu0 %v20307_v62  ;;  %2667 = vmatprep.subr.bf16.mxu1 %v20308_v63  ;;  %v20361_v62 = vld [vmem:[%s23737_s17 + $0x614] ss:$48 sps:$4 sm:$0xff]  }
 0x306   : > { %2839 = vmatprep.subr.bf16.mxu0 %v20310_v0 }
 0x308   : > { %2668 = vmatpush1.bf16.msra.mxu1 %v20312_v1 }
 0x309   : > { %2840 = vmatpush1.bf16.msra.mxu0 %v20313_v2  ;;  %2669 = vmatprep.subr.bf16.mxu1 %v20314_v3 }
 0x30a   : > { %2841 = vmatprep.subr.bf16.mxu0 %v20316_v4 }
 0x30c   : > { %2670 = vmatpush1.bf16.msra.mxu1 %v20318_v31 }
 0x30d   : > { %2842 = vmatpush1.bf16.msra.mxu0 %v20319_v32  ;;  %2671 = vmatprep.subr.bf16.mxu1 %v20320_v33  ;;  %v20356_v33 = vld [vmem:[%s23737_s17 + $0x600] ss:$48 sps:$4 sm:$0xff]  }
 0x30e   : > { %2843 = vmatprep.subr.bf16.mxu0 %v20322_v34  ;;  %v20359_v34 = vld [vmem:[%s23737_s17 + $0x610] ss:$48 sps:$4 sm:$0xff]  }
 0x310   : > { %2672 = vmatpush1.bf16.msra.mxu1 %v20324_v35 }
 0x311   : > { %2844 = vmatpush1.bf16.msra.mxu0 %v20325_v36  ;;  %2673 = vmatprep.subr.bf16.mxu1 %v20326_v37  ;;  %v20364_v37 = vld [vmem:[%s23737_s17 + $0x664] ss:$48 sps:$4 sm:$0xff]  }
 0x312   : > { %2845 = vmatprep.subr.bf16.mxu0 %v20328_v38 }
 0x314   : > { %2674 = vmatpush1.bf16.msra.mxu1 %v20330_v39  ;;  %v20362_v39 = vld [vmem:[%s23737_s17 + $0x660] ss:$48 sps:$4 sm:$0xff]  }
 0x315   : > { %2846 = vmatpush1.bf16.msra.mxu0 %v20331_v40  ;;  %2675 = vmatprep.subr.bf16.mxu1 %v20332_v41  ;;  %v20365_v40 = vld [vmem:[%s23737_s17 + $0x670] ss:$48 sps:$4 sm:$0xff]   ;;  %v20370_v41 = vld [vmem:[%s23737_s17 + $0x6c4] ss:$48 sps:$4 sm:$0xff]  }
 0x316   : > { %2847 = vmatprep.subr.bf16.mxu0 %v20334_v43  ;;  %v20373_v43 = vld [vmem:[%s23737_s17 + $0x6d4] ss:$48 sps:$4 sm:$0xff]  }
 0x318   : > { %2676 = vmatpush1.bf16.msra.mxu1 %v20336_v44  ;;  %v20368_v44 = vld [vmem:[%s23737_s17 + $0x6c0] ss:$48 sps:$4 sm:$0xff]  }
 0x319   : > { %2848 = vmatpush1.bf16.msra.mxu0 %v20337_v45  ;;  %2677 = vmatprep.subr.bf16.mxu1 %v20338_v49  ;;  %v20371_v45 = vld [vmem:[%s23737_s17 + $0x6d0] ss:$48 sps:$4 sm:$0xff]   ;;  %v23246_v49 = vmov 0  }
 0x31a   : > { %2849 = vmatprep.subr.bf16.mxu0 %v20340_v50  ;;  %v20376_v50 = vld [vmem:[%s23737_s17 + $0x724] ss:$48 sps:$4 sm:$0xff]  }
 0x31c   : > { %2678 = vmatpush1.bf16.msra.mxu1 %v20342_v51  ;;  %v20379_v51 = vld [vmem:[%s23737_s17 + $0x734] ss:$48 sps:$4 sm:$0xff]  }
 0x31d   : > { %2850 = vmatpush1.bf16.msra.mxu0 %v20343_v52  ;;  %2679 = vmatprep.subr.bf16.mxu1 %v20344_v53  ;;  %v20374_v52 = vld [vmem:[%s23737_s17 + $0x720] ss:$48 sps:$4 sm:$0xff]  }
 0x31e   : > { %2851 = vmatprep.subr.bf16.mxu0 %v20346_v54  ;;  %v20377_v53 = vld [vmem:[%s23737_s17 + $0x730] ss:$48 sps:$4 sm:$0xff]   ;;  %v20382_v54 = vld [vmem:[%s23737_s17 + $0x784] ss:$48 sps:$4 sm:$0xff]  }
 0x320   : > { %2680 = vmatpush1.bf16.msra.mxu1 %v20348_v55  ;;  %v20385_v55 = vld [vmem:[%s23737_s17 + $0x794] ss:$48 sps:$4 sm:$0xff]  }
 0x321   : > { %2852 = vmatpush1.bf16.msra.mxu0 %v20349_v56  ;;  %2681 = vmatprep.subr.bf16.mxu1 %v20350_v57  ;;  %v20380_v56 = vld [vmem:[%s23737_s17 + $0x780] ss:$48 sps:$4 sm:$0xff]  }
 0x322   : > { %2853 = vmatprep.subr.bf16.mxu0 %v20352_v58  ;;  %v20383_v57 = vld [vmem:[%s23737_s17 + $0x790] ss:$48 sps:$4 sm:$0xff]   ;;  %v20388_v58 = vld [vmem:[%s23737_s17 + $0x7e4] ss:$48 sps:$4 sm:$0xff]  }
 0x324   : > { %2682 = vmatpush1.bf16.msra.mxu1 %v20354_v59  ;;  %v20391_v59 = vld [vmem:[%s23737_s17 + $0x7f4] ss:$48 sps:$4 sm:$0xff]  }
 0x325   : > { %2854 = vmatpush1.bf16.msra.mxu0 %v20355_v60  ;;  %2694 = vmatprep.subr.bf16.mxu1 %v20358_v61  ;;  %v20386_v60 = vld [vmem:[%s23737_s17 + $0x7e0] ss:$48 sps:$4 sm:$0xff]  }
 0x326   : > { %2866 = vmatprep.subr.bf16.mxu0 %v20361_v62  ;;  %v20389_v61 = vld [vmem:[%s23737_s17 + $0x7f0] ss:$48 sps:$4 sm:$0xff]   ;;  %v20394_v62 = vld [vmem:[%s23737_s17 + $0x844] ss:$48 sps:$4 sm:$0xff]  }
 0x37a   : > { %v771_v5 = vpop.xlane.xlu0 %770 }
 0x37b   : > { %v776_v7 = vmul.f32 0.0026041667, %v771_v5  ;;  %v23901_v5 = vld [vmem:[%s23898_s16] sm:$0x7] }
 0x37d   : > { %v23840_v9 = vsub.f32 %v23783_v6, %v776_v7  ;;  %v23843_v10 = vsub.f32 %v23785_v8, %v776_v7  ;;  %v23846_v11 = vsub.f32 %v23787_v13, %v776_v7 }
 0x37f   : > { %v775_v12 = vpop.xlane.xlu1 %774  ;;  %v784_v14 = vmul.f32 %v23840_v9, %v23840_v9  ;;  %v785_v15 = vmul.f32 %v23843_v10, %v23843_v10  ;;  %v786_v17 = vmul.f32 %v23846_v11, %v23846_v11 }
 0x380   : > { %v777_v16 = vmul.f32 0.0026041667, %v775_v12  ;;  %v23909_v12 = vld [vmem:[%s23906_s3] sm:$0x7] }
 0x381   : > { %v790_v18 = vadd.f32 %v785_v15, %v784_v14  ;;  %v818_v15 = vrot.slane %v23901_v5, %v23772_v47 }
 0x382   : > { %v23855_v19 = vsub.f32 %v23792_v20, %v777_v16  ;;  %v23858_v21 = vsub.f32 %v23794_v22, %v777_v16  ;;  %v23861_v23 = vsub.f32 %v23796_v24, %v777_v16 }
 0x383   : > { %v791_v25 = vadd.f32 %v790_v18, %v786_v17  ;;  %v814_v17 = vrot.slane %v23901_v5, %v23769_v46 }
 0x384   : > { %v787_v26 = vmul.f32 %v23855_v19, %v23855_v19  ;;  %v788_v27 = vmul.f32 %v23858_v21, %v23858_v21  ;;  %v789_v28 = vmul.f32 %v23861_v23, %v23861_v23 }
 0x385   : > { %792 = vadd.xlane.f32.xlu0 %v791_v25  ;;  %v840_v25 = vrot.slane %v23909_v12, %v23772_v47 }
 0x386   : > { %v794_v29 = vadd.f32 %v788_v27, %v787_v26 }
 0x388   : > { %v795_v30 = vadd.f32 %v794_v29, %v789_v28 }
 0x38a   : > { %796 = vadd.xlane.f32.xlu1 %v795_v30 }
 0x412   : > { %v793_v63 = vpop.xlane.xlu0 %792 }
 0x413   : > { %v798_v0 = vmul.f32 0.0026041667, %v793_v63  ;;  %v20397_v63 = vld [vmem:[%s23737_s17 + $0x854] ss:$48 sps:$4 sm:$0xff]  }
 0x415   : > { %v800_v1 = vadd.f32 1e-05, %v798_v0 }
 0x417   : > { %22712 = vrsqrt.f32 %v800_v1  ;;  %v797_v2 = vpop.xlane.xlu1 %796  ;;  %v20392_v1 = vld [vmem:[%s23737_s17 + $0x840] ss:$48 sps:$4 sm:$0xff]  }
 0x418   : > { %v799_v3 = vmul.f32 0.0026041667, %v797_v2  ;;  %v20395_v2 = vld [vmem:[%s23737_s17 + $0x850] ss:$48 sps:$4 sm:$0xff]  }
 0x41a   : > { %v801_v4 = vadd.f32 1e-05, %v799_v3 }
 0x41c   : > { %22714 = vrsqrt.f32 %v801_v4  ;;  %v822_v4 = vrot.slane %v23901_v5, %v23775_v48  ;;  %v20406_v5 = vld [vmem:[%s23737_s17 + $0xc] ss:$48 sps:$4 sm:$0xff]  }
 0x421   : > { %v23903_v7 = vpop.eup %22712 }
 0x422   : > { %v805_v14 = vmul.f32 %v23903_v7, %v23843_v10  ;;  %v804_v16 = vmul.f32 %v23903_v7, %v23840_v9  ;;  %v836_v10 = vrot.slane %v23909_v12, %v23769_v46  ;;  %v806_v3 = vmul.f32 %v23903_v7, %v23846_v11  ;;  %v20409_v7 = vld [vmem:[%s23737_s17 + $0x24] ss:$48 sps:$4 sm:$0xff]  }
 0x423   : > { %v844_v11 = vrot.slane %v23909_v12, %v23775_v48 }
 0x424   : > { %v827_v27 = vmul.f32 %v818_v15, %v805_v14  ;;  %v826_v28 = vmul.f32 %v814_v17, %v804_v16  ;;  %v20400_v14 = vld [vmem:[%s23737_s17 + $0x8a4] ss:$48 sps:$4 sm:$0xff]  }
 0x426   : > { %v23919_v18 = vpop.eup %22714  ;;  %v849_v31 = vadd.f32 %v840_v25, %v827_v27  ;;  %v848_v35 = vadd.f32 %v836_v10, %v826_v28  ;;  %v20407_v27 = vld [vmem:[%s23737_s17 + $0x20] ss:$48 sps:$4 sm:$0xff]   ;;  %v20415_v28 = vld [vmem:[%s23737_s17 + $0x84] ss:$48 sps:$4 sm:$0xff]  }
 0x427   : > { %v808_v26 = vmul.f32 %v23919_v18, %v23858_v21  ;;  %v807_v9 = vmul.f32 %v23919_v18, %v23855_v19  ;;  %v20367_v21 = vld [vmem:[%s23737_s17 + $0x674] ss:$48 sps:$4 sm:$0xff]   ;;  %v809_v0 = vmul.f32 %v23919_v18, %v23861_v23  ;;  %v20398_v23 = vld [vmem:[%s23737_s17 + $0x8a0] ss:$48 sps:$4 sm:$0xff]   ;;  %v828_v18 = vmul.f32 %v822_v4, %v806_v3 }
 0x428   : > { %v20461_v3 = vld [vmem:[%s23737_s17 + $0x380] ss:$48 sps:$4 sm:$0xff]  }
 0x429   : > { %v830_v29 = vmul.f32 %v818_v15, %v808_v26  ;;  %v829_v30 = vmul.f32 %v814_v17, %v807_v9  ;;  %v20403_v15 = vld [vmem:[%s23737_s17 + $0x8b4] ss:$48 sps:$4 sm:$0xff]   ;;  %v831_v16 = vmul.f32 %v822_v4, %v809_v0  ;;  %v20401_v17 = vld [vmem:[%s23737_s17 + $0x8b0] ss:$48 sps:$4 sm:$0xff]   ;;  %v850_v26 = vadd.f32 %v844_v11, %v828_v18  ;;  %v20412_v9 = vld [vmem:[%s23737_s17 + $0x6c] ss:$48 sps:$4 sm:$0xff]  }
 0x42a   : > { %v20460_v0 = vld [vmem:[%s23737_s17 + $0x36c] ss:$48 sps:$4 sm:$0xff]   ;;  %v20470_v18 = vld [vmem:[%s23737_s17 + $0x428] ss:$48 sps:$4 sm:$0xff]  }
 0x42b   : > { %v852_v32 = vadd.f32 %v840_v25, %v830_v29  ;;  %v851_v36 = vadd.f32 %v836_v10, %v829_v30  ;;  %v853_v25 = vadd.f32 %v844_v11, %v831_v16  ;;  %v20404_v10 = vld [vmem:[%s23737_s17 + $0x8] ss:$48 sps:$4 sm:$0xff]   ;;  %v20413_v30 = vld [vmem:[%s23737_s17 + $0x80] ss:$48 sps:$4 sm:$0xff]   ;;  %v20466_v4 = vld [vmem:[%s23737_s17 + $0x3cc] ss:$48 sps:$4 sm:$0xff]  }
 0x42c   : > { %v20410_v29 = vld [vmem:[%s23737_s17 + $0x68] ss:$48 sps:$4 sm:$0xff]   ;;  %v20467_v16 = vld [vmem:[%s23737_s17 + $0x3e0] ss:$48 sps:$4 sm:$0xff]  }
 0x42d   : > { %v23933_v38 = vpack.c.bf16 %v852_v32, %v849_v31  ;;  %v23935_v19 = vpack.c.bf16 %v851_v36, %v848_v35  ;;  %v23983_v12 = vpack.c.bf16 %v853_v25, %v850_v26  ;;  %v20418_v31 = vld [vmem:[%s23737_s17 + $0xcc] ss:$48 sps:$4 sm:$0xff]   ;;  %v20421_v32 = vld [vmem:[%s23737_s17 + $0xe4] ss:$48 sps:$4 sm:$0xff]   ;;  %v20473_v11 = vld [vmem:[%s23737_s17 + $0x440] ss:$48 sps:$4 sm:$0xff]  }
 0x42e   : > { %v20424_v35 = vld [vmem:[%s23737_s17 + $0x12c] ss:$48 sps:$4 sm:$0xff]   ;;  %v20427_v36 = vld [vmem:[%s23737_s17 + $0x144] ss:$48 sps:$4 sm:$0xff]   ;;  %v20476_v25 = vld [vmem:[%s23737_s17 + $0x488] ss:$48 sps:$4 sm:$0xff]  }
 0x42f   : > { %2683 = vmatprep.mubr.bf16.mxu1 %v23933_v38  ;;  %2855 = vmatprep.mubr.bf16.mxu0 %v23933_v38  ;;  %v20484_v26 = vld [vmem:[%s23737_s17 + $0x4ec] ss:$48 sps:$4 sm:$0xff]  }
 0x430   : > { %2684 = vmatmul.mubr.bf16.vlgmr.msra.gmra.mrb[0].mxu1 %v23935_v19  ;;  %2856 = vmatmul.mubr.bf16.vlgmr.msra.gmra.mrb[0].mxu0 %v23935_v19 }
 0x431   : > { %2695 = vmatpush1.bf16.msra.mxu1 %v20356_v33  ;;  %2867 = vmatpush1.bf16.msra.mxu0 %v20359_v34  ;;  %v20416_v33 = vld [vmem:[%s23737_s17 + $0xc8] ss:$48 sps:$4 sm:$0xff]   ;;  %v20419_v34 = vld [vmem:[%s23737_s17 + $0xe0] ss:$48 sps:$4 sm:$0xff]  }
 0x432   : > { %2696 = vmatprep.subr.bf16.mxu1 %v20364_v37  ;;  %2868 = vmatprep.subr.bf16.mxu0 %v20367_v21  ;;  %v20422_v37 = vld [vmem:[%s23737_s17 + $0x128] ss:$48 sps:$4 sm:$0xff]   ;;  %v20425_v21 = vld [vmem:[%s23737_s17 + $0x140] ss:$48 sps:$4 sm:$0xff]  }
 0x433   : > { %2726 = vmatprep.mubr.bf16.mxu1 %v23246_v49  ;;  %2898 = vmatprep.mubr.bf16.mxu0 %v23246_v49 }
 0x435   : > { %2697 = vmatpush1.bf16.msra.mxu1 %v20362_v39  ;;  %2869 = vmatpush1.bf16.msra.mxu0 %v20365_v40  ;;  %v20430_v39 = vld [vmem:[%s23737_s17 + $0x18c] ss:$48 sps:$4 sm:$0xff]   ;;  %v20433_v40 = vld [vmem:[%s23737_s17 + $0x1a4] ss:$48 sps:$4 sm:$0xff]  }
 0x436   : > { %2698 = vmatprep.subr.bf16.mxu1 %v20370_v41  ;;  %2870 = vmatprep.subr.bf16.mxu0 %v20373_v43  ;;  %v20428_v41 = vld [vmem:[%s23737_s17 + $0x188] ss:$48 sps:$4 sm:$0xff]   ;;  %v20431_v43 = vld [vmem:[%s23737_s17 + $0x1a0] ss:$48 sps:$4 sm:$0xff]  }
 0x439   : > { %2699 = vmatpush1.bf16.msra.mxu1 %v20368_v44  ;;  %2871 = vmatpush1.bf16.msra.mxu0 %v20371_v45  ;;  %v20436_v44 = vld [vmem:[%s23737_s17 + $0x1ec] ss:$48 sps:$4 sm:$0xff]   ;;  %v20439_v45 = vld [vmem:[%s23737_s17 + $0x204] ss:$48 sps:$4 sm:$0xff]  }
 0x43a   : > { %2700 = vmatprep.subr.bf16.mxu1 %v20376_v50  ;;  %2872 = vmatprep.subr.bf16.mxu0 %v20379_v51  ;;  %v20434_v50 = vld [vmem:[%s23737_s17 + $0x1e8] ss:$48 sps:$4 sm:$0xff]   ;;  %v20437_v51 = vld [vmem:[%s23737_s17 + $0x200] ss:$48 sps:$4 sm:$0xff]  }
 0x43d   : > { %2701 = vmatpush1.bf16.msra.mxu1 %v20374_v52  ;;  %2873 = vmatpush1.bf16.msra.mxu0 %v20377_v53  ;;  %v20442_v52 = vld [vmem:[%s23737_s17 + $0x24c] ss:$48 sps:$4 sm:$0xff]   ;;  %v20445_v53 = vld [vmem:[%s23737_s17 + $0x264] ss:$48 sps:$4 sm:$0xff]  }
 0x43e   : > { %2702 = vmatprep.subr.bf16.mxu1 %v20382_v54  ;;  %2874 = vmatprep.subr.bf16.mxu0 %v20385_v55  ;;  %v20440_v54 = vld [vmem:[%s23737_s17 + $0x248] ss:$48 sps:$4 sm:$0xff]   ;;  %v20443_v55 = vld [vmem:[%s23737_s17 + $0x260] ss:$48 sps:$4 sm:$0xff]  }
 0x441   : > { %2703 = vmatpush1.bf16.msra.mxu1 %v20380_v56  ;;  %2875 = vmatpush1.bf16.msra.mxu0 %v20383_v57  ;;  %v20448_v56 = vld [vmem:[%s23737_s17 + $0x2ac] ss:$48 sps:$4 sm:$0xff]   ;;  %v20451_v57 = vld [vmem:[%s23737_s17 + $0x2c4] ss:$48 sps:$4 sm:$0xff]  }
 0x442   : > { %2704 = vmatprep.subr.bf16.mxu1 %v20388_v58  ;;  %2876 = vmatprep.subr.bf16.mxu0 %v20391_v59  ;;  %v20446_v58 = vld [vmem:[%s23737_s17 + $0x2a8] ss:$48 sps:$4 sm:$0xff]   ;;  %v20449_v59 = vld [vmem:[%s23737_s17 + $0x2c0] ss:$48 sps:$4 sm:$0xff]  }
 0x445   : > { %2705 = vmatpush1.bf16.msra.mxu1 %v20386_v60  ;;  %2877 = vmatpush1.bf16.msra.mxu0 %v20389_v61  ;;  %v20454_v60 = vld [vmem:[%s23737_s17 + $0x30c] ss:$48 sps:$4 sm:$0xff]   ;;  %v20457_v61 = vld [vmem:[%s23737_s17 + $0x324] ss:$48 sps:$4 sm:$0xff]  }
 0x446   : > { %2706 = vmatprep.subr.bf16.mxu1 %v20394_v62  ;;  %2878 = vmatprep.subr.bf16.mxu0 %v20397_v63  ;;  %v20452_v62 = vld [vmem:[%s23737_s17 + $0x308] ss:$48 sps:$4 sm:$0xff]   ;;  %v20455_v63 = vld [vmem:[%s23737_s17 + $0x320] ss:$48 sps:$4 sm:$0xff]  }
 0x449   : > { %2707 = vmatpush1.bf16.msra.mxu1 %v20392_v1  ;;  %2879 = vmatpush1.bf16.msra.mxu0 %v20395_v2  ;;  %v20463_v1 = vld [vmem:[%s23737_s17 + $0x384] ss:$48 sps:$4 sm:$0xff]   ;;  %v20458_v2 = vld [vmem:[%s23737_s17 + $0x368] ss:$48 sps:$4 sm:$0xff]  }
 0x44a   : > { %2708 = vmatprep.subr.bf16.mxu1 %v20400_v14  ;;  %2880 = vmatprep.subr.bf16.mxu0 %v20403_v15  ;;  %v20469_v14 = vld [vmem:[%s23737_s17 + $0x3e4] ss:$48 sps:$4 sm:$0xff]   ;;  %v20464_v15 = vld [vmem:[%s23737_s17 + $0x3c8] ss:$48 sps:$4 sm:$0xff]  }
 0x44d   : > { %2709 = vmatpush1.bf16.msra.mxu1 %v20398_v23  ;;  %2881 = vmatpush1.bf16.msra.mxu0 %v20401_v17  ;;  %v20472_v23 = vld [vmem:[%s23737_s17 + $0x42c] ss:$48 sps:$4 sm:$0xff]   ;;  %v20475_v17 = vld [vmem:[%s23737_s17 + $0x444] ss:$48 sps:$4 sm:$0xff]  }
 0x44e   : > { %2737 = vmatprep.subr.bf16.mxu1 %v20406_v5  ;;  %2995 = vmatprep.subr.bf16.mxu0 %v20409_v7  ;;  %v20478_v5 = vld [vmem:[%s23737_s17 + $0x48c] ss:$48 sps:$4 sm:$0xff]   ;;  %v20481_v7 = vld [vmem:[%s23737_s17 + $0x4a4] ss:$48 sps:$4 sm:$0xff]  }
 0x450   : > { %2727 = vmatmul.mubr.bf16.vlgmr.msra.gmra.mrb[0].mxu1 %v23983_v12  ;;  %2899 = vmatmul.mubr.bf16.vlgmr.msra.gmra.mrb[0].mxu0 %v23983_v12 }
 0x451   : > { %2738 = vmatpush1.bf16.msra.mxu1 %v20404_v10  ;;  %2769 = vmatprep.mubr.bf16.mxu1 %v23933_v38  ;;  %v20479_v10 = vld [vmem:[%s23737_s17 + $0x4a0] ss:$48 sps:$4 sm:$0xff]  }
 0x452   : > { %2996 = vmatpush1.bf16.msra.mxu0 %v20407_v27  ;;  %3027 = vmatprep.mubr.bf16.mxu0 %v23933_v38  ;;  %v20487_v27 = vld [vmem:[%s23737_s17 + $0x504] ss:$48 sps:$4 sm:$0xff]  }
 0x453   : > { %2739 = vmatprep.subr.bf16.mxu1 %v20412_v9  ;;  %2997 = vmatprep.subr.bf16.mxu0 %v20415_v28  ;;  %v20482_v9 = vld [vmem:[%s23737_s17 + $0x4e8] ss:$48 sps:$4 sm:$0xff]   ;;  %v20485_v28 = vld [vmem:[%s23737_s17 + $0x500] ss:$48 sps:$4 sm:$0xff]  }
 0x455   : > { %2740 = vmatpush1.bf16.msra.mxu1 %v20410_v29  ;;  %v20490_v29 = vld [vmem:[%s23737_s17 + $0x54c] ss:$48 sps:$4 sm:$0xff]  }
 0x456   : > { %2998 = vmatpush1.bf16.msra.mxu0 %v20413_v30  ;;  %2741 = vmatprep.subr.bf16.mxu1 %v20418_v31  ;;  %v20493_v30 = vld [vmem:[%s23737_s17 + $0x564] ss:$48 sps:$4 sm:$0xff]   ;;  %v20488_v31 = vld [vmem:[%s23737_s17 + $0x548] ss:$48 sps:$4 sm:$0xff]  }
 0x457   : > { %2999 = vmatprep.subr.bf16.mxu0 %v20421_v32  ;;  %v20491_v32 = vld [vmem:[%s23737_s17 + $0x560] ss:$48 sps:$4 sm:$0xff]  }
 0x459   : > { %2742 = vmatpush1.bf16.msra.mxu1 %v20416_v33  ;;  %v20496_v33 = vld [vmem:[%s23737_s17 + $0x5ac] ss:$48 sps:$4 sm:$0xff]  }
 0x45a   : > { %3000 = vmatpush1.bf16.msra.mxu0 %v20419_v34  ;;  %2743 = vmatprep.subr.bf16.mxu1 %v20424_v35  ;;  %v20499_v34 = vld [vmem:[%s23737_s17 + $0x5c4] ss:$48 sps:$4 sm:$0xff]   ;;  %v20494_v35 = vld [vmem:[%s23737_s17 + $0x5a8] ss:$48 sps:$4 sm:$0xff]  }
 0x45b   : > { %3001 = vmatprep.subr.bf16.mxu0 %v20427_v36  ;;  %v20497_v36 = vld [vmem:[%s23737_s17 + $0x5c0] ss:$48 sps:$4 sm:$0xff]  }
 0x45d   : > { %2744 = vmatpush1.bf16.msra.mxu1 %v20422_v37  ;;  %v20502_v37 = vld [vmem:[%s23737_s17 + $0x60c] ss:$48 sps:$4 sm:$0xff]  }
 0x45e   : > { %3002 = vmatpush1.bf16.msra.mxu0 %v20425_v21  ;;  %2745 = vmatprep.subr.bf16.mxu1 %v20430_v39  ;;  %v20505_v21 = vld [vmem:[%s23737_s17 + $0x624] ss:$48 sps:$4 sm:$0xff]   ;;  %v20500_v39 = vld [vmem:[%s23737_s17 + $0x608] ss:$48 sps:$4 sm:$0xff]  }
 0x45f   : > { %3003 = vmatprep.subr.bf16.mxu0 %v20433_v40  ;;  %v20503_v40 = vld [vmem:[%s23737_s17 + $0x620] ss:$48 sps:$4 sm:$0xff]  }
 0x461   : > { %2746 = vmatpush1.bf16.msra.mxu1 %v20428_v41  ;;  %v20508_v41 = vld [vmem:[%s23737_s17 + $0x66c] ss:$48 sps:$4 sm:$0xff]  }
 0x462   : > { %3004 = vmatpush1.bf16.msra.mxu0 %v20431_v43  ;;  %2747 = vmatprep.subr.bf16.mxu1 %v20436_v44  ;;  %v20511_v43 = vld [vmem:[%s23737_s17 + $0x684] ss:$48 sps:$4 sm:$0xff]   ;;  %v20506_v44 = vld [vmem:[%s23737_s17 + $0x668] ss:$48 sps:$4 sm:$0xff]  }
 0x463   : > { %3005 = vmatprep.subr.bf16.mxu0 %v20439_v45  ;;  %v20509_v45 = vld [vmem:[%s23737_s17 + $0x680] ss:$48 sps:$4 sm:$0xff]  }
 0x465   : > { %2748 = vmatpush1.bf16.msra.mxu1 %v20434_v50  ;;  %v20514_v50 = vld [vmem:[%s23737_s17 + $0x6cc] ss:$48 sps:$4 sm:$0xff]  }
 0x466   : > { %3006 = vmatpush1.bf16.msra.mxu0 %v20437_v51  ;;  %2749 = vmatprep.subr.bf16.mxu1 %v20442_v52  ;;  %v20517_v51 = vld [vmem:[%s23737_s17 + $0x6e4] ss:$48 sps:$4 sm:$0xff]   ;;  %v20512_v52 = vld [vmem:[%s23737_s17 + $0x6c8] ss:$48 sps:$4 sm:$0xff]  }
 0x467   : > { %3007 = vmatprep.subr.bf16.mxu0 %v20445_v53  ;;  %v20515_v53 = vld [vmem:[%s23737_s17 + $0x6e0] ss:$48 sps:$4 sm:$0xff]  }
 0x469   : > { %2750 = vmatpush1.bf16.msra.mxu1 %v20440_v54  ;;  %v20520_v54 = vld [vmem:[%s23737_s17 + $0x72c] ss:$48 sps:$4 sm:$0xff]  }
 0x46a   : > { %3008 = vmatpush1.bf16.msra.mxu0 %v20443_v55  ;;  %2751 = vmatprep.subr.bf16.mxu1 %v20448_v56  ;;  %v20523_v55 = vld [vmem:[%s23737_s17 + $0x744] ss:$48 sps:$4 sm:$0xff]   ;;  %v20518_v56 = vld [vmem:[%s23737_s17 + $0x728] ss:$48 sps:$4 sm:$0xff]  }
 0x46b   : > { %3009 = vmatprep.subr.bf16.mxu0 %v20451_v57  ;;  %v20521_v57 = vld [vmem:[%s23737_s17 + $0x740] ss:$48 sps:$4 sm:$0xff]  }
 0x46d   : > { %2752 = vmatpush1.bf16.msra.mxu1 %v20446_v58  ;;  %v20526_v58 = vld [vmem:[%s23737_s17 + $0x78c] ss:$48 sps:$4 sm:$0xff]  }
 0x46e   : > { %3010 = vmatpush1.bf16.msra.mxu0 %v20449_v59  ;;  %2753 = vmatprep.subr.bf16.mxu1 %v20454_v60  ;;  %v20529_v59 = vld [vmem:[%s23737_s17 + $0x7a4] ss:$48 sps:$4 sm:$0xff]   ;;  %v20524_v60 = vld [vmem:[%s23737_s17 + $0x788] ss:$48 sps:$4 sm:$0xff]  }
 0x46f   : > { %3011 = vmatprep.subr.bf16.mxu0 %v20457_v61  ;;  %v20527_v61 = vld [vmem:[%s23737_s17 + $0x7a0] ss:$48 sps:$4 sm:$0xff]  }
 0x471   : > { %2754 = vmatpush1.bf16.msra.mxu1 %v20452_v62  ;;  %v20532_v62 = vld [vmem:[%s23737_s17 + $0x7ec] ss:$48 sps:$4 sm:$0xff]  }
 0x472   : > { %3012 = vmatpush1.bf16.msra.mxu0 %v20455_v63  ;;  %2755 = vmatprep.subr.bf16.mxu1 %v20460_v0  ;;  %v20535_v63 = vld [vmem:[%s23737_s17 + $0x804] ss:$48 sps:$4 sm:$0xff]   ;;  %v20530_v0 = vld [vmem:[%s23737_s17 + $0x7e8] ss:$48 sps:$4 sm:$0xff]  }
 0x473   : > { %3013 = vmatprep.subr.bf16.mxu0 %v20463_v1  ;;  %v20533_v1 = vld [vmem:[%s23737_s17 + $0x800] ss:$48 sps:$4 sm:$0xff]  }
 0x475   : > { %2756 = vmatpush1.bf16.msra.mxu1 %v20458_v2  ;;  %v20538_v2 = vld [vmem:[%s23737_s17 + $0x84c] ss:$48 sps:$4 sm:$0xff]  }
 0x476   : > { %3014 = vmatpush1.bf16.msra.mxu0 %v20461_v3  ;;  %2757 = vmatprep.subr.bf16.mxu1 %v20466_v4  ;;  %v20541_v3 = vld [vmem:[%s23737_s17 + $0x864] ss:$48 sps:$4 sm:$0xff]   ;;  %v20536_v4 = vld [vmem:[%s23737_s17 + $0x848] ss:$48 sps:$4 sm:$0xff]  }
 0x477   : > { %3015 = vmatprep.subr.bf16.mxu0 %v20469_v14  ;;  %v20539_v14 = vld [vmem:[%s23737_s17 + $0x860] ss:$48 sps:$4 sm:$0xff]  }
 0x479   : > { %2758 = vmatpush1.bf16.msra.mxu1 %v20464_v15  ;;  %v20544_v15 = vld [vmem:[%s23737_s17 + $0x8ac] ss:$48 sps:$4 sm:$0xff]  }
 0x47a   : > { %3016 = vmatpush1.bf16.msra.mxu0 %v20467_v16  ;;  %2759 = vmatprep.subr.bf16.mxu1 %v20472_v23  ;;  %v20547_v16 = vld [vmem:[%s23737_s17 + $0x8c4] ss:$48 sps:$4 sm:$0xff]   ;;  %v20542_v23 = vld [vmem:[%s23737_s17 + $0x8a8] ss:$48 sps:$4 sm:$0xff]  }
 0x47b   : > { %3017 = vmatprep.subr.bf16.mxu0 %v20475_v17  ;;  %v20545_v17 = vld [vmem:[%s23737_s17 + $0x8c0] ss:$48 sps:$4 sm:$0xff]  }
 0x47d   : > { %2760 = vmatpush1.bf16.msra.mxu1 %v20470_v18  ;;  %v20550_v18 = vld [vmem:[%s23737_s17 + $0x1c] ss:$48 sps:$4 sm:$0xff]  }
 0x47e   : > { %3018 = vmatpush1.bf16.msra.mxu0 %v20473_v11  ;;  %2761 = vmatprep.subr.bf16.mxu1 %v20478_v5  ;;  %v20598_v11 = vld [vmem:[%s23743_s13 + $0x4] ss:$12 sps:$4 sm:$0xff]   ;;  %v20548_v5 = vld [vmem:[%s23737_s17 + $0x18] ss:$48 sps:$4 sm:$0xff]  }
 0x47f   : > { %3019 = vmatprep.subr.bf16.mxu0 %v20481_v7  ;;  %v20553_v7 = vld [vmem:[%s23737_s17 + $0x7c] ss:$48 sps:$4 sm:$0xff]  }
 0x481   : > { %2762 = vmatpush1.bf16.msra.mxu1 %v20476_v25  ;;  %v20596_v25 = vld [vmem:[%s23743_s13] ss:$12 sps:$4 sm:$0xff]  }
 0x482   : > { %3020 = vmatpush1.bf16.msra.mxu0 %v20479_v10  ;;  %2763 = vmatprep.subr.bf16.mxu1 %v20484_v26  ;;  %v20604_v10 = vld [vmem:[%s23743_s13 + $0x1c] ss:$12 sps:$4 sm:$0xff]  }
 0x483   : > { %3021 = vmatprep.subr.bf16.mxu0 %v20487_v27  ;;  %v20551_v26 = vld [vmem:[%s23737_s17 + $0x78] ss:$48 sps:$4 sm:$0xff]   ;;  %v20556_v27 = vld [vmem:[%s23737_s17 + $0xdc] ss:$48 sps:$4 sm:$0xff]  }
 0x485   : > { %2764 = vmatpush1.bf16.msra.mxu1 %v20482_v9  ;;  %v20602_v9 = vld [vmem:[%s23743_s13 + $0x18] ss:$12 sps:$4 sm:$0xff]  }
 0x486   : > { %3022 = vmatpush1.bf16.msra.mxu0 %v20485_v28  ;;  %2765 = vmatprep.subr.bf16.mxu1 %v20490_v29  ;;  %v20610_v28 = vld [vmem:[%s23743_s13 + $0x34] ss:$12 sps:$4 sm:$0xff]   ;;  %v20554_v29 = vld [vmem:[%s23737_s17 + $0xd8] ss:$48 sps:$4 sm:$0xff]  }
 0x487   : > { %3023 = vmatprep.subr.bf16.mxu0 %v20493_v30  ;;  %v20559_v30 = vld [vmem:[%s23737_s17 + $0x13c] ss:$48 sps:$4 sm:$0xff]  }
 0x489   : > { %2766 = vmatpush1.bf16.msra.mxu1 %v20488_v31  ;;  %v20608_v31 = vld [vmem:[%s23743_s13 + $0x30] ss:$12 sps:$4 sm:$0xff]  }
 0x48a   : > { %3024 = vmatpush1.bf16.msra.mxu0 %v20491_v32  ;;  %2767 = vmatprep.subr.bf16.mxu1 %v20496_v33  ;;  %v20616_v32 = vld [vmem:[%s23743_s13 + $0x4c] ss:$12 sps:$4 sm:$0xff]  }
 0x48b   : > { %3025 = vmatprep.subr.bf16.mxu0 %v20499_v34  ;;  %v20557_v33 = vld [vmem:[%s23737_s17 + $0x138] ss:$48 sps:$4 sm:$0xff]   ;;  %v20562_v34 = vld [vmem:[%s23737_s17 + $0x19c] ss:$48 sps:$4 sm:$0xff]  }
 0x48d   : > { %2768 = vmatpush1.bf16.msra.mxu1 %v20494_v35  ;;  %v20614_v35 = vld [vmem:[%s23743_s13 + $0x48] ss:$12 sps:$4 sm:$0xff]  }
 0x48e   : > { %3026 = vmatpush1.bf16.msra.mxu0 %v20497_v36  ;;  %2780 = vmatprep.subr.bf16.mxu1 %v20502_v37  ;;  %v20622_v36 = vld [vmem:[%s23743_s13 + $0x64] ss:$12 sps:$4 sm:$0xff]   ;;  %v20560_v37 = vld [vmem:[%s23737_s17 + $0x198] ss:$48 sps:$4 sm:$0xff]  }
 0x48f   : > { %3038 = vmatprep.subr.bf16.mxu0 %v20505_v21  ;;  %v20565_v21 = vld [vmem:[%s23737_s17 + $0x1fc] ss:$48 sps:$4 sm:$0xff]  }
 0x490   : > { %2770 = vmatmul.mubr.bf16.vlgmr.msra.gmra.mrb[4].mxu1 %v23935_v19 }
 0x491   : > { %3028 = vmatmul.mubr.bf16.vlgmr.msra.gmra.mrb[4].mxu0 %v23935_v19  ;;  %2781 = vmatpush1.bf16.msra.mxu1 %v20500_v39  ;;  %v20620_v39 = vld [vmem:[%s23743_s13 + $0x60] ss:$12 sps:$4 sm:$0xff]  }
 0x492   : > { %3039 = vmatpush1.bf16.msra.mxu0 %v20503_v40  ;;  %2782 = vmatprep.subr.bf16.mxu1 %v20508_v41  ;;  %v20628_v40 = vld [vmem:[%s23743_s13 + $0x7c] ss:$12 sps:$4 sm:$0xff]  }
 0x493   : > { %3040 = vmatprep.subr.bf16.mxu0 %v20511_v43  ;;  %2812 = vmatprep.mubr.bf16.mxu1 %v23246_v49  ;;  %v20563_v41 = vld [vmem:[%s23737_s17 + $0x1f8] ss:$48 sps:$4 sm:$0xff]   ;;  %v20568_v43 = vld [vmem:[%s23737_s17 + $0x25c] ss:$48 sps:$4 sm:$0xff]  }
 0x494   : > { %3070 = vmatprep.mubr.bf16.mxu0 %v23246_v49 }
 0x495   : > { %2783 = vmatpush1.bf16.msra.mxu1 %v20506_v44  ;;  %v20626_v44 = vld [vmem:[%s23743_s13 + $0x78] ss:$12 sps:$4 sm:$0xff]  }
 0x496   : > { %3041 = vmatpush1.bf16.msra.mxu0 %v20509_v45  ;;  %2784 = vmatprep.subr.bf16.mxu1 %v20514_v50  ;;  %v20634_v45 = vld [vmem:[%s23743_s13 + $0x94] ss:$12 sps:$4 sm:$0xff]   ;;  %v20566_v50 = vld [vmem:[%s23737_s17 + $0x258] ss:$48 sps:$4 sm:$0xff]  }
 0x497   : > { %3042 = vmatprep.subr.bf16.mxu0 %v20517_v51  ;;  %v20571_v51 = vld [vmem:[%s23737_s17 + $0x2bc] ss:$48 sps:$4 sm:$0xff]  }
 0x499   : > { %2785 = vmatpush1.bf16.msra.mxu1 %v20512_v52  ;;  %v20632_v52 = vld [vmem:[%s23743_s13 + $0x90] ss:$12 sps:$4 sm:$0xff]  }
 0x49a   : > { %3043 = vmatpush1.bf16.msra.mxu0 %v20515_v53  ;;  %2786 = vmatprep.subr.bf16.mxu1 %v20520_v54  ;;  %v20640_v53 = vld [vmem:[%s23743_s13 + $0xac] ss:$12 sps:$4 sm:$0xff]  }
 0x49b   : > { %3044 = vmatprep.subr.bf16.mxu0 %v20523_v55  ;;  %v20569_v54 = vld [vmem:[%s23737_s17 + $0x2b8] ss:$48 sps:$4 sm:$0xff]   ;;  %v20574_v55 = vld [vmem:[%s23737_s17 + $0x31c] ss:$48 sps:$4 sm:$0xff]  }
 0x49d   : > { %2787 = vmatpush1.bf16.msra.mxu1 %v20518_v56  ;;  %v20638_v56 = vld [vmem:[%s23743_s13 + $0xa8] ss:$12 sps:$4 sm:$0xff]  }
 0x49e   : > { %3045 = vmatpush1.bf16.msra.mxu0 %v20521_v57  ;;  %2788 = vmatprep.subr.bf16.mxu1 %v20526_v58  ;;  %v20646_v57 = vld [vmem:[%s23743_s13 + $0xc4] ss:$12 sps:$4 sm:$0xff]   ;;  %v20572_v58 = vld [vmem:[%s23737_s17 + $0x318] ss:$48 sps:$4 sm:$0xff]  }
 0x49f   : > { %3046 = vmatprep.subr.bf16.mxu0 %v20529_v59  ;;  %v20577_v59 = vld [vmem:[%s23737_s17 + $0x37c] ss:$48 sps:$4 sm:$0xff]  }
 0x4a1   : > { %2789 = vmatpush1.bf16.msra.mxu1 %v20524_v60  ;;  %v20644_v60 = vld [vmem:[%s23743_s13 + $0xc0] ss:$12 sps:$4 sm:$0xff]  }
 0x4a2   : > { %3047 = vmatpush1.bf16.msra.mxu0 %v20527_v61  ;;  %2790 = vmatprep.subr.bf16.mxu1 %v20532_v62  ;;  %v20652_v61 = vld [vmem:[%s23743_s13 + $0xdc] ss:$12 sps:$4 sm:$0xff]  }
 0x4a3   : > { %3048 = vmatprep.subr.bf16.mxu0 %v20535_v63  ;;  %v20575_v62 = vld [vmem:[%s23737_s17 + $0x378] ss:$48 sps:$4 sm:$0xff]   ;;  %v20580_v63 = vld [vmem:[%s23737_s17 + $0x3dc] ss:$48 sps:$4 sm:$0xff]  }
 0x4a5   : > { %2791 = vmatpush1.bf16.msra.mxu1 %v20530_v0  ;;  %v20650_v0 = vld [vmem:[%s23743_s13 + $0xd8] ss:$12 sps:$4 sm:$0xff]  }
 0x4a6   : > { %3049 = vmatpush1.bf16.msra.mxu0 %v20533_v1  ;;  %2792 = vmatprep.subr.bf16.mxu1 %v20538_v2  ;;  %v20658_v1 = vld [vmem:[%s23743_s13 + $0xf4] ss:$12 sps:$4 sm:$0xff]   ;;  %v20578_v2 = vld [vmem:[%s23737_s17 + $0x3d8] ss:$48 sps:$4 sm:$0xff]  }
 0x4a7   : > { %3050 = vmatprep.subr.bf16.mxu0 %v20541_v3  ;;  %v20583_v3 = vld [vmem:[%s23737_s17 + $0x43c] ss:$48 sps:$4 sm:$0xff]  }
 0x4a9   : > { %2793 = vmatpush1.bf16.msra.mxu1 %v20536_v4  ;;  %v20656_v4 = vld [vmem:[%s23743_s13 + $0xf0] ss:$12 sps:$4 sm:$0xff]  }
 0x4aa   : > { %3051 = vmatpush1.bf16.msra.mxu0 %v20539_v14  ;;  %2794 = vmatprep.subr.bf16.mxu1 %v20544_v15  ;;  %v20664_v14 = vld [vmem:[%s23743_s13 + $0x10c] ss:$12 sps:$4 sm:$0xff]  }
 0x4ab   : > { %3052 = vmatprep.subr.bf16.mxu0 %v20547_v16  ;;  %v20581_v15 = vld [vmem:[%s23737_s17 + $0x438] ss:$48 sps:$4 sm:$0xff]   ;;  %v20586_v16 = vld [vmem:[%s23737_s17 + $0x49c] ss:$48 sps:$4 sm:$0xff]  }
 0x4ad   : > { %2795 = vmatpush1.bf16.msra.mxu1 %v20542_v23  ;;  %v20662_v23 = vld [vmem:[%s23743_s13 + $0x108] ss:$12 sps:$4 sm:$0xff]  }
 0x4ae   : > { %3053 = vmatpush1.bf16.msra.mxu0 %v20545_v17  ;;  %2909 = vmatprep.subr.bf16.mxu1 %v20550_v18  ;;  %v20670_v17 = vld [vmem:[%s23743_s13 + $0x124] ss:$12 sps:$4 sm:$0xff]   ;;  %v20584_v18 = vld [vmem:[%s23737_s17 + $0x498] ss:$48 sps:$4 sm:$0xff]  }
 0x4af   : > { %5141 = vmatprep.subr.bf16.mxu0 %v20598_v11  ;;  %v20589_v11 = vld [vmem:[%s23737_s17 + $0x4fc] ss:$48 sps:$4 sm:$0xff]  }
 0x4b0   : > { %2813 = vmatmul.mubr.bf16.vlgmr.msra.gmra.mrb[4].mxu1 %v23983_v12 }
 0x4b1   : > { %3071 = vmatmul.mubr.bf16.vlgmr.msra.gmra.mrb[4].mxu0 %v23983_v12  ;;  %2910 = vmatpush1.bf16.msra.mxu1 %v20548_v5  ;;  %v20668_v5 = vld [vmem:[%s23743_s13 + $0x120] ss:$12 sps:$4 sm:$0xff]  }
 0x4b2   : > { %2941 = vmatprep.mubr.bf16.mxu1 %v23933_v38  ;;  %2911 = vmatprep.subr.bf16.mxu1 %v20553_v7  ;;  %v20676_v7 = vld [vmem:[%s23743_s13 + $0x13c] ss:$12 sps:$4 sm:$0xff]  }
 0x4b3   : > { %5142 = vmatpush1.bf16.msra.mxu0 %v20596_v25  ;;  %v20587_v25 = vld [vmem:[%s23737_s17 + $0x4f8] ss:$48 sps:$4 sm:$0xff]  }
 0x4b4   : > { %5143 = vmatprep.subr.bf16.mxu0 %v20604_v10  ;;  %v20592_v10 = vld [vmem:[%s23737_s17 + $0x55c] ss:$48 sps:$4 sm:$0xff]  }
 0x4b5   : > { %2912 = vmatpush1.bf16.msra.mxu1 %v20551_v26  ;;  %v20674_v26 = vld [vmem:[%s23743_s13 + $0x138] ss:$12 sps:$4 sm:$0xff]  }
 0x4b6   : > { %2913 = vmatprep.subr.bf16.mxu1 %v20556_v27  ;;  %v20682_v27 = vld [vmem:[%s23743_s13 + $0x154] ss:$12 sps:$4 sm:$0xff]  }
 0x4b7   : > { %5144 = vmatpush1.bf16.msra.mxu0 %v20602_v9  ;;  %v20590_v9 = vld [vmem:[%s23737_s17 + $0x558] ss:$48 sps:$4 sm:$0xff]  }
 0x4b8   : > { %5145 = vmatprep.subr.bf16.mxu0 %v20610_v28  ;;  %v20595_v28 = vld [vmem:[%s23737_s17 + $0x5bc] ss:$48 sps:$4 sm:$0xff]  }
 0x4b9   : > { %2914 = vmatpush1.bf16.msra.mxu1 %v20554_v29  ;;  %v20680_v29 = vld [vmem:[%s23743_s13 + $0x150] ss:$12 sps:$4 sm:$0xff]  }
 0x4ba   : > { %2915 = vmatprep.subr.bf16.mxu1 %v20559_v30  ;;  %v20688_v30 = vld [vmem:[%s23743_s13 + $0x16c] ss:$12 sps:$4 sm:$0xff]  }
 0x4bb   : > { %5146 = vmatpush1.bf16.msra.mxu0 %v20608_v31  ;;  %v20593_v31 = vld [vmem:[%s23737_s17 + $0x5b8] ss:$48 sps:$4 sm:$0xff]  }
 0x4bc   : > { %5147 = vmatprep.subr.bf16.mxu0 %v20616_v32  ;;  %v20601_v32 = vld [vmem:[%s23737_s17 + $0x61c] ss:$48 sps:$4 sm:$0xff]  }
 0x4bd   : > { %2916 = vmatpush1.bf16.msra.mxu1 %v20557_v33  ;;  %v20686_v33 = vld [vmem:[%s23743_s13 + $0x168] ss:$12 sps:$4 sm:$0xff]  }
 0x4be   : > { %2917 = vmatprep.subr.bf16.mxu1 %v20562_v34  ;;  %v20718_v34 = vld [vmem:[%s23743_s13 + $0x184] ss:$12 sps:$4 sm:$0xff]  }
 0x4bf   : > { %5148 = vmatpush1.bf16.msra.mxu0 %v20614_v35  ;;  %v20599_v35 = vld [vmem:[%s23737_s17 + $0x618] ss:$48 sps:$4 sm:$0xff]  }
 0x4c0   : > { %5149 = vmatprep.subr.bf16.mxu0 %v20622_v36  ;;  %v20607_v36 = vld [vmem:[%s23737_s17 + $0x67c] ss:$48 sps:$4 sm:$0xff]  }
 0x4c1   : > { %2918 = vmatpush1.bf16.msra.mxu1 %v20560_v37  ;;  %v20605_v37 = vld [vmem:[%s23737_s17 + $0x678] ss:$48 sps:$4 sm:$0xff]  }
 0x4c2   : > { %2919 = vmatprep.subr.bf16.mxu1 %v20565_v21  ;;  %v20613_v21 = vld [vmem:[%s23737_s17 + $0x6dc] ss:$48 sps:$4 sm:$0xff]  }
 0x4c3   : > { %5150 = vmatpush1.bf16.msra.mxu0 %v20620_v39  ;;  %v20611_v39 = vld [vmem:[%s23737_s17 + $0x6d8] ss:$48 sps:$4 sm:$0xff]  }
 0x4c4   : > { %5151 = vmatprep.subr.bf16.mxu0 %v20628_v40  ;;  %v20619_v40 = vld [vmem:[%s23737_s17 + $0x73c] ss:$48 sps:$4 sm:$0xff]  }
 0x4c5   : > { %2920 = vmatpush1.bf16.msra.mxu1 %v20563_v41  ;;  %v20617_v41 = vld [vmem:[%s23737_s17 + $0x738] ss:$48 sps:$4 sm:$0xff]  }
 0x4c6   : > { %2921 = vmatprep.subr.bf16.mxu1 %v20568_v43  ;;  %v20625_v43 = vld [vmem:[%s23737_s17 + $0x79c] ss:$48 sps:$4 sm:$0xff]  }
 0x4c7   : > { %5152 = vmatpush1.bf16.msra.mxu0 %v20626_v44  ;;  %v20623_v44 = vld [vmem:[%s23737_s17 + $0x798] ss:$48 sps:$4 sm:$0xff]  }
 0x4c8   : > { %5153 = vmatprep.subr.bf16.mxu0 %v20634_v45  ;;  %v20631_v45 = vld [vmem:[%s23737_s17 + $0x7fc] ss:$48 sps:$4 sm:$0xff]  }
 0x4c9   : > { %2922 = vmatpush1.bf16.msra.mxu1 %v20566_v50  ;;  %v20629_v50 = vld [vmem:[%s23737_s17 + $0x7f8] ss:$48 sps:$4 sm:$0xff]  }
 0x4ca   : > { %2923 = vmatprep.subr.bf16.mxu1 %v20571_v51  ;;  %v20637_v51 = vld [vmem:[%s23737_s17 + $0x85c] ss:$48 sps:$4 sm:$0xff]  }
 0x4cb   : > { %5154 = vmatpush1.bf16.msra.mxu0 %v20632_v52  ;;  %v20635_v52 = vld [vmem:[%s23737_s17 + $0x858] ss:$48 sps:$4 sm:$0xff]  }
 0x4cc   : > { %5155 = vmatprep.subr.bf16.mxu0 %v20640_v53  ;;  %v20643_v53 = vld [vmem:[%s23737_s17 + $0x8bc] ss:$48 sps:$4 sm:$0xff]  }
 0x4cd   : > { %2924 = vmatpush1.bf16.msra.mxu1 %v20569_v54  ;;  %v20641_v54 = vld [vmem:[%s23737_s17 + $0x8b8] ss:$48 sps:$4 sm:$0xff]  }
 0x4ce   : > { %2925 = vmatprep.subr.bf16.mxu1 %v20574_v55  ;;  %v20649_v55 = vld [vmem:[%s23737_s17 + $0x2c] ss:$48 sps:$4 sm:$0xff]  }
 0x4cf   : > { %5156 = vmatpush1.bf16.msra.mxu0 %v20638_v56  ;;  %v20647_v56 = vld [vmem:[%s23737_s17 + $0x28] ss:$48 sps:$4 sm:$0xff]  }
 0x4d0   : > { %5157 = vmatprep.subr.bf16.mxu0 %v20646_v57  ;;  %v20655_v57 = vld [vmem:[%s23737_s17 + $0x8c] ss:$48 sps:$4 sm:$0xff]  }
 0x4d1   : > { %2926 = vmatpush1.bf16.msra.mxu1 %v20572_v58  ;;  %v20653_v58 = vld [vmem:[%s23737_s17 + $0x88] ss:$48 sps:$4 sm:$0xff]  }
 0x4d2   : > { %2927 = vmatprep.subr.bf16.mxu1 %v20577_v59  ;;  %v20661_v59 = vld [vmem:[%s23737_s17 + $0xec] ss:$48 sps:$4 sm:$0xff]  }
 0x4d3   : > { %5158 = vmatpush1.bf16.msra.mxu0 %v20644_v60  ;;  %v20659_v60 = vld [vmem:[%s23737_s17 + $0xe8] ss:$48 sps:$4 sm:$0xff]  }
 0x4d4   : > { %5159 = vmatprep.subr.bf16.mxu0 %v20652_v61  ;;  %v20667_v61 = vld [vmem:[%s23737_s17 + $0x14c] ss:$48 sps:$4 sm:$0xff]  }
 0x4d5   : > { %2928 = vmatpush1.bf16.msra.mxu1 %v20575_v62  ;;  %v20665_v62 = vld [vmem:[%s23737_s17 + $0x148] ss:$48 sps:$4 sm:$0xff]  }
 0x4d6   : > { %2929 = vmatprep.subr.bf16.mxu1 %v20580_v63  ;;  %v20673_v63 = vld [vmem:[%s23737_s17 + $0x1ac] ss:$48 sps:$4 sm:$0xff]  }
 0x4d7   : > { %5160 = vmatpush1.bf16.msra.mxu0 %v20650_v0  ;;  %v24182_v0 = vsub.s32 4, %v23758_v42 }
 0x4d8   : > { %5161 = vmatprep.subr.bf16.mxu0 %v20658_v1  ;;  %v24188_v1 = vld [vmem:[%s24185_s7] sm:$0xff] }
 0x4d9   : > { %2930 = vmatpush1.bf16.msra.mxu1 %v20578_v2  ;;  %v24191_v2 = vsub.s32 5, %v23758_v42 }
 0x4da   : > { %2931 = vmatprep.subr.bf16.mxu1 %v20583_v3  ;;  %v20679_v3 = vld [vmem:[%s23737_s17 + $0x20c] ss:$48 sps:$4 sm:$0xff]  }
 0x4db   : > { %5162 = vmatpush1.bf16.msra.mxu0 %v20656_v4  ;;  %v1154_v4 = vrot.slane %v24188_v1, %v23769_v46 }
 0x4dc   : > { %5163 = vmatprep.subr.bf16.mxu0 %v20664_v14  ;;  %v1170_v14 = vrot.slane %v24188_v1, %v24182_v0 }
 0x4dd   : > { %2932 = vmatpush1.bf16.msra.mxu1 %v20581_v15  ;;  %v1158_v15 = vrot.slane %v24188_v1, %v23772_v47 }
 0x4de   : > { %2933 = vmatprep.subr.bf16.mxu1 %v20586_v16  ;;  %v1174_v16 = vrot.slane %v24188_v1, %v24191_v2 }
 0x4df   : > { %5164 = vmatpush1.bf16.msra.mxu0 %v20662_v23  ;;  %v20677_v23 = vld [vmem:[%s23737_s17 + $0x208] ss:$48 sps:$4 sm:$0xff]  }
 0x4e0   : > { %5165 = vmatprep.subr.bf16.mxu0 %v20670_v17  ;;  %v20685_v17 = vld [vmem:[%s23737_s17 + $0x26c] ss:$48 sps:$4 sm:$0xff]  }
 0x4e1   : > { %2934 = vmatpush1.bf16.msra.mxu1 %v20584_v18 }
 0x4e2   : > { %2935 = vmatprep.subr.bf16.mxu1 %v20589_v11 }
 0x4e3   : > { %5166 = vmatpush1.bf16.msra.mxu0 %v20668_v5 }
 0x4e4   : > { %5167 = vmatprep.subr.bf16.mxu0 %v20676_v7 }
 0x4e5   : > { %2936 = vmatpush1.bf16.msra.mxu1 %v20587_v25 }
 0x4e6   : > { %2937 = vmatprep.subr.bf16.mxu1 %v20592_v10 }
 0x4e7   : > { %5168 = vmatpush1.bf16.msra.mxu0 %v20674_v26 }
 0x4e8   : > { %5169 = vmatprep.subr.bf16.mxu0 %v20682_v27 }
 0x4e9   : > { %2938 = vmatpush1.bf16.msra.mxu1 %v20590_v9 }
 0x4ea   : > { %2939 = vmatprep.subr.bf16.mxu1 %v20595_v28 }
 0x4eb   : > { %5170 = vmatpush1.bf16.msra.mxu0 %v20680_v29  ;;  %v20683_v29 = vld [vmem:[%s23737_s17 + $0x268] ss:$48 sps:$4 sm:$0xff]  }
 0x4ec   : > { %5171 = vmatprep.subr.bf16.mxu0 %v20688_v30 }
 0x4ed   : > { %2940 = vmatpush1.bf16.msra.mxu1 %v20593_v31 }
 0x4ee   : > { %2952 = vmatprep.subr.bf16.mxu1 %v20601_v32 }
 0x4ef   : > { %5172 = vmatpush1.bf16.msra.mxu0 %v20686_v33 }
 0x4f0   : > { %2942 = vmatmul.mubr.bf16.vlgmr.msra.gmra.mrb[8].mxu1 %v23935_v19  ;;  %5184 = vmatprep.subr.bf16.mxu0 %v20718_v34  ;;  %v20691_v34 = vld [vmem:[%s23737_s17 + $0x2cc] ss:$48 sps:$4 sm:$0xff]  }
 0x4f1   : > { %2953 = vmatpush1.bf16.msra.mxu1 %v20599_v35  ;;  %2984 = vmatprep.mubr.bf16.mxu1 %v23246_v49 }
 0x4f2   : > { %2954 = vmatprep.subr.bf16.mxu1 %v20607_v36 }
 0x4f5   : > { %2955 = vmatpush1.bf16.msra.mxu1 %v20605_v37 }
 0x4f6   : > { %2956 = vmatprep.subr.bf16.mxu1 %v20613_v21 }
 0x4f9   : > { %2957 = vmatpush1.bf16.msra.mxu1 %v20611_v39 }
 0x4fa   : > { %2958 = vmatprep.subr.bf16.mxu1 %v20619_v40 }
 0x4fd   : > { %2959 = vmatpush1.bf16.msra.mxu1 %v20617_v41 }
 0x4fe   : > { %2960 = vmatprep.subr.bf16.mxu1 %v20625_v43 }
 0x501   : > { %2961 = vmatpush1.bf16.msra.mxu1 %v20623_v44 }
 0x502   : > { %2962 = vmatprep.subr.bf16.mxu1 %v20631_v45 }
 0x505   : > { %2963 = vmatpush1.bf16.msra.mxu1 %v20629_v50  ;;  %v20689_v50 = vld [vmem:[%s23737_s17 + $0x2c8] ss:$48 sps:$4 sm:$0xff]  }
 0x506   : > { %2964 = vmatprep.subr.bf16.mxu1 %v20637_v51 }
 0x509   : > { %2965 = vmatpush1.bf16.msra.mxu1 %v20635_v52 }
 0x50a   : > { %2966 = vmatprep.subr.bf16.mxu1 %v20643_v53  ;;  %v20694_v53 = vld [vmem:[%s23737_s17 + $0x32c] ss:$48 sps:$4 sm:$0xff]  }
 0x50d   : > { %2967 = vmatpush1.bf16.msra.mxu1 %v20641_v54 }
 0x50e   : > { %3081 = vmatprep.subr.bf16.mxu1 %v20649_v55 }
 0x510   : > { %2985 = vmatmul.mubr.bf16.vlgmr.msra.gmra.mrb[8].mxu1 %v23983_v12 }
 0x511   : > { %3082 = vmatpush1.bf16.msra.mxu1 %v20647_v56  ;;  %3113 = vmatprep.mubr.bf16.mxu1 %v23933_v38  ;;  %v20671_v38 = vld [vmem:[%s23737_s17 + $0x1a8] ss:$48 sps:$4 sm:$0xff]   ;;  %v20716_v56 = vld [vmem:[%s23743_s13 + $0x180] ss:$12 sps:$4 sm:$0xff]  }
 0x512   : > { %3083 = vmatprep.subr.bf16.mxu1 %v20655_v57  ;;  %v20724_v57 = vld [vmem:[%s23743_s13 + $0x19c] ss:$12 sps:$4 sm:$0xff]  }
 0x515   : > { %3084 = vmatpush1.bf16.msra.mxu1 %v20653_v58  ;;  %v20692_v58 = vld [vmem:[%s23737_s17 + $0x328] ss:$48 sps:$4 sm:$0xff]  }
 0x516   : > { %3085 = vmatprep.subr.bf16.mxu1 %v20661_v59  ;;  %v20697_v59 = vld [vmem:[%s23737_s17 + $0x38c] ss:$48 sps:$4 sm:$0xff]  }
 0x519   : > { %3086 = vmatpush1.bf16.msra.mxu1 %v20659_v60  ;;  %v20722_v60 = vld [vmem:[%s23743_s13 + $0x198] ss:$12 sps:$4 sm:$0xff]  }
 0x51a   : > { %3087 = vmatprep.subr.bf16.mxu1 %v20667_v61  ;;  %v20730_v61 = vld [vmem:[%s23743_s13 + $0x1b4] ss:$12 sps:$4 sm:$0xff]  }
 0x51d   : > { %3088 = vmatpush1.bf16.msra.mxu1 %v20665_v62  ;;  %v20695_v62 = vld [vmem:[%s23737_s17 + $0x388] ss:$48 sps:$4 sm:$0xff]  }
 0x51e   : > { %3089 = vmatprep.subr.bf16.mxu1 %v20673_v63  ;;  %v20700_v63 = vld [vmem:[%s23737_s17 + $0x3ec] ss:$48 sps:$4 sm:$0xff]  }
 0x521   : > { %3090 = vmatpush1.bf16.msra.mxu1 %v20671_v38  ;;  %v20728_v38 = vld [vmem:[%s23743_s13 + $0x1b0] ss:$12 sps:$4 sm:$0xff]  }
 0x522   : > { %3091 = vmatprep.subr.bf16.mxu1 %v20679_v3  ;;  %v20736_v3 = vld [vmem:[%s23743_s13 + $0x1cc] ss:$12 sps:$4 sm:$0xff]  }
 0x523   : > { %v2728_v18 = vpop.f32.mrb[0].mxu1  ;;  %v2900_v11 = vpop.f32.mrb[0].mxu0 }
 0x524   : > { %v19861_v5 = vadd.f32 %v2728_v18, %v1154_v4  ;;  %v19869_v7 = vadd.f32 %v2900_v11, %v1170_v14  ;;  %v2730_v25 = vpop.f32.mrb[1].mxu1  ;;  %v2902_v10 = vpop.f32.mrb[1].mxu0  ;;  %v20740_v18 = vld [vmem:[%s23743_s13 + $0x1e0] ss:$12 sps:$4 sm:$0xff]   ;;  %v20748_v11 = vld [vmem:[%s23743_s13 + $0x1fc] ss:$12 sps:$4 sm:$0xff]  }
 0x525   : > { %v19862_v26 = vadd.f32 %v2730_v25, %v1158_v15  ;;  %v19870_v27 = vadd.f32 %v2902_v10, %v1174_v16  ;;  %v2732_v9 = vpop.f32.mrb[2].mxu1  ;;  %v2904_v28 = vpop.f32.mrb[2].mxu0  ;;  %3092 = vmatpush1.bf16.msra.mxu1 %v20677_v23  ;;  %v20701_v23 = vld [vmem:[%s23737_s17 + $0x448] ss:$48 sps:$4 sm:$0xff]   ;;  %v20754_v10 = vld [vmem:[%s23743_s13 + $0x214] ss:$12 sps:$4 sm:$0xff]  }
 0x526   : > { %v19863_v30 = vadd.f32 %v2732_v9, %v1154_v4  ;;  %v19871_v31 = vadd.f32 %v2904_v28, %v1170_v14  ;;  %v2734_v32 = vpop.f32.mrb[3].mxu1  ;;  %v2906_v33 = vpop.f32.mrb[3].mxu0  ;;  %3093 = vmatprep.subr.bf16.mxu1 %v20685_v17  ;;  %v3167_v37 = vmax.f32 %v19861_v5, 0.0  ;;  %v3171_v21 = vmax.f32 %v19869_v7, 0.0  ;;  %v20698_v4 = vld [vmem:[%s23737_s17 + $0x3e8] ss:$48 sps:$4 sm:$0xff]  }
 0x527   : > { %v19864_v35 = vadd.f32 %v2734_v32, %v1158_v15  ;;  %v19872_v36 = vadd.f32 %v2906_v33, %v1174_v16  ;;  %v3168_v41 = vmax.f32 %v19862_v26, 0.0  ;;  %v3172_v43 = vmax.f32 %v19870_v27, 0.0  ;;  %v20703_v14 = vld [vmem:[%s23737_s17 + $0x44c] ss:$48 sps:$4 sm:$0xff]   ;;  %v20734_v15 = vld [vmem:[%s23743_s13 + $0x1c8] ss:$12 sps:$4 sm:$0xff]  }
 0x528   : > { %v3179_v39 = vmax.f32 %v19863_v30, 0.0  ;;  %v3183_v40 = vmax.f32 %v19871_v31, 0.0  ;;  %v20742_v16 = vld [vmem:[%s23743_s13 + $0x1e4] ss:$12 sps:$4 sm:$0xff]   ;;  %v20706_v17 = vld [vmem:[%s23737_s17 + $0x4ac] ss:$48 sps:$4 sm:$0xff]  }
 0x529   : > { %v3180_v44 = vmax.f32 %v19864_v35, 0.0  ;;  %v3184_v45 = vmax.f32 %v19872_v36, 0.0  ;;  %3094 = vmatpush1.bf16.msra.mxu1 %v20683_v29  ;;  %v20704_v5 = vld [vmem:[%s23737_s17 + $0x4a8] ss:$48 sps:$4 sm:$0xff]   ;;  %v20709_v7 = vld [vmem:[%s23737_s17 + $0x50c] ss:$48 sps:$4 sm:$0xff]  }
 0x52a   : > { %v24207_v51 = vpack.c.bf16 %v3179_v39, %v3167_v37  ;;  %v24209_v52 = vpack.c.bf16 %v3183_v40, %v3171_v21  ;;  %3095 = vmatprep.subr.bf16.mxu1 %v20691_v34  ;;  %v20746_v25 = vld [vmem:[%s23743_s13 + $0x1f8] ss:$12 sps:$4 sm:$0xff]   ;;  %v20712_v27 = vld [vmem:[%s23737_s17 + $0x56c] ss:$48 sps:$4 sm:$0xff]   ;;  %v20758_v31 = vld [vmem:[%s23743_s13 + $0x228] ss:$12 sps:$4 sm:$0xff]  }
 0x52b   : > { %v24212_v54 = vpack.c.bf16 %v3180_v44, %v3168_v41  ;;  %v24214_v55 = vpack.c.bf16 %v3184_v45, %v3172_v43  ;;  %v20707_v26 = vld [vmem:[%s23737_s17 + $0x508] ss:$48 sps:$4 sm:$0xff]   ;;  %v20752_v9 = vld [vmem:[%s23743_s13 + $0x210] ss:$12 sps:$4 sm:$0xff]   ;;  %v20764_v35 = vld [vmem:[%s23743_s13 + $0x240] ss:$12 sps:$4 sm:$0xff]  }
 0x52c   : > { %v20760_v28 = vld [vmem:[%s23743_s13 + $0x22c] ss:$12 sps:$4 sm:$0xff]   ;;  %v20766_v32 = vld [vmem:[%s23743_s13 + $0x244] ss:$12 sps:$4 sm:$0xff]   ;;  %v20770_v36 = vld [vmem:[%s23743_s13 + $0x25c] ss:$12 sps:$4 sm:$0xff]  }
 0x52d   : > { %3096 = vmatpush1.bf16.msra.mxu1 %v20689_v50  ;;  %5173 = vmatprep.mubr.bf16.mxu0 %v24212_v54  ;;  %v20710_v29 = vld [vmem:[%s23737_s17 + $0x568] ss:$48 sps:$4 sm:$0xff]   ;;  %v20715_v30 = vld [vmem:[%s23737_s17 + $0x5cc] ss:$48 sps:$4 sm:$0xff]   ;;  %v20775_v40 = vld [vmem:[%s23743_s13 + $0x274] ss:$12 sps:$4 sm:$0xff]  }
 0x52e   : > { %5174 = vmatmul.mubr.bf16.vlgmr.msra.gmra.mrb[8].mxu0 %v24207_v51  ;;  %3097 = vmatprep.subr.bf16.mxu1 %v20694_v53  ;;  %v20713_v33 = vld [vmem:[%s23737_s17 + $0x5c8] ss:$48 sps:$4 sm:$0xff]   ;;  %v20721_v34 = vld [vmem:[%s23737_s17 + $0x62c] ss:$48 sps:$4 sm:$0xff]  }
 0x52f   : > { %5185 = vmatpush1.bf16.msra.mxu0 %v20716_v56  ;;  %v20719_v37 = vld [vmem:[%s23737_s17 + $0x628] ss:$48 sps:$4 sm:$0xff]   ;;  %v20727_v21 = vld [vmem:[%s23737_s17 + $0x68c] ss:$48 sps:$4 sm:$0xff]   ;;  %v20785_v56 = vld [vmem:[%s23743_s13 + $0x2a4] ss:$12 sps:$4 sm:$0xff]  }
 0x530   : > { %5186 = vmatprep.subr.bf16.mxu0 %v20724_v57  ;;  %v20768_v39 = vld [vmem:[%s23743_s13 + $0x258] ss:$12 sps:$4 sm:$0xff]   ;;  %v20733_v43 = vld [vmem:[%s23737_s17 + $0x6ec] ss:$48 sps:$4 sm:$0xff]   ;;  %v20778_v53 = vld [vmem:[%s23743_s13 + $0x288] ss:$12 sps:$4 sm:$0xff]  }
 0x531   : > { %3098 = vmatpush1.bf16.msra.mxu1 %v20692_v58  ;;  %v20725_v41 = vld [vmem:[%s23737_s17 + $0x688] ss:$48 sps:$4 sm:$0xff]   ;;  %v20773_v44 = vld [vmem:[%s23743_s13 + $0x270] ss:$12 sps:$4 sm:$0xff]  }
 0x532   : > { %3099 = vmatprep.subr.bf16.mxu1 %v20697_v59  ;;  %v20780_v45 = vld [vmem:[%s23743_s13 + $0x28c] ss:$12 sps:$4 sm:$0xff]  }
 0x533   : > { %5187 = vmatpush1.bf16.msra.mxu0 %v20722_v60  ;;  %v20739_v50 = vld [vmem:[%s23737_s17 + $0x74c] ss:$48 sps:$4 sm:$0xff]   ;;  %v20737_v57 = vld [vmem:[%s23737_s17 + $0x748] ss:$48 sps:$4 sm:$0xff]  }
 0x534   : > { %5188 = vmatprep.subr.bf16.mxu0 %v20730_v61  ;;  %v20745_v58 = vld [vmem:[%s23737_s17 + $0x7ac] ss:$48 sps:$4 sm:$0xff]   ;;  %v20743_v61 = vld [vmem:[%s23737_s17 + $0x7a8] ss:$48 sps:$4 sm:$0xff]  }
 0x535   : > { %3100 = vmatpush1.bf16.msra.mxu1 %v20695_v62  ;;  %v20783_v59 = vld [vmem:[%s23743_s13 + $0x2a0] ss:$12 sps:$4 sm:$0xff]   ;;  %v20790_v60 = vld [vmem:[%s23743_s13 + $0x2bc] ss:$12 sps:$4 sm:$0xff]  }
 0x536   : > { %3101 = vmatprep.subr.bf16.mxu1 %v20700_v63  ;;  %v20751_v62 = vld [vmem:[%s23737_s17 + $0x80c] ss:$48 sps:$4 sm:$0xff]   ;;  %v20788_v63 = vld [vmem:[%s23743_s13 + $0x2b8] ss:$12 sps:$4 sm:$0xff]  }
 0x537   : > { %5189 = vmatpush1.bf16.msra.mxu0 %v20728_v38  ;;  %v20795_v38 = vld [vmem:[%s23743_s13 + $0x2d4] ss:$12 sps:$4 sm:$0xff]  }
 0x538   : > { %5190 = vmatprep.subr.bf16.mxu0 %v20736_v3  ;;  %v20749_v3 = vld [vmem:[%s23737_s17 + $0x808] ss:$48 sps:$4 sm:$0xff]  }
 0x539   : > { %3102 = vmatpush1.bf16.msra.mxu1 %v20698_v4  ;;  %v20757_v4 = vld [vmem:[%s23737_s17 + $0x86c] ss:$48 sps:$4 sm:$0xff]  }
 0x53a   : > { %3103 = vmatprep.subr.bf16.mxu1 %v20703_v14  ;;  %v20793_v14 = vld [vmem:[%s23743_s13 + $0x2d0] ss:$12 sps:$4 sm:$0xff]  }
 0x53b   : > { %5191 = vmatpush1.bf16.msra.mxu0 %v20734_v15  ;;  %v20800_v15 = vld [vmem:[%s23743_s13 + $0x2ec] ss:$12 sps:$4 sm:$0xff]  }
 0x53c   : > { %5192 = vmatprep.subr.bf16.mxu0 %v20742_v16  ;;  %v20755_v16 = vld [vmem:[%s23737_s17 + $0x868] ss:$48 sps:$4 sm:$0xff]  }
 0x53d   : > { %3104 = vmatpush1.bf16.msra.mxu1 %v20701_v23  ;;  %v20763_v23 = vld [vmem:[%s23737_s17 + $0x8cc] ss:$48 sps:$4 sm:$0xff]  }
 0x53e   : > { %3105 = vmatprep.subr.bf16.mxu1 %v20706_v17  ;;  %v20798_v17 = vld [vmem:[%s23743_s13 + $0x2e8] ss:$12 sps:$4 sm:$0xff]  }
 0x53f   : > { %5193 = vmatpush1.bf16.msra.mxu0 %v20740_v18  ;;  %v20805_v18 = vld [vmem:[%s23743_s13 + $0x304] ss:$12 sps:$4 sm:$0xff]  }
 0x540   : > { %5194 = vmatprep.subr.bf16.mxu0 %v20748_v11  ;;  %v20761_v11 = vld [vmem:[%s23737_s17 + $0x8c8] ss:$48 sps:$4 sm:$0xff]  }
 0x541   : > { %3106 = vmatpush1.bf16.msra.mxu1 %v20704_v5  ;;  %v20767_v5 = vld [vmem:[%s23743_s13 + $0xc8] ss:$12 sps:$4 sm:$0xff]  }
 0x542   : > { %3107 = vmatprep.subr.bf16.mxu1 %v20709_v7  ;;  %v20771_v7 = vld [vmem:[%s23743_s13 + $0x8] ss:$12 sps:$4 sm:$0xff]  }
 0x543   : > { %5195 = vmatpush1.bf16.msra.mxu0 %v20746_v25  ;;  %v20772_v25 = vld [vmem:[%s23743_s13 + $0xe0] ss:$12 sps:$4 sm:$0xff]  }
 0x544   : > { %5196 = vmatprep.subr.bf16.mxu0 %v20754_v10  ;;  %v20776_v10 = vld [vmem:[%s23743_s13 + $0x20] ss:$12 sps:$4 sm:$0xff]  }
 0x545   : > { %3108 = vmatpush1.bf16.msra.mxu1 %v20707_v26  ;;  %v20777_v26 = vld [vmem:[%s23743_s13 + $0xf8] ss:$12 sps:$4 sm:$0xff]  }
 0x546   : > { %3109 = vmatprep.subr.bf16.mxu1 %v20712_v27  ;;  %v20781_v27 = vld [vmem:[%s23743_s13 + $0x38] ss:$12 sps:$4 sm:$0xff]  }
 0x547   : > { %5197 = vmatpush1.bf16.msra.mxu0 %v20752_v9  ;;  %v20782_v9 = vld [vmem:[%s23743_s13 + $0x110] ss:$12 sps:$4 sm:$0xff]  }
 0x548   : > { %5198 = vmatprep.subr.bf16.mxu0 %v20760_v28  ;;  %v20786_v28 = vld [vmem:[%s23743_s13 + $0x50] ss:$12 sps:$4 sm:$0xff]  }
 0x549   : > { %3110 = vmatpush1.bf16.msra.mxu1 %v20710_v29  ;;  %v20787_v29 = vld [vmem:[%s23743_s13 + $0x128] ss:$12 sps:$4 sm:$0xff]  }
 0x54a   : > { %3111 = vmatprep.subr.bf16.mxu1 %v20715_v30  ;;  %v24296_v30 = vsub.s32 3, %v23758_v42 }
 0x54b   : > { %5199 = vmatpush1.bf16.msra.mxu0 %v20758_v31  ;;  %v20792_v31 = vld [vmem:[%s23743_s13 + $0x140] ss:$12 sps:$4 sm:$0xff]  }
 0x54c   : > { %5200 = vmatprep.subr.bf16.mxu0 %v20766_v32  ;;  %v1162_v32 = vrot.slane %v24188_v1, %v23775_v48 }
 0x54d   : > { %3112 = vmatpush1.bf16.msra.mxu1 %v20713_v33 }
 0x54e   : > { %3124 = vmatprep.subr.bf16.mxu1 %v20721_v34  ;;  %v1166_v34 = vrot.slane %v24188_v1, %v24296_v30 }
 0x54f   : > { %5201 = vmatpush1.bf16.msra.mxu0 %v20764_v35  ;;  %v20796_v35 = vld [vmem:[%s23743_s13 + $0x80] ss:$12 sps:$4 sm:$0xff]  }
 0x550   : > { %3114 = vmatmul.mubr.bf16.vlgmr.msra.gmra.mrb[12].mxu1 %v23935_v19  ;;  %5202 = vmatprep.subr.bf16.mxu0 %v20770_v36  ;;  %v20731_v19 = vld [vmem:[%s23737_s17 + $0x6e8] ss:$48 sps:$4 sm:$0xff]  }
 0x551   : > { %3125 = vmatpush1.bf16.msra.mxu1 %v20719_v37  ;;  %3156 = vmatprep.mubr.bf16.mxu1 %v23246_v49  ;;  %v20797_v37 = vld [vmem:[%s23743_s13 + $0x158] ss:$12 sps:$4 sm:$0xff]  }
 0x552   : > { %3126 = vmatprep.subr.bf16.mxu1 %v20727_v21 }
 0x553   : > { %5203 = vmatpush1.bf16.msra.mxu0 %v20768_v39 }
 0x554   : > { %5204 = vmatprep.subr.bf16.mxu0 %v20775_v40 }
 0x555   : > { %3127 = vmatpush1.bf16.msra.mxu1 %v20725_v41 }
 0x556   : > { %3128 = vmatprep.subr.bf16.mxu1 %v20733_v43 }
 0x557   : > { %5205 = vmatpush1.bf16.msra.mxu0 %v20773_v44 }
 0x558   : > { %5206 = vmatprep.subr.bf16.mxu0 %v20780_v45 }
 0x559   : > { %3129 = vmatpush1.bf16.msra.mxu1 %v20731_v19 }
 0x55a   : > { %3130 = vmatprep.subr.bf16.mxu1 %v20739_v50  ;;  %v20801_v50 = vld [vmem:[%s23743_s13 + $0x98] ss:$12 sps:$4 sm:$0xff]  }
 0x55b   : > { %5207 = vmatpush1.bf16.msra.mxu0 %v20778_v53 }
 0x55c   : > { %5208 = vmatprep.subr.bf16.mxu0 %v20785_v56 }
 0x55d   : > { %3131 = vmatpush1.bf16.msra.mxu1 %v20737_v57 }
 0x55e   : > { %3132 = vmatprep.subr.bf16.mxu1 %v20745_v58 }
 0x55f   : > { %5209 = vmatpush1.bf16.msra.mxu0 %v20783_v59  ;;  %v20802_v59 = vld [vmem:[%s23743_s13 + $0x170] ss:$12 sps:$4 sm:$0xff]  }
 0x560   : > { %5210 = vmatprep.subr.bf16.mxu0 %v20790_v60 }
 0x561   : > { %3133 = vmatpush1.bf16.msra.mxu1 %v20743_v61 }
 0x562   : > { %3134 = vmatprep.subr.bf16.mxu1 %v20751_v62 }
 0x563   : > { %5211 = vmatpush1.bf16.msra.mxu0 %v20788_v63 }
 0x564   : > { %5212 = vmatprep.subr.bf16.mxu0 %v20795_v38 }
 0x565   : > { %3135 = vmatpush1.bf16.msra.mxu1 %v20749_v3 }
 0x566   : > { %3136 = vmatprep.subr.bf16.mxu1 %v20757_v4 }
 0x567   : > { %5213 = vmatpush1.bf16.msra.mxu0 %v20793_v14 }
 0x568   : > { %5214 = vmatprep.subr.bf16.mxu0 %v20800_v15 }
 0x569   : > { %3137 = vmatpush1.bf16.msra.mxu1 %v20755_v16 }
 0x56a   : > { %3138 = vmatprep.subr.bf16.mxu1 %v20763_v23  ;;  %v20806_v23 = vld [vmem:[%s23743_s13 + $0xb0] ss:$12 sps:$4 sm:$0xff]  }
 0x56b   : > { %5215 = vmatpush1.bf16.msra.mxu0 %v20798_v17 }
 0x56c   : > { %5227 = vmatprep.subr.bf16.mxu0 %v20805_v18 }
 0x56d   : > { %3139 = vmatpush1.bf16.msra.mxu1 %v20761_v11 }
 0x56e   : > { %19414 = vmatprep.subr.bf16.mxu1 %v20767_v5  ;;  %v20807_v5 = vld [vmem:[%s23743_s13 + $0x248] ss:$12 sps:$4 sm:$0xff]  }
 0x570   : > { %3157 = vmatmul.mubr.bf16.vlgmr.msra.gmra.mrb[12].mxu1 %v23983_v12  ;;  %v20791_v12 = vld [vmem:[%s23743_s13 + $0x68] ss:$12 sps:$4 sm:$0xff]  }
 0x571   : > { %19415 = vmatpush3.bf16.msra.mxu1 %v20771_v7  ;;  %5431 = vmatprep.mubr.bf16.mxu1 %v24212_v54  ;;  %v24299_v54 = vld [vmem:[%s24185_s7 + $0x8] sm:$0xf] }
 0x572   : > { %19416 = vmatprep.subr.bf16.mxu1 %v20772_v25  ;;  %v1186_v33 = vrot.slane %v24299_v54, %v23769_v46  ;;  %v1190_v36 = vrot.slane %v24299_v54, %v23772_v47 }
 0x575   : > { %19417 = vmatpush3.bf16.msra.mxu1 %v20776_v10  ;;  %v20803_v10 = vld [vmem:[%s23743_s13 + $0x300] ss:$12 sps:$4 sm:$0xff]  }
 0x576   : > { %19418 = vmatprep.subr.bf16.mxu1 %v20777_v26 }
 0x579   : > { %19419 = vmatpush3.bf16.msra.mxu1 %v20781_v27  ;;  %v20810_v27 = vld [vmem:[%s23743_s13 + $0x31c] ss:$12 sps:$4 sm:$0xff]  }
 0x57a   : > { %19420 = vmatprep.subr.bf16.mxu1 %v20782_v9  ;;  %v20811_v9 = vld [vmem:[%s23743_s13 + $0x188] ss:$12 sps:$4 sm:$0xff]  }
 0x57d   : > { %19421 = vmatpush3.bf16.msra.mxu1 %v20786_v28  ;;  %v20812_v28 = vld [vmem:[%s23743_s13 + $0x260] ss:$12 sps:$4 sm:$0xff]  }
 0x57e   : > { %19422 = vmatprep.subr.bf16.mxu1 %v20787_v29  ;;  %v20808_v29 = vld [vmem:[%s23743_s13 + $0x318] ss:$12 sps:$4 sm:$0xff]  }
 0x581   : > { %19423 = vmatpush3.bf16.msra.mxu1 %v20791_v12  ;;  %v20815_v12 = vld [vmem:[%s23743_s13 + $0x334] ss:$12 sps:$4 sm:$0xff]  }
 0x582   : > { %19424 = vmatprep.subr.bf16.mxu1 %v20792_v31  ;;  %v20816_v31 = vld [vmem:[%s23743_s13 + $0x1a0] ss:$12 sps:$4 sm:$0xff]  }
 0x583   : > { %v2814_v21 = vpop.f32.mrb[4].mxu1 }
 0x584   : > { %v19865_v39 = vadd.f32 %v2814_v21, %v1162_v32  ;;  %v3072_v40 = vpop.f32.mrb[4].mxu0  ;;  %v2816_v41 = vpop.f32.mrb[5].mxu1  ;;  %v20826_v21 = vld [vmem:[%s23743_s13 + $0x1d0] ss:$12 sps:$4 sm:$0xff]  }
 0x585   : > { %v19877_v43 = vadd.f32 %v3072_v40, %v1186_v33  ;;  %v19866_v44 = vadd.f32 %v2816_v41, %v1166_v34  ;;  %v3074_v45 = vpop.f32.mrb[5].mxu0  ;;  %v2818_v19 = vpop.f32.mrb[6].mxu1  ;;  %19425 = vmatpush3.bf16.msra.mxu1 %v20796_v35  ;;  %v20821_v35 = vld [vmem:[%s23743_s13 + $0x1b8] ss:$12 sps:$4 sm:$0xff]   ;;  %v20823_v40 = vld [vmem:[%s23743_s13 + $0x360] ss:$12 sps:$4 sm:$0xff]  }
 0x586   : > { %v19878_v53 = vadd.f32 %v3074_v45, %v1190_v36  ;;  %v19867_v56 = vadd.f32 %v2818_v19, %v1162_v32  ;;  %v3076_v57 = vpop.f32.mrb[6].mxu0  ;;  %v2820_v58 = vpop.f32.mrb[7].mxu1  ;;  %19426 = vmatprep.subr.bf16.mxu1 %v20797_v37  ;;  %v3169_v63 = vmax.f32 %v19865_v39, 0.0  ;;  %v20817_v32 = vld [vmem:[%s23743_s13 + $0x278] ss:$12 sps:$4 sm:$0xff]  }
 0x587   : > { %v19879_v60 = vadd.f32 %v3076_v57, %v1186_v33  ;;  %v19868_v61 = vadd.f32 %v2820_v58, %v1166_v34  ;;  %v3078_v62 = vpop.f32.mrb[7].mxu0  ;;  %v3175_v4 = vmax.f32 %v19877_v43, 0.0  ;;  %v3170_v14 = vmax.f32 %v19866_v44, 0.0  ;;  %v20813_v33 = vld [vmem:[%s23743_s13 + $0x330] ss:$12 sps:$4 sm:$0xff]  }
 0x588   : > { %v3181_v38 = vmax.f32 %v19867_v56, 0.0  ;;  %v19880_v3 = vadd.f32 %v3078_v62, %v1190_v36  ;;  %v3176_v17 = vmax.f32 %v19878_v53, 0.0  ;;  %v20820_v34 = vld [vmem:[%s23743_s13 + $0x34c] ss:$12 sps:$4 sm:$0xff]   ;;  %v20818_v36 = vld [vmem:[%s23743_s13 + $0x348] ss:$12 sps:$4 sm:$0xff]  }
 0x589   : > { %v3187_v15 = vmax.f32 %v19879_v60, 0.0  ;;  %v3182_v16 = vmax.f32 %v19868_v61, 0.0  ;;  %19427 = vmatpush3.bf16.msra.mxu1 %v20801_v50  ;;  %v20825_v37 = vld [vmem:[%s23743_s13 + $0x364] ss:$12 sps:$4 sm:$0xff]   ;;  %v20827_v39 = vld [vmem:[%s23743_s13 + $0x2a8] ss:$12 sps:$4 sm:$0xff]  }
 0x58a   : > { %v24315_v18 = vpack.c.bf16 %v3181_v38, %v3169_v63  ;;  %v3188_v11 = vmax.f32 %v19880_v3, 0.0  ;;  %19428 = vmatprep.subr.bf16.mxu1 %v20802_v59  ;;  %v20830_v41 = vld [vmem:[%s23743_s13 + $0x37c] ss:$12 sps:$4 sm:$0xff]   ;;  %v20832_v44 = vld [vmem:[%s23743_s13 + $0x2c0] ss:$12 sps:$4 sm:$0xff]  }
 0x58b   : > { %v24318_v7 = vpack.c.bf16 %v3187_v15, %v3175_v4  ;;  %v3194_v25 = vpack.c.bf16 %v3182_v16, %v3170_v14  ;;  %v20831_v43 = vld [vmem:[%s23743_s13 + $0x1e8] ss:$12 sps:$4 sm:$0xff]   ;;  %v20828_v45 = vld [vmem:[%s23743_s13 + $0x378] ss:$12 sps:$4 sm:$0xff]   ;;  %v20836_v50 = vld [vmem:[%s23743_s13 + $0x200] ss:$12 sps:$4 sm:$0xff]  }
 0x58c   : > { %v24321_v26 = vpack.c.bf16 %v3188_v11, %v3176_v17  ;;  %v20835_v19 = vld [vmem:[%s23743_s13 + $0x394] ss:$12 sps:$4 sm:$0xff]   ;;  %v20837_v53 = vld [vmem:[%s23743_s13 + $0x2d8] ss:$12 sps:$4 sm:$0xff]   ;;  %v20833_v56 = vld [vmem:[%s23743_s13 + $0x390] ss:$12 sps:$4 sm:$0xff]  }
 0x58d   : > { %5216 = vmatprep.mubr.bf16.mxu0 %v3194_v25  ;;  %19429 = vmatpush3.bf16.msra.mxu1 %v20806_v23  ;;  %v20840_v57 = vld [vmem:[%s23743_s13 + $0x3ac] ss:$12 sps:$4 sm:$0xff]   ;;  %v20842_v59 = vld [vmem:[%s23743_s13 + $0x2f0] ss:$12 sps:$4 sm:$0xff]   ;;  %v20838_v60 = vld [vmem:[%s23743_s13 + $0x3a8] ss:$12 sps:$4 sm:$0xff]  }
 0x58e   : > { %5217 = vmatmul.mubr.bf16.vlgmr.msra.gmra.mrb[8].mxu0 %v24315_v18  ;;  %19436 = vmatprep.subr.bf16.mxu1 %v20807_v5  ;;  %v20841_v58 = vld [vmem:[%s23743_s13 + $0x218] ss:$12 sps:$4 sm:$0xff]   ;;  %v20846_v62 = vld [vmem:[%s23743_s13 + $0x230] ss:$12 sps:$4 sm:$0xff]   ;;  %v20847_v63 = vld [vmem:[%s23743_s13 + $0x3c8] ss:$12 sps:$4 sm:$0xff]  }
 0x58f   : > { %5228 = vmatpush1.bf16.msra.mxu0 %v20803_v10  ;;  %5259 = vmatprep.mubr.bf16.mxu0 %v24214_v55  ;;  %v20845_v61 = vld [vmem:[%s23743_s13 + $0x3c4] ss:$12 sps:$4 sm:$0xff]   ;;  %v20843_v38 = vld [vmem:[%s23743_s13 + $0x3c0] ss:$12 sps:$4 sm:$0xff]   ;;  %v20850_v3 = vld [vmem:[%s23743_s13 + $0x3dc] ss:$12 sps:$4 sm:$0xff]  }
 0x590   : > { %5432 = vmatmul.mubr.bf16.vlgmr.msra.gmra.mrb[16].mxu1 %v24207_v51  ;;  %5229 = vmatprep.subr.bf16.mxu0 %v20810_v27  ;;  %v20822_v51 = vld [vmem:[%s23743_s13 + $0x290] ss:$12 sps:$4 sm:$0xff]   ;;  %v20851_v4 = vld [vmem:[%s23743_s13 + $0x308] ss:$12 sps:$4 sm:$0xff]   ;;  %v20852_v14 = vld [vmem:[%s23743_s13 + $0x3e0] ss:$12 sps:$4 sm:$0xff]  }
 0x591   : > { %19437 = vmatpush3.bf16.msra.mxu1 %v20811_v9  ;;  %5472 = vmatprep.mubr.bf16.mxu1 %v3194_v25  ;;  %v20848_v15 = vld [vmem:[%s23743_s13 + $0x3d8] ss:$12 sps:$4 sm:$0xff]   ;;  %v20855_v16 = vld [vmem:[%s23743_s13 + $0x3f4] ss:$12 sps:$4 sm:$0xff]   ;;  %v20853_v11 = vld [vmem:[%s23743_s13 + $0x3f0] ss:$12 sps:$4 sm:$0xff]  }
 0x592   : > { %19438 = vmatprep.subr.bf16.mxu1 %v20812_v28  ;;  %v20856_v23 = vld [vmem:[%s23743_s13 + $0x320] ss:$12 sps:$4 sm:$0xff]   ;;  %v20857_v17 = vld [vmem:[%s23743_s13 + $0x3f8] ss:$12 sps:$4 sm:$0xff]   ;;  %v20862_v25 = vld [vmem:[%s23743_s13 + $0x410] ss:$12 sps:$4 sm:$0xff]  }
 0x593   : > { %5230 = vmatpush1.bf16.msra.mxu0 %v20808_v29  ;;  %v20860_v5 = vld [vmem:[%s23743_s13 + $0x40c] ss:$12 sps:$4 sm:$0xff]   ;;  %v20858_v10 = vld [vmem:[%s23743_s13 + $0x408] ss:$12 sps:$4 sm:$0xff]   ;;  %v20866_v27 = vld [vmem:[%s23743_s13 + $0x350] ss:$12 sps:$4 sm:$0xff]  }
 0x594   : > { %5231 = vmatprep.subr.bf16.mxu0 %v20815_v12  ;;  %v20867_v9 = vld [vmem:[%s23743_s13 + $0x428] ss:$12 sps:$4 sm:$0xff]   ;;  %v20863_v28 = vld [vmem:[%s23743_s13 + $0x420] ss:$12 sps:$4 sm:$0xff]  }
 0x595   : > { %19439 = vmatpush3.bf16.msra.mxu1 %v20816_v31  ;;  %v20870_v29 = vld [vmem:[%s23743_s13 + $0x43c] ss:$12 sps:$4 sm:$0xff]   ;;  %v20872_v31 = vld [vmem:[%s23743_s13 + $0x440] ss:$12 sps:$4 sm:$0xff]  }
 0x596   : > { %19440 = vmatprep.subr.bf16.mxu1 %v20817_v32  ;;  %v20871_v12 = vld [vmem:[%s23743_s13 + $0x368] ss:$12 sps:$4 sm:$0xff]   ;;  %v20868_v32 = vld [vmem:[%s23743_s13 + $0x438] ss:$12 sps:$4 sm:$0xff]  }
 0x597   : > { %5232 = vmatpush1.bf16.msra.mxu0 %v20813_v33  ;;  %v20875_v33 = vld [vmem:[%s23743_s13 + $0x454] ss:$12 sps:$4 sm:$0xff]  }
 0x598   : > { %5233 = vmatprep.subr.bf16.mxu0 %v20820_v34  ;;  %v20876_v34 = vld [vmem:[%s23743_s13 + $0x380] ss:$12 sps:$4 sm:$0xff]  }
 0x599   : > { %19441 = vmatpush3.bf16.msra.mxu1 %v20821_v35  ;;  %v20877_v35 = vld [vmem:[%s23743_s13 + $0x458] ss:$12 sps:$4 sm:$0xff]  }
 0x59a   : > { %19442 = vmatprep.subr.bf16.mxu1 %v20822_v51  ;;  %v20873_v51 = vld [vmem:[%s23743_s13 + $0x450] ss:$12 sps:$4 sm:$0xff]  }
 0x59b   : > { %5234 = vmatpush1.bf16.msra.mxu0 %v20818_v36  ;;  %v20880_v36 = vld [vmem:[%s23743_s13 + $0x46c] ss:$12 sps:$4 sm:$0xff]  }
 0x59c   : > { %5235 = vmatprep.subr.bf16.mxu0 %v20825_v37  ;;  %v20881_v37 = vld [vmem:[%s23743_s13 + $0x398] ss:$12 sps:$4 sm:$0xff]  }
 0x59d   : > { %19443 = vmatpush3.bf16.msra.mxu1 %v20826_v21  ;;  %v20882_v21 = vld [vmem:[%s23743_s13 + $0x470] ss:$12 sps:$4 sm:$0xff]  }
 0x59e   : > { %19444 = vmatprep.subr.bf16.mxu1 %v20827_v39  ;;  %v20878_v39 = vld [vmem:[%s23743_s13 + $0x468] ss:$12 sps:$4 sm:$0xff]  }
 0x59f   : > { %5236 = vmatpush1.bf16.msra.mxu0 %v20823_v40  ;;  %v20885_v40 = vld [vmem:[%s23743_s13 + $0x484] ss:$12 sps:$4 sm:$0xff]  }
 0x5a0   : > { %5237 = vmatprep.subr.bf16.mxu0 %v20830_v41  ;;  %v20886_v41 = vld [vmem:[%s23743_s13 + $0x3b0] ss:$12 sps:$4 sm:$0xff]  }
 0x5a1   : > { %19445 = vmatpush3.bf16.msra.mxu1 %v20831_v43  ;;  %v20887_v43 = vld [vmem:[%s23743_s13 + $0x548] ss:$12 sps:$4 sm:$0xff]  }
 0x5a2   : > { %19446 = vmatprep.subr.bf16.mxu1 %v20832_v44  ;;  %v20883_v44 = vld [vmem:[%s23743_s13 + $0x480] ss:$12 sps:$4 sm:$0xff]  }
 0x5a3   : > { %5238 = vmatpush1.bf16.msra.mxu0 %v20828_v45  ;;  %v20890_v45 = vld [vmem:[%s23743_s13 + $0x49c] ss:$12 sps:$4 sm:$0xff]  }
 0x5a4   : > { %5239 = vmatprep.subr.bf16.mxu0 %v20835_v19  ;;  %v20891_v19 = vld [vmem:[%s23743_s13 + $0x488] ss:$12 sps:$4 sm:$0xff]  }
 0x5a5   : > { %19447 = vmatpush3.bf16.msra.mxu1 %v20836_v50  ;;  %v20892_v50 = vld [vmem:[%s23743_s13 + $0x560] ss:$12 sps:$4 sm:$0xff]  }
 0x5a6   : > { %19448 = vmatprep.subr.bf16.mxu1 %v20837_v53  ;;  %v20888_v53 = vld [vmem:[%s23743_s13 + $0x498] ss:$12 sps:$4 sm:$0xff]  }
 0x5a7   : > { %5240 = vmatpush1.bf16.msra.mxu0 %v20833_v56  ;;  %v20895_v56 = vld [vmem:[%s23743_s13 + $0x4b4] ss:$12 sps:$4 sm:$0xff]  }
 0x5a8   : > { %5241 = vmatprep.subr.bf16.mxu0 %v20840_v57  ;;  %v20896_v57 = vld [vmem:[%s23743_s13 + $0x4a0] ss:$12 sps:$4 sm:$0xff]  }
 0x5a9   : > { %19449 = vmatpush3.bf16.msra.mxu1 %v20841_v58  ;;  %v20897_v58 = vld [vmem:[%s23743_s13 + $0x578] ss:$12 sps:$4 sm:$0xff]  }
 0x5aa   : > { %19450 = vmatprep.subr.bf16.mxu1 %v20842_v59  ;;  %v20893_v59 = vld [vmem:[%s23743_s13 + $0x4b0] ss:$12 sps:$4 sm:$0xff]  }
 0x5ab   : > { %5242 = vmatpush1.bf16.msra.mxu0 %v20838_v60  ;;  %v20900_v60 = vld [vmem:[%s23743_s13 + $0x4cc] ss:$12 sps:$4 sm:$0xff]  }
 0x5ac   : > { %5243 = vmatprep.subr.bf16.mxu0 %v20845_v61  ;;  %v20901_v61 = vld [vmem:[%s23743_s13 + $0x4b8] ss:$12 sps:$4 sm:$0xff]  }
 0x5ad   : > { %19451 = vmatpush3.bf16.msra.mxu1 %v20846_v62  ;;  %v20898_v62 = vld [vmem:[%s23743_s13 + $0x4c8] ss:$12 sps:$4 sm:$0xff]  }
 0x5ae   : > { %19458 = vmatprep.subr.bf16.mxu1 %v20847_v63  ;;  %v20905_v63 = vld [vmem:[%s23743_s13 + $0x4e4] ss:$12 sps:$4 sm:$0xff]  }
 0x5af   : > { %5244 = vmatpush1.bf16.msra.mxu0 %v20843_v38  ;;  %v20906_v38 = vld [vmem:[%s23743_s13 + $0x4d0] ss:$12 sps:$4 sm:$0xff]  }
 0x5b0   : > { %5473 = vmatmul.mubr.bf16.vlgmr.msra.gmra.mrb[20].mxu1 %v24315_v18  ;;  %5245 = vmatprep.subr.bf16.mxu0 %v20850_v3  ;;  %v20861_v18 = vld [vmem:[%s23743_s13 + $0x338] ss:$12 sps:$4 sm:$0xff]   ;;  %v20907_v3 = vld [vmem:[%s23743_s13 + $0x5a8] ss:$12 sps:$4 sm:$0xff]  }
 0x5b1   : > { %19459 = vmatpush3.bf16.msra.mxu1 %v20851_v4  ;;  %5513 = vmatprep.mubr.bf16.mxu1 %v24214_v55  ;;  %v20865_v55 = vld [vmem:[%s23743_s13 + $0x424] ss:$12 sps:$4 sm:$0xff]   ;;  %v20903_v4 = vld [vmem:[%s23743_s13 + $0x4e0] ss:$12 sps:$4 sm:$0xff]  }
 0x5b2   : > { %19460 = vmatprep.subr.bf16.mxu1 %v20852_v14  ;;  %v20910_v14 = vld [vmem:[%s23743_s13 + $0x4fc] ss:$12 sps:$4 sm:$0xff]  }
 0x5b3   : > { %5246 = vmatpush1.bf16.msra.mxu0 %v20848_v15  ;;  %v24412_v15 = vsub.s32 6, %v23758_v42 }
 0x5b4   : > { %5247 = vmatprep.subr.bf16.mxu0 %v20855_v16  ;;  %v20911_v16 = vld [vmem:[%s23743_s13 + $0x4e8] ss:$12 sps:$4 sm:$0xff]  }
 0x5b5   : > { %19461 = vmatpush3.bf16.msra.mxu1 %v20856_v23  ;;  %v24416_v23 = vsub.s32 7, %v23758_v42  ;;  %v20917_v42 = vld [vmem:[%s23743_s13 + $0x5d8] ss:$12 sps:$4 sm:$0xff]  }
 0x5b6   : > { %19462 = vmatprep.subr.bf16.mxu1 %v20857_v17  ;;  %v20912_v17 = vld [vmem:[%s23743_s13 + $0x5c0] ss:$12 sps:$4 sm:$0xff]  }
 0x5b7   : > { %5248 = vmatpush1.bf16.msra.mxu0 %v20853_v11  ;;  %v20908_v11 = vld [vmem:[%s23743_s13 + $0x4f8] ss:$12 sps:$4 sm:$0xff]  }
 0x5b8   : > { %5249 = vmatprep.subr.bf16.mxu0 %v20860_v5  ;;  %v1178_v5 = vrot.slane %v24188_v1, %v24412_v15 }
 0x5b9   : > { %19463 = vmatpush3.bf16.msra.mxu1 %v20861_v18  ;;  %v20915_v18 = vld [vmem:[%s23743_s13 + $0x514] ss:$12 sps:$4 sm:$0xff]  }
 0x5ba   : > { %19464 = vmatprep.subr.bf16.mxu1 %v20862_v25  ;;  %v1182_v25 = vrot.slane %v24188_v1, %v24416_v23 }
 0x5bb   : > { %5250 = vmatpush1.bf16.msra.mxu0 %v20858_v10  ;;  %v20916_v10 = vld [vmem:[%s23743_s13 + $0x500] ss:$12 sps:$4 sm:$0xff]  }
 0x5bc   : > { %5251 = vmatprep.subr.bf16.mxu0 %v20865_v55 }
 0x5bd   : > { %19465 = vmatpush3.bf16.msra.mxu1 %v20866_v27  ;;  %v20913_v27 = vld [vmem:[%s23743_s13 + $0x510] ss:$12 sps:$4 sm:$0xff]  }
 0x5be   : > { %19466 = vmatprep.subr.bf16.mxu1 %v20867_v9 }
 0x5bf   : > { %5252 = vmatpush1.bf16.msra.mxu0 %v20863_v28 }
 0x5c0   : > { %5253 = vmatprep.subr.bf16.mxu0 %v20870_v29  ;;  %v20920_v29 = vld [vmem:[%s23743_s13 + $0x52c] ss:$12 sps:$4 sm:$0xff]  }
 0x5c1   : > { %19467 = vmatpush3.bf16.msra.mxu1 %v20871_v12 }
 0x5c2   : > { %19468 = vmatprep.subr.bf16.mxu1 %v20872_v31 }
 0x5c3   : > { %5254 = vmatpush1.bf16.msra.mxu0 %v20868_v32  ;;  %v20921_v32 = vld [vmem:[%s23743_s13 + $0x518] ss:$12 sps:$4 sm:$0xff]  }
 0x5c4   : > { %5255 = vmatprep.subr.bf16.mxu0 %v20875_v33 }
 0x5c5   : > { %19469 = vmatpush3.bf16.msra.mxu1 %v20876_v34  ;;  %v20922_v34 = vld [vmem:[%s23743_s13 + $0x5f0] ss:$12 sps:$4 sm:$0xff]  }
 0x5c6   : > { %19470 = vmatprep.subr.bf16.mxu1 %v20877_v35 }
 0x5c7   : > { %5256 = vmatpush1.bf16.msra.mxu0 %v20873_v51  ;;  %v20918_v51 = vld [vmem:[%s23743_s13 + $0x528] ss:$12 sps:$4 sm:$0xff]  }
 0x5c8   : > { %5257 = vmatprep.subr.bf16.mxu0 %v20880_v36 }
 0x5c9   : > { %19471 = vmatpush3.bf16.msra.mxu1 %v20881_v37 }
 0x5ca   : > { %19472 = vmatprep.subr.bf16.mxu1 %v20882_v21  ;;  %v20925_v21 = vld [vmem:[%s23743_s13 + $0x544] ss:$12 sps:$4 sm:$0xff]  }
 0x5cb   : > { %5258 = vmatpush1.bf16.msra.mxu0 %v20878_v39 }
 0x5cc   : > { %5270 = vmatprep.subr.bf16.mxu0 %v20885_v40 }
 0x5cd   : > { %19473 = vmatpush3.bf16.msra.mxu1 %v20886_v41  ;;  %v20926_v41 = vld [vmem:[%s23743_s13 + $0x530] ss:$12 sps:$4 sm:$0xff]  }
 0x5ce   : > { %5260 = vmatmul.mubr.bf16.vlgmr.msra.gmra.mrb[8].mxu0 %v24209_v52  ;;  %19480 = vmatprep.subr.bf16.mxu1 %v20887_v43 }
 0x5cf   : > { %5271 = vmatpush1.bf16.msra.mxu0 %v20883_v44  ;;  %v20927_v44 = vld [vmem:[%s23743_s13 + $0x6c8] ss:$12 sps:$4 sm:$0xff]  }
 0x5d0   : > { %5514 = vmatmul.mubr.bf16.vlgmr.msra.gmra.mrb[24].mxu1 %v24209_v52  ;;  %5272 = vmatprep.subr.bf16.mxu0 %v20890_v45  ;;  %v20902_v52 = vld [vmem:[%s23743_s13 + $0x590] ss:$12 sps:$4 sm:$0xff]  }
 0x5d1   : > { %19481 = vmatpush3.bf16.msra.mxu1 %v20891_v19  ;;  %v20923_v19 = vld [vmem:[%s23743_s13 + $0x540] ss:$12 sps:$4 sm:$0xff]  }
 0x5d2   : > { %19482 = vmatprep.subr.bf16.mxu1 %v20892_v50  ;;  %v20930_v50 = vld [vmem:[%s23743_s13 + $0x55c] ss:$12 sps:$4 sm:$0xff]  }
 0x5d3   : > { %5273 = vmatpush1.bf16.msra.mxu0 %v20888_v53  ;;  %v20931_v53 = vld [vmem:[%s23743_s13 + $0x608] ss:$12 sps:$4 sm:$0xff]  }
 0x5d4   : > { %5274 = vmatprep.subr.bf16.mxu0 %v20895_v56  ;;  %v20932_v56 = vld [vmem:[%s23743_s13 + $0x6e0] ss:$12 sps:$4 sm:$0xff]  }
 0x5d5   : > { %19483 = vmatpush3.bf16.msra.mxu1 %v20896_v57  ;;  %v20928_v57 = vld [vmem:[%s23743_s13 + $0x558] ss:$12 sps:$4 sm:$0xff]  }
 0x5d6   : > { %19484 = vmatprep.subr.bf16.mxu1 %v20897_v58  ;;  %v20935_v58 = vld [vmem:[%s23743_s13 + $0x574] ss:$12 sps:$4 sm:$0xff]  }
 0x5d7   : > { %5275 = vmatpush1.bf16.msra.mxu0 %v20893_v59  ;;  %v20936_v59 = vld [vmem:[%s23743_s13 + $0x620] ss:$12 sps:$4 sm:$0xff]  }
 0x5d8   : > { %5276 = vmatprep.subr.bf16.mxu0 %v20900_v60  ;;  %v20937_v60 = vld [vmem:[%s23743_s13 + $0x6f8] ss:$12 sps:$4 sm:$0xff]  }
 0x5d9   : > { %19485 = vmatpush3.bf16.msra.mxu1 %v20901_v61  ;;  %v20933_v61 = vld [vmem:[%s23743_s13 + $0x570] ss:$12 sps:$4 sm:$0xff]  }
 0x5da   : > { %19486 = vmatprep.subr.bf16.mxu1 %v20902_v52  ;;  %v20940_v52 = vld [vmem:[%s23743_s13 + $0x58c] ss:$12 sps:$4 sm:$0xff]  }
 0x5db   : > { %5277 = vmatpush1.bf16.msra.mxu0 %v20898_v62  ;;  %v20941_v62 = vld [vmem:[%s23743_s13 + $0x638] ss:$12 sps:$4 sm:$0xff]  }
 0x5dc   : > { %5278 = vmatprep.subr.bf16.mxu0 %v20905_v63  ;;  %v20942_v63 = vld [vmem:[%s23743_s13 + $0x710] ss:$12 sps:$4 sm:$0xff]  }
 0x5dd   : > { %19487 = vmatpush3.bf16.msra.mxu1 %v20906_v38  ;;  %v20938_v38 = vld [vmem:[%s23743_s13 + $0x588] ss:$12 sps:$4 sm:$0xff]  }
 0x5de   : > { %19488 = vmatprep.subr.bf16.mxu1 %v20907_v3  ;;  %v20945_v3 = vld [vmem:[%s23743_s13 + $0x5a4] ss:$12 sps:$4 sm:$0xff]  }
 0x5df   : > { %5279 = vmatpush1.bf16.msra.mxu0 %v20903_v4  ;;  %v20946_v4 = vld [vmem:[%s23743_s13 + $0x650] ss:$12 sps:$4 sm:$0xff]  }
 0x5e0   : > { %5280 = vmatprep.subr.bf16.mxu0 %v20910_v14  ;;  %v20947_v14 = vld [vmem:[%s23743_s13 + $0x728] ss:$12 sps:$4 sm:$0xff]  }
 0x5e1   : > { %19489 = vmatpush3.bf16.msra.mxu1 %v20911_v16  ;;  %v20943_v16 = vld [vmem:[%s23743_s13 + $0x5a0] ss:$12 sps:$4 sm:$0xff]  }
 0x5e2   : > { %19490 = vmatprep.subr.bf16.mxu1 %v20912_v17  ;;  %v20950_v17 = vld [vmem:[%s23743_s13 + $0x5bc] ss:$12 sps:$4 sm:$0xff]  }
 0x5e3   : > { %5281 = vmatpush1.bf16.msra.mxu0 %v20908_v11  ;;  %v2986_v55 = vpop.f32.mrb[8].mxu1  ;;  %v20951_v11 = vld [vmem:[%s23743_s13 + $0x668] ss:$12 sps:$4 sm:$0xff]  }
 0x5e4   : > { %v19873_v9 = vadd.f32 %v2986_v55, %v1178_v5  ;;  %v2988_v28 = vpop.f32.mrb[9].mxu1  ;;  %5282 = vmatprep.subr.bf16.mxu0 %v20915_v18  ;;  %v20948_v18 = vld [vmem:[%s23743_s13 + $0x5b8] ss:$12 sps:$4 sm:$0xff]   ;;  %v20953_v55 = vld [vmem:[%s23743_s13 + $0x5d0] ss:$12 sps:$4 sm:$0xff]  }
 0x5e5   : > { %v19874_v12 = vadd.f32 %v2988_v28, %v1182_v25  ;;  %v2990_v31 = vpop.f32.mrb[10].mxu1  ;;  %19491 = vmatpush3.bf16.msra.mxu1 %v20916_v10  ;;  %v20956_v10 = vld [vmem:[%s23743_s13 + $0x680] ss:$12 sps:$4 sm:$0xff]   ;;  %v20962_v28 = vld [vmem:[%s23743_s13 + $0x770] ss:$12 sps:$4 sm:$0xff]  }
 0x5e6   : > { %v19875_v33 = vadd.f32 %v2990_v31, %v1178_v5  ;;  %v2992_v1 = vpop.f32.mrb[11].mxu1  ;;  %19492 = vmatprep.subr.bf16.mxu1 %v20917_v42  ;;  %v3173_v36 = vmax.f32 %v19873_v9, 0.0  ;;  %v20952_v5 = vld [vmem:[%s23743_s13 + $0x740] ss:$12 sps:$4 sm:$0xff]   ;;  %v20957_v42 = vld [vmem:[%s23743_s13 + $0x758] ss:$12 sps:$4 sm:$0xff]  }
 0x5e7   : > { %v19876_v35 = vadd.f32 %v2992_v1, %v1182_v25  ;;  %5283 = vmatpush1.bf16.msra.mxu0 %v20913_v27  ;;  %v3174_v39 = vmax.f32 %v19874_v12, 0.0  ;;  %v20955_v25 = vld [vmem:[%s23743_s13 + $0x5d4] ss:$12 sps:$4 sm:$0xff]   ;;  %v20960_v27 = vld [vmem:[%s23743_s13 + $0x5ec] ss:$12 sps:$4 sm:$0xff]  }
 0x5e8   : > { %v3185_v37 = vmax.f32 %v19875_v33, 0.0  ;;  %5284 = vmatprep.subr.bf16.mxu0 %v20920_v29  ;;  %v20961_v9 = vld [vmem:[%s23743_s13 + $0x698] ss:$12 sps:$4 sm:$0xff]   ;;  %v20958_v29 = vld [vmem:[%s23743_s13 + $0x5e8] ss:$12 sps:$4 sm:$0xff]  }
 0x5e9   : > { %v3186_v40 = vmax.f32 %v19876_v35, 0.0  ;;  %19493 = vmatpush3.bf16.msra.mxu1 %v20921_v32  ;;  %v20965_v12 = vld [vmem:[%s23743_s13 + $0x604] ss:$12 sps:$4 sm:$0xff]   ;;  %v20991_v32 = vld [vmem:[%s23743_s13 + $0x848] ss:$12 sps:$4 sm:$0xff]  }
 0x5ea   : > { %v24434_v43 = vpack.c.bf16 %v3185_v37, %v3173_v36  ;;  %19494 = vmatprep.subr.bf16.mxu1 %v20922_v34  ;;  %v20966_v31 = vld [vmem:[%s23743_s13 + $0x6b0] ss:$12 sps:$4 sm:$0xff]   ;;  %v20963_v33 = vld [vmem:[%s23743_s13 + $0x600] ss:$12 sps:$4 sm:$0xff]   ;;  %v20992_v34 = vld [vmem:[%s23743_s13 + $0x788] ss:$12 sps:$4 sm:$0xff]  }
 0x5eb   : > { %v3198_v45 = vpack.c.bf16 %v3186_v40, %v3174_v39  ;;  %5285 = vmatpush1.bf16.msra.mxu0 %v20918_v51  ;;  %v20969_v1 = vld [vmem:[%s23743_s13 + $0x61c] ss:$12 sps:$4 sm:$0xff]   ;;  %v20996_v35 = vld [vmem:[%s23743_s13 + $0x860] ss:$12 sps:$4 sm:$0xff]   ;;  %v20967_v51 = vld [vmem:[%s23743_s13 + $0x618] ss:$12 sps:$4 sm:$0xff]  }
 0x5ec   : > { %5286 = vmatprep.subr.bf16.mxu0 %v20925_v21  ;;  %v20972_v36 = vld [vmem:[%s23743_s13 + $0x634] ss:$12 sps:$4 sm:$0xff]   ;;  %v21001_v21 = vld [vmem:[%s23743_s13 + $0x878] ss:$12 sps:$4 sm:$0xff]   ;;  %v20970_v39 = vld [vmem:[%s23743_s13 + $0x630] ss:$12 sps:$4 sm:$0xff]  }
 0x5ed   : > { %5302 = vmatprep.mubr.bf16.mxu0 %v3198_v45  ;;  %19495 = vmatpush3.bf16.msra.mxu1 %v20926_v41  ;;  %v20997_v37 = vld [vmem:[%s23743_s13 + $0x7a0] ss:$12 sps:$4 sm:$0xff]   ;;  %v21006_v41 = vld [vmem:[%s23743_s13 + $0x890] ss:$12 sps:$4 sm:$0xff]  }
 0x5ee   : > { %5554 = vmatprep.mubr.bf16.mxu1 %v3198_v45  ;;  %19502 = vmatprep.subr.bf16.mxu1 %v20927_v44  ;;  %v20975_v40 = vld [vmem:[%s23743_s13 + $0x64c] ss:$12 sps:$4 sm:$0xff]   ;;  %v20978_v44 = vld [vmem:[%s23743_s13 + $0x664] ss:$12 sps:$4 sm:$0xff]  }
 0x5ef   : > { %5287 = vmatpush1.bf16.msra.mxu0 %v20923_v19  ;;  %v21007_v45 = vld [vmem:[%s23743_s13 + $0x7d0] ss:$12 sps:$4 sm:$0xff]   ;;  %v21011_v19 = vld [vmem:[%s23743_s13 + $0x8a8] ss:$12 sps:$4 sm:$0xff]  }
 0x5f0   : > { %5555 = vmatmul.mubr.bf16.vlgmr.msra.gmra.mrb[28].mxu1 %v24434_v43  ;;  %5288 = vmatprep.subr.bf16.mxu0 %v20930_v50  ;;  %v20976_v50 = vld [vmem:[%s23743_s13 + $0x660] ss:$12 sps:$4 sm:$0xff]  }
 0x5f1   : > { %19503 = vmatpush3.bf16.msra.mxu1 %v20931_v53  ;;  %5595 = vmatprep.mubr.bf16.mxu1 %v24321_v26  ;;  %v20981_v53 = vld [vmem:[%s23743_s13 + $0x67c] ss:$12 sps:$4 sm:$0xff]  }
 0x5f2   : > { %19504 = vmatprep.subr.bf16.mxu1 %v20932_v56  ;;  %v21012_v56 = vld [vmem:[%s23743_s13 + $0x7e8] ss:$12 sps:$4 sm:$0xff]  }
 0x5f3   : > { %5289 = vmatpush1.bf16.msra.mxu0 %v20928_v57  ;;  %v21016_v57 = vld [vmem:[%s23743_s13 + $0x8c0] ss:$12 sps:$4 sm:$0xff]  }
 0x5f4   : > { %5290 = vmatprep.subr.bf16.mxu0 %v20935_v58  ;;  %v20979_v58 = vld [vmem:[%s23743_s13 + $0x678] ss:$12 sps:$4 sm:$0xff]  }
 0x5f5   : > { %19505 = vmatpush3.bf16.msra.mxu1 %v20936_v59  ;;  %v20984_v59 = vld [vmem:[%s23743_s13 + $0x694] ss:$12 sps:$4 sm:$0xff]  }
 0x5f6   : > { %19506 = vmatprep.subr.bf16.mxu1 %v20937_v60  ;;  %v21017_v60 = vld [vmem:[%s23743_s13 + $0x800] ss:$12 sps:$4 sm:$0xff]  }
 0x5f7   : > { %5291 = vmatpush1.bf16.msra.mxu0 %v20933_v61  ;;  %v21021_v61 = vld [vmem:[%s23743_s13 + $0x8d8] ss:$12 sps:$4 sm:$0xff]  }
 0x5f8   : > { %5292 = vmatprep.subr.bf16.mxu0 %v20940_v52  ;;  %v20982_v52 = vld [vmem:[%s23743_s13 + $0x690] ss:$12 sps:$4 sm:$0xff]  }
 0x5f9   : > { %19507 = vmatpush3.bf16.msra.mxu1 %v20941_v62  ;;  %v20987_v62 = vld [vmem:[%s23743_s13 + $0x6ac] ss:$12 sps:$4 sm:$0xff]  }
 0x5fa   : > { %19508 = vmatprep.subr.bf16.mxu1 %v20942_v63  ;;  %v21022_v63 = vld [vmem:[%s23743_s13 + $0x818] ss:$12 sps:$4 sm:$0xff]  }
 0x5fb   : > { %5293 = vmatpush1.bf16.msra.mxu0 %v20938_v38  ;;  %v21026_v38 = vld [vmem:[%s23743_s13 + $0x8f0] ss:$12 sps:$4 sm:$0xff]  }
 0x5fc   : > { %5294 = vmatprep.subr.bf16.mxu0 %v20945_v3  ;;  %v20985_v3 = vld [vmem:[%s23743_s13 + $0x6a8] ss:$12 sps:$4 sm:$0xff]  }
 0x5fd   : > { %19509 = vmatpush3.bf16.msra.mxu1 %v20946_v4  ;;  %v20990_v4 = vld [vmem:[%s23743_s13 + $0x6c4] ss:$12 sps:$4 sm:$0xff]  }
 0x5fe   : > { %19510 = vmatprep.subr.bf16.mxu1 %v20947_v14  ;;  %v21027_v14 = vld [vmem:[%s23743_s13 + $0x830] ss:$12 sps:$4 sm:$0xff]  }
 0x5ff   : > { %5295 = vmatpush1.bf16.msra.mxu0 %v20943_v16  ;;  %v20988_v16 = vld [vmem:[%s23743_s13 + $0x6c0] ss:$12 sps:$4 sm:$0xff]  }
 0x600   : > { %5296 = vmatprep.subr.bf16.mxu0 %v20950_v17  ;;  %v20995_v17 = vld [vmem:[%s23743_s13 + $0x6dc] ss:$12 sps:$4 sm:$0xff]  }
 0x601   : > { %19511 = vmatpush3.bf16.msra.mxu1 %v20951_v11  ;;  %v20993_v11 = vld [vmem:[%s23743_s13 + $0x6d8] ss:$12 sps:$4 sm:$0xff]  }
 0x602   : > { %19512 = vmatprep.subr.bf16.mxu1 %v20952_v5  ;;  %v21000_v5 = vld [vmem:[%s23743_s13 + $0x6f4] ss:$12 sps:$4 sm:$0xff]  }
 0x603   : > { %5297 = vmatpush1.bf16.msra.mxu0 %v20948_v18  ;;  %v20998_v18 = vld [vmem:[%s23743_s13 + $0x6f0] ss:$12 sps:$4 sm:$0xff]  }
 0x604   : > { %5298 = vmatprep.subr.bf16.mxu0 %v20955_v25  ;;  %v21005_v25 = vld [vmem:[%s23743_s13 + $0x70c] ss:$12 sps:$4 sm:$0xff]  }
 0x605   : > { %19513 = vmatpush3.bf16.msra.mxu1 %v20956_v10  ;;  %v21003_v10 = vld [vmem:[%s23743_s13 + $0x708] ss:$12 sps:$4 sm:$0xff]  }
 0x606   : > { %19514 = vmatprep.subr.bf16.mxu1 %v20957_v42  ;;  %v21010_v42 = vld [vmem:[%s23743_s13 + $0x724] ss:$12 sps:$4 sm:$0xff]  }
 0x607   : > { %5299 = vmatpush1.bf16.msra.mxu0 %v20953_v55  ;;  %v21008_v55 = vld [vmem:[%s23743_s13 + $0x720] ss:$12 sps:$4 sm:$0xff]  }
 0x608   : > { %5300 = vmatprep.subr.bf16.mxu0 %v20960_v27  ;;  %v21015_v27 = vld [vmem:[%s23743_s13 + $0x73c] ss:$12 sps:$4 sm:$0xff]  }
 0x609   : > { %19515 = vmatpush3.bf16.msra.mxu1 %v20961_v9  ;;  %v21013_v9 = vld [vmem:[%s23743_s13 + $0x738] ss:$12 sps:$4 sm:$0xff]  }
 0x60a   : > { %19516 = vmatprep.subr.bf16.mxu1 %v20962_v28  ;;  %v1194_v28 = vrot.slane %v24299_v54, %v23775_v48 }
 0x60b   : > { %5301 = vmatpush1.bf16.msra.mxu0 %v20958_v29  ;;  %v21020_v29 = vld [vmem:[%s23743_s13 + $0x754] ss:$12 sps:$4 sm:$0xff]  }
 0x60c   : > { %5313 = vmatprep.subr.bf16.mxu0 %v20965_v12  ;;  %v1198_v12 = vrot.slane %v24299_v54, %v24296_v30  ;;  %v21030_v54 = vld [vmem:[%s23743_s13 + $0x784] ss:$12 sps:$4 sm:$0xff]  }
 0x60d   : > { %19517 = vmatpush3.bf16.msra.mxu1 %v20966_v31 }
 0x60e   : > { %5303 = vmatmul.mubr.bf16.vlgmr.msra.gmra.mrb[8].mxu0 %v24434_v43  ;;  %19524 = vmatprep.subr.bf16.mxu1 %v20991_v32  ;;  %v20973_v43 = vld [vmem:[%s23743_s13 + $0x648] ss:$12 sps:$4 sm:$0xff]   ;;  %v21018_v32 = vld [vmem:[%s23743_s13 + $0x750] ss:$12 sps:$4 sm:$0xff]  }
 0x60f   : > { %5314 = vmatpush1.bf16.msra.mxu0 %v20963_v33  ;;  %5345 = vmatprep.mubr.bf16.mxu0 %v24321_v26  ;;  %v21002_v26 = vld [vmem:[%s23743_s13 + $0x7b8] ss:$12 sps:$4 sm:$0xff]  }
 0x610   : > { %5596 = vmatmul.mubr.bf16.vlgmr.msra.gmra.mrb[32].mxu1 %v24318_v7  ;;  %5315 = vmatprep.subr.bf16.mxu0 %v20969_v1 }
 0x611   : > { %19525 = vmatpush3.bf16.msra.mxu1 %v20992_v34  ;;  %v21025_v34 = vld [vmem:[%s23743_s13 + $0x76c] ss:$12 sps:$4 sm:$0xff]  }
 0x612   : > { %19526 = vmatprep.subr.bf16.mxu1 %v20996_v35 }
 0x613   : > { %5316 = vmatpush1.bf16.msra.mxu0 %v20967_v51 }
 0x614   : > { %5317 = vmatprep.subr.bf16.mxu0 %v20972_v36 }
 0x615   : > { %19527 = vmatpush3.bf16.msra.mxu1 %v20997_v37 }
 0x616   : > { %19528 = vmatprep.subr.bf16.mxu1 %v21001_v21 }
 0x617   : > { %5318 = vmatpush1.bf16.msra.mxu0 %v20970_v39  ;;  %v21023_v39 = vld [vmem:[%s23743_s13 + $0x768] ss:$12 sps:$4 sm:$0xff]  }
 0x618   : > { %5319 = vmatprep.subr.bf16.mxu0 %v20975_v40 }
 0x619   : > { %19529 = vmatpush3.bf16.msra.mxu1 %v21002_v26 }
 0x61a   : > { %19530 = vmatprep.subr.bf16.mxu1 %v21006_v41 }
 0x61b   : > { %5320 = vmatpush1.bf16.msra.mxu0 %v20973_v43 }
 0x61c   : > { %5321 = vmatprep.subr.bf16.mxu0 %v20978_v44 }
 0x61d   : > { %19531 = vmatpush3.bf16.msra.mxu1 %v21007_v45 }
 0x61e   : > { %19532 = vmatprep.subr.bf16.mxu1 %v21011_v19  ;;  %v21028_v19 = vld [vmem:[%s23743_s13 + $0x780] ss:$12 sps:$4 sm:$0xff]  }
 0x61f   : > { %5322 = vmatpush1.bf16.msra.mxu0 %v20976_v50  ;;  %v21033_v50 = vld [vmem:[%s23743_s13 + $0x79c] ss:$12 sps:$4 sm:$0xff]  }
 0x620   : > { %5323 = vmatprep.subr.bf16.mxu0 %v20981_v53  ;;  %v21031_v53 = vld [vmem:[%s23743_s13 + $0x798] ss:$12 sps:$4 sm:$0xff]  }
 0x621   : > { %19533 = vmatpush3.bf16.msra.mxu1 %v21012_v56  ;;  %v21036_v56 = vld [vmem:[%s23743_s13 + $0x7b4] ss:$12 sps:$4 sm:$0xff]  }
 0x622   : > { %19534 = vmatprep.subr.bf16.mxu1 %v21016_v57  ;;  %v21034_v57 = vld [vmem:[%s23743_s13 + $0x7b0] ss:$12 sps:$4 sm:$0xff]  }
 0x623   : > { %5324 = vmatpush1.bf16.msra.mxu0 %v20979_v58  ;;  %v21039_v58 = vld [vmem:[%s23743_s13 + $0x7cc] ss:$12 sps:$4 sm:$0xff]  }
 0x624   : > { %5325 = vmatprep.subr.bf16.mxu0 %v20984_v59  ;;  %v21037_v59 = vld [vmem:[%s23743_s13 + $0x7c8] ss:$12 sps:$4 sm:$0xff]  }
 0x625   : > { %19535 = vmatpush3.bf16.msra.mxu1 %v21017_v60  ;;  %v21040_v60 = vld [vmem:[%s23743_s13 + $0x7e0] ss:$12 sps:$4 sm:$0xff]  }
 0x626   : > { %19536 = vmatprep.subr.bf16.mxu1 %v21021_v61  ;;  %v21045_v61 = vld [vmem:[%s23743_s13 + $0x7fc] ss:$12 sps:$4 sm:$0xff]  }
 0x627   : > { %5326 = vmatpush1.bf16.msra.mxu0 %v20982_v52  ;;  %v21043_v52 = vld [vmem:[%s23743_s13 + $0x7f8] ss:$12 sps:$4 sm:$0xff]  }
 0x628   : > { %5327 = vmatprep.subr.bf16.mxu0 %v20987_v62  ;;  %v21048_v62 = vld [vmem:[%s23743_s13 + $0x814] ss:$12 sps:$4 sm:$0xff]  }
 0x629   : > { %19537 = vmatpush3.bf16.msra.mxu1 %v21022_v63 }
 0x62a   : > { %19538 = vmatprep.subr.bf16.mxu1 %v21026_v38  ;;  %v21046_v38 = vld [vmem:[%s23743_s13 + $0x810] ss:$12 sps:$4 sm:$0xff]  }
 0x62b   : > { %5328 = vmatpush1.bf16.msra.mxu0 %v20985_v3 }
 0x62c   : > { %5329 = vmatprep.subr.bf16.mxu0 %v20990_v4  ;;  %v21051_v4 = vld [vmem:[%s23743_s13 + $0x82c] ss:$12 sps:$4 sm:$0xff]  }
 0x62d   : > { %19539 = vmatpush3.bf16.msra.mxu1 %v21027_v14 }
 0x62f   : > { %5330 = vmatpush1.bf16.msra.mxu0 %v20988_v16 }
 0x630   : > { %5331 = vmatprep.subr.bf16.mxu0 %v20995_v17 }
 0x633   : > { %5332 = vmatpush1.bf16.msra.mxu0 %v20993_v11 }
 0x634   : > { %5333 = vmatprep.subr.bf16.mxu0 %v21000_v5  ;;  %v21049_v5 = vld [vmem:[%s23743_s13 + $0x828] ss:$12 sps:$4 sm:$0xff]  }
 0x637   : > { %5334 = vmatpush1.bf16.msra.mxu0 %v20998_v18  ;;  %v21054_v18 = vld [vmem:[%s23743_s13 + $0x844] ss:$12 sps:$4 sm:$0xff]  }
 0x638   : > { %5335 = vmatprep.subr.bf16.mxu0 %v21005_v25  ;;  %v21052_v25 = vld [vmem:[%s23743_s13 + $0x840] ss:$12 sps:$4 sm:$0xff]  }
 0x63b   : > { %5336 = vmatpush1.bf16.msra.mxu0 %v21003_v10  ;;  %v21057_v10 = vld [vmem:[%s23743_s13 + $0x85c] ss:$12 sps:$4 sm:$0xff]  }
 0x63c   : > { %5337 = vmatprep.subr.bf16.mxu0 %v21010_v42  ;;  %v21055_v42 = vld [vmem:[%s23743_s13 + $0x858] ss:$12 sps:$4 sm:$0xff]  }
 0x63f   : > { %5338 = vmatpush1.bf16.msra.mxu0 %v21008_v55  ;;  %v21060_v55 = vld [vmem:[%s23743_s13 + $0x874] ss:$12 sps:$4 sm:$0xff]  }
 0x640   : > { %5339 = vmatprep.subr.bf16.mxu0 %v21015_v27  ;;  %v21058_v27 = vld [vmem:[%s23743_s13 + $0x870] ss:$12 sps:$4 sm:$0xff]  }
 0x643   : > { %5340 = vmatpush1.bf16.msra.mxu0 %v21013_v9  ;;  %v3158_v31 = vpop.f32.mrb[12].mxu1  ;;  %v21063_v9 = vld [vmem:[%s23743_s13 + $0x88c] ss:$12 sps:$4 sm:$0xff]  }
 0x644   : > { %v19881_v33 = vadd.f32 %v3158_v31, %v1194_v28  ;;  %v3160_v1 = vpop.f32.mrb[13].mxu1  ;;  %5341 = vmatprep.subr.bf16.mxu0 %v21020_v29  ;;  %v21066_v29 = vld [vmem:[%s23743_s13 + $0x8a4] ss:$12 sps:$4 sm:$0xff]   ;;  %v21069_v31 = vld [vmem:[%s23743_s13 + $0x8bc] ss:$12 sps:$4 sm:$0xff]  }
 0x645   : > { %v19882_v35 = vadd.f32 %v3160_v1, %v1198_v12  ;;  %v3162_v51 = vpop.f32.mrb[14].mxu1  ;;  %v21072_v1 = vld [vmem:[%s23743_s13 + $0x8d4] ss:$12 sps:$4 sm:$0xff]  }
 0x646   : > { %v19883_v36 = vadd.f32 %v3162_v51, %v1194_v28  ;;  %v3164_v37 = vpop.f32.mrb[15].mxu1  ;;  %v3177_v40 = vmax.f32 %v19881_v33, 0.0  ;;  %v21061_v28 = vld [vmem:[%s23743_s13 + $0x888] ss:$12 sps:$4 sm:$0xff]   ;;  %v21067_v33 = vld [vmem:[%s23743_s13 + $0x8b8] ss:$12 sps:$4 sm:$0xff]  }
 0x647   : > { %v19884_v21 = vadd.f32 %v3164_v37, %v1198_v12  ;;  %5342 = vmatpush1.bf16.msra.mxu0 %v21018_v32  ;;  %v3178_v41 = vmax.f32 %v19882_v35, 0.0  ;;  %v21064_v12 = vld [vmem:[%s23743_s13 + $0x8a0] ss:$12 sps:$4 sm:$0xff]   ;;  %v21070_v51 = vld [vmem:[%s23743_s13 + $0x8d0] ss:$12 sps:$4 sm:$0xff]  }
 0x648   : > { %v3189_v26 = vmax.f32 %v19883_v36, 0.0  ;;  %5343 = vmatprep.subr.bf16.mxu0 %v21025_v34  ;;  %v3588_v32 = vld [vmem:[%s24556_s30] sm:$0x7]  ;;  %v21075_v37 = vld [vmem:[%s23743_s13 + $0x8ec] ss:$12 sps:$4 sm:$0xff]  }
 0x649   : > { %v3190_v43 = vmax.f32 %v19884_v21, 0.0  ;;  %v3601_v34 = vrot.slane %v3588_v32, %v23775_v48 }
 0x64a   : > { %v24525_v44 = vpack.c.bf16 %v3189_v26, %v3177_v40 }
 0x64b   : > { %v3202_v45 = vpack.c.bf16 %v3190_v43, %v3178_v41  ;;  %5344 = vmatpush1.bf16.msra.mxu0 %v21023_v39 }
 0x64c   : > { %5356 = vmatprep.subr.bf16.mxu0 %v21030_v54 }
 0x64d   : > { %5636 = vmatprep.mubr.bf16.mxu1 %v3202_v45 }
 0x64e   : > { %5346 = vmatmul.mubr.bf16.vlgmr.msra.gmra.mrb[8].mxu0 %v24318_v7  ;;  %5637 = vmatmul.mubr.bf16.vlgmr.msra.gmra.mrb[36].mxu1 %v24525_v44  ;;  %v21042_v7 = vld [vmem:[%s23743_s13 + $0x7e4] ss:$12 sps:$4 sm:$0xff]  }
 0x64f   : > { %5357 = vmatpush1.bf16.msra.mxu0 %v21028_v19  ;;  %5388 = vmatprep.mubr.bf16.mxu0 %v3202_v45  ;;  %v21073_v45 = vld [vmem:[%s23743_s13 + $0x8e8] ss:$12 sps:$4 sm:$0xff]  }
 0x650   : > { %5358 = vmatprep.subr.bf16.mxu0 %v21033_v50 }
 0x653   : > { %5359 = vmatpush1.bf16.msra.mxu0 %v21031_v53 }
 0x654   : > { %5360 = vmatprep.subr.bf16.mxu0 %v21036_v56 }
 0x657   : > { %5361 = vmatpush1.bf16.msra.mxu0 %v21034_v57 }
 0x658   : > { %5362 = vmatprep.subr.bf16.mxu0 %v21039_v58 }
 0x65b   : > { %5363 = vmatpush1.bf16.msra.mxu0 %v21037_v59 }
 0x65c   : > { %5364 = vmatprep.subr.bf16.mxu0 %v21042_v7 }
 0x65f   : > { %5365 = vmatpush1.bf16.msra.mxu0 %v21040_v60 }
 0x660   : > { %5366 = vmatprep.subr.bf16.mxu0 %v21045_v61 }
 0x663   : > { %5367 = vmatpush1.bf16.msra.mxu0 %v21043_v52  ;;  %v19430_v63 = vpop.f32.mrb[16].mxu1 }
 0x664   : > { %v19431_v3 = vpop.f32.mrb[17].mxu1  ;;  %5368 = vmatprep.subr.bf16.mxu0 %v21048_v62 }
 0x665   : > { %v19432_v14 = vadd.f32 %v19431_v3, %v19430_v63  ;;  %v19433_v16 = vpop.f32.mrb[18].mxu1 }
 0x666   : > { %v19434_v17 = vpop.f32.mrb[19].mxu1 }
 0x667   : > { %5369 = vmatpush1.bf16.msra.mxu0 %v21046_v38  ;;  %v19435_v11 = vadd.f32 %v19434_v17, %v19433_v16  ;;  %v5434_v21 = vadd.f32 %v19432_v14, %v3601_v34 }
 0x668   : > { %5370 = vmatprep.subr.bf16.mxu0 %v21051_v4 }
 0x669   : > { %v5437_v54 = vadd.f32 %v19435_v11, %v3601_v34 }
 0x66b   : > { %5371 = vmatpush1.bf16.msra.mxu0 %v21049_v5 }
 0x66c   : > { %5372 = vmatprep.subr.bf16.mxu0 %v21054_v18 }
 0x66f   : > { %5373 = vmatpush1.bf16.msra.mxu0 %v21052_v25 }
 0x670   : > { %5374 = vmatprep.subr.bf16.mxu0 %v21057_v10 }
 0x673   : > { %5375 = vmatpush1.bf16.msra.mxu0 %v21055_v42 }
 0x674   : > { %5376 = vmatprep.subr.bf16.mxu0 %v21060_v55 }
 0x677   : > { %5377 = vmatpush1.bf16.msra.mxu0 %v21058_v27 }
 0x678   : > { %5378 = vmatprep.subr.bf16.mxu0 %v21063_v9 }
 0x67b   : > { %5379 = vmatpush1.bf16.msra.mxu0 %v21061_v28 }
 0x67c   : > { %5380 = vmatprep.subr.bf16.mxu0 %v21066_v29 }
 0x67f   : > { %5381 = vmatpush1.bf16.msra.mxu0 %v21064_v12 }
 0x680   : > { %5382 = vmatprep.subr.bf16.mxu0 %v21069_v31 }
 0x683   : > { %5383 = vmatpush1.bf16.msra.mxu0 %v21067_v33  ;;  %v19452_v35 = vpop.f32.mrb[20].mxu1  ;;  %v3593_v33 = vrot.slane %v3588_v32, %v23769_v46 }
 0x684   : > { %v19453_v36 = vpop.f32.mrb[21].mxu1  ;;  %5384 = vmatprep.subr.bf16.mxu0 %v21072_v1  ;;  %v3597_v1 = vrot.slane %v3588_v32, %v23772_v47 }
 0x685   : > { %v19454_v39 = vadd.f32 %v19453_v36, %v19452_v35  ;;  %v19455_v40 = vpop.f32.mrb[22].mxu1 }
 0x686   : > { %v19456_v26 = vpop.f32.mrb[23].mxu1 }
 0x687   : > { %v5475_v41 = vadd.f32 %v19454_v39, %v5434_v21  ;;  %5385 = vmatpush1.bf16.msra.mxu0 %v21070_v51  ;;  %v19457_v43 = vadd.f32 %v19456_v26, %v19455_v40 }
 0x688   : > { %5386 = vmatprep.subr.bf16.mxu0 %v21075_v37 }
 0x689   : > { %v5478_v19 = vadd.f32 %v19457_v43, %v5437_v54 }
 0x68b   : > { %5387 = vmatpush1.bf16.msra.mxu0 %v21073_v45 }
 0x68e   : > { %5389 = vmatmul.mubr.bf16.vlgmr.msra.gmra.mrb[8].mxu0 %v24525_v44 }
 0x6a3   : > { %v19474_v50 = vpop.f32.mrb[24].mxu1 }
 0x6a4   : > { %v19475_v53 = vpop.f32.mrb[25].mxu1 }
 0x6a5   : > { %v19476_v56 = vadd.f32 %v19475_v53, %v19474_v50  ;;  %v19477_v57 = vpop.f32.mrb[26].mxu1 }
 0x6a6   : > { %v19478_v58 = vpop.f32.mrb[27].mxu1 }
 0x6a7   : > { %v5516_v59 = vadd.f32 %v19476_v56, %v5475_v41  ;;  %v19479_v7 = vadd.f32 %v19478_v58, %v19477_v57 }
 0x6a9   : > { %v5519_v60 = vadd.f32 %v19479_v7, %v5478_v19 }
 0x6c3   : > { %v19496_v61 = vpop.f32.mrb[28].mxu1 }
 0x6c4   : > { %v19497_v52 = vpop.f32.mrb[29].mxu1 }
 0x6c5   : > { %v19498_v62 = vadd.f32 %v19497_v52, %v19496_v61  ;;  %v19499_v63 = vpop.f32.mrb[30].mxu1 }
 0x6c6   : > { %v19500_v38 = vpop.f32.mrb[31].mxu1 }
 0x6c7   : > { %v5557_v3 = vadd.f32 %v19498_v62, %v5516_v59  ;;  %v19501_v4 = vadd.f32 %v19500_v38, %v19499_v63 }
 0x6c9   : > { %v5560_v14 = vadd.f32 %v19501_v4, %v5519_v60 }
 0x6e3   : > { %v19518_v16 = vpop.f32.mrb[32].mxu1 }
 0x6e4   : > { %v19519_v17 = vpop.f32.mrb[33].mxu1 }
 0x6e5   : > { %v19520_v11 = vadd.f32 %v19519_v17, %v19518_v16  ;;  %v19521_v44 = vpop.f32.mrb[34].mxu1 }
 0x6e6   : > { %v19522_v5 = vpop.f32.mrb[35].mxu1 }
 0x6e7   : > { %v5598_v18 = vadd.f32 %v19520_v11, %v5557_v3  ;;  %v19523_v25 = vadd.f32 %v19522_v5, %v19521_v44 }
 0x6e9   : > { %v5601_v10 = vadd.f32 %v19523_v25, %v5560_v14 }
 0x721   : > { %v19540_v42 = vpop.f32.mrb[36].mxu1 }
 0x722   : > { %v19541_v55 = vpop.f32.mrb[37].mxu1 }
 0x723   : > { %v19542_v27 = vadd.f32 %v19541_v55, %v19540_v42  ;;  %v19543_v9 = vpop.f32.mrb[38].mxu1  ;;  %v16865_v42 = vld [vmem:[%s23765_s1 + $0x3] sm:$0x7] }
 0x724   : > { %v19544_v28 = vpop.f32.mrb[39].mxu1 }
 0x725   : > { %v5639_v29 = vadd.f32 %v19542_v27, %v5598_v18  ;;  %v19545_v12 = vadd.f32 %v19544_v28, %v19543_v9 }
 0x727   : > { %v5642_v31 = vadd.f32 %v19545_v12, %v5601_v10  ;;  %v24578_v43 = vadd.f32 %v5639_v29, %v23787_v13  ;;  %v16863_v10 = vld [vmem:[%s23761_s15 + $0x3] sm:$0x7]  ;;  %v5725_v29 = vrot.slane %v16865_v42, %v23769_v46  ;;  %v5729_v12 = vrot.slane %v16865_v42, %v23772_v47 }
 0x728   : > { %v5703_v55 = vrot.slane %v16863_v10, %v23769_v46  ;;  %v5707_v27 = vrot.slane %v16863_v10, %v23772_v47  ;;  %v5711_v9 = vrot.slane %v16863_v10, %v23775_v48  ;;  %v21105_v10 = vld [vmem:[%s23737_s17 + $0xa94] ss:$48 sps:$4 sm:$0xff]  }
 0x761   : > { %v5390_v34 = vpop.f32.mrb[8].mxu0 }
 0x762   : > { %v19885_v35 = vadd.f32 %v5390_v34, %v3593_v33  ;;  %v5392_v51 = vpop.f32.mrb[9].mxu0 }
 0x763   : > { %v19886_v36 = vadd.f32 %v5392_v51, %v3597_v1  ;;  %v5394_v37 = vpop.f32.mrb[10].mxu0 }
 0x764   : > { %v24569_v21 = vadd.f32 %v19885_v35, %v23783_v6  ;;  %v19887_v39 = vadd.f32 %v5394_v37, %v3593_v33  ;;  %v5396_v40 = vpop.f32.mrb[11].mxu0  ;;  %v24586_v6 = vadd.f32 %v5642_v31, %v23796_v24  ;;  %v5733_v35 = vrot.slane %v16865_v42, %v23775_v48  ;;  %v21100_v42 = vld [vmem:[%s23737_s17 + $0xa80] ss:$48 sps:$4 sm:$0xff]  }
 0x765   : > { %v24572_v26 = vadd.f32 %v19886_v36, %v23785_v8  ;;  %v19888_v54 = vadd.f32 %v5396_v40, %v3597_v1 }
 0x766   : > { %v24575_v41 = vadd.f32 %v19887_v39, %v23792_v20 }
 0x767   : > { %v24581_v32 = vadd.f32 %v19888_v54, %v23794_v22  ;;  %v5657_v45 = vadd.f32 %v24572_v26, %v24569_v21 }
 0x769   : > { %v5658_v19 = vadd.f32 %v5657_v45, %v24578_v43  ;;  %v5661_v8 = vadd.f32 %v24581_v32, %v24575_v41 }
 0x76b   : > { %5659 = vadd.xlane.f32.xlu0 %v5658_v19  ;;  %v5662_v20 = vadd.f32 %v5661_v8, %v24586_v6 }
 0x76d   : > { %5663 = vadd.xlane.f32.xlu1 %v5662_v20 }
 0x7f8   : > { %v5660_v13 = vpop.xlane.xlu0 %5659 }
 0x7f9   : > { %v5665_v50 = vmul.f32 0.0026041667, %v5660_v13 }
 0x7fa   : > { %v5664_v53 = vpop.xlane.xlu1 %5663 }
 0x7fb   : > { %v5667_v22 = vsub.f32 %v24569_v21, %v5665_v50  ;;  %v5668_v56 = vsub.f32 %v24572_v26, %v5665_v50  ;;  %v5666_v57 = vmul.f32 0.0026041667, %v5664_v53  ;;  %v5669_v24 = vsub.f32 %v24578_v43, %v5665_v50 }
 0x7fd   : > { %v5670_v58 = vsub.f32 %v24575_v41, %v5666_v57  ;;  %v5671_v59 = vsub.f32 %v24581_v32, %v5666_v57  ;;  %v5672_v7 = vsub.f32 %v24586_v6, %v5666_v57  ;;  %v5673_v60 = vmul.f32 %v5667_v22, %v5667_v22 }
 0x7fe   : > { %v5674_v61 = vmul.f32 %v5668_v56, %v5668_v56  ;;  %v5675_v63 = vmul.f32 %v5669_v24, %v5669_v24 }
 0x7ff   : > { %v5676_v52 = vmul.f32 %v5670_v58, %v5670_v58  ;;  %v5677_v62 = vmul.f32 %v5671_v59, %v5671_v59  ;;  %v5678_v3 = vmul.f32 %v5672_v7, %v5672_v7 }
 0x800   : > { %v5679_v38 = vadd.f32 %v5674_v61, %v5673_v60 }
 0x801   : > { %v5683_v4 = vadd.f32 %v5677_v62, %v5676_v52  ;;  %v21079_v52 = vld [vmem:[%s23737_s17 + $0x910] ss:$48 sps:$4 sm:$0xff]   ;;  %v21081_v62 = vld [vmem:[%s23737_s17 + $0x914] ss:$48 sps:$4 sm:$0xff]  }
 0x802   : > { %v5680_v14 = vadd.f32 %v5679_v38, %v5675_v63  ;;  %v21084_v63 = vld [vmem:[%s23737_s17 + $0x964] ss:$48 sps:$4 sm:$0xff]   ;;  %7809 = vmatprep.subr.bf16.mxu0 %v21081_v62  ;;  %v21082_v38 = vld [vmem:[%s23737_s17 + $0x960] ss:$48 sps:$4 sm:$0xff]  }
 0x803   : > { %v5684_v16 = vadd.f32 %v5683_v4, %v5678_v3  ;;  %7810 = vmatpush1.bf16.msra.mxu0 %v21079_v52  ;;  %v21085_v3 = vld [vmem:[%s23737_s17 + $0x970] ss:$48 sps:$4 sm:$0xff]   ;;  %v21090_v4 = vld [vmem:[%s23737_s17 + $0x9c4] ss:$48 sps:$4 sm:$0xff]  }
 0x804   : > { %5681 = vadd.xlane.f32.xlu0 %v5680_v14  ;;  %v21093_v14 = vld [vmem:[%s23737_s17 + $0x9d4] ss:$48 sps:$4 sm:$0xff]  }
 0x805   : > { %5685 = vadd.xlane.f32.xlu1 %v5684_v16  ;;  %v21088_v16 = vld [vmem:[%s23737_s17 + $0x9c0] ss:$48 sps:$4 sm:$0xff]  }
 0x891   : > { %v5682_v17 = vpop.xlane.xlu0 %5681 }
 0x892   : > { %v5687_v11 = vmul.f32 0.0026041667, %v5682_v17  ;;  %v5686_v44 = vpop.xlane.xlu1 %5685  ;;  %v21091_v17 = vld [vmem:[%s23737_s17 + $0x9d0] ss:$48 sps:$4 sm:$0xff]  }
 0x893   : > { %v5688_v5 = vmul.f32 0.0026041667, %v5686_v44  ;;  %v21099_v44 = vld [vmem:[%s23737_s17 + $0xa34] ss:$48 sps:$4 sm:$0xff]  }
 0x894   : > { %v5689_v18 = vadd.f32 1e-05, %v5687_v11  ;;  %v21096_v11 = vld [vmem:[%s23737_s17 + $0xa24] ss:$48 sps:$4 sm:$0xff]  }
 0x895   : > { %v5690_v25 = vadd.f32 1e-05, %v5688_v5  ;;  %v21094_v5 = vld [vmem:[%s23737_s17 + $0xa20] ss:$48 sps:$4 sm:$0xff]  }
 0x896   : > { %22716 = vrsqrt.f32 %v5689_v18  ;;  %v21097_v18 = vld [vmem:[%s23737_s17 + $0xa30] ss:$48 sps:$4 sm:$0xff]  }
 0x897   : > { %22718 = vrsqrt.f32 %v5690_v25  ;;  %v21102_v25 = vld [vmem:[%s23737_s17 + $0xa84] ss:$48 sps:$4 sm:$0xff]  }
 0x8a0   : > { %v22717_v28 = vpop.eup %22716 }
 0x8a1   : > { %v22719_v31 = vpop.eup %22718  ;;  %v5693_v33 = vmul.f32 %v22717_v28, %v5667_v22  ;;  %v5694_v1 = vmul.f32 %v22717_v28, %v5668_v56  ;;  %v5695_v34 = vmul.f32 %v22717_v28, %v5669_v24  ;;  %v21106_v28 = vld [vmem:[%s23737_s17 + $0xae0] ss:$48 sps:$4 sm:$0xff]  }
 0x8a2   : > { %v5696_v51 = vmul.f32 %v22719_v31, %v5670_v58  ;;  %v5697_v36 = vmul.f32 %v22719_v31, %v5671_v59  ;;  %v5698_v37 = vmul.f32 %v22719_v31, %v5672_v7  ;;  %v21117_v31 = vld [vmem:[%s23737_s17 + $0xb54] ss:$48 sps:$4 sm:$0xff]  }
 0x8a3   : > { %v5715_v39 = vmul.f32 %v5703_v55, %v5693_v33  ;;  %v5716_v40 = vmul.f32 %v5707_v27, %v5694_v1  ;;  %v5717_v54 = vmul.f32 %v5711_v9, %v5695_v34  ;;  %v21112_v33 = vld [vmem:[%s23737_s17 + $0xb40] ss:$48 sps:$4 sm:$0xff]   ;;  %v21120_v34 = vld [vmem:[%s23737_s17 + $0xba4] ss:$48 sps:$4 sm:$0xff]  }
 0x8a4   : > { %v5718_v45 = vmul.f32 %v5703_v55, %v5696_v51  ;;  %v5719_v19 = vmul.f32 %v5707_v27, %v5697_v36  ;;  %v5720_v8 = vmul.f32 %v5711_v9, %v5698_v37  ;;  %v21103_v55 = vld [vmem:[%s23737_s17 + $0xa90] ss:$48 sps:$4 sm:$0xff]   ;;  %v21108_v27 = vld [vmem:[%s23737_s17 + $0xae4] ss:$48 sps:$4 sm:$0xff]  }
 0x8a5   : > { %v5737_v20 = vadd.f32 %v5725_v29, %v5715_v39  ;;  %v5738_v13 = vadd.f32 %v5729_v12, %v5716_v40  ;;  %v5739_v50 = vadd.f32 %v5733_v35, %v5717_v54  ;;  %v21111_v9 = vld [vmem:[%s23737_s17 + $0xaf4] ss:$48 sps:$4 sm:$0xff]   ;;  %v21115_v1 = vld [vmem:[%s23737_s17 + $0xb50] ss:$48 sps:$4 sm:$0xff]  }
 0x8a6   : > { %v5740_v53 = vadd.f32 %v5725_v29, %v5718_v45  ;;  %v5741_v22 = vadd.f32 %v5729_v12, %v5719_v19  ;;  %v5742_v56 = vadd.f32 %v5733_v35, %v5720_v8  ;;  %v21109_v29 = vld [vmem:[%s23737_s17 + $0xaf0] ss:$48 sps:$4 sm:$0xff]   ;;  %v21114_v12 = vld [vmem:[%s23737_s17 + $0xb44] ss:$48 sps:$4 sm:$0xff]  }
 0x8a7   : > { %v24607_v57 = vadd.f32 %v5737_v20, %v24569_v21  ;;  %v24610_v24 = vadd.f32 %v5738_v13, %v24572_v26  ;;  %v24619_v7 = vadd.f32 %v5739_v50, %v24578_v43  ;;  %v21076_v43 = vld [vmem:[%s23737_s17 + $0x900] ss:$48 sps:$4 sm:$0xff]   ;;  %v21123_v35 = vld [vmem:[%s23737_s17 + $0xbb4] ss:$48 sps:$4 sm:$0xff]  }
 0x8a8   : > { %v24613_v58 = vadd.f32 %v5740_v53, %v24575_v41  ;;  %v24616_v59 = vadd.f32 %v5741_v22, %v24581_v32  ;;  %v24624_v21 = vadd.f32 %v5742_v56, %v24586_v6  ;;  %v21078_v32 = vld [vmem:[%s23737_s17 + $0x904] ss:$48 sps:$4 sm:$0xff]   ;;  %v21118_v51 = vld [vmem:[%s23737_s17 + $0xba0] ss:$48 sps:$4 sm:$0xff]  }
 0x8a9   : > { %v5753_v60 = vadd.f32 %v24610_v24, %v24607_v57  ;;  %7637 = vmatprep.subr.bf16.mxu1 %v21078_v32  ;;  %v21087_v6 = vld [vmem:[%s23737_s17 + $0x974] ss:$48 sps:$4 sm:$0xff]   ;;  %v21121_v36 = vld [vmem:[%s23737_s17 + $0xbb0] ss:$48 sps:$4 sm:$0xff]  }
 0x8aa   : > { %v5757_v26 = vadd.f32 %v24616_v59, %v24613_v58  ;;  %7638 = vmatpush1.bf16.msra.mxu1 %v21076_v43  ;;  %7811 = vmatprep.subr.bf16.mxu0 %v21087_v6  ;;  %v21126_v37 = vld [vmem:[%s23737_s17 + $0xc04] ss:$48 sps:$4 sm:$0xff]   ;;  %v21124_v40 = vld [vmem:[%s23737_s17 + $0xc00] ss:$48 sps:$4 sm:$0xff]  }
 0x8ab   : > { %v5754_v41 = vadd.f32 %v5753_v60, %v24619_v7  ;;  %7639 = vmatprep.subr.bf16.mxu1 %v21084_v63  ;;  %7812 = vmatpush1.bf16.msra.mxu0 %v21085_v3  ;;  %v21129_v39 = vld [vmem:[%s23737_s17 + $0xc14] ss:$48 sps:$4 sm:$0xff]   ;;  %v21127_v54 = vld [vmem:[%s23737_s17 + $0xc10] ss:$48 sps:$4 sm:$0xff]  }
 0x8ac   : > { %v5758_v61 = vadd.f32 %v5757_v26, %v24624_v21  ;;  %7813 = vmatprep.subr.bf16.mxu0 %v21093_v14  ;;  %v21132_v45 = vld [vmem:[%s23737_s17 + $0xc64] ss:$48 sps:$4 sm:$0xff]   ;;  %v21130_v8 = vld [vmem:[%s23737_s17 + $0xc60] ss:$48 sps:$4 sm:$0xff]  }
 0x8ad   : > { %5755 = vadd.xlane.f32.xlu0 %v5754_v41  ;;  %v21135_v19 = vld [vmem:[%s23737_s17 + $0xc74] ss:$48 sps:$4 sm:$0xff]   ;;  %v21133_v20 = vld [vmem:[%s23737_s17 + $0xc70] ss:$48 sps:$4 sm:$0xff]  }
 0x8ae   : > { %5759 = vadd.xlane.f32.xlu1 %v5758_v61  ;;  %7640 = vmatpush1.bf16.msra.mxu1 %v21082_v38 }
 0x8af   : > { %7641 = vmatprep.subr.bf16.mxu1 %v21090_v4  ;;  %7814 = vmatpush1.bf16.msra.mxu0 %v21091_v17  ;;  %v21138_v17 = vld [vmem:[%s23737_s17 + $0xcc4] ss:$48 sps:$4 sm:$0xff]  }
 0x8b0   : > { %7815 = vmatprep.subr.bf16.mxu0 %v21099_v44  ;;  %v21136_v44 = vld [vmem:[%s23737_s17 + $0xcc0] ss:$48 sps:$4 sm:$0xff]  }
 0x8b2   : > { %7642 = vmatpush1.bf16.msra.mxu1 %v21088_v16 }
 0x8b3   : > { %7643 = vmatprep.subr.bf16.mxu1 %v21096_v11  ;;  %7816 = vmatpush1.bf16.msra.mxu0 %v21097_v18  ;;  %v21141_v11 = vld [vmem:[%s23737_s17 + $0xcd4] ss:$48 sps:$4 sm:$0xff]  }
 0x8b4   : > { %7817 = vmatprep.subr.bf16.mxu0 %v21105_v10  ;;  %v21144_v18 = vld [vmem:[%s23737_s17 + $0xd24] ss:$48 sps:$4 sm:$0xff]   ;;  %v21142_v10 = vld [vmem:[%s23737_s17 + $0xd20] ss:$48 sps:$4 sm:$0xff]  }
 0x8b6   : > { %7644 = vmatpush1.bf16.msra.mxu1 %v21094_v5  ;;  %v21139_v5 = vld [vmem:[%s23737_s17 + $0xcd0] ss:$48 sps:$4 sm:$0xff]  }
 0x8b7   : > { %7645 = vmatprep.subr.bf16.mxu1 %v21102_v25  ;;  %7818 = vmatpush1.bf16.msra.mxu0 %v21103_v55  ;;  %v21147_v25 = vld [vmem:[%s23737_s17 + $0xd34] ss:$48 sps:$4 sm:$0xff]  }
 0x8b8   : > { %7819 = vmatprep.subr.bf16.mxu0 %v21111_v9  ;;  %v21150_v55 = vld [vmem:[%s23737_s17 + $0xd84] ss:$48 sps:$4 sm:$0xff]   ;;  %v21151_v9 = vld [vmem:[%s23737_s17 + $0xd90] ss:$48 sps:$4 sm:$0xff]  }
 0x8ba   : > { %7646 = vmatpush1.bf16.msra.mxu1 %v21100_v42  ;;  %v21145_v42 = vld [vmem:[%s23737_s17 + $0xd30] ss:$48 sps:$4 sm:$0xff]  }
 0x8bb   : > { %7647 = vmatprep.subr.bf16.mxu1 %v21108_v27  ;;  %7820 = vmatpush1.bf16.msra.mxu0 %v21109_v29  ;;  %v21148_v27 = vld [vmem:[%s23737_s17 + $0xd80] ss:$48 sps:$4 sm:$0xff]   ;;  %v21156_v29 = vld [vmem:[%s23737_s17 + $0xde4] ss:$48 sps:$4 sm:$0xff]  }
 0x8bc   : > { %7821 = vmatprep.subr.bf16.mxu0 %v21117_v31  ;;  %v21154_v31 = vld [vmem:[%s23737_s17 + $0xde0] ss:$48 sps:$4 sm:$0xff]  }
 0x8be   : > { %7648 = vmatpush1.bf16.msra.mxu1 %v21106_v28  ;;  %v21153_v28 = vld [vmem:[%s23737_s17 + $0xd94] ss:$48 sps:$4 sm:$0xff]  }
 0x8bf   : > { %7649 = vmatprep.subr.bf16.mxu1 %v21114_v12  ;;  %7822 = vmatpush1.bf16.msra.mxu0 %v21115_v1  ;;  %v21159_v12 = vld [vmem:[%s23737_s17 + $0xdf4] ss:$48 sps:$4 sm:$0xff]  }
 0x8c0   : > { %7823 = vmatprep.subr.bf16.mxu0 %v21123_v35  ;;  %v21162_v1 = vld [vmem:[%s23737_s17 + $0xe44] ss:$48 sps:$4 sm:$0xff]   ;;  %v21160_v35 = vld [vmem:[%s23737_s17 + $0xe40] ss:$48 sps:$4 sm:$0xff]  }
 0x8c2   : > { %7650 = vmatpush1.bf16.msra.mxu1 %v21112_v33  ;;  %v21157_v33 = vld [vmem:[%s23737_s17 + $0xdf0] ss:$48 sps:$4 sm:$0xff]  }
 0x8c3   : > { %7651 = vmatprep.subr.bf16.mxu1 %v21120_v34  ;;  %7824 = vmatpush1.bf16.msra.mxu0 %v21121_v36  ;;  %v21165_v34 = vld [vmem:[%s23737_s17 + $0xe54] ss:$48 sps:$4 sm:$0xff]  }
 0x8c4   : > { %7825 = vmatprep.subr.bf16.mxu0 %v21129_v39  ;;  %v21168_v36 = vld [vmem:[%s23737_s17 + $0xea4] ss:$48 sps:$4 sm:$0xff]   ;;  %v21166_v39 = vld [vmem:[%s23737_s17 + $0xea0] ss:$48 sps:$4 sm:$0xff]  }
 0x8c6   : > { %7652 = vmatpush1.bf16.msra.mxu1 %v21118_v51  ;;  %v21163_v51 = vld [vmem:[%s23737_s17 + $0xe50] ss:$48 sps:$4 sm:$0xff]  }
 0x8c7   : > { %7653 = vmatprep.subr.bf16.mxu1 %v21126_v37  ;;  %7826 = vmatpush1.bf16.msra.mxu0 %v21127_v54  ;;  %v21171_v37 = vld [vmem:[%s23737_s17 + $0xeb4] ss:$48 sps:$4 sm:$0xff]  }
 0x8c8   : > { %7827 = vmatprep.subr.bf16.mxu0 %v21135_v19  ;;  %v21174_v54 = vld [vmem:[%s23737_s17 + $0xf04] ss:$48 sps:$4 sm:$0xff]  }
 0x8ca   : > { %7654 = vmatpush1.bf16.msra.mxu1 %v21124_v40  ;;  %v21169_v40 = vld [vmem:[%s23737_s17 + $0xeb0] ss:$48 sps:$4 sm:$0xff]  }
 0x8cb   : > { %7655 = vmatprep.subr.bf16.mxu1 %v21132_v45  ;;  %7828 = vmatpush1.bf16.msra.mxu0 %v21133_v20  ;;  %v21177_v45 = vld [vmem:[%s23737_s17 + $0xf14] ss:$48 sps:$4 sm:$0xff]  }
 0x8cc   : > { %7829 = vmatprep.subr.bf16.mxu0 %v21141_v11 }
 0x8ce   : > { %7656 = vmatpush1.bf16.msra.mxu1 %v21130_v8 }
 0x8cf   : > { %7657 = vmatprep.subr.bf16.mxu1 %v21138_v17  ;;  %7830 = vmatpush1.bf16.msra.mxu0 %v21139_v5 }
 0x8d0   : > { %7831 = vmatprep.subr.bf16.mxu0 %v21147_v25 }
 0x8d2   : > { %7658 = vmatpush1.bf16.msra.mxu1 %v21136_v44 }
 0x8d3   : > { %7659 = vmatprep.subr.bf16.mxu1 %v21144_v18  ;;  %7832 = vmatpush1.bf16.msra.mxu0 %v21145_v42  ;;  %v21172_v42 = vld [vmem:[%s23737_s17 + $0xf00] ss:$48 sps:$4 sm:$0xff]  }
 0x8d4   : > { %7833 = vmatprep.subr.bf16.mxu0 %v21153_v28  ;;  %v21178_v28 = vld [vmem:[%s23737_s17 + $0xf60] ss:$48 sps:$4 sm:$0xff]  }
 0x8d6   : > { %7660 = vmatpush1.bf16.msra.mxu1 %v21142_v10 }
 0x8d7   : > { %7661 = vmatprep.subr.bf16.mxu1 %v21150_v55  ;;  %7834 = vmatpush1.bf16.msra.mxu0 %v21151_v9  ;;  %v21175_v55 = vld [vmem:[%s23737_s17 + $0xf10] ss:$48 sps:$4 sm:$0xff]   ;;  %v21183_v9 = vld [vmem:[%s23737_s17 + $0xf74] ss:$48 sps:$4 sm:$0xff]  }
 0x8d8   : > { %7835 = vmatprep.subr.bf16.mxu0 %v21159_v12  ;;  %v21186_v12 = vld [vmem:[%s23737_s17 + $0xfc4] ss:$48 sps:$4 sm:$0xff]  }
 0x8da   : > { %7662 = vmatpush1.bf16.msra.mxu1 %v21148_v27  ;;  %v21180_v27 = vld [vmem:[%s23737_s17 + $0xf64] ss:$48 sps:$4 sm:$0xff]  }
 0x8db   : > { %7663 = vmatprep.subr.bf16.mxu1 %v21156_v29  ;;  %7836 = vmatpush1.bf16.msra.mxu0 %v21157_v33  ;;  %v21181_v29 = vld [vmem:[%s23737_s17 + $0xf70] ss:$48 sps:$4 sm:$0xff]  }
 0x8dc   : > { %7837 = vmatprep.subr.bf16.mxu0 %v21165_v34  ;;  %v21184_v33 = vld [vmem:[%s23737_s17 + $0xfc0] ss:$48 sps:$4 sm:$0xff]   ;;  %v21192_v34 = vld [vmem:[%s23737_s17 + $0x1024] ss:$48 sps:$4 sm:$0xff]  }
 0x8de   : > { %7664 = vmatpush1.bf16.msra.mxu1 %v21154_v31  ;;  %v21189_v31 = vld [vmem:[%s23737_s17 + $0xfd4] ss:$48 sps:$4 sm:$0xff]  }
 0x8df   : > { %7665 = vmatprep.subr.bf16.mxu1 %v21162_v1  ;;  %7838 = vmatpush1.bf16.msra.mxu0 %v21163_v51  ;;  %v21187_v1 = vld [vmem:[%s23737_s17 + $0xfd0] ss:$48 sps:$4 sm:$0xff]  }
 0x8e0   : > { %7839 = vmatprep.subr.bf16.mxu0 %v21171_v37  ;;  %v21190_v51 = vld [vmem:[%s23737_s17 + $0x1020] ss:$48 sps:$4 sm:$0xff]   ;;  %v21198_v37 = vld [vmem:[%s23737_s17 + $0x1084] ss:$48 sps:$4 sm:$0xff]  }
 0x8e2   : > { %7666 = vmatpush1.bf16.msra.mxu1 %v21160_v35  ;;  %v21195_v35 = vld [vmem:[%s23737_s17 + $0x1034] ss:$48 sps:$4 sm:$0xff]  }
 0x8e3   : > { %7667 = vmatprep.subr.bf16.mxu1 %v21168_v36  ;;  %7840 = vmatpush1.bf16.msra.mxu0 %v21169_v40  ;;  %v21193_v36 = vld [vmem:[%s23737_s17 + $0x1030] ss:$48 sps:$4 sm:$0xff]  }
 0x8e4   : > { %7852 = vmatprep.subr.bf16.mxu0 %v21177_v45  ;;  %v21196_v40 = vld [vmem:[%s23737_s17 + $0x1080] ss:$48 sps:$4 sm:$0xff]   ;;  %v21204_v45 = vld [vmem:[%s23737_s17 + $0x10e4] ss:$48 sps:$4 sm:$0xff]  }
 0x8e6   : > { %7668 = vmatpush1.bf16.msra.mxu1 %v21166_v39  ;;  %v21201_v39 = vld [vmem:[%s23737_s17 + $0x1094] ss:$48 sps:$4 sm:$0xff]  }
 0x8e7   : > { %7680 = vmatprep.subr.bf16.mxu1 %v21174_v54  ;;  %v21199_v54 = vld [vmem:[%s23737_s17 + $0x1090] ss:$48 sps:$4 sm:$0xff]  }
 0x93a   : > { %v5756_v13 = vpop.xlane.xlu0 %5755 }
 0x93b   : > { %v5761_v50 = vmul.f32 0.0026041667, %v5756_v13  ;;  %v5760_v53 = vpop.xlane.xlu1 %5759 }
 0x93c   : > { %v5762_v22 = vmul.f32 0.0026041667, %v5760_v53 }
 0x93d   : > { %v24671_v56 = vsub.f32 %v24607_v57, %v5761_v50  ;;  %v24674_v60 = vsub.f32 %v24610_v24, %v5761_v50  ;;  %v24677_v26 = vsub.f32 %v24619_v7, %v5761_v50 }
 0x93e   : > { %v24680_v41 = vsub.f32 %v24613_v58, %v5762_v22  ;;  %v24683_v61 = vsub.f32 %v24616_v59, %v5762_v22  ;;  %v24686_v43 = vsub.f32 %v24624_v21, %v5762_v22  ;;  %v24727_v22 = vld [vmem:[%s23898_s16 + $0x3] sm:$0x7] }
 0x93f   : > { %v5769_v32 = vmul.f32 %v24671_v56, %v24671_v56  ;;  %v5770_v52 = vmul.f32 %v24674_v60, %v24674_v60  ;;  %v5771_v6 = vmul.f32 %v24677_v26, %v24677_v26 }
 0x940   : > { %v5772_v62 = vmul.f32 %v24680_v41, %v24680_v41  ;;  %v5773_v63 = vmul.f32 %v24683_v61, %v24683_v61  ;;  %v5774_v3 = vmul.f32 %v24686_v43, %v24686_v43 }
 0x941   : > { %v5775_v38 = vadd.f32 %v5770_v52, %v5769_v32  ;;  %v24730_v32 = vld [vmem:[%s23906_s3 + $0x3] sm:$0x7]  ;;  %v5803_v52 = vrot.slane %v24727_v22, %v23772_v47 }
 0x942   : > { %v5779_v4 = vadd.f32 %v5773_v63, %v5772_v62  ;;  %v5799_v62 = vrot.slane %v24727_v22, %v23769_v46  ;;  %v5821_v17 = vrot.slane %v24730_v32, %v23769_v46 }
 0x943   : > { %v5776_v14 = vadd.f32 %v5775_v38, %v5771_v6 }
 0x944   : > { %v5780_v16 = vadd.f32 %v5779_v4, %v5774_v3 }
 0x945   : > { %5777 = vadd.xlane.f32.xlu0 %v5776_v14  ;;  %v5825_v14 = vrot.slane %v24730_v32, %v23772_v47 }
 0x946   : > { %5781 = vadd.xlane.f32.xlu1 %v5780_v16 }
 0x9d2   : > { %v5778_v19 = vpop.xlane.xlu0 %5777 }
 0x9d3   : > { %v5783_v8 = vmul.f32 0.0026041667, %v5778_v19  ;;  %v5782_v20 = vpop.xlane.xlu1 %5781  ;;  %v21207_v19 = vld [vmem:[%s23737_s17 + $0x10f4] ss:$48 sps:$4 sm:$0xff]  }
 0x9d4   : > { %v5784_v13 = vmul.f32 0.0026041667, %v5782_v20  ;;  %v21205_v20 = vld [vmem:[%s23737_s17 + $0x10f0] ss:$48 sps:$4 sm:$0xff]  }
 0x9d5   : > { %v5785_v50 = vadd.f32 1e-05, %v5783_v8  ;;  %v21202_v8 = vld [vmem:[%s23737_s17 + $0x10e0] ss:$48 sps:$4 sm:$0xff]  }
 0x9d6   : > { %v5786_v53 = vadd.f32 1e-05, %v5784_v13  ;;  %v21210_v13 = vld [vmem:[%s23737_s17 + $0x1144] ss:$48 sps:$4 sm:$0xff]  }
 0x9d7   : > { %22720 = vrsqrt.f32 %v5785_v50  ;;  %v21213_v50 = vld [vmem:[%s23737_s17 + $0x1154] ss:$48 sps:$4 sm:$0xff]  }
 0x9d8   : > { %22722 = vrsqrt.f32 %v5786_v53 }
 0x9e1   : > { %v24736_v63 = vpop.eup %22720 }
 0x9e2   : > { %v24738_v6 = vpop.eup %22722  ;;  %v5790_v38 = vmul.f32 %v24736_v63, %v24674_v60  ;;  %v5789_v3 = vmul.f32 %v24736_v63, %v24671_v56 }
 0x9e3   : > { %v5793_v4 = vmul.f32 %v24738_v6, %v24683_v61  ;;  %v5792_v16 = vmul.f32 %v24738_v6, %v24680_v41  ;;  %v5794_v53 = vmul.f32 %v24738_v6, %v24686_v43 }
 0x9e4   : > { %v5812_v11 = vmul.f32 %v5803_v52, %v5790_v38  ;;  %v5811_v60 = vmul.f32 %v5799_v62, %v5789_v3  ;;  %v21208_v38 = vld [vmem:[%s23737_s17 + $0x1140] ss:$48 sps:$4 sm:$0xff]  }
 0x9e5   : > { %v5815_v44 = vmul.f32 %v5803_v52, %v5793_v4  ;;  %v5814_v5 = vmul.f32 %v5799_v62, %v5792_v16  ;;  %v5791_v52 = vmul.f32 %v24736_v63, %v24677_v26  ;;  %v5807_v62 = vrot.slane %v24727_v22, %v23775_v48  ;;  %v21211_v3 = vld [vmem:[%s23737_s17 + $0x1150] ss:$48 sps:$4 sm:$0xff]   ;;  %v21216_v4 = vld [vmem:[%s23737_s17 + $0x11a4] ss:$48 sps:$4 sm:$0xff]  }
 0x9e6   : > { %v5834_v18 = vadd.f32 %v5825_v14, %v5812_v11  ;;  %v5833_v61 = vadd.f32 %v5821_v17, %v5811_v60  ;;  %v5829_v26 = vrot.slane %v24730_v32, %v23775_v48  ;;  %v21214_v22 = vld [vmem:[%s23737_s17 + $0x11a0] ss:$48 sps:$4 sm:$0xff]   ;;  %v21225_v11 = vld [vmem:[%s23737_s17 + $0x924] ss:$48 sps:$4 sm:$0xff]  }
 0x9e7   : > { %v5837_v56 = vadd.f32 %v5825_v14, %v5815_v44  ;;  %v5836_v25 = vadd.f32 %v5821_v17, %v5814_v5  ;;  %v21219_v14 = vld [vmem:[%s23737_s17 + $0x11b4] ss:$48 sps:$4 sm:$0xff]   ;;  %v5816_v43 = vmul.f32 %v5807_v62, %v5794_v53  ;;  %v5813_v6 = vmul.f32 %v5807_v62, %v5791_v52  ;;  %v21217_v63 = vld [vmem:[%s23737_s17 + $0x11b0] ss:$48 sps:$4 sm:$0xff]   ;;  %v21222_v17 = vld [vmem:[%s23737_s17 + $0x90c] ss:$48 sps:$4 sm:$0xff]  }
 0x9e8   : > { %v21220_v44 = vld [vmem:[%s23737_s17 + $0x908] ss:$48 sps:$4 sm:$0xff]   ;;  %v21223_v5 = vld [vmem:[%s23737_s17 + $0x920] ss:$48 sps:$4 sm:$0xff]   ;;  %v21270_v53 = vld [vmem:[%s23737_s17 + $0xc0c] ss:$48 sps:$4 sm:$0xff]  }
 0x9e9   : > { %v24752_v10 = vpack.c.bf16 %v5837_v56, %v5834_v18  ;;  %v24756_v41 = vpack.c.bf16 %v5836_v25, %v5833_v61  ;;  %v5838_v16 = vadd.f32 %v5829_v26, %v5816_v43  ;;  %v5835_v60 = vadd.f32 %v5829_v26, %v5813_v6  ;;  %v21228_v18 = vld [vmem:[%s23737_s17 + $0x96c] ss:$48 sps:$4 sm:$0xff]   ;;  %v21231_v56 = vld [vmem:[%s23737_s17 + $0x984] ss:$48 sps:$4 sm:$0xff]   ;;  %v21226_v61 = vld [vmem:[%s23737_s17 + $0x968] ss:$48 sps:$4 sm:$0xff]  }
 0x9ea   : > { %v21229_v25 = vld [vmem:[%s23737_s17 + $0x980] ss:$48 sps:$4 sm:$0xff]   ;;  %v21273_v52 = vld [vmem:[%s23737_s17 + $0xc24] ss:$48 sps:$4 sm:$0xff]   ;;  %v21268_v62 = vld [vmem:[%s23737_s17 + $0xc08] ss:$48 sps:$4 sm:$0xff]  }
 0x9eb   : > { %7669 = vmatprep.mubr.bf16.mxu1 %v24752_v10  ;;  %7841 = vmatprep.mubr.bf16.mxu0 %v24752_v10  ;;  %v24803_v32 = vpack.c.bf16 %v5838_v16, %v5835_v60  ;;  %v21277_v43 = vld [vmem:[%s23737_s17 + $0xc80] ss:$48 sps:$4 sm:$0xff]   ;;  %v21282_v6 = vld [vmem:[%s23737_s17 + $0xccc] ss:$48 sps:$4 sm:$0xff]   ;;  %v21285_v26 = vld [vmem:[%s23737_s17 + $0xce4] ss:$48 sps:$4 sm:$0xff]  }
 0x9ec   : > { %7670 = vmatmul.mubr.bf16.vlgmr.msra.gmra.mrb[40].mxu1 %v24756_v41  ;;  %7842 = vmatmul.mubr.bf16.vlgmr.msra.gmra.mrb[12].mxu0 %v24756_v41  ;;  %v21288_v16 = vld [vmem:[%s23737_s17 + $0xd2c] ss:$48 sps:$4 sm:$0xff]   ;;  %v21289_v60 = vld [vmem:[%s23737_s17 + $0xd40] ss:$48 sps:$4 sm:$0xff]  }
 0x9ed   : > { %7681 = vmatpush1.bf16.msra.mxu1 %v21172_v42  ;;  %7853 = vmatpush1.bf16.msra.mxu0 %v21175_v55  ;;  %v21234_v42 = vld [vmem:[%s23737_s17 + $0x9cc] ss:$48 sps:$4 sm:$0xff]   ;;  %v21237_v55 = vld [vmem:[%s23737_s17 + $0x9e4] ss:$48 sps:$4 sm:$0xff]  }
 0x9ee   : > { %7682 = vmatprep.subr.bf16.mxu1 %v21180_v27  ;;  %7854 = vmatprep.subr.bf16.mxu0 %v21183_v9  ;;  %v21232_v27 = vld [vmem:[%s23737_s17 + $0x9c8] ss:$48 sps:$4 sm:$0xff]   ;;  %v21235_v9 = vld [vmem:[%s23737_s17 + $0x9e0] ss:$48 sps:$4 sm:$0xff]  }
 0x9ef   : > { %7712 = vmatprep.mubr.bf16.mxu1 %v23246_v49  ;;  %7884 = vmatprep.mubr.bf16.mxu0 %v23246_v49 }
 0x9f1   : > { %7683 = vmatpush1.bf16.msra.mxu1 %v21178_v28  ;;  %7855 = vmatpush1.bf16.msra.mxu0 %v21181_v29  ;;  %v21240_v28 = vld [vmem:[%s23737_s17 + $0xa2c] ss:$48 sps:$4 sm:$0xff]   ;;  %v21243_v29 = vld [vmem:[%s23737_s17 + $0xa44] ss:$48 sps:$4 sm:$0xff]  }
 0x9f2   : > { %7684 = vmatprep.subr.bf16.mxu1 %v21186_v12  ;;  %7856 = vmatprep.subr.bf16.mxu0 %v21189_v31  ;;  %v21238_v12 = vld [vmem:[%s23737_s17 + $0xa28] ss:$48 sps:$4 sm:$0xff]   ;;  %v21241_v31 = vld [vmem:[%s23737_s17 + $0xa40] ss:$48 sps:$4 sm:$0xff]  }
 0x9f5   : > { %7685 = vmatpush1.bf16.msra.mxu1 %v21184_v33  ;;  %7857 = vmatpush1.bf16.msra.mxu0 %v21187_v1  ;;  %v21246_v33 = vld [vmem:[%s23737_s17 + $0xa8c] ss:$48 sps:$4 sm:$0xff]   ;;  %v21249_v1 = vld [vmem:[%s23737_s17 + $0xaa4] ss:$48 sps:$4 sm:$0xff]  }
 0x9f6   : > { %7686 = vmatprep.subr.bf16.mxu1 %v21192_v34  ;;  %7858 = vmatprep.subr.bf16.mxu0 %v21195_v35  ;;  %v21244_v34 = vld [vmem:[%s23737_s17 + $0xa88] ss:$48 sps:$4 sm:$0xff]   ;;  %v21247_v35 = vld [vmem:[%s23737_s17 + $0xaa0] ss:$48 sps:$4 sm:$0xff]  }
 0x9f9   : > { %7687 = vmatpush1.bf16.msra.mxu1 %v21190_v51  ;;  %7859 = vmatpush1.bf16.msra.mxu0 %v21193_v36  ;;  %v21252_v51 = vld [vmem:[%s23737_s17 + $0xaec] ss:$48 sps:$4 sm:$0xff]   ;;  %v21255_v36 = vld [vmem:[%s23737_s17 + $0xb04] ss:$48 sps:$4 sm:$0xff]  }
 0x9fa   : > { %7688 = vmatprep.subr.bf16.mxu1 %v21198_v37  ;;  %7860 = vmatprep.subr.bf16.mxu0 %v21201_v39  ;;  %v21250_v37 = vld [vmem:[%s23737_s17 + $0xae8] ss:$48 sps:$4 sm:$0xff]   ;;  %v21253_v39 = vld [vmem:[%s23737_s17 + $0xb00] ss:$48 sps:$4 sm:$0xff]  }
 0x9fd   : > { %7689 = vmatpush1.bf16.msra.mxu1 %v21196_v40  ;;  %7861 = vmatpush1.bf16.msra.mxu0 %v21199_v54  ;;  %v21258_v40 = vld [vmem:[%s23737_s17 + $0xb4c] ss:$48 sps:$4 sm:$0xff]   ;;  %v21261_v54 = vld [vmem:[%s23737_s17 + $0xb64] ss:$48 sps:$4 sm:$0xff]  }
 0x9fe   : > { %7690 = vmatprep.subr.bf16.mxu1 %v21204_v45  ;;  %7862 = vmatprep.subr.bf16.mxu0 %v21207_v19  ;;  %v21256_v45 = vld [vmem:[%s23737_s17 + $0xb48] ss:$48 sps:$4 sm:$0xff]   ;;  %v21259_v19 = vld [vmem:[%s23737_s17 + $0xb60] ss:$48 sps:$4 sm:$0xff]  }
 0xa01   : > { %7691 = vmatpush1.bf16.msra.mxu1 %v21202_v8  ;;  %7863 = vmatpush1.bf16.msra.mxu0 %v21205_v20  ;;  %v21264_v8 = vld [vmem:[%s23737_s17 + $0xbac] ss:$48 sps:$4 sm:$0xff]   ;;  %v21267_v20 = vld [vmem:[%s23737_s17 + $0xbc4] ss:$48 sps:$4 sm:$0xff]  }
 0xa02   : > { %7692 = vmatprep.subr.bf16.mxu1 %v21210_v13  ;;  %7864 = vmatprep.subr.bf16.mxu0 %v21213_v50  ;;  %v21262_v13 = vld [vmem:[%s23737_s17 + $0xba8] ss:$48 sps:$4 sm:$0xff]   ;;  %v21265_v50 = vld [vmem:[%s23737_s17 + $0xbc0] ss:$48 sps:$4 sm:$0xff]  }
 0xa05   : > { %7693 = vmatpush1.bf16.msra.mxu1 %v21208_v38  ;;  %7865 = vmatpush1.bf16.msra.mxu0 %v21211_v3  ;;  %v21271_v38 = vld [vmem:[%s23737_s17 + $0xc20] ss:$48 sps:$4 sm:$0xff]   ;;  %v21276_v3 = vld [vmem:[%s23737_s17 + $0xc6c] ss:$48 sps:$4 sm:$0xff]  }
 0xa06   : > { %7694 = vmatprep.subr.bf16.mxu1 %v21216_v4  ;;  %7866 = vmatprep.subr.bf16.mxu0 %v21219_v14  ;;  %v21279_v4 = vld [vmem:[%s23737_s17 + $0xc84] ss:$48 sps:$4 sm:$0xff]   ;;  %v21274_v14 = vld [vmem:[%s23737_s17 + $0xc68] ss:$48 sps:$4 sm:$0xff]  }
 0xa09   : > { %7695 = vmatpush1.bf16.msra.mxu1 %v21214_v22  ;;  %7867 = vmatpush1.bf16.msra.mxu0 %v21217_v63  ;;  %v21280_v22 = vld [vmem:[%s23737_s17 + $0xcc8] ss:$48 sps:$4 sm:$0xff]   ;;  %v21283_v63 = vld [vmem:[%s23737_s17 + $0xce0] ss:$48 sps:$4 sm:$0xff]  }
 0xa0a   : > { %7723 = vmatprep.subr.bf16.mxu1 %v21222_v17  ;;  %7981 = vmatprep.subr.bf16.mxu0 %v21225_v11  ;;  %v21291_v17 = vld [vmem:[%s23737_s17 + $0xd44] ss:$48 sps:$4 sm:$0xff]   ;;  %v21286_v11 = vld [vmem:[%s23737_s17 + $0xd28] ss:$48 sps:$4 sm:$0xff]  }
 0xa0c   : > { %7713 = vmatmul.mubr.bf16.vlgmr.msra.gmra.mrb[40].mxu1 %v24803_v32  ;;  %7885 = vmatmul.mubr.bf16.vlgmr.msra.gmra.mrb[12].mxu0 %v24803_v32 }
 0xa0d   : > { %7724 = vmatpush1.bf16.msra.mxu1 %v21220_v44  ;;  %7755 = vmatprep.mubr.bf16.mxu1 %v24752_v10  ;;  %v21294_v44 = vld [vmem:[%s23737_s17 + $0xd8c] ss:$48 sps:$4 sm:$0xff]  }
 0xa0e   : > { %7982 = vmatpush1.bf16.msra.mxu0 %v21223_v5  ;;  %8013 = vmatprep.mubr.bf16.mxu0 %v24752_v10  ;;  %v21297_v5 = vld [vmem:[%s23737_s17 + $0xda4] ss:$48 sps:$4 sm:$0xff]  }
 0xa0f   : > { %7725 = vmatprep.subr.bf16.mxu1 %v21228_v18  ;;  %7983 = vmatprep.subr.bf16.mxu0 %v21231_v56  ;;  %v21292_v18 = vld [vmem:[%s23737_s17 + $0xd88] ss:$48 sps:$4 sm:$0xff]   ;;  %v21295_v56 = vld [vmem:[%s23737_s17 + $0xda0] ss:$48 sps:$4 sm:$0xff]  }
 0xa11   : > { %7726 = vmatpush1.bf16.msra.mxu1 %v21226_v61  ;;  %v21300_v61 = vld [vmem:[%s23737_s17 + $0xdec] ss:$48 sps:$4 sm:$0xff]  }
 0xa12   : > { %7984 = vmatpush1.bf16.msra.mxu0 %v21229_v25  ;;  %7727 = vmatprep.subr.bf16.mxu1 %v21234_v42  ;;  %v21303_v25 = vld [vmem:[%s23737_s17 + $0xe04] ss:$48 sps:$4 sm:$0xff]   ;;  %v21298_v42 = vld [vmem:[%s23737_s17 + $0xde8] ss:$48 sps:$4 sm:$0xff]  }
 0xa13   : > { %7985 = vmatprep.subr.bf16.mxu0 %v21237_v55  ;;  %v21301_v55 = vld [vmem:[%s23737_s17 + $0xe00] ss:$48 sps:$4 sm:$0xff]  }
 0xa15   : > { %7728 = vmatpush1.bf16.msra.mxu1 %v21232_v27  ;;  %v21306_v27 = vld [vmem:[%s23737_s17 + $0xe4c] ss:$48 sps:$4 sm:$0xff]  }
 0xa16   : > { %7986 = vmatpush1.bf16.msra.mxu0 %v21235_v9  ;;  %7729 = vmatprep.subr.bf16.mxu1 %v21240_v28  ;;  %v21309_v9 = vld [vmem:[%s23737_s17 + $0xe64] ss:$48 sps:$4 sm:$0xff]   ;;  %v21304_v28 = vld [vmem:[%s23737_s17 + $0xe48] ss:$48 sps:$4 sm:$0xff]  }
 0xa17   : > { %7987 = vmatprep.subr.bf16.mxu0 %v21243_v29  ;;  %v21307_v29 = vld [vmem:[%s23737_s17 + $0xe60] ss:$48 sps:$4 sm:$0xff]  }
 0xa19   : > { %7730 = vmatpush1.bf16.msra.mxu1 %v21238_v12  ;;  %v21312_v12 = vld [vmem:[%s23737_s17 + $0xeac] ss:$48 sps:$4 sm:$0xff]  }
 0xa1a   : > { %7988 = vmatpush1.bf16.msra.mxu0 %v21241_v31  ;;  %7731 = vmatprep.subr.bf16.mxu1 %v21246_v33  ;;  %v21315_v31 = vld [vmem:[%s23737_s17 + $0xec4] ss:$48 sps:$4 sm:$0xff]   ;;  %v21310_v33 = vld [vmem:[%s23737_s17 + $0xea8] ss:$48 sps:$4 sm:$0xff]  }
 0xa1b   : > { %7989 = vmatprep.subr.bf16.mxu0 %v21249_v1  ;;  %v21313_v1 = vld [vmem:[%s23737_s17 + $0xec0] ss:$48 sps:$4 sm:$0xff]  }
 0xa1d   : > { %7732 = vmatpush1.bf16.msra.mxu1 %v21244_v34  ;;  %v21318_v34 = vld [vmem:[%s23737_s17 + $0xf0c] ss:$48 sps:$4 sm:$0xff]  }
 0xa1e   : > { %7990 = vmatpush1.bf16.msra.mxu0 %v21247_v35  ;;  %7733 = vmatprep.subr.bf16.mxu1 %v21252_v51  ;;  %v21321_v35 = vld [vmem:[%s23737_s17 + $0xf24] ss:$48 sps:$4 sm:$0xff]   ;;  %v21316_v51 = vld [vmem:[%s23737_s17 + $0xf08] ss:$48 sps:$4 sm:$0xff]  }
 0xa1f   : > { %7991 = vmatprep.subr.bf16.mxu0 %v21255_v36  ;;  %v21319_v36 = vld [vmem:[%s23737_s17 + $0xf20] ss:$48 sps:$4 sm:$0xff]  }
 0xa21   : > { %7734 = vmatpush1.bf16.msra.mxu1 %v21250_v37  ;;  %v21324_v37 = vld [vmem:[%s23737_s17 + $0xf6c] ss:$48 sps:$4 sm:$0xff]  }
 0xa22   : > { %7992 = vmatpush1.bf16.msra.mxu0 %v21253_v39  ;;  %7735 = vmatprep.subr.bf16.mxu1 %v21258_v40  ;;  %v21327_v39 = vld [vmem:[%s23737_s17 + $0xf84] ss:$48 sps:$4 sm:$0xff]   ;;  %v21322_v40 = vld [vmem:[%s23737_s17 + $0xf68] ss:$48 sps:$4 sm:$0xff]  }
 0xa23   : > { %7993 = vmatprep.subr.bf16.mxu0 %v21261_v54  ;;  %v21325_v54 = vld [vmem:[%s23737_s17 + $0xf80] ss:$48 sps:$4 sm:$0xff]  }
 0xa25   : > { %7736 = vmatpush1.bf16.msra.mxu1 %v21256_v45  ;;  %v21330_v45 = vld [vmem:[%s23737_s17 + $0xfcc] ss:$48 sps:$4 sm:$0xff]  }
 0xa26   : > { %7994 = vmatpush1.bf16.msra.mxu0 %v21259_v19  ;;  %7737 = vmatprep.subr.bf16.mxu1 %v21264_v8  ;;  %v21333_v19 = vld [vmem:[%s23737_s17 + $0xfe4] ss:$48 sps:$4 sm:$0xff]   ;;  %v21328_v8 = vld [vmem:[%s23737_s17 + $0xfc8] ss:$48 sps:$4 sm:$0xff]  }
 0xa27   : > { %7995 = vmatprep.subr.bf16.mxu0 %v21267_v20  ;;  %v21331_v20 = vld [vmem:[%s23737_s17 + $0xfe0] ss:$48 sps:$4 sm:$0xff]  }
 0xa29   : > { %7738 = vmatpush1.bf16.msra.mxu1 %v21262_v13  ;;  %v21336_v13 = vld [vmem:[%s23737_s17 + $0x102c] ss:$48 sps:$4 sm:$0xff]  }
 0xa2a   : > { %7996 = vmatpush1.bf16.msra.mxu0 %v21265_v50  ;;  %7739 = vmatprep.subr.bf16.mxu1 %v21270_v53  ;;  %v21339_v50 = vld [vmem:[%s23737_s17 + $0x1044] ss:$48 sps:$4 sm:$0xff]   ;;  %v21334_v53 = vld [vmem:[%s23737_s17 + $0x1028] ss:$48 sps:$4 sm:$0xff]  }
 0xa2b   : > { %7997 = vmatprep.subr.bf16.mxu0 %v21273_v52  ;;  %v21337_v52 = vld [vmem:[%s23737_s17 + $0x1040] ss:$48 sps:$4 sm:$0xff]  }
 0xa2d   : > { %7740 = vmatpush1.bf16.msra.mxu1 %v21268_v62  ;;  %v21342_v62 = vld [vmem:[%s23737_s17 + $0x108c] ss:$48 sps:$4 sm:$0xff]  }
 0xa2e   : > { %7998 = vmatpush1.bf16.msra.mxu0 %v21271_v38  ;;  %7741 = vmatprep.subr.bf16.mxu1 %v21276_v3  ;;  %v21345_v38 = vld [vmem:[%s23737_s17 + $0x10a4] ss:$48 sps:$4 sm:$0xff]   ;;  %v21340_v3 = vld [vmem:[%s23737_s17 + $0x1088] ss:$48 sps:$4 sm:$0xff]  }
 0xa2f   : > { %7999 = vmatprep.subr.bf16.mxu0 %v21279_v4  ;;  %v21343_v4 = vld [vmem:[%s23737_s17 + $0x10a0] ss:$48 sps:$4 sm:$0xff]  }
 0xa31   : > { %7742 = vmatpush1.bf16.msra.mxu1 %v21274_v14  ;;  %v21348_v14 = vld [vmem:[%s23737_s17 + $0x10ec] ss:$48 sps:$4 sm:$0xff]  }
 0xa32   : > { %8000 = vmatpush1.bf16.msra.mxu0 %v21277_v43  ;;  %7743 = vmatprep.subr.bf16.mxu1 %v21282_v6  ;;  %v21351_v43 = vld [vmem:[%s23737_s17 + $0x1104] ss:$48 sps:$4 sm:$0xff]   ;;  %v21346_v6 = vld [vmem:[%s23737_s17 + $0x10e8] ss:$48 sps:$4 sm:$0xff]  }
 0xa33   : > { %8001 = vmatprep.subr.bf16.mxu0 %v21285_v26  ;;  %v21349_v26 = vld [vmem:[%s23737_s17 + $0x1100] ss:$48 sps:$4 sm:$0xff]  }
 0xa35   : > { %7744 = vmatpush1.bf16.msra.mxu1 %v21280_v22  ;;  %v21354_v22 = vld [vmem:[%s23737_s17 + $0x114c] ss:$48 sps:$4 sm:$0xff]  }
 0xa36   : > { %8002 = vmatpush1.bf16.msra.mxu0 %v21283_v63  ;;  %7745 = vmatprep.subr.bf16.mxu1 %v21288_v16  ;;  %v21357_v63 = vld [vmem:[%s23737_s17 + $0x1164] ss:$48 sps:$4 sm:$0xff]   ;;  %v21352_v16 = vld [vmem:[%s23737_s17 + $0x1148] ss:$48 sps:$4 sm:$0xff]  }
 0xa37   : > { %8003 = vmatprep.subr.bf16.mxu0 %v21291_v17  ;;  %v21355_v17 = vld [vmem:[%s23737_s17 + $0x1160] ss:$48 sps:$4 sm:$0xff]  }
 0xa39   : > { %7746 = vmatpush1.bf16.msra.mxu1 %v21286_v11  ;;  %v21360_v11 = vld [vmem:[%s23737_s17 + $0x11ac] ss:$48 sps:$4 sm:$0xff]  }
 0xa3a   : > { %8004 = vmatpush1.bf16.msra.mxu0 %v21289_v60  ;;  %7747 = vmatprep.subr.bf16.mxu1 %v21294_v44  ;;  %v21363_v60 = vld [vmem:[%s23737_s17 + $0x11c4] ss:$48 sps:$4 sm:$0xff]   ;;  %v21358_v44 = vld [vmem:[%s23737_s17 + $0x11a8] ss:$48 sps:$4 sm:$0xff]  }
 0xa3b   : > { %8005 = vmatprep.subr.bf16.mxu0 %v21297_v5  ;;  %v21361_v5 = vld [vmem:[%s23737_s17 + $0x11c0] ss:$48 sps:$4 sm:$0xff]  }
 0xa3d   : > { %7748 = vmatpush1.bf16.msra.mxu1 %v21292_v18  ;;  %v21366_v18 = vld [vmem:[%s23737_s17 + $0x91c] ss:$48 sps:$4 sm:$0xff]  }
 0xa3e   : > { %8006 = vmatpush1.bf16.msra.mxu0 %v21295_v56  ;;  %7749 = vmatprep.subr.bf16.mxu1 %v21300_v61  ;;  %v21414_v56 = vld [vmem:[%s23743_s13 + $0x904] ss:$12 sps:$4 sm:$0xff]   ;;  %v21364_v61 = vld [vmem:[%s23737_s17 + $0x918] ss:$48 sps:$4 sm:$0xff]  }
 0xa3f   : > { %8007 = vmatprep.subr.bf16.mxu0 %v21303_v25  ;;  %v21369_v25 = vld [vmem:[%s23737_s17 + $0x97c] ss:$48 sps:$4 sm:$0xff]  }
 0xa41   : > { %7750 = vmatpush1.bf16.msra.mxu1 %v21298_v42  ;;  %v21412_v42 = vld [vmem:[%s23743_s13 + $0x900] ss:$12 sps:$4 sm:$0xff]  }
 0xa42   : > { %8008 = vmatpush1.bf16.msra.mxu0 %v21301_v55  ;;  %7751 = vmatprep.subr.bf16.mxu1 %v21306_v27  ;;  %v21420_v55 = vld [vmem:[%s23743_s13 + $0x91c] ss:$12 sps:$4 sm:$0xff]  }
 0xa43   : > { %8009 = vmatprep.subr.bf16.mxu0 %v21309_v9  ;;  %v21367_v27 = vld [vmem:[%s23737_s17 + $0x978] ss:$48 sps:$4 sm:$0xff]   ;;  %v21372_v9 = vld [vmem:[%s23737_s17 + $0x9dc] ss:$48 sps:$4 sm:$0xff]  }
 0xa45   : > { %7752 = vmatpush1.bf16.msra.mxu1 %v21304_v28  ;;  %v21418_v28 = vld [vmem:[%s23743_s13 + $0x918] ss:$12 sps:$4 sm:$0xff]  }
 0xa46   : > { %8010 = vmatpush1.bf16.msra.mxu0 %v21307_v29  ;;  %7753 = vmatprep.subr.bf16.mxu1 %v21312_v12  ;;  %v21426_v29 = vld [vmem:[%s23743_s13 + $0x934] ss:$12 sps:$4 sm:$0xff]   ;;  %v21370_v12 = vld [vmem:[%s23737_s17 + $0x9d8] ss:$48 sps:$4 sm:$0xff]  }
 0xa47   : > { %8011 = vmatprep.subr.bf16.mxu0 %v21315_v31  ;;  %v21375_v31 = vld [vmem:[%s23737_s17 + $0xa3c] ss:$48 sps:$4 sm:$0xff]  }
 0xa49   : > { %7754 = vmatpush1.bf16.msra.mxu1 %v21310_v33  ;;  %v21424_v33 = vld [vmem:[%s23743_s13 + $0x930] ss:$12 sps:$4 sm:$0xff]  }
 0xa4a   : > { %8012 = vmatpush1.bf16.msra.mxu0 %v21313_v1  ;;  %7766 = vmatprep.subr.bf16.mxu1 %v21318_v34  ;;  %v21432_v1 = vld [vmem:[%s23743_s13 + $0x94c] ss:$12 sps:$4 sm:$0xff]  }
 0xa4b   : > { %8024 = vmatprep.subr.bf16.mxu0 %v21321_v35  ;;  %v21373_v34 = vld [vmem:[%s23737_s17 + $0xa38] ss:$48 sps:$4 sm:$0xff]   ;;  %v21378_v35 = vld [vmem:[%s23737_s17 + $0xa9c] ss:$48 sps:$4 sm:$0xff]  }
 0xa4c   : > { %7756 = vmatmul.mubr.bf16.vlgmr.msra.gmra.mrb[44].mxu1 %v24756_v41 }
 0xa4d   : > { %8014 = vmatmul.mubr.bf16.vlgmr.msra.gmra.mrb[16].mxu0 %v24756_v41  ;;  %7767 = vmatpush1.bf16.msra.mxu1 %v21316_v51  ;;  %v21430_v51 = vld [vmem:[%s23743_s13 + $0x948] ss:$12 sps:$4 sm:$0xff]  }
 0xa4e   : > { %8025 = vmatpush1.bf16.msra.mxu0 %v21319_v36  ;;  %7768 = vmatprep.subr.bf16.mxu1 %v21324_v37  ;;  %v21438_v36 = vld [vmem:[%s23743_s13 + $0x964] ss:$12 sps:$4 sm:$0xff]   ;;  %v21376_v37 = vld [vmem:[%s23737_s17 + $0xa98] ss:$48 sps:$4 sm:$0xff]  }
 0xa4f   : > { %8026 = vmatprep.subr.bf16.mxu0 %v21327_v39  ;;  %7798 = vmatprep.mubr.bf16.mxu1 %v23246_v49  ;;  %v21381_v39 = vld [vmem:[%s23737_s17 + $0xafc] ss:$48 sps:$4 sm:$0xff]  }
 0xa50   : > { %8056 = vmatprep.mubr.bf16.mxu0 %v23246_v49 }
 0xa51   : > { %7769 = vmatpush1.bf16.msra.mxu1 %v21322_v40  ;;  %v21436_v40 = vld [vmem:[%s23743_s13 + $0x960] ss:$12 sps:$4 sm:$0xff]  }
 0xa52   : > { %8027 = vmatpush1.bf16.msra.mxu0 %v21325_v54  ;;  %7770 = vmatprep.subr.bf16.mxu1 %v21330_v45  ;;  %v21444_v54 = vld [vmem:[%s23743_s13 + $0x97c] ss:$12 sps:$4 sm:$0xff]  }
 0xa53   : > { %8028 = vmatprep.subr.bf16.mxu0 %v21333_v19  ;;  %v21379_v45 = vld [vmem:[%s23737_s17 + $0xaf8] ss:$48 sps:$4 sm:$0xff]   ;;  %v21384_v19 = vld [vmem:[%s23737_s17 + $0xb5c] ss:$48 sps:$4 sm:$0xff]  }
 0xa55   : > { %7771 = vmatpush1.bf16.msra.mxu1 %v21328_v8  ;;  %v21442_v8 = vld [vmem:[%s23743_s13 + $0x978] ss:$12 sps:$4 sm:$0xff]  }
 0xa56   : > { %8029 = vmatpush1.bf16.msra.mxu0 %v21331_v20  ;;  %7772 = vmatprep.subr.bf16.mxu1 %v21336_v13  ;;  %v21450_v20 = vld [vmem:[%s23743_s13 + $0x994] ss:$12 sps:$4 sm:$0xff]   ;;  %v21382_v13 = vld [vmem:[%s23737_s17 + $0xb58] ss:$48 sps:$4 sm:$0xff]  }
 0xa57   : > { %8030 = vmatprep.subr.bf16.mxu0 %v21339_v50  ;;  %v21387_v50 = vld [vmem:[%s23737_s17 + $0xbbc] ss:$48 sps:$4 sm:$0xff]  }
 0xa59   : > { %7773 = vmatpush1.bf16.msra.mxu1 %v21334_v53  ;;  %v21448_v53 = vld [vmem:[%s23743_s13 + $0x990] ss:$12 sps:$4 sm:$0xff]  }
 0xa5a   : > { %8031 = vmatpush1.bf16.msra.mxu0 %v21337_v52  ;;  %7774 = vmatprep.subr.bf16.mxu1 %v21342_v62  ;;  %v21456_v52 = vld [vmem:[%s23743_s13 + $0x9ac] ss:$12 sps:$4 sm:$0xff]  }
 0xa5b   : > { %8032 = vmatprep.subr.bf16.mxu0 %v21345_v38  ;;  %v21385_v62 = vld [vmem:[%s23737_s17 + $0xbb8] ss:$48 sps:$4 sm:$0xff]   ;;  %v21390_v38 = vld [vmem:[%s23737_s17 + $0xc1c] ss:$48 sps:$4 sm:$0xff]  }
 0xa5d   : > { %7775 = vmatpush1.bf16.msra.mxu1 %v21340_v3  ;;  %v21454_v3 = vld [vmem:[%s23743_s13 + $0x9a8] ss:$12 sps:$4 sm:$0xff]  }
 0xa5e   : > { %8033 = vmatpush1.bf16.msra.mxu0 %v21343_v4  ;;  %7776 = vmatprep.subr.bf16.mxu1 %v21348_v14  ;;  %v21462_v4 = vld [vmem:[%s23743_s13 + $0x9c4] ss:$12 sps:$4 sm:$0xff]   ;;  %v21388_v14 = vld [vmem:[%s23737_s17 + $0xc18] ss:$48 sps:$4 sm:$0xff]  }
 0xa5f   : > { %8034 = vmatprep.subr.bf16.mxu0 %v21351_v43  ;;  %v21393_v43 = vld [vmem:[%s23737_s17 + $0xc7c] ss:$48 sps:$4 sm:$0xff]  }
 0xa61   : > { %7777 = vmatpush1.bf16.msra.mxu1 %v21346_v6  ;;  %v21460_v6 = vld [vmem:[%s23743_s13 + $0x9c0] ss:$12 sps:$4 sm:$0xff]  }
 0xa62   : > { %8035 = vmatpush1.bf16.msra.mxu0 %v21349_v26  ;;  %7778 = vmatprep.subr.bf16.mxu1 %v21354_v22  ;;  %v21468_v26 = vld [vmem:[%s23743_s13 + $0x9dc] ss:$12 sps:$4 sm:$0xff]  }
 0xa63   : > { %8036 = vmatprep.subr.bf16.mxu0 %v21357_v63  ;;  %v21391_v22 = vld [vmem:[%s23737_s17 + $0xc78] ss:$48 sps:$4 sm:$0xff]   ;;  %v21396_v63 = vld [vmem:[%s23737_s17 + $0xcdc] ss:$48 sps:$4 sm:$0xff]  }
 0xa65   : > { %7779 = vmatpush1.bf16.msra.mxu1 %v21352_v16  ;;  %v21466_v16 = vld [vmem:[%s23743_s13 + $0x9d8] ss:$12 sps:$4 sm:$0xff]  }
 0xa66   : > { %8037 = vmatpush1.bf16.msra.mxu0 %v21355_v17  ;;  %7780 = vmatprep.subr.bf16.mxu1 %v21360_v11  ;;  %v21474_v17 = vld [vmem:[%s23743_s13 + $0x9f4] ss:$12 sps:$4 sm:$0xff]   ;;  %v21394_v11 = vld [vmem:[%s23737_s17 + $0xcd8] ss:$48 sps:$4 sm:$0xff]  }
 0xa67   : > { %8038 = vmatprep.subr.bf16.mxu0 %v21363_v60  ;;  %v21399_v60 = vld [vmem:[%s23737_s17 + $0xd3c] ss:$48 sps:$4 sm:$0xff]  }
 0xa69   : > { %7781 = vmatpush1.bf16.msra.mxu1 %v21358_v44  ;;  %v21472_v44 = vld [vmem:[%s23743_s13 + $0x9f0] ss:$12 sps:$4 sm:$0xff]  }
 0xa6a   : > { %8039 = vmatpush1.bf16.msra.mxu0 %v21361_v5  ;;  %7895 = vmatprep.subr.bf16.mxu1 %v21366_v18  ;;  %v21480_v5 = vld [vmem:[%s23743_s13 + $0xa0c] ss:$12 sps:$4 sm:$0xff]  }
 0xa6b   : > { %10128 = vmatprep.subr.bf16.mxu0 %v21414_v56  ;;  %v21397_v18 = vld [vmem:[%s23737_s17 + $0xd38] ss:$48 sps:$4 sm:$0xff]   ;;  %v21402_v56 = vld [vmem:[%s23737_s17 + $0xd9c] ss:$48 sps:$4 sm:$0xff]  }
 0xa6c   : > { %7799 = vmatmul.mubr.bf16.vlgmr.msra.gmra.mrb[44].mxu1 %v24803_v32 }
 0xa6d   : > { %8057 = vmatmul.mubr.bf16.vlgmr.msra.gmra.mrb[16].mxu0 %v24803_v32  ;;  %7896 = vmatpush1.bf16.msra.mxu1 %v21364_v61  ;;  %v21478_v61 = vld [vmem:[%s23743_s13 + $0xa08] ss:$12 sps:$4 sm:$0xff]  }
 0xa6e   : > { %7927 = vmatprep.mubr.bf16.mxu1 %v24752_v10  ;;  %7897 = vmatprep.subr.bf16.mxu1 %v21369_v25  ;;  %v21486_v25 = vld [vmem:[%s23743_s13 + $0xa24] ss:$12 sps:$4 sm:$0xff]  }
 0xa6f   : > { %10129 = vmatpush1.bf16.msra.mxu0 %v21412_v42  ;;  %v21400_v42 = vld [vmem:[%s23737_s17 + $0xd98] ss:$48 sps:$4 sm:$0xff]  }
 0xa70   : > { %10130 = vmatprep.subr.bf16.mxu0 %v21420_v55  ;;  %v21405_v55 = vld [vmem:[%s23737_s17 + $0xdfc] ss:$48 sps:$4 sm:$0xff]  }
 0xa71   : > { %7898 = vmatpush1.bf16.msra.mxu1 %v21367_v27  ;;  %v21484_v27 = vld [vmem:[%s23743_s13 + $0xa20] ss:$12 sps:$4 sm:$0xff]  }
 0xa72   : > { %7899 = vmatprep.subr.bf16.mxu1 %v21372_v9  ;;  %v21492_v9 = vld [vmem:[%s23743_s13 + $0xa3c] ss:$12 sps:$4 sm:$0xff]  }
 0xa73   : > { %10131 = vmatpush1.bf16.msra.mxu0 %v21418_v28  ;;  %v21403_v28 = vld [vmem:[%s23737_s17 + $0xdf8] ss:$48 sps:$4 sm:$0xff]  }
 0xa74   : > { %10132 = vmatprep.subr.bf16.mxu0 %v21426_v29  ;;  %v21408_v29 = vld [vmem:[%s23737_s17 + $0xe5c] ss:$48 sps:$4 sm:$0xff]  }
 0xa75   : > { %7900 = vmatpush1.bf16.msra.mxu1 %v21370_v12  ;;  %v21490_v12 = vld [vmem:[%s23743_s13 + $0xa38] ss:$12 sps:$4 sm:$0xff]  }
 0xa76   : > { %7901 = vmatprep.subr.bf16.mxu1 %v21375_v31  ;;  %v21498_v31 = vld [vmem:[%s23743_s13 + $0xa54] ss:$12 sps:$4 sm:$0xff]  }
 0xa77   : > { %10133 = vmatpush1.bf16.msra.mxu0 %v21424_v33  ;;  %v21406_v33 = vld [vmem:[%s23737_s17 + $0xe58] ss:$48 sps:$4 sm:$0xff]  }
 0xa78   : > { %10134 = vmatprep.subr.bf16.mxu0 %v21432_v1  ;;  %v21411_v1 = vld [vmem:[%s23737_s17 + $0xebc] ss:$48 sps:$4 sm:$0xff]  }
 0xa79   : > { %7902 = vmatpush1.bf16.msra.mxu1 %v21373_v34  ;;  %v21496_v34 = vld [vmem:[%s23743_s13 + $0xa50] ss:$12 sps:$4 sm:$0xff]  }
 0xa7a   : > { %7903 = vmatprep.subr.bf16.mxu1 %v21378_v35  ;;  %v21504_v35 = vld [vmem:[%s23743_s13 + $0xa6c] ss:$12 sps:$4 sm:$0xff]  }
 0xa7b   : > { %10135 = vmatpush1.bf16.msra.mxu0 %v21430_v51  ;;  %v21409_v51 = vld [vmem:[%s23737_s17 + $0xeb8] ss:$48 sps:$4 sm:$0xff]  }
 0xa7c   : > { %10136 = vmatprep.subr.bf16.mxu0 %v21438_v36  ;;  %v21417_v36 = vld [vmem:[%s23737_s17 + $0xf1c] ss:$48 sps:$4 sm:$0xff]  }
 0xa7d   : > { %7904 = vmatpush1.bf16.msra.mxu1 %v21376_v37  ;;  %v21502_v37 = vld [vmem:[%s23743_s13 + $0xa68] ss:$12 sps:$4 sm:$0xff]  }
 0xa7e   : > { %7905 = vmatprep.subr.bf16.mxu1 %v21381_v39  ;;  %v21534_v39 = vld [vmem:[%s23743_s13 + $0xa84] ss:$12 sps:$4 sm:$0xff]  }
 0xa7f   : > { %10137 = vmatpush1.bf16.msra.mxu0 %v21436_v40  ;;  %v21415_v40 = vld [vmem:[%s23737_s17 + $0xf18] ss:$48 sps:$4 sm:$0xff]  }
 0xa80   : > { %10138 = vmatprep.subr.bf16.mxu0 %v21444_v54  ;;  %v21423_v54 = vld [vmem:[%s23737_s17 + $0xf7c] ss:$48 sps:$4 sm:$0xff]  }
 0xa81   : > { %7906 = vmatpush1.bf16.msra.mxu1 %v21379_v45  ;;  %v21421_v45 = vld [vmem:[%s23737_s17 + $0xf78] ss:$48 sps:$4 sm:$0xff]  }
 0xa82   : > { %7907 = vmatprep.subr.bf16.mxu1 %v21384_v19  ;;  %v21429_v19 = vld [vmem:[%s23737_s17 + $0xfdc] ss:$48 sps:$4 sm:$0xff]  }
 0xa83   : > { %10139 = vmatpush1.bf16.msra.mxu0 %v21442_v8  ;;  %v21427_v8 = vld [vmem:[%s23737_s17 + $0xfd8] ss:$48 sps:$4 sm:$0xff]  }
 0xa84   : > { %10140 = vmatprep.subr.bf16.mxu0 %v21450_v20  ;;  %v21435_v20 = vld [vmem:[%s23737_s17 + $0x103c] ss:$48 sps:$4 sm:$0xff]  }
 0xa85   : > { %7908 = vmatpush1.bf16.msra.mxu1 %v21382_v13  ;;  %v21433_v13 = vld [vmem:[%s23737_s17 + $0x1038] ss:$48 sps:$4 sm:$0xff]  }
 0xa86   : > { %7909 = vmatprep.subr.bf16.mxu1 %v21387_v50  ;;  %v21441_v50 = vld [vmem:[%s23737_s17 + $0x109c] ss:$48 sps:$4 sm:$0xff]  }
 0xa87   : > { %10141 = vmatpush1.bf16.msra.mxu0 %v21448_v53  ;;  %v21439_v53 = vld [vmem:[%s23737_s17 + $0x1098] ss:$48 sps:$4 sm:$0xff]  }
 0xa88   : > { %10142 = vmatprep.subr.bf16.mxu0 %v21456_v52  ;;  %v21447_v52 = vld [vmem:[%s23737_s17 + $0x10fc] ss:$48 sps:$4 sm:$0xff]  }
 0xa89   : > { %7910 = vmatpush1.bf16.msra.mxu1 %v21385_v62  ;;  %v21445_v62 = vld [vmem:[%s23737_s17 + $0x10f8] ss:$48 sps:$4 sm:$0xff]  }
 0xa8a   : > { %7911 = vmatprep.subr.bf16.mxu1 %v21390_v38  ;;  %v21453_v38 = vld [vmem:[%s23737_s17 + $0x115c] ss:$48 sps:$4 sm:$0xff]  }
 0xa8b   : > { %10143 = vmatpush1.bf16.msra.mxu0 %v21454_v3  ;;  %v21451_v3 = vld [vmem:[%s23737_s17 + $0x1158] ss:$48 sps:$4 sm:$0xff]  }
 0xa8c   : > { %10144 = vmatprep.subr.bf16.mxu0 %v21462_v4  ;;  %v21459_v4 = vld [vmem:[%s23737_s17 + $0x11bc] ss:$48 sps:$4 sm:$0xff]  }
 0xa8d   : > { %7912 = vmatpush1.bf16.msra.mxu1 %v21388_v14  ;;  %v21457_v14 = vld [vmem:[%s23737_s17 + $0x11b8] ss:$48 sps:$4 sm:$0xff]  }
 0xa8e   : > { %7913 = vmatprep.subr.bf16.mxu1 %v21393_v43  ;;  %v21465_v43 = vld [vmem:[%s23737_s17 + $0x92c] ss:$48 sps:$4 sm:$0xff]  }
 0xa8f   : > { %10145 = vmatpush1.bf16.msra.mxu0 %v21460_v6  ;;  %v21463_v6 = vld [vmem:[%s23737_s17 + $0x928] ss:$48 sps:$4 sm:$0xff]  }
 0xa90   : > { %10146 = vmatprep.subr.bf16.mxu0 %v21468_v26  ;;  %v21471_v26 = vld [vmem:[%s23737_s17 + $0x98c] ss:$48 sps:$4 sm:$0xff]  }
 0xa91   : > { %7914 = vmatpush1.bf16.msra.mxu1 %v21391_v22  ;;  %v21469_v22 = vld [vmem:[%s23737_s17 + $0x988] ss:$48 sps:$4 sm:$0xff]  }
 0xa92   : > { %7915 = vmatprep.subr.bf16.mxu1 %v21396_v63  ;;  %v21477_v63 = vld [vmem:[%s23737_s17 + $0x9ec] ss:$48 sps:$4 sm:$0xff]  }
 0xa93   : > { %10147 = vmatpush1.bf16.msra.mxu0 %v21466_v16  ;;  %v21475_v16 = vld [vmem:[%s23737_s17 + $0x9e8] ss:$48 sps:$4 sm:$0xff]  }
 0xa94   : > { %10148 = vmatprep.subr.bf16.mxu0 %v21474_v17  ;;  %v21483_v17 = vld [vmem:[%s23737_s17 + $0xa4c] ss:$48 sps:$4 sm:$0xff]  }
 0xa95   : > { %7916 = vmatpush1.bf16.msra.mxu1 %v21394_v11  ;;  %v21481_v11 = vld [vmem:[%s23737_s17 + $0xa48] ss:$48 sps:$4 sm:$0xff]  }
 0xa96   : > { %7917 = vmatprep.subr.bf16.mxu1 %v21399_v60  ;;  %v21489_v60 = vld [vmem:[%s23737_s17 + $0xaac] ss:$48 sps:$4 sm:$0xff]  }
 0xa97   : > { %10149 = vmatpush1.bf16.msra.mxu0 %v21472_v44  ;;  %v21487_v44 = vld [vmem:[%s23737_s17 + $0xaa8] ss:$48 sps:$4 sm:$0xff]  }
 0xa98   : > { %10150 = vmatprep.subr.bf16.mxu0 %v21480_v5  ;;  %v25005_v5 = vld [vmem:[%s24185_s7 + $0xc] sm:$0xff] }
 0xa99   : > { %7918 = vmatpush1.bf16.msra.mxu1 %v21397_v18  ;;  %v6140_v18 = vrot.slane %v25005_v5, %v23769_v46 }
 0xa9a   : > { %7919 = vmatprep.subr.bf16.mxu1 %v21402_v56  ;;  %v6156_v56 = vrot.slane %v25005_v5, %v24182_v0 }
 0xa9b   : > { %10151 = vmatpush1.bf16.msra.mxu0 %v21478_v61  ;;  %v6144_v61 = vrot.slane %v25005_v5, %v23772_v47 }
 0xa9c   : > { %10152 = vmatprep.subr.bf16.mxu0 %v21486_v25  ;;  %v6160_v25 = vrot.slane %v25005_v5, %v24191_v2 }
 0xa9d   : > { %7920 = vmatpush1.bf16.msra.mxu1 %v21400_v42  ;;  %v21493_v42 = vld [vmem:[%s23737_s17 + $0xb08] ss:$48 sps:$4 sm:$0xff]  }
 0xa9e   : > { %7921 = vmatprep.subr.bf16.mxu1 %v21405_v55  ;;  %v21501_v55 = vld [vmem:[%s23737_s17 + $0xb6c] ss:$48 sps:$4 sm:$0xff]  }
 0xa9f   : > { %10153 = vmatpush1.bf16.msra.mxu0 %v21484_v27 }
 0xaa0   : > { %10154 = vmatprep.subr.bf16.mxu0 %v21492_v9 }
 0xaa1   : > { %7922 = vmatpush1.bf16.msra.mxu1 %v21403_v28 }
 0xaa2   : > { %7923 = vmatprep.subr.bf16.mxu1 %v21408_v29 }
 0xaa3   : > { %10155 = vmatpush1.bf16.msra.mxu0 %v21490_v12 }
 0xaa4   : > { %10156 = vmatprep.subr.bf16.mxu0 %v21498_v31 }
 0xaa5   : > { %7924 = vmatpush1.bf16.msra.mxu1 %v21406_v33 }
 0xaa6   : > { %7925 = vmatprep.subr.bf16.mxu1 %v21411_v1 }
 0xaa7   : > { %10157 = vmatpush1.bf16.msra.mxu0 %v21496_v34 }
 0xaa8   : > { %10158 = vmatprep.subr.bf16.mxu0 %v21504_v35 }
 0xaa9   : > { %7926 = vmatpush1.bf16.msra.mxu1 %v21409_v51  ;;  %v21499_v51 = vld [vmem:[%s23737_s17 + $0xb68] ss:$48 sps:$4 sm:$0xff]  }
 0xaaa   : > { %7938 = vmatprep.subr.bf16.mxu1 %v21417_v36 }
 0xaab   : > { %10159 = vmatpush1.bf16.msra.mxu0 %v21502_v37 }
 0xaac   : > { %7928 = vmatmul.mubr.bf16.vlgmr.msra.gmra.mrb[48].mxu1 %v24756_v41  ;;  %10171 = vmatprep.subr.bf16.mxu0 %v21534_v39 }
 0xaad   : > { %7939 = vmatpush1.bf16.msra.mxu1 %v21415_v40  ;;  %7970 = vmatprep.mubr.bf16.mxu1 %v23246_v49 }
 0xaae   : > { %7940 = vmatprep.subr.bf16.mxu1 %v21423_v54  ;;  %v21507_v54 = vld [vmem:[%s23737_s17 + $0xbcc] ss:$48 sps:$4 sm:$0xff]  }
 0xab1   : > { %7941 = vmatpush1.bf16.msra.mxu1 %v21421_v45 }
 0xab2   : > { %7942 = vmatprep.subr.bf16.mxu1 %v21429_v19 }
 0xab5   : > { %7943 = vmatpush1.bf16.msra.mxu1 %v21427_v8 }
 0xab6   : > { %7944 = vmatprep.subr.bf16.mxu1 %v21435_v20 }
 0xab9   : > { %7945 = vmatpush1.bf16.msra.mxu1 %v21433_v13 }
 0xaba   : > { %7946 = vmatprep.subr.bf16.mxu1 %v21441_v50 }
 0xabd   : > { %7947 = vmatpush1.bf16.msra.mxu1 %v21439_v53 }
 0xabe   : > { %7948 = vmatprep.subr.bf16.mxu1 %v21447_v52 }
 0xac1   : > { %7949 = vmatpush1.bf16.msra.mxu1 %v21445_v62 }
 0xac2   : > { %7950 = vmatprep.subr.bf16.mxu1 %v21453_v38 }
 0xac5   : > { %7951 = vmatpush1.bf16.msra.mxu1 %v21451_v3  ;;  %v21505_v3 = vld [vmem:[%s23737_s17 + $0xbc8] ss:$48 sps:$4 sm:$0xff]  }
 0xac6   : > { %7952 = vmatprep.subr.bf16.mxu1 %v21459_v4 }
 0xac9   : > { %7953 = vmatpush1.bf16.msra.mxu1 %v21457_v14 }
 0xaca   : > { %8067 = vmatprep.subr.bf16.mxu1 %v21465_v43  ;;  %v21510_v43 = vld [vmem:[%s23737_s17 + $0xc2c] ss:$48 sps:$4 sm:$0xff]  }
 0xacc   : > { %7971 = vmatmul.mubr.bf16.vlgmr.msra.gmra.mrb[48].mxu1 %v24803_v32 }
 0xacd   : > { %8068 = vmatpush1.bf16.msra.mxu1 %v21463_v6  ;;  %8099 = vmatprep.mubr.bf16.mxu1 %v24752_v10  ;;  %v21495_v10 = vld [vmem:[%s23737_s17 + $0xb0c] ss:$48 sps:$4 sm:$0xff]  }
 0xace   : > { %8069 = vmatprep.subr.bf16.mxu1 %v21471_v26 }
 0xad1   : > { %8070 = vmatpush1.bf16.msra.mxu1 %v21469_v22  ;;  %v21532_v22 = vld [vmem:[%s23743_s13 + $0xa80] ss:$12 sps:$4 sm:$0xff]  }
 0xad2   : > { %8071 = vmatprep.subr.bf16.mxu1 %v21477_v63  ;;  %v21540_v63 = vld [vmem:[%s23743_s13 + $0xa9c] ss:$12 sps:$4 sm:$0xff]  }
 0xad5   : > { %8072 = vmatpush1.bf16.msra.mxu1 %v21475_v16  ;;  %v21508_v16 = vld [vmem:[%s23737_s17 + $0xc28] ss:$48 sps:$4 sm:$0xff]  }
 0xad6   : > { %8073 = vmatprep.subr.bf16.mxu1 %v21483_v17  ;;  %v21513_v17 = vld [vmem:[%s23737_s17 + $0xc8c] ss:$48 sps:$4 sm:$0xff]  }
 0xad9   : > { %8074 = vmatpush1.bf16.msra.mxu1 %v21481_v11  ;;  %v21538_v11 = vld [vmem:[%s23743_s13 + $0xa98] ss:$12 sps:$4 sm:$0xff]  }
 0xada   : > { %8075 = vmatprep.subr.bf16.mxu1 %v21489_v60  ;;  %v21546_v60 = vld [vmem:[%s23743_s13 + $0xab4] ss:$12 sps:$4 sm:$0xff]  }
 0xadd   : > { %8076 = vmatpush1.bf16.msra.mxu1 %v21487_v44  ;;  %v21511_v44 = vld [vmem:[%s23737_s17 + $0xc88] ss:$48 sps:$4 sm:$0xff]  }
 0xade   : > { %8077 = vmatprep.subr.bf16.mxu1 %v21495_v10  ;;  %v21516_v10 = vld [vmem:[%s23737_s17 + $0xcec] ss:$48 sps:$4 sm:$0xff]  }
 0xadf   : > { %v7714_v27 = vpop.f32.mrb[40].mxu1  ;;  %v7886_v9 = vpop.f32.mrb[12].mxu0 }
 0xae0   : > { %v19889_v28 = vadd.f32 %v7714_v27, %v6140_v18  ;;  %v19897_v29 = vadd.f32 %v7886_v9, %v6156_v56  ;;  %v7716_v12 = vpop.f32.mrb[41].mxu1  ;;  %v7888_v31 = vpop.f32.mrb[13].mxu0  ;;  %v21517_v27 = vld [vmem:[%s23737_s17 + $0xd48] ss:$48 sps:$4 sm:$0xff]   ;;  %v21522_v9 = vld [vmem:[%s23737_s17 + $0xdac] ss:$48 sps:$4 sm:$0xff]  }
 0xae1   : > { %v19890_v33 = vadd.f32 %v7716_v12, %v6144_v61  ;;  %v19898_v1 = vadd.f32 %v7888_v31, %v6160_v25  ;;  %v7718_v34 = vpop.f32.mrb[42].mxu1  ;;  %v7890_v35 = vpop.f32.mrb[14].mxu0  ;;  %8078 = vmatpush1.bf16.msra.mxu1 %v21493_v42  ;;  %v21550_v42 = vld [vmem:[%s23743_s13 + $0xac8] ss:$12 sps:$4 sm:$0xff]   ;;  %v21525_v31 = vld [vmem:[%s23737_s17 + $0xe0c] ss:$48 sps:$4 sm:$0xff]  }
 0xae2   : > { %v19891_v36 = vadd.f32 %v7718_v34, %v6140_v18  ;;  %v19899_v37 = vadd.f32 %v7890_v35, %v6156_v56  ;;  %v7720_v39 = vpop.f32.mrb[43].mxu1  ;;  %v7892_v40 = vpop.f32.mrb[15].mxu0  ;;  %8079 = vmatprep.subr.bf16.mxu1 %v21501_v55  ;;  %v8153_v8 = vmax.f32 %v19889_v28, 0.0  ;;  %v8157_v20 = vmax.f32 %v19897_v29, 0.0  ;;  %v21544_v18 = vld [vmem:[%s23743_s13 + $0xab0] ss:$12 sps:$4 sm:$0xff]  }
 0xae3   : > { %v19892_v45 = vadd.f32 %v7720_v39, %v6144_v61  ;;  %v19900_v19 = vadd.f32 %v7892_v40, %v6160_v25  ;;  %v8154_v53 = vmax.f32 %v19890_v33, 0.0  ;;  %v8158_v52 = vmax.f32 %v19898_v1, 0.0  ;;  %v21552_v56 = vld [vmem:[%s23743_s13 + $0xacc] ss:$12 sps:$4 sm:$0xff]   ;;  %v21558_v55 = vld [vmem:[%s23743_s13 + $0xae4] ss:$12 sps:$4 sm:$0xff]  }
 0xae4   : > { %v8165_v13 = vmax.f32 %v19891_v36, 0.0  ;;  %v8169_v50 = vmax.f32 %v19899_v37, 0.0  ;;  %v21514_v61 = vld [vmem:[%s23737_s17 + $0xce8] ss:$48 sps:$4 sm:$0xff]   ;;  %v21519_v25 = vld [vmem:[%s23737_s17 + $0xd4c] ss:$48 sps:$4 sm:$0xff]  }
 0xae5   : > { %v8166_v62 = vmax.f32 %v19892_v45, 0.0  ;;  %v8170_v38 = vmax.f32 %v19900_v19, 0.0  ;;  %8080 = vmatpush1.bf16.msra.mxu1 %v21499_v51  ;;  %v21556_v28 = vld [vmem:[%s23743_s13 + $0xae0] ss:$12 sps:$4 sm:$0xff]   ;;  %v21564_v29 = vld [vmem:[%s23743_s13 + $0xafc] ss:$12 sps:$4 sm:$0xff]  }
 0xae6   : > { %v25021_v4 = vpack.c.bf16 %v8165_v13, %v8153_v8  ;;  %v25023_v14 = vpack.c.bf16 %v8169_v50, %v8157_v20  ;;  %8081 = vmatprep.subr.bf16.mxu1 %v21507_v54  ;;  %v21520_v12 = vld [vmem:[%s23737_s17 + $0xda8] ss:$48 sps:$4 sm:$0xff]   ;;  %v21570_v1 = vld [vmem:[%s23743_s13 + $0xb14] ss:$12 sps:$4 sm:$0xff]   ;;  %v21528_v35 = vld [vmem:[%s23737_s17 + $0xe6c] ss:$48 sps:$4 sm:$0xff]  }
 0xae7   : > { %v25026_v6 = vpack.c.bf16 %v8166_v62, %v8154_v53  ;;  %v25028_v26 = vpack.c.bf16 %v8170_v38, %v8158_v52  ;;  %v21562_v33 = vld [vmem:[%s23743_s13 + $0xaf8] ss:$12 sps:$4 sm:$0xff]   ;;  %v21568_v51 = vld [vmem:[%s23743_s13 + $0xb10] ss:$12 sps:$4 sm:$0xff]   ;;  %v21574_v40 = vld [vmem:[%s23743_s13 + $0xb28] ss:$12 sps:$4 sm:$0xff]  }
 0xae8   : > { %v21523_v34 = vld [vmem:[%s23737_s17 + $0xe08] ss:$48 sps:$4 sm:$0xff]   ;;  %v21531_v39 = vld [vmem:[%s23737_s17 + $0xecc] ss:$48 sps:$4 sm:$0xff]   ;;  %v21582_v54 = vld [vmem:[%s23743_s13 + $0xb44] ss:$12 sps:$4 sm:$0xff]  }
 0xae9   : > { %8082 = vmatpush1.bf16.msra.mxu1 %v21505_v3  ;;  %10160 = vmatprep.mubr.bf16.mxu0 %v25026_v6  ;;  %v21576_v36 = vld [vmem:[%s23743_s13 + $0xb2c] ss:$12 sps:$4 sm:$0xff]   ;;  %v21586_v20 = vld [vmem:[%s23743_s13 + $0xb5c] ss:$12 sps:$4 sm:$0xff]   ;;  %v21591_v52 = vld [vmem:[%s23743_s13 + $0xb74] ss:$12 sps:$4 sm:$0xff]  }
 0xaea   : > { %10161 = vmatmul.mubr.bf16.vlgmr.msra.gmra.mrb[20].mxu0 %v25021_v4  ;;  %8083 = vmatprep.subr.bf16.mxu1 %v21510_v43  ;;  %v21526_v37 = vld [vmem:[%s23737_s17 + $0xe68] ss:$48 sps:$4 sm:$0xff]   ;;  %v21537_v19 = vld [vmem:[%s23737_s17 + $0xf2c] ss:$48 sps:$4 sm:$0xff]  }
 0xaeb   : > { %10172 = vmatpush1.bf16.msra.mxu0 %v21532_v22  ;;  %v21529_v45 = vld [vmem:[%s23737_s17 + $0xec8] ss:$48 sps:$4 sm:$0xff]   ;;  %v21580_v8 = vld [vmem:[%s23743_s13 + $0xb40] ss:$12 sps:$4 sm:$0xff]   ;;  %v21589_v3 = vld [vmem:[%s23743_s13 + $0xb70] ss:$12 sps:$4 sm:$0xff]  }
 0xaec   : > { %10173 = vmatprep.subr.bf16.mxu0 %v21540_v63  ;;  %v21535_v13 = vld [vmem:[%s23737_s17 + $0xf28] ss:$48 sps:$4 sm:$0xff]   ;;  %v21543_v50 = vld [vmem:[%s23737_s17 + $0xf8c] ss:$48 sps:$4 sm:$0xff]  }
 0xaed   : > { %8084 = vmatpush1.bf16.msra.mxu1 %v21508_v16  ;;  %v21584_v53 = vld [vmem:[%s23743_s13 + $0xb58] ss:$12 sps:$4 sm:$0xff]   ;;  %v21549_v38 = vld [vmem:[%s23737_s17 + $0xfec] ss:$48 sps:$4 sm:$0xff]   ;;  %v21594_v63 = vld [vmem:[%s23743_s13 + $0xb88] ss:$12 sps:$4 sm:$0xff]  }
 0xaee   : > { %8085 = vmatprep.subr.bf16.mxu1 %v21513_v17  ;;  %v21541_v62 = vld [vmem:[%s23737_s17 + $0xf88] ss:$48 sps:$4 sm:$0xff]   ;;  %v21555_v22 = vld [vmem:[%s23737_s17 + $0x104c] ss:$48 sps:$4 sm:$0xff]   ;;  %v21601_v16 = vld [vmem:[%s23743_s13 + $0xba4] ss:$12 sps:$4 sm:$0xff]  }
 0xaef   : > { %10174 = vmatpush1.bf16.msra.mxu0 %v21538_v11  ;;  %v21596_v43 = vld [vmem:[%s23743_s13 + $0xb8c] ss:$12 sps:$4 sm:$0xff]  }
 0xaf0   : > { %10175 = vmatprep.subr.bf16.mxu0 %v21546_v60  ;;  %v21553_v17 = vld [vmem:[%s23737_s17 + $0x1048] ss:$48 sps:$4 sm:$0xff]   ;;  %v21561_v11 = vld [vmem:[%s23737_s17 + $0x10ac] ss:$48 sps:$4 sm:$0xff]  }
 0xaf1   : > { %8086 = vmatpush1.bf16.msra.mxu1 %v21511_v44  ;;  %v21599_v60 = vld [vmem:[%s23743_s13 + $0xba0] ss:$12 sps:$4 sm:$0xff]   ;;  %v21606_v44 = vld [vmem:[%s23743_s13 + $0xbbc] ss:$12 sps:$4 sm:$0xff]  }
 0xaf2   : > { %8087 = vmatprep.subr.bf16.mxu1 %v21516_v10  ;;  %v21559_v10 = vld [vmem:[%s23737_s17 + $0x10a8] ss:$48 sps:$4 sm:$0xff]  }
 0xaf3   : > { %10176 = vmatpush1.bf16.msra.mxu0 %v21544_v18  ;;  %v21567_v18 = vld [vmem:[%s23737_s17 + $0x110c] ss:$48 sps:$4 sm:$0xff]  }
 0xaf4   : > { %10177 = vmatprep.subr.bf16.mxu0 %v21552_v56  ;;  %v21604_v56 = vld [vmem:[%s23743_s13 + $0xbb8] ss:$12 sps:$4 sm:$0xff]  }
 0xaf5   : > { %8088 = vmatpush1.bf16.msra.mxu1 %v21514_v61  ;;  %v21611_v61 = vld [vmem:[%s23743_s13 + $0xbd4] ss:$12 sps:$4 sm:$0xff]  }
 0xaf6   : > { %8089 = vmatprep.subr.bf16.mxu1 %v21519_v25  ;;  %v21565_v25 = vld [vmem:[%s23737_s17 + $0x1108] ss:$48 sps:$4 sm:$0xff]  }
 0xaf7   : > { %10178 = vmatpush1.bf16.msra.mxu0 %v21550_v42  ;;  %v21573_v42 = vld [vmem:[%s23737_s17 + $0x116c] ss:$48 sps:$4 sm:$0xff]  }
 0xaf8   : > { %10179 = vmatprep.subr.bf16.mxu0 %v21558_v55  ;;  %v21609_v55 = vld [vmem:[%s23743_s13 + $0xbd0] ss:$12 sps:$4 sm:$0xff]  }
 0xaf9   : > { %8090 = vmatpush1.bf16.msra.mxu1 %v21517_v27  ;;  %v21616_v27 = vld [vmem:[%s23743_s13 + $0xbec] ss:$12 sps:$4 sm:$0xff]  }
 0xafa   : > { %8091 = vmatprep.subr.bf16.mxu1 %v21522_v9  ;;  %v21571_v9 = vld [vmem:[%s23737_s17 + $0x1168] ss:$48 sps:$4 sm:$0xff]  }
 0xafb   : > { %10180 = vmatpush1.bf16.msra.mxu0 %v21556_v28  ;;  %v21579_v28 = vld [vmem:[%s23737_s17 + $0x11cc] ss:$48 sps:$4 sm:$0xff]  }
 0xafc   : > { %10181 = vmatprep.subr.bf16.mxu0 %v21564_v29  ;;  %v21614_v29 = vld [vmem:[%s23743_s13 + $0xbe8] ss:$12 sps:$4 sm:$0xff]  }
 0xafd   : > { %8092 = vmatpush1.bf16.msra.mxu1 %v21520_v12  ;;  %v21621_v12 = vld [vmem:[%s23743_s13 + $0xc04] ss:$12 sps:$4 sm:$0xff]  }
 0xafe   : > { %8093 = vmatprep.subr.bf16.mxu1 %v21525_v31  ;;  %v21577_v31 = vld [vmem:[%s23737_s17 + $0x11c8] ss:$48 sps:$4 sm:$0xff]  }
 0xaff   : > { %10182 = vmatpush1.bf16.msra.mxu0 %v21562_v33  ;;  %v21583_v33 = vld [vmem:[%s23743_s13 + $0x9c8] ss:$12 sps:$4 sm:$0xff]  }
 0xb00   : > { %10183 = vmatprep.subr.bf16.mxu0 %v21570_v1  ;;  %v21587_v1 = vld [vmem:[%s23743_s13 + $0x908] ss:$12 sps:$4 sm:$0xff]  }
 0xb01   : > { %8094 = vmatpush1.bf16.msra.mxu1 %v21523_v34  ;;  %v21588_v34 = vld [vmem:[%s23743_s13 + $0x9e0] ss:$12 sps:$4 sm:$0xff]  }
 0xb02   : > { %8095 = vmatprep.subr.bf16.mxu1 %v21528_v35  ;;  %v21592_v35 = vld [vmem:[%s23743_s13 + $0x920] ss:$12 sps:$4 sm:$0xff]  }
 0xb03   : > { %10184 = vmatpush1.bf16.msra.mxu0 %v21568_v51  ;;  %v21593_v51 = vld [vmem:[%s23743_s13 + $0x9f8] ss:$12 sps:$4 sm:$0xff]  }
 0xb04   : > { %10185 = vmatprep.subr.bf16.mxu0 %v21576_v36  ;;  %v21597_v36 = vld [vmem:[%s23743_s13 + $0x938] ss:$12 sps:$4 sm:$0xff]  }
 0xb05   : > { %8096 = vmatpush1.bf16.msra.mxu1 %v21526_v37  ;;  %v21598_v37 = vld [vmem:[%s23743_s13 + $0xa10] ss:$12 sps:$4 sm:$0xff]  }
 0xb06   : > { %8097 = vmatprep.subr.bf16.mxu1 %v21531_v39  ;;  %v21602_v39 = vld [vmem:[%s23743_s13 + $0x950] ss:$12 sps:$4 sm:$0xff]  }
 0xb07   : > { %10186 = vmatpush1.bf16.msra.mxu0 %v21574_v40  ;;  %v21603_v40 = vld [vmem:[%s23743_s13 + $0xa28] ss:$12 sps:$4 sm:$0xff]  }
 0xb08   : > { %10187 = vmatprep.subr.bf16.mxu0 %v21582_v54  ;;  %v25110_v54 = vld [vmem:[%s24185_s7 + $0x14] sm:$0xf] }
 0xb09   : > { %8098 = vmatpush1.bf16.msra.mxu1 %v21529_v45  ;;  %v6148_v45 = vrot.slane %v25005_v5, %v23775_v48 }
 0xb0a   : > { %8110 = vmatprep.subr.bf16.mxu1 %v21537_v19  ;;  %v6172_v19 = vrot.slane %v25110_v54, %v23769_v46 }
 0xb0b   : > { %10188 = vmatpush1.bf16.msra.mxu0 %v21580_v8  ;;  %v6152_v8 = vrot.slane %v25005_v5, %v24296_v30 }
 0xb0c   : > { %8100 = vmatmul.mubr.bf16.vlgmr.msra.gmra.mrb[52].mxu1 %v24756_v41  ;;  %10189 = vmatprep.subr.bf16.mxu0 %v21586_v20  ;;  %v21547_v41 = vld [vmem:[%s23737_s17 + $0xfe8] ss:$48 sps:$4 sm:$0xff]   ;;  %v21612_v20 = vld [vmem:[%s23743_s13 + $0x980] ss:$12 sps:$4 sm:$0xff]  }
 0xb0d   : > { %8111 = vmatpush1.bf16.msra.mxu1 %v21535_v13  ;;  %8142 = vmatprep.mubr.bf16.mxu1 %v23246_v49  ;;  %v6176_v13 = vrot.slane %v25110_v54, %v23772_v47 }
 0xb0e   : > { %8112 = vmatprep.subr.bf16.mxu1 %v21543_v50  ;;  %v21613_v50 = vld [vmem:[%s23743_s13 + $0xa58] ss:$12 sps:$4 sm:$0xff]  }
 0xb0f   : > { %10190 = vmatpush1.bf16.msra.mxu0 %v21584_v53 }
 0xb10   : > { %10191 = vmatprep.subr.bf16.mxu0 %v21591_v52 }
 0xb11   : > { %8113 = vmatpush1.bf16.msra.mxu1 %v21541_v62 }
 0xb12   : > { %8114 = vmatprep.subr.bf16.mxu1 %v21549_v38 }
 0xb13   : > { %10192 = vmatpush1.bf16.msra.mxu0 %v21589_v3 }
 0xb14   : > { %10193 = vmatprep.subr.bf16.mxu0 %v21596_v43 }
 0xb15   : > { %8115 = vmatpush1.bf16.msra.mxu1 %v21547_v41 }
 0xb16   : > { %8116 = vmatprep.subr.bf16.mxu1 %v21555_v22 }
 0xb17   : > { %10194 = vmatpush1.bf16.msra.mxu0 %v21594_v63  ;;  %v21617_v63 = vld [vmem:[%s23743_s13 + $0x998] ss:$12 sps:$4 sm:$0xff]  }
 0xb18   : > { %10195 = vmatprep.subr.bf16.mxu0 %v21601_v16 }
 0xb19   : > { %8117 = vmatpush1.bf16.msra.mxu1 %v21553_v17 }
 0xb1a   : > { %8118 = vmatprep.subr.bf16.mxu1 %v21561_v11 }
 0xb1b   : > { %10196 = vmatpush1.bf16.msra.mxu0 %v21599_v60 }
 0xb1c   : > { %10197 = vmatprep.subr.bf16.mxu0 %v21606_v44  ;;  %v21618_v44 = vld [vmem:[%s23743_s13 + $0xa70] ss:$12 sps:$4 sm:$0xff]  }
 0xb1d   : > { %8119 = vmatpush1.bf16.msra.mxu1 %v21559_v10 }
 0xb1e   : > { %8120 = vmatprep.subr.bf16.mxu1 %v21567_v18 }
 0xb1f   : > { %10198 = vmatpush1.bf16.msra.mxu0 %v21604_v56 }
 0xb20   : > { %10199 = vmatprep.subr.bf16.mxu0 %v21611_v61 }
 0xb21   : > { %8121 = vmatpush1.bf16.msra.mxu1 %v21565_v25 }
 0xb22   : > { %8122 = vmatprep.subr.bf16.mxu1 %v21573_v42 }
 0xb23   : > { %10200 = vmatpush1.bf16.msra.mxu0 %v21609_v55 }
 0xb24   : > { %10201 = vmatprep.subr.bf16.mxu0 %v21616_v27 }
 0xb25   : > { %8123 = vmatpush1.bf16.msra.mxu1 %v21571_v9 }
 0xb26   : > { %8124 = vmatprep.subr.bf16.mxu1 %v21579_v28 }
 0xb27   : > { %10202 = vmatpush1.bf16.msra.mxu0 %v21614_v29  ;;  %v21622_v29 = vld [vmem:[%s23743_s13 + $0x9b0] ss:$12 sps:$4 sm:$0xff]  }
 0xb28   : > { %10214 = vmatprep.subr.bf16.mxu0 %v21621_v12 }
 0xb29   : > { %8125 = vmatpush1.bf16.msra.mxu1 %v21577_v31 }
 0xb2a   : > { %19546 = vmatprep.subr.bf16.mxu1 %v21583_v33 }
 0xb2c   : > { %8143 = vmatmul.mubr.bf16.vlgmr.msra.gmra.mrb[52].mxu1 %v24803_v32  ;;  %v21607_v32 = vld [vmem:[%s23743_s13 + $0x968] ss:$12 sps:$4 sm:$0xff]  }
 0xb2d   : > { %19547 = vmatpush3.bf16.msra.mxu1 %v21587_v1  ;;  %10418 = vmatprep.mubr.bf16.mxu1 %v25026_v6  ;;  %v21608_v6 = vld [vmem:[%s23743_s13 + $0xa40] ss:$12 sps:$4 sm:$0xff]   ;;  %v21623_v1 = vld [vmem:[%s23743_s13 + $0xb48] ss:$12 sps:$4 sm:$0xff]  }
 0xb2e   : > { %19548 = vmatprep.subr.bf16.mxu1 %v21588_v34 }
 0xb31   : > { %19549 = vmatpush3.bf16.msra.mxu1 %v21592_v35 }
 0xb32   : > { %19550 = vmatprep.subr.bf16.mxu1 %v21593_v51  ;;  %v21619_v51 = vld [vmem:[%s23743_s13 + $0xc00] ss:$12 sps:$4 sm:$0xff]  }
 0xb35   : > { %19551 = vmatpush3.bf16.msra.mxu1 %v21597_v36 }
 0xb36   : > { %19552 = vmatprep.subr.bf16.mxu1 %v21598_v37  ;;  %v21626_v37 = vld [vmem:[%s23743_s13 + $0xc1c] ss:$12 sps:$4 sm:$0xff]  }
 0xb39   : > { %19553 = vmatpush3.bf16.msra.mxu1 %v21602_v39  ;;  %v21627_v39 = vld [vmem:[%s23743_s13 + $0xa88] ss:$12 sps:$4 sm:$0xff]  }
 0xb3a   : > { %19554 = vmatprep.subr.bf16.mxu1 %v21603_v40  ;;  %v21628_v40 = vld [vmem:[%s23743_s13 + $0xb60] ss:$12 sps:$4 sm:$0xff]  }
 0xb3d   : > { %19555 = vmatpush3.bf16.msra.mxu1 %v21607_v32  ;;  %v21624_v32 = vld [vmem:[%s23743_s13 + $0xc18] ss:$12 sps:$4 sm:$0xff]  }
 0xb3e   : > { %19556 = vmatprep.subr.bf16.mxu1 %v21608_v6  ;;  %v21631_v6 = vld [vmem:[%s23743_s13 + $0xc34] ss:$12 sps:$4 sm:$0xff]  }
 0xb3f   : > { %v7800_v53 = vpop.f32.mrb[44].mxu1 }
 0xb40   : > { %v19893_v52 = vadd.f32 %v7800_v53, %v6148_v45  ;;  %v8058_v62 = vpop.f32.mrb[16].mxu0  ;;  %v7802_v38 = vpop.f32.mrb[45].mxu1  ;;  %v21641_v53 = vld [vmem:[%s23743_s13 + $0xc64] ss:$12 sps:$4 sm:$0xff]  }
 0xb41   : > { %v19905_v3 = vadd.f32 %v8058_v62, %v6172_v19  ;;  %v19894_v43 = vadd.f32 %v7802_v38, %v6152_v8  ;;  %v8060_v41 = vpop.f32.mrb[17].mxu0  ;;  %v7804_v22 = vpop.f32.mrb[46].mxu1  ;;  %19557 = vmatpush3.bf16.msra.mxu1 %v21612_v20  ;;  %v21636_v20 = vld [vmem:[%s23743_s13 + $0xc4c] ss:$12 sps:$4 sm:$0xff]   ;;  %v21643_v62 = vld [vmem:[%s23743_s13 + $0xba8] ss:$12 sps:$4 sm:$0xff]  }
 0xb42   : > { %v19906_v16 = vadd.f32 %v8060_v41, %v6176_v13  ;;  %v19895_v17 = vadd.f32 %v7804_v22, %v6148_v45  ;;  %v8062_v11 = vpop.f32.mrb[18].mxu0  ;;  %v7806_v60 = vpop.f32.mrb[47].mxu1  ;;  %19558 = vmatprep.subr.bf16.mxu1 %v21613_v50  ;;  %v8155_v61 = vmax.f32 %v19893_v52, 0.0  ;;  %v21632_v45 = vld [vmem:[%s23743_s13 + $0xaa0] ss:$12 sps:$4 sm:$0xff]  }
 0xb43   : > { %v19907_v10 = vadd.f32 %v8062_v11, %v6172_v19  ;;  %v19896_v18 = vadd.f32 %v7806_v60, %v6152_v8  ;;  %v8064_v56 = vpop.f32.mrb[19].mxu0  ;;  %v8161_v55 = vmax.f32 %v19905_v3, 0.0  ;;  %v8156_v27 = vmax.f32 %v19894_v43, 0.0  ;;  %v21633_v19 = vld [vmem:[%s23743_s13 + $0xb78] ss:$12 sps:$4 sm:$0xff]  }
 0xb44   : > { %v8167_v25 = vmax.f32 %v19895_v17, 0.0  ;;  %v19908_v42 = vadd.f32 %v8064_v56, %v6176_v13  ;;  %v8162_v12 = vmax.f32 %v19906_v16, 0.0  ;;  %v21629_v8 = vld [vmem:[%s23743_s13 + $0xc30] ss:$12 sps:$4 sm:$0xff]   ;;  %v21637_v13 = vld [vmem:[%s23743_s13 + $0xab8] ss:$12 sps:$4 sm:$0xff]  }
 0xb45   : > { %v8173_v9 = vmax.f32 %v19907_v10, 0.0  ;;  %v8168_v28 = vmax.f32 %v19896_v18, 0.0  ;;  %19559 = vmatpush3.bf16.msra.mxu1 %v21617_v63  ;;  %v21634_v50 = vld [vmem:[%s23743_s13 + $0xc48] ss:$12 sps:$4 sm:$0xff]   ;;  %v21642_v52 = vld [vmem:[%s23743_s13 + $0xad0] ss:$12 sps:$4 sm:$0xff]  }
 0xb46   : > { %v25126_v31 = vpack.c.bf16 %v8167_v25, %v8155_v61  ;;  %v8174_v33 = vmax.f32 %v19908_v42, 0.0  ;;  %19560 = vmatprep.subr.bf16.mxu1 %v21618_v44  ;;  %v21639_v38 = vld [vmem:[%s23743_s13 + $0xc60] ss:$12 sps:$4 sm:$0xff]   ;;  %v21646_v3 = vld [vmem:[%s23743_s13 + $0xc7c] ss:$12 sps:$4 sm:$0xff]  }
 0xb47   : > { %v25129_v34 = vpack.c.bf16 %v8173_v9, %v8161_v55  ;;  %v8180_v35 = vpack.c.bf16 %v8168_v28, %v8156_v27  ;;  %v21647_v43 = vld [vmem:[%s23743_s13 + $0xae8] ss:$12 sps:$4 sm:$0xff]   ;;  %v21648_v41 = vld [vmem:[%s23743_s13 + $0xbc0] ss:$12 sps:$4 sm:$0xff]   ;;  %v21644_v22 = vld [vmem:[%s23743_s13 + $0xc78] ss:$12 sps:$4 sm:$0xff]  }
 0xb48   : > { %v25132_v36 = vpack.c.bf16 %v8174_v33, %v8162_v12  ;;  %v21651_v63 = vld [vmem:[%s23743_s13 + $0xc94] ss:$12 sps:$4 sm:$0xff]   ;;  %v21653_v17 = vld [vmem:[%s23743_s13 + $0xbd8] ss:$12 sps:$4 sm:$0xff]   ;;  %v21649_v11 = vld [vmem:[%s23743_s13 + $0xc90] ss:$12 sps:$4 sm:$0xff]  }
 0xb49   : > { %10203 = vmatprep.mubr.bf16.mxu0 %v8180_v35  ;;  %19561 = vmatpush3.bf16.msra.mxu1 %v21622_v29  ;;  %v21652_v16 = vld [vmem:[%s23743_s13 + $0xb00] ss:$12 sps:$4 sm:$0xff]   ;;  %v21657_v44 = vld [vmem:[%s23743_s13 + $0xb18] ss:$12 sps:$4 sm:$0xff]   ;;  %v21658_v10 = vld [vmem:[%s23743_s13 + $0xbf0] ss:$12 sps:$4 sm:$0xff]  }
 0xb4a   : > { %10204 = vmatmul.mubr.bf16.vlgmr.msra.gmra.mrb[20].mxu0 %v25126_v31  ;;  %19568 = vmatprep.subr.bf16.mxu1 %v21623_v1  ;;  %v21656_v60 = vld [vmem:[%s23743_s13 + $0xcac] ss:$12 sps:$4 sm:$0xff]   ;;  %v21654_v18 = vld [vmem:[%s23743_s13 + $0xca8] ss:$12 sps:$4 sm:$0xff]   ;;  %v21661_v56 = vld [vmem:[%s23743_s13 + $0xcc4] ss:$12 sps:$4 sm:$0xff]  }
 0xb4b   : > { %10215 = vmatpush1.bf16.msra.mxu0 %v21619_v51  ;;  %10246 = vmatprep.mubr.bf16.mxu0 %v25028_v26  ;;  %v21662_v61 = vld [vmem:[%s23743_s13 + $0xb30] ss:$12 sps:$4 sm:$0xff]   ;;  %v21663_v25 = vld [vmem:[%s23743_s13 + $0xcc8] ss:$12 sps:$4 sm:$0xff]   ;;  %v21659_v42 = vld [vmem:[%s23743_s13 + $0xcc0] ss:$12 sps:$4 sm:$0xff]  }
 0xb4c   : > { %10419 = vmatmul.mubr.bf16.vlgmr.msra.gmra.mrb[56].mxu1 %v25021_v4  ;;  %10216 = vmatprep.subr.bf16.mxu0 %v21626_v37  ;;  %v21638_v4 = vld [vmem:[%s23743_s13 + $0xb90] ss:$12 sps:$4 sm:$0xff]   ;;  %v21667_v27 = vld [vmem:[%s23743_s13 + $0xc08] ss:$12 sps:$4 sm:$0xff]   ;;  %v21668_v9 = vld [vmem:[%s23743_s13 + $0xce0] ss:$12 sps:$4 sm:$0xff]  }
 0xb4d   : > { %19569 = vmatpush3.bf16.msra.mxu1 %v21627_v39  ;;  %10459 = vmatprep.mubr.bf16.mxu1 %v8180_v35  ;;  %v21666_v55 = vld [vmem:[%s23743_s13 + $0xcdc] ss:$12 sps:$4 sm:$0xff]   ;;  %v21664_v28 = vld [vmem:[%s23743_s13 + $0xcd8] ss:$12 sps:$4 sm:$0xff]   ;;  %v21671_v29 = vld [vmem:[%s23743_s13 + $0xcf4] ss:$12 sps:$4 sm:$0xff]  }
 0xb4e   : > { %19570 = vmatprep.subr.bf16.mxu1 %v21628_v40  ;;  %v21672_v12 = vld [vmem:[%s23743_s13 + $0xc20] ss:$12 sps:$4 sm:$0xff]   ;;  %v21673_v33 = vld [vmem:[%s23743_s13 + $0xcf8] ss:$12 sps:$4 sm:$0xff]   ;;  %v21669_v1 = vld [vmem:[%s23743_s13 + $0xcf0] ss:$12 sps:$4 sm:$0xff]  }
 0xb4f   : > { %10217 = vmatpush1.bf16.msra.mxu0 %v21624_v32  ;;  %v21676_v35 = vld [vmem:[%s23743_s13 + $0xd0c] ss:$12 sps:$4 sm:$0xff]   ;;  %v21678_v51 = vld [vmem:[%s23743_s13 + $0xd10] ss:$12 sps:$4 sm:$0xff]   ;;  %v21674_v37 = vld [vmem:[%s23743_s13 + $0xd08] ss:$12 sps:$4 sm:$0xff]  }
 0xb50   : > { %10218 = vmatprep.subr.bf16.mxu0 %v21631_v6  ;;  %v21682_v39 = vld [vmem:[%s23743_s13 + $0xc50] ss:$12 sps:$4 sm:$0xff]   ;;  %v21683_v40 = vld [vmem:[%s23743_s13 + $0xd28] ss:$12 sps:$4 sm:$0xff]   ;;  %v21679_v32 = vld [vmem:[%s23743_s13 + $0xd20] ss:$12 sps:$4 sm:$0xff]  }
 0xb51   : > { %19571 = vmatpush3.bf16.msra.mxu1 %v21632_v45  ;;  %v21686_v6 = vld [vmem:[%s23743_s13 + $0xd3c] ss:$12 sps:$4 sm:$0xff]  }
 0xb52   : > { %19572 = vmatprep.subr.bf16.mxu1 %v21633_v19  ;;  %v21687_v45 = vld [vmem:[%s23743_s13 + $0xc68] ss:$12 sps:$4 sm:$0xff]   ;;  %v21688_v19 = vld [vmem:[%s23743_s13 + $0xd40] ss:$12 sps:$4 sm:$0xff]  }
 0xb53   : > { %10219 = vmatpush1.bf16.msra.mxu0 %v21629_v8  ;;  %v21684_v8 = vld [vmem:[%s23743_s13 + $0xd38] ss:$12 sps:$4 sm:$0xff]  }
 0xb54   : > { %10220 = vmatprep.subr.bf16.mxu0 %v21636_v20  ;;  %v21691_v20 = vld [vmem:[%s23743_s13 + $0xd54] ss:$12 sps:$4 sm:$0xff]  }
 0xb55   : > { %19573 = vmatpush3.bf16.msra.mxu1 %v21637_v13  ;;  %v21692_v13 = vld [vmem:[%s23743_s13 + $0xc80] ss:$12 sps:$4 sm:$0xff]  }
 0xb56   : > { %19574 = vmatprep.subr.bf16.mxu1 %v21638_v4  ;;  %v21693_v4 = vld [vmem:[%s23743_s13 + $0xd58] ss:$12 sps:$4 sm:$0xff]  }
 0xb57   : > { %10221 = vmatpush1.bf16.msra.mxu0 %v21634_v50  ;;  %v21689_v50 = vld [vmem:[%s23743_s13 + $0xd50] ss:$12 sps:$4 sm:$0xff]  }
 0xb58   : > { %10222 = vmatprep.subr.bf16.mxu0 %v21641_v53  ;;  %v21696_v53 = vld [vmem:[%s23743_s13 + $0xd6c] ss:$12 sps:$4 sm:$0xff]  }
 0xb59   : > { %19575 = vmatpush3.bf16.msra.mxu1 %v21642_v52  ;;  %v21697_v52 = vld [vmem:[%s23743_s13 + $0xc98] ss:$12 sps:$4 sm:$0xff]  }
 0xb5a   : > { %19576 = vmatprep.subr.bf16.mxu1 %v21643_v62  ;;  %v21698_v62 = vld [vmem:[%s23743_s13 + $0xd70] ss:$12 sps:$4 sm:$0xff]  }
 0xb5b   : > { %10223 = vmatpush1.bf16.msra.mxu0 %v21639_v38  ;;  %v21694_v38 = vld [vmem:[%s23743_s13 + $0xd68] ss:$12 sps:$4 sm:$0xff]  }
 0xb5c   : > { %10224 = vmatprep.subr.bf16.mxu0 %v21646_v3  ;;  %v21701_v3 = vld [vmem:[%s23743_s13 + $0xd84] ss:$12 sps:$4 sm:$0xff]  }
 0xb5d   : > { %19577 = vmatpush3.bf16.msra.mxu1 %v21647_v43  ;;  %v21702_v43 = vld [vmem:[%s23743_s13 + $0xcb0] ss:$12 sps:$4 sm:$0xff]  }
 0xb5e   : > { %19578 = vmatprep.subr.bf16.mxu1 %v21648_v41  ;;  %v21703_v41 = vld [vmem:[%s23743_s13 + $0xe48] ss:$12 sps:$4 sm:$0xff]  }
 0xb5f   : > { %10225 = vmatpush1.bf16.msra.mxu0 %v21644_v22  ;;  %v21699_v22 = vld [vmem:[%s23743_s13 + $0xd80] ss:$12 sps:$4 sm:$0xff]  }
 0xb60   : > { %10226 = vmatprep.subr.bf16.mxu0 %v21651_v63  ;;  %v21706_v63 = vld [vmem:[%s23743_s13 + $0xd9c] ss:$12 sps:$4 sm:$0xff]  }
 0xb61   : > { %19579 = vmatpush3.bf16.msra.mxu1 %v21652_v16  ;;  %v21707_v16 = vld [vmem:[%s23743_s13 + $0xd88] ss:$12 sps:$4 sm:$0xff]  }
 0xb62   : > { %19580 = vmatprep.subr.bf16.mxu1 %v21653_v17  ;;  %v21708_v17 = vld [vmem:[%s23743_s13 + $0xe60] ss:$12 sps:$4 sm:$0xff]  }
 0xb63   : > { %10227 = vmatpush1.bf16.msra.mxu0 %v21649_v11  ;;  %v21704_v11 = vld [vmem:[%s23743_s13 + $0xd98] ss:$12 sps:$4 sm:$0xff]  }
 0xb64   : > { %10228 = vmatprep.subr.bf16.mxu0 %v21656_v60  ;;  %v21711_v60 = vld [vmem:[%s23743_s13 + $0xdb4] ss:$12 sps:$4 sm:$0xff]  }
 0xb65   : > { %19581 = vmatpush3.bf16.msra.mxu1 %v21657_v44  ;;  %v21712_v44 = vld [vmem:[%s23743_s13 + $0xda0] ss:$12 sps:$4 sm:$0xff]  }
 0xb66   : > { %19582 = vmatprep.subr.bf16.mxu1 %v21658_v10  ;;  %v21713_v10 = vld [vmem:[%s23743_s13 + $0xe78] ss:$12 sps:$4 sm:$0xff]  }
 0xb67   : > { %10229 = vmatpush1.bf16.msra.mxu0 %v21654_v18  ;;  %v21709_v18 = vld [vmem:[%s23743_s13 + $0xdb0] ss:$12 sps:$4 sm:$0xff]  }
 0xb68   : > { %10230 = vmatprep.subr.bf16.mxu0 %v21661_v56  ;;  %v21716_v56 = vld [vmem:[%s23743_s13 + $0xdcc] ss:$12 sps:$4 sm:$0xff]  }
 0xb69   : > { %19583 = vmatpush3.bf16.msra.mxu1 %v21662_v61  ;;  %v21717_v61 = vld [vmem:[%s23743_s13 + $0xdb8] ss:$12 sps:$4 sm:$0xff]  }
 0xb6a   : > { %19590 = vmatprep.subr.bf16.mxu1 %v21663_v25  ;;  %v21714_v25 = vld [vmem:[%s23743_s13 + $0xdc8] ss:$12 sps:$4 sm:$0xff]  }
 0xb6b   : > { %10231 = vmatpush1.bf16.msra.mxu0 %v21659_v42  ;;  %v21721_v42 = vld [vmem:[%s23743_s13 + $0xde4] ss:$12 sps:$4 sm:$0xff]  }
 0xb6c   : > { %10460 = vmatmul.mubr.bf16.vlgmr.msra.gmra.mrb[60].mxu1 %v25126_v31  ;;  %10232 = vmatprep.subr.bf16.mxu0 %v21666_v55  ;;  %v21677_v31 = vld [vmem:[%s23743_s13 + $0xc38] ss:$12 sps:$4 sm:$0xff]   ;;  %v21722_v55 = vld [vmem:[%s23743_s13 + $0xdd0] ss:$12 sps:$4 sm:$0xff]  }
 0xb6d   : > { %19591 = vmatpush3.bf16.msra.mxu1 %v21667_v27  ;;  %10500 = vmatprep.mubr.bf16.mxu1 %v25028_v26  ;;  %v21681_v26 = vld [vmem:[%s23743_s13 + $0xd24] ss:$12 sps:$4 sm:$0xff]   ;;  %v21723_v27 = vld [vmem:[%s23743_s13 + $0xea8] ss:$12 sps:$4 sm:$0xff]  }
 0xb6e   : > { %19592 = vmatprep.subr.bf16.mxu1 %v21668_v9  ;;  %v21719_v9 = vld [vmem:[%s23743_s13 + $0xde0] ss:$12 sps:$4 sm:$0xff]  }
 0xb6f   : > { %10233 = vmatpush1.bf16.msra.mxu0 %v21664_v28  ;;  %v21726_v28 = vld [vmem:[%s23743_s13 + $0xdfc] ss:$12 sps:$4 sm:$0xff]  }
 0xb70   : > { %10234 = vmatprep.subr.bf16.mxu0 %v21671_v29  ;;  %v21727_v29 = vld [vmem:[%s23743_s13 + $0xde8] ss:$12 sps:$4 sm:$0xff]  }
 0xb71   : > { %19593 = vmatpush3.bf16.msra.mxu1 %v21672_v12  ;;  %v21728_v12 = vld [vmem:[%s23743_s13 + $0xec0] ss:$12 sps:$4 sm:$0xff]  }
 0xb72   : > { %19594 = vmatprep.subr.bf16.mxu1 %v21673_v33  ;;  %v21724_v33 = vld [vmem:[%s23743_s13 + $0xdf8] ss:$12 sps:$4 sm:$0xff]  }
 0xb73   : > { %10235 = vmatpush1.bf16.msra.mxu0 %v21669_v1  ;;  %v6164_v1 = vrot.slane %v25005_v5, %v24412_v15 }
 0xb74   : > { %10236 = vmatprep.subr.bf16.mxu0 %v21676_v35  ;;  %v21731_v35 = vld [vmem:[%s23743_s13 + $0xe14] ss:$12 sps:$4 sm:$0xff]  }
 0xb75   : > { %19595 = vmatpush3.bf16.msra.mxu1 %v21677_v31  ;;  %v6168_v31 = vrot.slane %v25005_v5, %v24416_v23 }
 0xb76   : > { %19596 = vmatprep.subr.bf16.mxu1 %v21678_v51  ;;  %v21732_v51 = vld [vmem:[%s23743_s13 + $0xe00] ss:$12 sps:$4 sm:$0xff]  }
 0xb77   : > { %10237 = vmatpush1.bf16.msra.mxu0 %v21674_v37  ;;  %v21733_v37 = vld [vmem:[%s23743_s13 + $0xed8] ss:$12 sps:$4 sm:$0xff]  }
 0xb78   : > { %10238 = vmatprep.subr.bf16.mxu0 %v21681_v26 }
 0xb79   : > { %19597 = vmatpush3.bf16.msra.mxu1 %v21682_v39  ;;  %v21729_v39 = vld [vmem:[%s23743_s13 + $0xe10] ss:$12 sps:$4 sm:$0xff]  }
 0xb7a   : > { %19598 = vmatprep.subr.bf16.mxu1 %v21683_v40 }
 0xb7b   : > { %10239 = vmatpush1.bf16.msra.mxu0 %v21679_v32 }
 0xb7c   : > { %10240 = vmatprep.subr.bf16.mxu0 %v21686_v6  ;;  %v21736_v6 = vld [vmem:[%s23743_s13 + $0xe2c] ss:$12 sps:$4 sm:$0xff]  }
 0xb7d   : > { %19599 = vmatpush3.bf16.msra.mxu1 %v21687_v45 }
 0xb7e   : > { %19600 = vmatprep.subr.bf16.mxu1 %v21688_v19 }
 0xb7f   : > { %10241 = vmatpush1.bf16.msra.mxu0 %v21684_v8  ;;  %v21737_v8 = vld [vmem:[%s23743_s13 + $0xe18] ss:$12 sps:$4 sm:$0xff]  }
 0xb80   : > { %10242 = vmatprep.subr.bf16.mxu0 %v21691_v20 }
 0xb81   : > { %19601 = vmatpush3.bf16.msra.mxu1 %v21692_v13  ;;  %v21738_v13 = vld [vmem:[%s23743_s13 + $0xef0] ss:$12 sps:$4 sm:$0xff]  }
 0xb82   : > { %19602 = vmatprep.subr.bf16.mxu1 %v21693_v4 }
 0xb83   : > { %10243 = vmatpush1.bf16.msra.mxu0 %v21689_v50  ;;  %v21734_v50 = vld [vmem:[%s23743_s13 + $0xe28] ss:$12 sps:$4 sm:$0xff]  }
 0xb84   : > { %10244 = vmatprep.subr.bf16.mxu0 %v21696_v53 }
 0xb85   : > { %19603 = vmatpush3.bf16.msra.mxu1 %v21697_v52 }
 0xb86   : > { %19604 = vmatprep.subr.bf16.mxu1 %v21698_v62  ;;  %v21741_v62 = vld [vmem:[%s23743_s13 + $0xe44] ss:$12 sps:$4 sm:$0xff]  }
 0xb87   : > { %10245 = vmatpush1.bf16.msra.mxu0 %v21694_v38 }
 0xb88   : > { %10257 = vmatprep.subr.bf16.mxu0 %v21701_v3 }
 0xb89   : > { %19605 = vmatpush3.bf16.msra.mxu1 %v21702_v43  ;;  %v21742_v43 = vld [vmem:[%s23743_s13 + $0xe30] ss:$12 sps:$4 sm:$0xff]  }
 0xb8a   : > { %10247 = vmatmul.mubr.bf16.vlgmr.msra.gmra.mrb[20].mxu0 %v25023_v14  ;;  %19612 = vmatprep.subr.bf16.mxu1 %v21703_v41 }
 0xb8b   : > { %10258 = vmatpush1.bf16.msra.mxu0 %v21699_v22  ;;  %v21743_v22 = vld [vmem:[%s23743_s13 + $0xfc8] ss:$12 sps:$4 sm:$0xff]  }
 0xb8c   : > { %10501 = vmatmul.mubr.bf16.vlgmr.msra.gmra.mrb[64].mxu1 %v25023_v14  ;;  %10259 = vmatprep.subr.bf16.mxu0 %v21706_v63  ;;  %v21718_v14 = vld [vmem:[%s23743_s13 + $0xe90] ss:$12 sps:$4 sm:$0xff]  }
 0xb8d   : > { %19613 = vmatpush3.bf16.msra.mxu1 %v21707_v16  ;;  %v21739_v16 = vld [vmem:[%s23743_s13 + $0xe40] ss:$12 sps:$4 sm:$0xff]  }
 0xb8e   : > { %19614 = vmatprep.subr.bf16.mxu1 %v21708_v17  ;;  %v21746_v17 = vld [vmem:[%s23743_s13 + $0xe5c] ss:$12 sps:$4 sm:$0xff]  }
 0xb8f   : > { %10260 = vmatpush1.bf16.msra.mxu0 %v21704_v11  ;;  %v21747_v11 = vld [vmem:[%s23743_s13 + $0xf08] ss:$12 sps:$4 sm:$0xff]  }
 0xb90   : > { %10261 = vmatprep.subr.bf16.mxu0 %v21711_v60  ;;  %v21748_v60 = vld [vmem:[%s23743_s13 + $0xfe0] ss:$12 sps:$4 sm:$0xff]  }
 0xb91   : > { %19615 = vmatpush3.bf16.msra.mxu1 %v21712_v44  ;;  %v21744_v44 = vld [vmem:[%s23743_s13 + $0xe58] ss:$12 sps:$4 sm:$0xff]  }
 0xb92   : > { %19616 = vmatprep.subr.bf16.mxu1 %v21713_v10  ;;  %v21751_v10 = vld [vmem:[%s23743_s13 + $0xe74] ss:$12 sps:$4 sm:$0xff]  }
 0xb93   : > { %10262 = vmatpush1.bf16.msra.mxu0 %v21709_v18  ;;  %v21752_v18 = vld [vmem:[%s23743_s13 + $0xf20] ss:$12 sps:$4 sm:$0xff]  }
 0xb94   : > { %10263 = vmatprep.subr.bf16.mxu0 %v21716_v56  ;;  %v21753_v56 = vld [vmem:[%s23743_s13 + $0xff8] ss:$12 sps:$4 sm:$0xff]  }
 0xb95   : > { %19617 = vmatpush3.bf16.msra.mxu1 %v21717_v61  ;;  %v21749_v61 = vld [vmem:[%s23743_s13 + $0xe70] ss:$12 sps:$4 sm:$0xff]  }
 0xb96   : > { %19618 = vmatprep.subr.bf16.mxu1 %v21718_v14  ;;  %v21756_v14 = vld [vmem:[%s23743_s13 + $0xe8c] ss:$12 sps:$4 sm:$0xff]  }
 0xb97   : > { %10264 = vmatpush1.bf16.msra.mxu0 %v21714_v25  ;;  %v21757_v25 = vld [vmem:[%s23743_s13 + $0xf38] ss:$12 sps:$4 sm:$0xff]  }
 0xb98   : > { %10265 = vmatprep.subr.bf16.mxu0 %v21721_v42  ;;  %v21758_v42 = vld [vmem:[%s23743_s13 + $0x1010] ss:$12 sps:$4 sm:$0xff]  }
 0xb99   : > { %19619 = vmatpush3.bf16.msra.mxu1 %v21722_v55  ;;  %v21754_v55 = vld [vmem:[%s23743_s13 + $0xe88] ss:$12 sps:$4 sm:$0xff]  }
 0xb9a   : > { %19620 = vmatprep.subr.bf16.mxu1 %v21723_v27  ;;  %v21761_v27 = vld [vmem:[%s23743_s13 + $0xea4] ss:$12 sps:$4 sm:$0xff]  }
 0xb9b   : > { %10266 = vmatpush1.bf16.msra.mxu0 %v21719_v9  ;;  %v21762_v9 = vld [vmem:[%s23743_s13 + $0xf50] ss:$12 sps:$4 sm:$0xff]  }
 0xb9c   : > { %10267 = vmatprep.subr.bf16.mxu0 %v21726_v28  ;;  %v21763_v28 = vld [vmem:[%s23743_s13 + $0x1028] ss:$12 sps:$4 sm:$0xff]  }
 0xb9d   : > { %19621 = vmatpush3.bf16.msra.mxu1 %v21727_v29  ;;  %v21759_v29 = vld [vmem:[%s23743_s13 + $0xea0] ss:$12 sps:$4 sm:$0xff]  }
 0xb9e   : > { %19622 = vmatprep.subr.bf16.mxu1 %v21728_v12  ;;  %v21766_v12 = vld [vmem:[%s23743_s13 + $0xebc] ss:$12 sps:$4 sm:$0xff]  }
 0xb9f   : > { %10268 = vmatpush1.bf16.msra.mxu0 %v21724_v33  ;;  %v7972_v26 = vpop.f32.mrb[48].mxu1  ;;  %v21767_v33 = vld [vmem:[%s23743_s13 + $0xf68] ss:$12 sps:$4 sm:$0xff]  }
 0xba0   : > { %v19901_v40 = vadd.f32 %v7972_v26, %v6164_v1  ;;  %v7974_v32 = vpop.f32.mrb[49].mxu1  ;;  %10269 = vmatprep.subr.bf16.mxu0 %v21731_v35  ;;  %v21764_v35 = vld [vmem:[%s23743_s13 + $0xeb8] ss:$12 sps:$4 sm:$0xff]   ;;  %v21769_v26 = vld [vmem:[%s23743_s13 + $0xed0] ss:$12 sps:$4 sm:$0xff]  }
 0xba1   : > { %v19902_v45 = vadd.f32 %v7974_v32, %v6168_v31  ;;  %v7976_v19 = vpop.f32.mrb[50].mxu1  ;;  %19623 = vmatpush3.bf16.msra.mxu1 %v21732_v51  ;;  %v21772_v51 = vld [vmem:[%s23743_s13 + $0xf80] ss:$12 sps:$4 sm:$0xff]   ;;  %v21778_v32 = vld [vmem:[%s23743_s13 + $0x1070] ss:$12 sps:$4 sm:$0xff]  }
 0xba2   : > { %v19903_v20 = vadd.f32 %v7976_v19, %v6164_v1  ;;  %v7978_v5 = vpop.f32.mrb[51].mxu1  ;;  %19624 = vmatprep.subr.bf16.mxu1 %v21733_v37  ;;  %v8159_v53 = vmax.f32 %v19901_v40, 0.0  ;;  %v21768_v1 = vld [vmem:[%s23743_s13 + $0x1040] ss:$12 sps:$4 sm:$0xff]   ;;  %v21773_v37 = vld [vmem:[%s23743_s13 + $0x1058] ss:$12 sps:$4 sm:$0xff]  }
 0xba3   : > { %v19904_v4 = vadd.f32 %v7978_v5, %v6168_v31  ;;  %10270 = vmatpush1.bf16.msra.mxu0 %v21729_v39  ;;  %v8160_v38 = vmax.f32 %v19902_v45, 0.0  ;;  %v21771_v31 = vld [vmem:[%s23743_s13 + $0xed4] ss:$12 sps:$4 sm:$0xff]   ;;  %v21776_v39 = vld [vmem:[%s23743_s13 + $0xeec] ss:$12 sps:$4 sm:$0xff]  }
 0xba4   : > { %v8171_v52 = vmax.f32 %v19903_v20, 0.0  ;;  %10271 = vmatprep.subr.bf16.mxu0 %v21736_v6  ;;  %v21777_v40 = vld [vmem:[%s23743_s13 + $0xf98] ss:$12 sps:$4 sm:$0xff]   ;;  %v21774_v6 = vld [vmem:[%s23743_s13 + $0xee8] ss:$12 sps:$4 sm:$0xff]  }
 0xba5   : > { %v8172_v3 = vmax.f32 %v19904_v4, 0.0  ;;  %19625 = vmatpush3.bf16.msra.mxu1 %v21737_v8  ;;  %v21781_v45 = vld [vmem:[%s23743_s13 + $0xf04] ss:$12 sps:$4 sm:$0xff]   ;;  %v21807_v8 = vld [vmem:[%s23743_s13 + $0x1148] ss:$12 sps:$4 sm:$0xff]  }
 0xba6   : > { %v25239_v41 = vpack.c.bf16 %v8171_v52, %v8159_v53  ;;  %19626 = vmatprep.subr.bf16.mxu1 %v21738_v13  ;;  %v21782_v19 = vld [vmem:[%s23743_s13 + $0xfb0] ss:$12 sps:$4 sm:$0xff]   ;;  %v21779_v20 = vld [vmem:[%s23743_s13 + $0xf00] ss:$12 sps:$4 sm:$0xff]   ;;  %v21808_v13 = vld [vmem:[%s23743_s13 + $0x1088] ss:$12 sps:$4 sm:$0xff]  }
 0xba7   : > { %v8184_v63 = vpack.c.bf16 %v8172_v3, %v8160_v38  ;;  %10272 = vmatpush1.bf16.msra.mxu0 %v21734_v50  ;;  %v21785_v5 = vld [vmem:[%s23743_s13 + $0xf1c] ss:$12 sps:$4 sm:$0xff]   ;;  %v21812_v4 = vld [vmem:[%s23743_s13 + $0x1160] ss:$12 sps:$4 sm:$0xff]   ;;  %v21783_v50 = vld [vmem:[%s23743_s13 + $0xf18] ss:$12 sps:$4 sm:$0xff]  }
 0xba8   : > { %10273 = vmatprep.subr.bf16.mxu0 %v21741_v62  ;;  %v21788_v53 = vld [vmem:[%s23743_s13 + $0xf34] ss:$12 sps:$4 sm:$0xff]   ;;  %v21817_v62 = vld [vmem:[%s23743_s13 + $0x1178] ss:$12 sps:$4 sm:$0xff]   ;;  %v21786_v38 = vld [vmem:[%s23743_s13 + $0xf30] ss:$12 sps:$4 sm:$0xff]  }
 0xba9   : > { %10289 = vmatprep.mubr.bf16.mxu0 %v8184_v63  ;;  %19627 = vmatpush3.bf16.msra.mxu1 %v21742_v43  ;;  %v21813_v52 = vld [vmem:[%s23743_s13 + $0x10a0] ss:$12 sps:$4 sm:$0xff]   ;;  %v21822_v43 = vld [vmem:[%s23743_s13 + $0x1190] ss:$12 sps:$4 sm:$0xff]  }
 0xbaa   : > { %10541 = vmatprep.mubr.bf16.mxu1 %v8184_v63  ;;  %19634 = vmatprep.subr.bf16.mxu1 %v21743_v22  ;;  %v21791_v3 = vld [vmem:[%s23743_s13 + $0xf4c] ss:$12 sps:$4 sm:$0xff]   ;;  %v21794_v22 = vld [vmem:[%s23743_s13 + $0xf64] ss:$12 sps:$4 sm:$0xff]  }
 0xbab   : > { %10274 = vmatpush1.bf16.msra.mxu0 %v21739_v16  ;;  %v21823_v63 = vld [vmem:[%s23743_s13 + $0x10d0] ss:$12 sps:$4 sm:$0xff]   ;;  %v21827_v16 = vld [vmem:[%s23743_s13 + $0x11a8] ss:$12 sps:$4 sm:$0xff]  }
 0xbac   : > { %10542 = vmatmul.mubr.bf16.vlgmr.msra.gmra.mrb[68].mxu1 %v25239_v41  ;;  %10275 = vmatprep.subr.bf16.mxu0 %v21746_v17  ;;  %v21792_v17 = vld [vmem:[%s23743_s13 + $0xf60] ss:$12 sps:$4 sm:$0xff]  }
 0xbad   : > { %19635 = vmatpush3.bf16.msra.mxu1 %v21747_v11  ;;  %10582 = vmatprep.mubr.bf16.mxu1 %v25132_v36  ;;  %v21797_v11 = vld [vmem:[%s23743_s13 + $0xf7c] ss:$12 sps:$4 sm:$0xff]  }
 0xbae   : > { %19636 = vmatprep.subr.bf16.mxu1 %v21748_v60  ;;  %v21828_v60 = vld [vmem:[%s23743_s13 + $0x10e8] ss:$12 sps:$4 sm:$0xff]  }
 0xbaf   : > { %10276 = vmatpush1.bf16.msra.mxu0 %v21744_v44  ;;  %v21832_v44 = vld [vmem:[%s23743_s13 + $0x11c0] ss:$12 sps:$4 sm:$0xff]  }
 0xbb0   : > { %10277 = vmatprep.subr.bf16.mxu0 %v21751_v10  ;;  %v21795_v10 = vld [vmem:[%s23743_s13 + $0xf78] ss:$12 sps:$4 sm:$0xff]  }
 0xbb1   : > { %19637 = vmatpush3.bf16.msra.mxu1 %v21752_v18  ;;  %v21800_v18 = vld [vmem:[%s23743_s13 + $0xf94] ss:$12 sps:$4 sm:$0xff]  }
 0xbb2   : > { %19638 = vmatprep.subr.bf16.mxu1 %v21753_v56  ;;  %v21833_v56 = vld [vmem:[%s23743_s13 + $0x1100] ss:$12 sps:$4 sm:$0xff]  }
 0xbb3   : > { %10278 = vmatpush1.bf16.msra.mxu0 %v21749_v61  ;;  %v21837_v61 = vld [vmem:[%s23743_s13 + $0x11d8] ss:$12 sps:$4 sm:$0xff]  }
 0xbb4   : > { %10279 = vmatprep.subr.bf16.mxu0 %v21756_v14  ;;  %v21798_v14 = vld [vmem:[%s23743_s13 + $0xf90] ss:$12 sps:$4 sm:$0xff]  }
 0xbb5   : > { %19639 = vmatpush3.bf16.msra.mxu1 %v21757_v25  ;;  %v21803_v25 = vld [vmem:[%s23743_s13 + $0xfac] ss:$12 sps:$4 sm:$0xff]  }
 0xbb6   : > { %19640 = vmatprep.subr.bf16.mxu1 %v21758_v42  ;;  %v21838_v42 = vld [vmem:[%s23743_s13 + $0x1118] ss:$12 sps:$4 sm:$0xff]  }
 0xbb7   : > { %10280 = vmatpush1.bf16.msra.mxu0 %v21754_v55  ;;  %v21842_v55 = vld [vmem:[%s23743_s13 + $0x11f0] ss:$12 sps:$4 sm:$0xff]  }
 0xbb8   : > { %10281 = vmatprep.subr.bf16.mxu0 %v21761_v27  ;;  %v21801_v27 = vld [vmem:[%s23743_s13 + $0xfa8] ss:$12 sps:$4 sm:$0xff]  }
 0xbb9   : > { %19641 = vmatpush3.bf16.msra.mxu1 %v21762_v9  ;;  %v21806_v9 = vld [vmem:[%s23743_s13 + $0xfc4] ss:$12 sps:$4 sm:$0xff]  }
 0xbba   : > { %19642 = vmatprep.subr.bf16.mxu1 %v21763_v28  ;;  %v21843_v28 = vld [vmem:[%s23743_s13 + $0x1130] ss:$12 sps:$4 sm:$0xff]  }
 0xbbb   : > { %10282 = vmatpush1.bf16.msra.mxu0 %v21759_v29  ;;  %v21804_v29 = vld [vmem:[%s23743_s13 + $0xfc0] ss:$12 sps:$4 sm:$0xff]  }
 0xbbc   : > { %10283 = vmatprep.subr.bf16.mxu0 %v21766_v12  ;;  %v21811_v12 = vld [vmem:[%s23743_s13 + $0xfdc] ss:$12 sps:$4 sm:$0xff]  }
 0xbbd   : > { %19643 = vmatpush3.bf16.msra.mxu1 %v21767_v33  ;;  %v21809_v33 = vld [vmem:[%s23743_s13 + $0xfd8] ss:$12 sps:$4 sm:$0xff]  }
 0xbbe   : > { %19644 = vmatprep.subr.bf16.mxu1 %v21768_v1  ;;  %v21816_v1 = vld [vmem:[%s23743_s13 + $0xff4] ss:$12 sps:$4 sm:$0xff]  }
 0xbbf   : > { %10284 = vmatpush1.bf16.msra.mxu0 %v21764_v35  ;;  %v21814_v35 = vld [vmem:[%s23743_s13 + $0xff0] ss:$12 sps:$4 sm:$0xff]  }
 0xbc0   : > { %10285 = vmatprep.subr.bf16.mxu0 %v21771_v31  ;;  %v21821_v31 = vld [vmem:[%s23743_s13 + $0x100c] ss:$12 sps:$4 sm:$0xff]  }
 0xbc1   : > { %19645 = vmatpush3.bf16.msra.mxu1 %v21772_v51  ;;  %v21819_v51 = vld [vmem:[%s23743_s13 + $0x1008] ss:$12 sps:$4 sm:$0xff]  }
 0xbc2   : > { %19646 = vmatprep.subr.bf16.mxu1 %v21773_v37  ;;  %v21826_v37 = vld [vmem:[%s23743_s13 + $0x1024] ss:$12 sps:$4 sm:$0xff]  }
 0xbc3   : > { %10286 = vmatpush1.bf16.msra.mxu0 %v21769_v26  ;;  %v21824_v26 = vld [vmem:[%s23743_s13 + $0x1020] ss:$12 sps:$4 sm:$0xff]  }
 0xbc4   : > { %10287 = vmatprep.subr.bf16.mxu0 %v21776_v39  ;;  %v21831_v39 = vld [vmem:[%s23743_s13 + $0x103c] ss:$12 sps:$4 sm:$0xff]  }
 0xbc5   : > { %19647 = vmatpush3.bf16.msra.mxu1 %v21777_v40  ;;  %v21829_v40 = vld [vmem:[%s23743_s13 + $0x1038] ss:$12 sps:$4 sm:$0xff]  }
 0xbc6   : > { %19648 = vmatprep.subr.bf16.mxu1 %v21778_v32  ;;  %v6180_v32 = vrot.slane %v25110_v54, %v23775_v48 }
 0xbc7   : > { %10288 = vmatpush1.bf16.msra.mxu0 %v21774_v6  ;;  %v21836_v6 = vld [vmem:[%s23743_s13 + $0x1054] ss:$12 sps:$4 sm:$0xff]  }
 0xbc8   : > { %10300 = vmatprep.subr.bf16.mxu0 %v21781_v45  ;;  %v6184_v45 = vrot.slane %v25110_v54, %v24296_v30  ;;  %v21846_v54 = vld [vmem:[%s23743_s13 + $0x1084] ss:$12 sps:$4 sm:$0xff]  }
 0xbc9   : > { %19649 = vmatpush3.bf16.msra.mxu1 %v21782_v19 }
 0xbca   : > { %10290 = vmatmul.mubr.bf16.vlgmr.msra.gmra.mrb[20].mxu0 %v25239_v41  ;;  %19656 = vmatprep.subr.bf16.mxu1 %v21807_v8  ;;  %v21789_v41 = vld [vmem:[%s23743_s13 + $0xf48] ss:$12 sps:$4 sm:$0xff]   ;;  %v21834_v8 = vld [vmem:[%s23743_s13 + $0x1050] ss:$12 sps:$4 sm:$0xff]  }
 0xbcb   : > { %10301 = vmatpush1.bf16.msra.mxu0 %v21779_v20  ;;  %10332 = vmatprep.mubr.bf16.mxu0 %v25132_v36  ;;  %v21818_v36 = vld [vmem:[%s23743_s13 + $0x10b8] ss:$12 sps:$4 sm:$0xff]  }
 0xbcc   : > { %10583 = vmatmul.mubr.bf16.vlgmr.msra.gmra.mrb[72].mxu1 %v25129_v34  ;;  %10302 = vmatprep.subr.bf16.mxu0 %v21785_v5 }
 0xbcd   : > { %19657 = vmatpush3.bf16.msra.mxu1 %v21808_v13  ;;  %v21841_v13 = vld [vmem:[%s23743_s13 + $0x106c] ss:$12 sps:$4 sm:$0xff]  }
 0xbce   : > { %19658 = vmatprep.subr.bf16.mxu1 %v21812_v4 }
 0xbcf   : > { %10303 = vmatpush1.bf16.msra.mxu0 %v21783_v50 }
 0xbd0   : > { %10304 = vmatprep.subr.bf16.mxu0 %v21788_v53 }
 0xbd1   : > { %19659 = vmatpush3.bf16.msra.mxu1 %v21813_v52 }
 0xbd2   : > { %19660 = vmatprep.subr.bf16.mxu1 %v21817_v62 }
 0xbd3   : > { %10305 = vmatpush1.bf16.msra.mxu0 %v21786_v38  ;;  %v21839_v38 = vld [vmem:[%s23743_s13 + $0x1068] ss:$12 sps:$4 sm:$0xff]  }
 0xbd4   : > { %10306 = vmatprep.subr.bf16.mxu0 %v21791_v3 }
 0xbd5   : > { %19661 = vmatpush3.bf16.msra.mxu1 %v21818_v36 }
 0xbd6   : > { %19662 = vmatprep.subr.bf16.mxu1 %v21822_v43 }
 0xbd7   : > { %10307 = vmatpush1.bf16.msra.mxu0 %v21789_v41 }
 0xbd8   : > { %10308 = vmatprep.subr.bf16.mxu0 %v21794_v22 }
 0xbd9   : > { %19663 = vmatpush3.bf16.msra.mxu1 %v21823_v63 }
 0xbda   : > { %19664 = vmatprep.subr.bf16.mxu1 %v21827_v16  ;;  %v21844_v16 = vld [vmem:[%s23743_s13 + $0x1080] ss:$12 sps:$4 sm:$0xff]  }
 0xbdb   : > { %10309 = vmatpush1.bf16.msra.mxu0 %v21792_v17  ;;  %v21849_v17 = vld [vmem:[%s23743_s13 + $0x109c] ss:$12 sps:$4 sm:$0xff]  }
 0xbdc   : > { %10310 = vmatprep.subr.bf16.mxu0 %v21797_v11  ;;  %v21847_v11 = vld [vmem:[%s23743_s13 + $0x1098] ss:$12 sps:$4 sm:$0xff]  }
 0xbdd   : > { %19665 = vmatpush3.bf16.msra.mxu1 %v21828_v60  ;;  %v21852_v60 = vld [vmem:[%s23743_s13 + $0x10b4] ss:$12 sps:$4 sm:$0xff]  }
 0xbde   : > { %19666 = vmatprep.subr.bf16.mxu1 %v21832_v44  ;;  %v21850_v44 = vld [vmem:[%s23743_s13 + $0x10b0] ss:$12 sps:$4 sm:$0xff]  }
 0xbdf   : > { %10311 = vmatpush1.bf16.msra.mxu0 %v21795_v10  ;;  %v21855_v10 = vld [vmem:[%s23743_s13 + $0x10cc] ss:$12 sps:$4 sm:$0xff]  }
 0xbe0   : > { %10312 = vmatprep.subr.bf16.mxu0 %v21800_v18  ;;  %v21853_v18 = vld [vmem:[%s23743_s13 + $0x10c8] ss:$12 sps:$4 sm:$0xff]  }
 0xbe1   : > { %19667 = vmatpush3.bf16.msra.mxu1 %v21833_v56  ;;  %v21856_v56 = vld [vmem:[%s23743_s13 + $0x10e0] ss:$12 sps:$4 sm:$0xff]  }
 0xbe2   : > { %19668 = vmatprep.subr.bf16.mxu1 %v21837_v61  ;;  %v21861_v61 = vld [vmem:[%s23743_s13 + $0x10fc] ss:$12 sps:$4 sm:$0xff]  }
 0xbe3   : > { %10313 = vmatpush1.bf16.msra.mxu0 %v21798_v14  ;;  %v21859_v14 = vld [vmem:[%s23743_s13 + $0x10f8] ss:$12 sps:$4 sm:$0xff]  }
 0xbe4   : > { %10314 = vmatprep.subr.bf16.mxu0 %v21803_v25  ;;  %v21864_v25 = vld [vmem:[%s23743_s13 + $0x1114] ss:$12 sps:$4 sm:$0xff]  }
 0xbe5   : > { %19669 = vmatpush3.bf16.msra.mxu1 %v21838_v42 }
 0xbe6   : > { %19670 = vmatprep.subr.bf16.mxu1 %v21842_v55  ;;  %v21862_v55 = vld [vmem:[%s23743_s13 + $0x1110] ss:$12 sps:$4 sm:$0xff]  }
 0xbe7   : > { %10315 = vmatpush1.bf16.msra.mxu0 %v21801_v27 }
 0xbe8   : > { %10316 = vmatprep.subr.bf16.mxu0 %v21806_v9  ;;  %v21867_v9 = vld [vmem:[%s23743_s13 + $0x112c] ss:$12 sps:$4 sm:$0xff]  }
 0xbe9   : > { %19671 = vmatpush3.bf16.msra.mxu1 %v21843_v28 }
 0xbeb   : > { %10317 = vmatpush1.bf16.msra.mxu0 %v21804_v29 }
 0xbec   : > { %10318 = vmatprep.subr.bf16.mxu0 %v21811_v12 }
 0xbef   : > { %10319 = vmatpush1.bf16.msra.mxu0 %v21809_v33 }
 0xbf0   : > { %10320 = vmatprep.subr.bf16.mxu0 %v21816_v1  ;;  %v21865_v1 = vld [vmem:[%s23743_s13 + $0x1128] ss:$12 sps:$4 sm:$0xff]  }
 0xbf3   : > { %10321 = vmatpush1.bf16.msra.mxu0 %v21814_v35  ;;  %v21870_v35 = vld [vmem:[%s23743_s13 + $0x1144] ss:$12 sps:$4 sm:$0xff]  }
 0xbf4   : > { %10322 = vmatprep.subr.bf16.mxu0 %v21821_v31  ;;  %v21868_v31 = vld [vmem:[%s23743_s13 + $0x1140] ss:$12 sps:$4 sm:$0xff]  }
 0xbf7   : > { %10323 = vmatpush1.bf16.msra.mxu0 %v21819_v51  ;;  %v21873_v51 = vld [vmem:[%s23743_s13 + $0x115c] ss:$12 sps:$4 sm:$0xff]  }
 0xbf8   : > { %10324 = vmatprep.subr.bf16.mxu0 %v21826_v37  ;;  %v21871_v37 = vld [vmem:[%s23743_s13 + $0x1158] ss:$12 sps:$4 sm:$0xff]  }
 0xbfb   : > { %10325 = vmatpush1.bf16.msra.mxu0 %v21824_v26  ;;  %v21876_v26 = vld [vmem:[%s23743_s13 + $0x1174] ss:$12 sps:$4 sm:$0xff]  }
 0xbfc   : > { %10326 = vmatprep.subr.bf16.mxu0 %v21831_v39  ;;  %v21874_v39 = vld [vmem:[%s23743_s13 + $0x1170] ss:$12 sps:$4 sm:$0xff]  }
 0xbff   : > { %10327 = vmatpush1.bf16.msra.mxu0 %v21829_v40  ;;  %v8144_v19 = vpop.f32.mrb[52].mxu1  ;;  %v21879_v40 = vld [vmem:[%s23743_s13 + $0x118c] ss:$12 sps:$4 sm:$0xff]  }
 0xc00   : > { %v19909_v20 = vadd.f32 %v8144_v19, %v6180_v32  ;;  %v8146_v5 = vpop.f32.mrb[53].mxu1  ;;  %10328 = vmatprep.subr.bf16.mxu0 %v21836_v6  ;;  %v21882_v6 = vld [vmem:[%s23743_s13 + $0x11a4] ss:$12 sps:$4 sm:$0xff]   ;;  %v21885_v19 = vld [vmem:[%s23743_s13 + $0x11bc] ss:$12 sps:$4 sm:$0xff]  }
 0xc01   : > { %v19910_v4 = vadd.f32 %v8146_v5, %v6184_v45  ;;  %v8148_v50 = vpop.f32.mrb[54].mxu1  ;;  %v21888_v5 = vld [vmem:[%s23743_s13 + $0x11d4] ss:$12 sps:$4 sm:$0xff]  }
 0xc02   : > { %v19911_v53 = vadd.f32 %v8148_v50, %v6180_v32  ;;  %v8150_v52 = vpop.f32.mrb[55].mxu1  ;;  %v8163_v3 = vmax.f32 %v19909_v20, 0.0  ;;  %v21877_v32 = vld [vmem:[%s23743_s13 + $0x1188] ss:$12 sps:$4 sm:$0xff]   ;;  %v21883_v20 = vld [vmem:[%s23743_s13 + $0x11b8] ss:$12 sps:$4 sm:$0xff]  }
 0xc03   : > { %v19912_v62 = vadd.f32 %v8150_v52, %v6184_v45  ;;  %10329 = vmatpush1.bf16.msra.mxu0 %v21834_v8  ;;  %v8164_v43 = vmax.f32 %v19910_v4, 0.0  ;;  %v21880_v45 = vld [vmem:[%s23743_s13 + $0x11a0] ss:$12 sps:$4 sm:$0xff]   ;;  %v21886_v50 = vld [vmem:[%s23743_s13 + $0x11d0] ss:$12 sps:$4 sm:$0xff]  }
 0xc04   : > { %v8175_v36 = vmax.f32 %v19911_v53, 0.0  ;;  %10330 = vmatprep.subr.bf16.mxu0 %v21841_v13  ;;  %v17834_v8 = vld [vmem:[%s24556_s30 + $0x3] sm:$0x7]  ;;  %v21891_v52 = vld [vmem:[%s23743_s13 + $0x11ec] ss:$12 sps:$4 sm:$0xff]  }
 0xc05   : > { %v8176_v41 = vmax.f32 %v19912_v62, 0.0  ;;  %v8588_v13 = vrot.slane %v17834_v8, %v23775_v48 }
 0xc06   : > { %v25330_v22 = vpack.c.bf16 %v8175_v36, %v8163_v3 }
 0xc07   : > { %v8188_v63 = vpack.c.bf16 %v8176_v41, %v8164_v43  ;;  %10331 = vmatpush1.bf16.msra.mxu0 %v21839_v38 }
 0xc08   : > { %10343 = vmatprep.subr.bf16.mxu0 %v21846_v54 }
 0xc09   : > { %10623 = vmatprep.mubr.bf16.mxu1 %v8188_v63 }
 0xc0a   : > { %10333 = vmatmul.mubr.bf16.vlgmr.msra.gmra.mrb[20].mxu0 %v25129_v34  ;;  %10624 = vmatmul.mubr.bf16.vlgmr.msra.gmra.mrb[76].mxu1 %v25330_v22  ;;  %v21858_v34 = vld [vmem:[%s23743_s13 + $0x10e4] ss:$12 sps:$4 sm:$0xff]  }
 0xc0b   : > { %10344 = vmatpush1.bf16.msra.mxu0 %v21844_v16  ;;  %10375 = vmatprep.mubr.bf16.mxu0 %v8188_v63  ;;  %v21889_v63 = vld [vmem:[%s23743_s13 + $0x11e8] ss:$12 sps:$4 sm:$0xff]  }
 0xc0c   : > { %10345 = vmatprep.subr.bf16.mxu0 %v21849_v17 }
 0xc0f   : > { %10346 = vmatpush1.bf16.msra.mxu0 %v21847_v11 }
 0xc10   : > { %10347 = vmatprep.subr.bf16.mxu0 %v21852_v60 }
 0xc13   : > { %10348 = vmatpush1.bf16.msra.mxu0 %v21850_v44 }
 0xc14   : > { %10349 = vmatprep.subr.bf16.mxu0 %v21855_v10 }
 0xc17   : > { %10350 = vmatpush1.bf16.msra.mxu0 %v21853_v18 }
 0xc18   : > { %10351 = vmatprep.subr.bf16.mxu0 %v21858_v34 }
 0xc1b   : > { %10352 = vmatpush1.bf16.msra.mxu0 %v21856_v56 }
 0xc1c   : > { %10353 = vmatprep.subr.bf16.mxu0 %v21861_v61 }
 0xc1f   : > { %10354 = vmatpush1.bf16.msra.mxu0 %v21859_v14  ;;  %v19562_v42 = vpop.f32.mrb[56].mxu1 }
 0xc20   : > { %v19563_v27 = vpop.f32.mrb[57].mxu1  ;;  %10355 = vmatprep.subr.bf16.mxu0 %v21864_v25 }
 0xc21   : > { %v19564_v28 = vadd.f32 %v19563_v27, %v19562_v42  ;;  %v19565_v29 = vpop.f32.mrb[58].mxu1 }
 0xc22   : > { %v19566_v12 = vpop.f32.mrb[59].mxu1 }
 0xc23   : > { %10356 = vmatpush1.bf16.msra.mxu0 %v21862_v55  ;;  %v19567_v33 = vadd.f32 %v19566_v12, %v19565_v29  ;;  %v10421_v62 = vadd.f32 %v19564_v28, %v8588_v13 }
 0xc24   : > { %10357 = vmatprep.subr.bf16.mxu0 %v21867_v9 }
 0xc25   : > { %v10424_v54 = vadd.f32 %v19567_v33, %v8588_v13 }
 0xc27   : > { %10358 = vmatpush1.bf16.msra.mxu0 %v21865_v1 }
 0xc28   : > { %10359 = vmatprep.subr.bf16.mxu0 %v21870_v35 }
 0xc2b   : > { %10360 = vmatpush1.bf16.msra.mxu0 %v21868_v31 }
 0xc2c   : > { %10361 = vmatprep.subr.bf16.mxu0 %v21873_v51 }
 0xc2f   : > { %10362 = vmatpush1.bf16.msra.mxu0 %v21871_v37 }
 0xc30   : > { %10363 = vmatprep.subr.bf16.mxu0 %v21876_v26 }
 0xc33   : > { %10364 = vmatpush1.bf16.msra.mxu0 %v21874_v39 }
 0xc34   : > { %10365 = vmatprep.subr.bf16.mxu0 %v21879_v40 }
 0xc37   : > { %10366 = vmatpush1.bf16.msra.mxu0 %v21877_v32 }
 0xc38   : > { %10367 = vmatprep.subr.bf16.mxu0 %v21882_v6 }
 0xc3b   : > { %10368 = vmatpush1.bf16.msra.mxu0 %v21880_v45 }
 0xc3c   : > { %10369 = vmatprep.subr.bf16.mxu0 %v21885_v19 }
 0xc3f   : > { %10370 = vmatpush1.bf16.msra.mxu0 %v21883_v20  ;;  %v19584_v4 = vpop.f32.mrb[60].mxu1  ;;  %v8580_v20 = vrot.slane %v17834_v8, %v23769_v46 }
 0xc40   : > { %v19585_v53 = vpop.f32.mrb[61].mxu1  ;;  %10371 = vmatprep.subr.bf16.mxu0 %v21888_v5  ;;  %v8584_v5 = vrot.slane %v17834_v8, %v23772_v47 }
 0xc41   : > { %v19586_v38 = vadd.f32 %v19585_v53, %v19584_v4  ;;  %v19587_v3 = vpop.f32.mrb[62].mxu1 }
 0xc42   : > { %v19588_v36 = vpop.f32.mrb[63].mxu1 }
 0xc43   : > { %v10462_v43 = vadd.f32 %v19586_v38, %v10421_v62  ;;  %10372 = vmatpush1.bf16.msra.mxu0 %v21886_v50  ;;  %v19589_v41 = vadd.f32 %v19588_v36, %v19587_v3 }
 0xc44   : > { %10373 = vmatprep.subr.bf16.mxu0 %v21891_v52 }
 0xc45   : > { %v10465_v16 = vadd.f32 %v19589_v41, %v10424_v54 }
 0xc47   : > { %10374 = vmatpush1.bf16.msra.mxu0 %v21889_v63 }
 0xc4a   : > { %10376 = vmatmul.mubr.bf16.vlgmr.msra.gmra.mrb[20].mxu0 %v25330_v22 }
 0xc5f   : > { %v19606_v17 = vpop.f32.mrb[64].mxu1 }
 0xc60   : > { %v19607_v11 = vpop.f32.mrb[65].mxu1 }
 0xc61   : > { %v19608_v60 = vadd.f32 %v19607_v11, %v19606_v17  ;;  %v19609_v44 = vpop.f32.mrb[66].mxu1 }
 0xc62   : > { %v19610_v10 = vpop.f32.mrb[67].mxu1 }
 0xc63   : > { %v10503_v18 = vadd.f32 %v19608_v60, %v10462_v43  ;;  %v19611_v34 = vadd.f32 %v19610_v10, %v19609_v44 }
 0xc65   : > { %v10506_v56 = vadd.f32 %v19611_v34, %v10465_v16 }
 0xc7f   : > { %v19628_v61 = vpop.f32.mrb[68].mxu1 }
 0xc80   : > { %v19629_v14 = vpop.f32.mrb[69].mxu1 }
 0xc81   : > { %v19630_v25 = vadd.f32 %v19629_v14, %v19628_v61  ;;  %v19631_v42 = vpop.f32.mrb[70].mxu1 }
 0xc82   : > { %v19632_v55 = vpop.f32.mrb[71].mxu1 }
 0xc83   : > { %v10544_v27 = vadd.f32 %v19630_v25, %v10503_v18  ;;  %v19633_v9 = vadd.f32 %v19632_v55, %v19631_v42 }
 0xc85   : > { %v10547_v28 = vadd.f32 %v19633_v9, %v10506_v56 }
 0xc9f   : > { %v19650_v29 = vpop.f32.mrb[72].mxu1 }
 0xca0   : > { %v19651_v12 = vpop.f32.mrb[73].mxu1 }
 0xca1   : > { %v19652_v33 = vadd.f32 %v19651_v12, %v19650_v29  ;;  %v19653_v22 = vpop.f32.mrb[74].mxu1 }
 0xca2   : > { %v19654_v1 = vpop.f32.mrb[75].mxu1 }
 0xca3   : > { %v10585_v35 = vadd.f32 %v19652_v33, %v10544_v27  ;;  %v19655_v31 = vadd.f32 %v19654_v1, %v19653_v22 }
 0xca5   : > { %v10588_v51 = vadd.f32 %v19655_v31, %v10547_v28 }
 0xcdd   : > { %v19672_v37 = vpop.f32.mrb[76].mxu1 }
 0xcde   : > { %v19673_v26 = vpop.f32.mrb[77].mxu1 }
 0xcdf   : > { %v19674_v39 = vadd.f32 %v19673_v26, %v19672_v37  ;;  %v19675_v40 = vpop.f32.mrb[78].mxu1  ;;  %v18126_v37 = vld [vmem:[%s23765_s1 + $0x6] sm:$0x7] }
 0xce0   : > { %v19676_v32 = vpop.f32.mrb[79].mxu1 }
 0xce1   : > { %v10626_v6 = vadd.f32 %v19674_v39, %v10585_v35  ;;  %v19677_v45 = vadd.f32 %v19676_v32, %v19675_v40 }
 0xce3   : > { %v10629_v19 = vadd.f32 %v19677_v45, %v10588_v51  ;;  %v25380_v41 = vadd.f32 %v10626_v6, %v24619_v7  ;;  %v18124_v51 = vld [vmem:[%s23761_s15 + $0x6] sm:$0x7]  ;;  %v10712_v6 = vrot.slane %v18126_v37, %v23769_v46  ;;  %v10716_v45 = vrot.slane %v18126_v37, %v23772_v47 }
 0xce4   : > { %v10690_v26 = vrot.slane %v18124_v51, %v23769_v46  ;;  %v10694_v39 = vrot.slane %v18124_v51, %v23772_v47  ;;  %v10698_v40 = vrot.slane %v18124_v51, %v23775_v48  ;;  %v21921_v51 = vld [vmem:[%s23737_s17 + $0x1394] ss:$48 sps:$4 sm:$0xff]  }
 0xd1d   : > { %v10377_v13 = vpop.f32.mrb[20].mxu0 }
 0xd1e   : > { %v19913_v4 = vadd.f32 %v10377_v13, %v8580_v20  ;;  %v10379_v50 = vpop.f32.mrb[21].mxu0 }
 0xd1f   : > { %v19914_v53 = vadd.f32 %v10379_v50, %v8584_v5  ;;  %v10381_v52 = vpop.f32.mrb[22].mxu0 }
 0xd20   : > { %v25371_v62 = vadd.f32 %v19913_v4, %v24607_v57  ;;  %v19915_v38 = vadd.f32 %v10381_v52, %v8580_v20  ;;  %v10383_v3 = vpop.f32.mrb[23].mxu0  ;;  %v25388_v57 = vadd.f32 %v10629_v19, %v24624_v21  ;;  %v10720_v4 = vrot.slane %v18126_v37, %v23775_v48  ;;  %v21916_v37 = vld [vmem:[%s23737_s17 + $0x1380] ss:$48 sps:$4 sm:$0xff]  }
 0xd21   : > { %v25374_v36 = vadd.f32 %v19914_v53, %v24610_v24  ;;  %v19916_v54 = vadd.f32 %v10383_v3, %v8584_v5 }
 0xd22   : > { %v25377_v43 = vadd.f32 %v19915_v38, %v24613_v58 }
 0xd23   : > { %v25383_v8 = vadd.f32 %v19916_v54, %v24616_v59  ;;  %v10644_v63 = vadd.f32 %v25374_v36, %v25371_v62 }
 0xd25   : > { %v10645_v16 = vadd.f32 %v10644_v63, %v25380_v41  ;;  %v10648_v24 = vadd.f32 %v25383_v8, %v25377_v43 }
 0xd27   : > { %10646 = vadd.xlane.f32.xlu0 %v10645_v16  ;;  %v10649_v58 = vadd.f32 %v10648_v24, %v25388_v57 }
 0xd29   : > { %10650 = vadd.xlane.f32.xlu1 %v10649_v58 }
 0xdb4   : > { %v10647_v7 = vpop.xlane.xlu0 %10646 }
 0xdb5   : > { %v10652_v17 = vmul.f32 0.0026041667, %v10647_v7 }
 0xdb6   : > { %v10651_v11 = vpop.xlane.xlu1 %10650 }
 0xdb7   : > { %v10654_v59 = vsub.f32 %v25371_v62, %v10652_v17  ;;  %v10655_v60 = vsub.f32 %v25374_v36, %v10652_v17  ;;  %v10653_v44 = vmul.f32 0.0026041667, %v10651_v11  ;;  %v10656_v21 = vsub.f32 %v25380_v41, %v10652_v17 }
 0xdb9   : > { %v10657_v10 = vsub.f32 %v25377_v43, %v10653_v44  ;;  %v10658_v18 = vsub.f32 %v25383_v8, %v10653_v44  ;;  %v10659_v34 = vsub.f32 %v25388_v57, %v10653_v44  ;;  %v10660_v56 = vmul.f32 %v10654_v59, %v10654_v59 }
 0xdba   : > { %v10661_v61 = vmul.f32 %v10655_v60, %v10655_v60  ;;  %v10662_v42 = vmul.f32 %v10656_v21, %v10656_v21 }
 0xdbb   : > { %v10663_v14 = vmul.f32 %v10657_v10, %v10657_v10  ;;  %v10664_v25 = vmul.f32 %v10658_v18, %v10658_v18  ;;  %v10665_v27 = vmul.f32 %v10659_v34, %v10659_v34 }
 0xdbc   : > { %v10666_v55 = vadd.f32 %v10661_v61, %v10660_v56 }
 0xdbd   : > { %v10670_v9 = vadd.f32 %v10664_v25, %v10663_v14  ;;  %v21895_v14 = vld [vmem:[%s23737_s17 + $0x1210] ss:$48 sps:$4 sm:$0xff]   ;;  %v21897_v25 = vld [vmem:[%s23737_s17 + $0x1214] ss:$48 sps:$4 sm:$0xff]  }
 0xdbe   : > { %v10667_v28 = vadd.f32 %v10666_v55, %v10662_v42  ;;  %v21900_v42 = vld [vmem:[%s23737_s17 + $0x1264] ss:$48 sps:$4 sm:$0xff]   ;;  %12796 = vmatprep.subr.bf16.mxu0 %v21897_v25  ;;  %v21898_v55 = vld [vmem:[%s23737_s17 + $0x1260] ss:$48 sps:$4 sm:$0xff]  }
 0xdbf   : > { %v10671_v29 = vadd.f32 %v10670_v9, %v10665_v27  ;;  %12797 = vmatpush1.bf16.msra.mxu0 %v21895_v14  ;;  %v21901_v27 = vld [vmem:[%s23737_s17 + $0x1270] ss:$48 sps:$4 sm:$0xff]   ;;  %v21906_v9 = vld [vmem:[%s23737_s17 + $0x12c4] ss:$48 sps:$4 sm:$0xff]  }
 0xdc0   : > { %10668 = vadd.xlane.f32.xlu0 %v10667_v28  ;;  %v21909_v28 = vld [vmem:[%s23737_s17 + $0x12d4] ss:$48 sps:$4 sm:$0xff]  }
 0xdc1   : > { %10672 = vadd.xlane.f32.xlu1 %v10671_v29  ;;  %v21904_v29 = vld [vmem:[%s23737_s17 + $0x12c0] ss:$48 sps:$4 sm:$0xff]  }
 0xe4d   : > { %v10669_v12 = vpop.xlane.xlu0 %10668 }
 0xe4e   : > { %v10674_v33 = vmul.f32 0.0026041667, %v10669_v12  ;;  %v10673_v22 = vpop.xlane.xlu1 %10672  ;;  %v21907_v12 = vld [vmem:[%s23737_s17 + $0x12d0] ss:$48 sps:$4 sm:$0xff]  }
 0xe4f   : > { %v10675_v1 = vmul.f32 0.0026041667, %v10673_v22  ;;  %v21915_v22 = vld [vmem:[%s23737_s17 + $0x1334] ss:$48 sps:$4 sm:$0xff]  }
 0xe50   : > { %v10676_v35 = vadd.f32 1e-05, %v10674_v33  ;;  %v21912_v33 = vld [vmem:[%s23737_s17 + $0x1324] ss:$48 sps:$4 sm:$0xff]  }
 0xe51   : > { %v10677_v31 = vadd.f32 1e-05, %v10675_v1  ;;  %v21910_v1 = vld [vmem:[%s23737_s17 + $0x1320] ss:$48 sps:$4 sm:$0xff]  }
 0xe52   : > { %22724 = vrsqrt.f32 %v10676_v35  ;;  %v21913_v35 = vld [vmem:[%s23737_s17 + $0x1330] ss:$48 sps:$4 sm:$0xff]  }
 0xe53   : > { %22726 = vrsqrt.f32 %v10677_v31  ;;  %v21918_v31 = vld [vmem:[%s23737_s17 + $0x1384] ss:$48 sps:$4 sm:$0xff]  }
 0xe5c   : > { %v22725_v32 = vpop.eup %22724 }
 0xe5d   : > { %v22727_v19 = vpop.eup %22726  ;;  %v10680_v20 = vmul.f32 %v22725_v32, %v10654_v59  ;;  %v10681_v5 = vmul.f32 %v22725_v32, %v10655_v60  ;;  %v10682_v13 = vmul.f32 %v22725_v32, %v10656_v21  ;;  %v21922_v32 = vld [vmem:[%s23737_s17 + $0x13e0] ss:$48 sps:$4 sm:$0xff]  }
 0xe5e   : > { %v10683_v50 = vmul.f32 %v22727_v19, %v10657_v10  ;;  %v10684_v53 = vmul.f32 %v22727_v19, %v10658_v18  ;;  %v10685_v52 = vmul.f32 %v22727_v19, %v10659_v34  ;;  %v21933_v19 = vld [vmem:[%s23737_s17 + $0x1454] ss:$48 sps:$4 sm:$0xff]  }
 0xe5f   : > { %v10702_v38 = vmul.f32 %v10690_v26, %v10680_v20  ;;  %v10703_v3 = vmul.f32 %v10694_v39, %v10681_v5  ;;  %v10704_v54 = vmul.f32 %v10698_v40, %v10682_v13  ;;  %v21928_v20 = vld [vmem:[%s23737_s17 + $0x1440] ss:$48 sps:$4 sm:$0xff]   ;;  %v21936_v13 = vld [vmem:[%s23737_s17 + $0x14a4] ss:$48 sps:$4 sm:$0xff]  }
 0xe60   : > { %v10705_v63 = vmul.f32 %v10690_v26, %v10683_v50  ;;  %v10706_v16 = vmul.f32 %v10694_v39, %v10684_v53  ;;  %v10707_v24 = vmul.f32 %v10698_v40, %v10685_v52  ;;  %v21919_v26 = vld [vmem:[%s23737_s17 + $0x1390] ss:$48 sps:$4 sm:$0xff]   ;;  %v21924_v39 = vld [vmem:[%s23737_s17 + $0x13e4] ss:$48 sps:$4 sm:$0xff]  }
 0xe61   : > { %v10724_v58 = vadd.f32 %v10712_v6, %v10702_v38  ;;  %v10725_v7 = vadd.f32 %v10716_v45, %v10703_v3  ;;  %v10726_v17 = vadd.f32 %v10720_v4, %v10704_v54  ;;  %v21927_v40 = vld [vmem:[%s23737_s17 + $0x13f4] ss:$48 sps:$4 sm:$0xff]   ;;  %v21931_v5 = vld [vmem:[%s23737_s17 + $0x1450] ss:$48 sps:$4 sm:$0xff]  }
 0xe62   : > { %v10727_v11 = vadd.f32 %v10712_v6, %v10705_v63  ;;  %v10728_v59 = vadd.f32 %v10716_v45, %v10706_v16  ;;  %v10729_v60 = vadd.f32 %v10720_v4, %v10707_v24  ;;  %v21925_v6 = vld [vmem:[%s23737_s17 + $0x13f0] ss:$48 sps:$4 sm:$0xff]   ;;  %v21930_v45 = vld [vmem:[%s23737_s17 + $0x1444] ss:$48 sps:$4 sm:$0xff]  }
 0xe63   : > { %v25409_v44 = vadd.f32 %v10724_v58, %v25371_v62  ;;  %v25412_v21 = vadd.f32 %v10725_v7, %v25374_v36  ;;  %v25421_v34 = vadd.f32 %v10726_v17, %v25380_v41  ;;  %v21892_v41 = vld [vmem:[%s23737_s17 + $0x1200] ss:$48 sps:$4 sm:$0xff]   ;;  %v21939_v4 = vld [vmem:[%s23737_s17 + $0x14b4] ss:$48 sps:$4 sm:$0xff]  }
 0xe64   : > { %v25415_v10 = vadd.f32 %v10727_v11, %v25377_v43  ;;  %v25418_v18 = vadd.f32 %v10728_v59, %v25383_v8  ;;  %v25426_v62 = vadd.f32 %v10729_v60, %v25388_v57  ;;  %v21894_v8 = vld [vmem:[%s23737_s17 + $0x1204] ss:$48 sps:$4 sm:$0xff]   ;;  %v21934_v50 = vld [vmem:[%s23737_s17 + $0x14a0] ss:$48 sps:$4 sm:$0xff]  }
 0xe65   : > { %v10740_v56 = vadd.f32 %v25412_v21, %v25409_v44  ;;  %12624 = vmatprep.subr.bf16.mxu1 %v21894_v8  ;;  %v21903_v57 = vld [vmem:[%s23737_s17 + $0x1274] ss:$48 sps:$4 sm:$0xff]   ;;  %v21937_v53 = vld [vmem:[%s23737_s17 + $0x14b0] ss:$48 sps:$4 sm:$0xff]  }
 0xe66   : > { %v10744_v36 = vadd.f32 %v25418_v18, %v25415_v10  ;;  %12625 = vmatpush1.bf16.msra.mxu1 %v21892_v41  ;;  %12798 = vmatprep.subr.bf16.mxu0 %v21903_v57  ;;  %v21942_v52 = vld [vmem:[%s23737_s17 + $0x1504] ss:$48 sps:$4 sm:$0xff]   ;;  %v21940_v3 = vld [vmem:[%s23737_s17 + $0x1500] ss:$48 sps:$4 sm:$0xff]  }
 0xe67   : > { %v10741_v43 = vadd.f32 %v10740_v56, %v25421_v34  ;;  %12626 = vmatprep.subr.bf16.mxu1 %v21900_v42  ;;  %12799 = vmatpush1.bf16.msra.mxu0 %v21901_v27  ;;  %v21945_v38 = vld [vmem:[%s23737_s17 + $0x1514] ss:$48 sps:$4 sm:$0xff]   ;;  %v21943_v54 = vld [vmem:[%s23737_s17 + $0x1510] ss:$48 sps:$4 sm:$0xff]  }
 0xe68   : > { %v10745_v61 = vadd.f32 %v10744_v36, %v25426_v62  ;;  %12800 = vmatprep.subr.bf16.mxu0 %v21909_v28  ;;  %v21948_v63 = vld [vmem:[%s23737_s17 + $0x1564] ss:$48 sps:$4 sm:$0xff]   ;;  %v21946_v24 = vld [vmem:[%s23737_s17 + $0x1560] ss:$48 sps:$4 sm:$0xff]  }
 0xe69   : > { %10742 = vadd.xlane.f32.xlu0 %v10741_v43  ;;  %v21951_v16 = vld [vmem:[%s23737_s17 + $0x1574] ss:$48 sps:$4 sm:$0xff]   ;;  %v21949_v58 = vld [vmem:[%s23737_s17 + $0x1570] ss:$48 sps:$4 sm:$0xff]  }
 0xe6a   : > { %10746 = vadd.xlane.f32.xlu1 %v10745_v61  ;;  %12627 = vmatpush1.bf16.msra.mxu1 %v21898_v55 }
 0xe6b   : > { %12628 = vmatprep.subr.bf16.mxu1 %v21906_v9  ;;  %12801 = vmatpush1.bf16.msra.mxu0 %v21907_v12  ;;  %v21954_v12 = vld [vmem:[%s23737_s17 + $0x15c4] ss:$48 sps:$4 sm:$0xff]  }
 0xe6c   : > { %12802 = vmatprep.subr.bf16.mxu0 %v21915_v22  ;;  %v21952_v22 = vld [vmem:[%s23737_s17 + $0x15c0] ss:$48 sps:$4 sm:$0xff]  }
 0xe6e   : > { %12629 = vmatpush1.bf16.msra.mxu1 %v21904_v29 }
 0xe6f   : > { %12630 = vmatprep.subr.bf16.mxu1 %v21912_v33  ;;  %12803 = vmatpush1.bf16.msra.mxu0 %v21913_v35  ;;  %v21957_v33 = vld [vmem:[%s23737_s17 + $0x15d4] ss:$48 sps:$4 sm:$0xff]  }
 0xe70   : > { %12804 = vmatprep.subr.bf16.mxu0 %v21921_v51  ;;  %v21960_v35 = vld [vmem:[%s23737_s17 + $0x1624] ss:$48 sps:$4 sm:$0xff]   ;;  %v21958_v51 = vld [vmem:[%s23737_s17 + $0x1620] ss:$48 sps:$4 sm:$0xff]  }
 0xe72   : > { %12631 = vmatpush1.bf16.msra.mxu1 %v21910_v1  ;;  %v21955_v1 = vld [vmem:[%s23737_s17 + $0x15d0] ss:$48 sps:$4 sm:$0xff]  }
 0xe73   : > { %12632 = vmatprep.subr.bf16.mxu1 %v21918_v31  ;;  %12805 = vmatpush1.bf16.msra.mxu0 %v21919_v26  ;;  %v21963_v31 = vld [vmem:[%s23737_s17 + $0x1634] ss:$48 sps:$4 sm:$0xff]  }
 0xe74   : > { %12806 = vmatprep.subr.bf16.mxu0 %v21927_v40  ;;  %v21966_v26 = vld [vmem:[%s23737_s17 + $0x1684] ss:$48 sps:$4 sm:$0xff]   ;;  %v21967_v40 = vld [vmem:[%s23737_s17 + $0x1690] ss:$48 sps:$4 sm:$0xff]  }
 0xe76   : > { %12633 = vmatpush1.bf16.msra.mxu1 %v21916_v37  ;;  %v21961_v37 = vld [vmem:[%s23737_s17 + $0x1630] ss:$48 sps:$4 sm:$0xff]  }
 0xe77   : > { %12634 = vmatprep.subr.bf16.mxu1 %v21924_v39  ;;  %12807 = vmatpush1.bf16.msra.mxu0 %v21925_v6  ;;  %v21964_v39 = vld [vmem:[%s23737_s17 + $0x1680] ss:$48 sps:$4 sm:$0xff]   ;;  %v21972_v6 = vld [vmem:[%s23737_s17 + $0x16e4] ss:$48 sps:$4 sm:$0xff]  }
 0xe78   : > { %12808 = vmatprep.subr.bf16.mxu0 %v21933_v19  ;;  %v21970_v19 = vld [vmem:[%s23737_s17 + $0x16e0] ss:$48 sps:$4 sm:$0xff]  }
 0xe7a   : > { %12635 = vmatpush1.bf16.msra.mxu1 %v21922_v32  ;;  %v21969_v32 = vld [vmem:[%s23737_s17 + $0x1694] ss:$48 sps:$4 sm:$0xff]  }
 0xe7b   : > { %12636 = vmatprep.subr.bf16.mxu1 %v21930_v45  ;;  %12809 = vmatpush1.bf16.msra.mxu0 %v21931_v5  ;;  %v21975_v45 = vld [vmem:[%s23737_s17 + $0x16f4] ss:$48 sps:$4 sm:$0xff]  }
 0xe7c   : > { %12810 = vmatprep.subr.bf16.mxu0 %v21939_v4  ;;  %v21978_v5 = vld [vmem:[%s23737_s17 + $0x1744] ss:$48 sps:$4 sm:$0xff]   ;;  %v21976_v4 = vld [vmem:[%s23737_s17 + $0x1740] ss:$48 sps:$4 sm:$0xff]  }
 0xe7e   : > { %12637 = vmatpush1.bf16.msra.mxu1 %v21928_v20  ;;  %v21973_v20 = vld [vmem:[%s23737_s17 + $0x16f0] ss:$48 sps:$4 sm:$0xff]  }
 0xe7f   : > { %12638 = vmatprep.subr.bf16.mxu1 %v21936_v13  ;;  %12811 = vmatpush1.bf16.msra.mxu0 %v21937_v53  ;;  %v21981_v13 = vld [vmem:[%s23737_s17 + $0x1754] ss:$48 sps:$4 sm:$0xff]  }
 0xe80   : > { %12812 = vmatprep.subr.bf16.mxu0 %v21945_v38  ;;  %v21984_v53 = vld [vmem:[%s23737_s17 + $0x17a4] ss:$48 sps:$4 sm:$0xff]   ;;  %v21982_v38 = vld [vmem:[%s23737_s17 + $0x17a0] ss:$48 sps:$4 sm:$0xff]  }
 0xe82   : > { %12639 = vmatpush1.bf16.msra.mxu1 %v21934_v50  ;;  %v21979_v50 = vld [vmem:[%s23737_s17 + $0x1750] ss:$48 sps:$4 sm:$0xff]  }
 0xe83   : > { %12640 = vmatprep.subr.bf16.mxu1 %v21942_v52  ;;  %12813 = vmatpush1.bf16.msra.mxu0 %v21943_v54  ;;  %v21987_v52 = vld [vmem:[%s23737_s17 + $0x17b4] ss:$48 sps:$4 sm:$0xff]  }
 0xe84   : > { %12814 = vmatprep.subr.bf16.mxu0 %v21951_v16  ;;  %v21990_v54 = vld [vmem:[%s23737_s17 + $0x1804] ss:$48 sps:$4 sm:$0xff]  }
 0xe86   : > { %12641 = vmatpush1.bf16.msra.mxu1 %v21940_v3  ;;  %v21985_v3 = vld [vmem:[%s23737_s17 + $0x17b0] ss:$48 sps:$4 sm:$0xff]  }
 0xe87   : > { %12642 = vmatprep.subr.bf16.mxu1 %v21948_v63  ;;  %12815 = vmatpush1.bf16.msra.mxu0 %v21949_v58  ;;  %v21993_v63 = vld [vmem:[%s23737_s17 + $0x1814] ss:$48 sps:$4 sm:$0xff]  }
 0xe88   : > { %12816 = vmatprep.subr.bf16.mxu0 %v21957_v33 }
 0xe8a   : > { %12643 = vmatpush1.bf16.msra.mxu1 %v21946_v24 }
 0xe8b   : > { %12644 = vmatprep.subr.bf16.mxu1 %v21954_v12  ;;  %12817 = vmatpush1.bf16.msra.mxu0 %v21955_v1 }
 0xe8c   : > { %12818 = vmatprep.subr.bf16.mxu0 %v21963_v31 }
 0xe8e   : > { %12645 = vmatpush1.bf16.msra.mxu1 %v21952_v22 }
 0xe8f   : > { %12646 = vmatprep.subr.bf16.mxu1 %v21960_v35  ;;  %12819 = vmatpush1.bf16.msra.mxu0 %v21961_v37  ;;  %v21988_v37 = vld [vmem:[%s23737_s17 + $0x1800] ss:$48 sps:$4 sm:$0xff]  }
 0xe90   : > { %12820 = vmatprep.subr.bf16.mxu0 %v21969_v32  ;;  %v21994_v32 = vld [vmem:[%s23737_s17 + $0x1860] ss:$48 sps:$4 sm:$0xff]  }
 0xe92   : > { %12647 = vmatpush1.bf16.msra.mxu1 %v21958_v51 }
 0xe93   : > { %12648 = vmatprep.subr.bf16.mxu1 %v21966_v26  ;;  %12821 = vmatpush1.bf16.msra.mxu0 %v21967_v40  ;;  %v21991_v26 = vld [vmem:[%s23737_s17 + $0x1810] ss:$48 sps:$4 sm:$0xff]   ;;  %v21999_v40 = vld [vmem:[%s23737_s17 + $0x1874] ss:$48 sps:$4 sm:$0xff]  }
 0xe94   : > { %12822 = vmatprep.subr.bf16.mxu0 %v21975_v45  ;;  %v22002_v45 = vld [vmem:[%s23737_s17 + $0x18c4] ss:$48 sps:$4 sm:$0xff]  }
 0xe96   : > { %12649 = vmatpush1.bf16.msra.mxu1 %v21964_v39  ;;  %v21996_v39 = vld [vmem:[%s23737_s17 + $0x1864] ss:$48 sps:$4 sm:$0xff]  }
 0xe97   : > { %12650 = vmatprep.subr.bf16.mxu1 %v21972_v6  ;;  %12823 = vmatpush1.bf16.msra.mxu0 %v21973_v20  ;;  %v21997_v6 = vld [vmem:[%s23737_s17 + $0x1870] ss:$48 sps:$4 sm:$0xff]  }
 0xe98   : > { %12824 = vmatprep.subr.bf16.mxu0 %v21981_v13  ;;  %v22000_v20 = vld [vmem:[%s23737_s17 + $0x18c0] ss:$48 sps:$4 sm:$0xff]   ;;  %v22008_v13 = vld [vmem:[%s23737_s17 + $0x1924] ss:$48 sps:$4 sm:$0xff]  }
 0xe9a   : > { %12651 = vmatpush1.bf16.msra.mxu1 %v21970_v19  ;;  %v22005_v19 = vld [vmem:[%s23737_s17 + $0x18d4] ss:$48 sps:$4 sm:$0xff]  }
 0xe9b   : > { %12652 = vmatprep.subr.bf16.mxu1 %v21978_v5  ;;  %12825 = vmatpush1.bf16.msra.mxu0 %v21979_v50  ;;  %v22003_v5 = vld [vmem:[%s23737_s17 + $0x18d0] ss:$48 sps:$4 sm:$0xff]  }
 0xe9c   : > { %12826 = vmatprep.subr.bf16.mxu0 %v21987_v52  ;;  %v22006_v50 = vld [vmem:[%s23737_s17 + $0x1920] ss:$48 sps:$4 sm:$0xff]   ;;  %v22014_v52 = vld [vmem:[%s23737_s17 + $0x1984] ss:$48 sps:$4 sm:$0xff]  }
 0xe9e   : > { %12653 = vmatpush1.bf16.msra.mxu1 %v21976_v4  ;;  %v22011_v4 = vld [vmem:[%s23737_s17 + $0x1934] ss:$48 sps:$4 sm:$0xff]  }
 0xe9f   : > { %12654 = vmatprep.subr.bf16.mxu1 %v21984_v53  ;;  %12827 = vmatpush1.bf16.msra.mxu0 %v21985_v3  ;;  %v22009_v53 = vld [vmem:[%s23737_s17 + $0x1930] ss:$48 sps:$4 sm:$0xff]  }
 0xea0   : > { %12839 = vmatprep.subr.bf16.mxu0 %v21993_v63  ;;  %v22012_v3 = vld [vmem:[%s23737_s17 + $0x1980] ss:$48 sps:$4 sm:$0xff]   ;;  %v22020_v63 = vld [vmem:[%s23737_s17 + $0x19e4] ss:$48 sps:$4 sm:$0xff]  }
 0xea2   : > { %12655 = vmatpush1.bf16.msra.mxu1 %v21982_v38  ;;  %v22017_v38 = vld [vmem:[%s23737_s17 + $0x1994] ss:$48 sps:$4 sm:$0xff]  }
 0xea3   : > { %12667 = vmatprep.subr.bf16.mxu1 %v21990_v54  ;;  %v22015_v54 = vld [vmem:[%s23737_s17 + $0x1990] ss:$48 sps:$4 sm:$0xff]  }
 0xef6   : > { %v10743_v7 = vpop.xlane.xlu0 %10742 }
 0xef7   : > { %v10748_v17 = vmul.f32 0.0026041667, %v10743_v7  ;;  %v10747_v11 = vpop.xlane.xlu1 %10746 }
 0xef8   : > { %v10749_v59 = vmul.f32 0.0026041667, %v10747_v11 }
 0xef9   : > { %v25473_v60 = vsub.f32 %v25409_v44, %v10748_v17  ;;  %v25476_v56 = vsub.f32 %v25412_v21, %v10748_v17  ;;  %v25479_v36 = vsub.f32 %v25421_v34, %v10748_v17 }
 0xefa   : > { %v25482_v43 = vsub.f32 %v25415_v10, %v10749_v59  ;;  %v25485_v61 = vsub.f32 %v25418_v18, %v10749_v59  ;;  %v25488_v41 = vsub.f32 %v25426_v62, %v10749_v59  ;;  %v25529_v59 = vld [vmem:[%s23898_s16 + $0x6] sm:$0x7] }
 0xefb   : > { %v10756_v8 = vmul.f32 %v25473_v60, %v25473_v60  ;;  %v10757_v14 = vmul.f32 %v25476_v56, %v25476_v56  ;;  %v10758_v57 = vmul.f32 %v25479_v36, %v25479_v36 }
 0xefc   : > { %v10759_v25 = vmul.f32 %v25482_v43, %v25482_v43  ;;  %v10760_v42 = vmul.f32 %v25485_v61, %v25485_v61  ;;  %v10761_v27 = vmul.f32 %v25488_v41, %v25488_v41 }
 0xefd   : > { %v10762_v55 = vadd.f32 %v10757_v14, %v10756_v8  ;;  %v25532_v8 = vld [vmem:[%s23906_s3 + $0x6] sm:$0x7]  ;;  %v10790_v14 = vrot.slane %v25529_v59, %v23772_v47 }
 0xefe   : > { %v10766_v9 = vadd.f32 %v10760_v42, %v10759_v25  ;;  %v10786_v25 = vrot.slane %v25529_v59, %v23769_v46  ;;  %v10808_v12 = vrot.slane %v25532_v8, %v23769_v46 }
 0xeff   : > { %v10763_v28 = vadd.f32 %v10762_v55, %v10758_v57 }
 0xf00   : > { %v10767_v29 = vadd.f32 %v10766_v9, %v10761_v27 }
 0xf01   : > { %10764 = vadd.xlane.f32.xlu0 %v10763_v28  ;;  %v10812_v28 = vrot.slane %v25532_v8, %v23772_v47 }
 0xf02   : > { %10768 = vadd.xlane.f32.xlu1 %v10767_v29 }
 0xf8e   : > { %v10765_v16 = vpop.xlane.xlu0 %10764 }
 0xf8f   : > { %v10770_v24 = vmul.f32 0.0026041667, %v10765_v16  ;;  %v10769_v58 = vpop.xlane.xlu1 %10768  ;;  %v22023_v16 = vld [vmem:[%s23737_s17 + $0x19f4] ss:$48 sps:$4 sm:$0xff]  }
 0xf90   : > { %v10771_v7 = vmul.f32 0.0026041667, %v10769_v58  ;;  %v22021_v58 = vld [vmem:[%s23737_s17 + $0x19f0] ss:$48 sps:$4 sm:$0xff]  }
 0xf91   : > { %v10772_v17 = vadd.f32 1e-05, %v10770_v24  ;;  %v22018_v24 = vld [vmem:[%s23737_s17 + $0x19e0] ss:$48 sps:$4 sm:$0xff]  }
 0xf92   : > { %v10773_v11 = vadd.f32 1e-05, %v10771_v7  ;;  %v22026_v7 = vld [vmem:[%s23737_s17 + $0x1a44] ss:$48 sps:$4 sm:$0xff]  }
 0xf93   : > { %22728 = vrsqrt.f32 %v10772_v17  ;;  %v22029_v17 = vld [vmem:[%s23737_s17 + $0x1a54] ss:$48 sps:$4 sm:$0xff]  }
 0xf94   : > { %22730 = vrsqrt.f32 %v10773_v11 }
 0xf9d   : > { %v25538_v42 = vpop.eup %22728 }
 0xf9e   : > { %v25540_v57 = vpop.eup %22730  ;;  %v10777_v55 = vmul.f32 %v25538_v42, %v25476_v56  ;;  %v10776_v27 = vmul.f32 %v25538_v42, %v25473_v60 }
 0xf9f   : > { %v10780_v9 = vmul.f32 %v25540_v57, %v25485_v61  ;;  %v10779_v29 = vmul.f32 %v25540_v57, %v25482_v43  ;;  %v10781_v11 = vmul.f32 %v25540_v57, %v25488_v41 }
 0xfa0   : > { %v10799_v33 = vmul.f32 %v10790_v14, %v10777_v55  ;;  %v10798_v56 = vmul.f32 %v10786_v25, %v10776_v27  ;;  %v22024_v55 = vld [vmem:[%s23737_s17 + $0x1a40] ss:$48 sps:$4 sm:$0xff]  }
 0xfa1   : > { %v10802_v22 = vmul.f32 %v10790_v14, %v10780_v9  ;;  %v10801_v1 = vmul.f32 %v10786_v25, %v10779_v29  ;;  %v10778_v14 = vmul.f32 %v25538_v42, %v25479_v36  ;;  %v10794_v25 = vrot.slane %v25529_v59, %v23775_v48  ;;  %v22027_v27 = vld [vmem:[%s23737_s17 + $0x1a50] ss:$48 sps:$4 sm:$0xff]   ;;  %v22032_v9 = vld [vmem:[%s23737_s17 + $0x1aa4] ss:$48 sps:$4 sm:$0xff]  }
 0xfa2   : > { %v10821_v35 = vadd.f32 %v10812_v28, %v10799_v33  ;;  %v10820_v61 = vadd.f32 %v10808_v12, %v10798_v56  ;;  %v10816_v36 = vrot.slane %v25532_v8, %v23775_v48  ;;  %v22030_v59 = vld [vmem:[%s23737_s17 + $0x1aa0] ss:$48 sps:$4 sm:$0xff]   ;;  %v22041_v33 = vld [vmem:[%s23737_s17 + $0x1224] ss:$48 sps:$4 sm:$0xff]  }
 0xfa3   : > { %v10824_v60 = vadd.f32 %v10812_v28, %v10802_v22  ;;  %v10823_v31 = vadd.f32 %v10808_v12, %v10801_v1  ;;  %v22035_v28 = vld [vmem:[%s23737_s17 + $0x1ab4] ss:$48 sps:$4 sm:$0xff]   ;;  %v10803_v41 = vmul.f32 %v10794_v25, %v10781_v11  ;;  %v10800_v57 = vmul.f32 %v10794_v25, %v10778_v14  ;;  %v22033_v42 = vld [vmem:[%s23737_s17 + $0x1ab0] ss:$48 sps:$4 sm:$0xff]   ;;  %v22038_v12 = vld [vmem:[%s23737_s17 + $0x120c] ss:$48 sps:$4 sm:$0xff]  }
 0xfa4   : > { %v22036_v22 = vld [vmem:[%s23737_s17 + $0x1208] ss:$48 sps:$4 sm:$0xff]   ;;  %v22039_v1 = vld [vmem:[%s23737_s17 + $0x1220] ss:$48 sps:$4 sm:$0xff]   ;;  %v22086_v11 = vld [vmem:[%s23737_s17 + $0x150c] ss:$48 sps:$4 sm:$0xff]  }
 0xfa5   : > { %v25554_v51 = vpack.c.bf16 %v10824_v60, %v10821_v35  ;;  %v25558_v43 = vpack.c.bf16 %v10823_v31, %v10820_v61  ;;  %v10825_v29 = vadd.f32 %v10816_v36, %v10803_v41  ;;  %v10822_v56 = vadd.f32 %v10816_v36, %v10800_v57  ;;  %v22044_v35 = vld [vmem:[%s23737_s17 + $0x126c] ss:$48 sps:$4 sm:$0xff]   ;;  %v22047_v60 = vld [vmem:[%s23737_s17 + $0x1284] ss:$48 sps:$4 sm:$0xff]   ;;  %v22042_v61 = vld [vmem:[%s23737_s17 + $0x1268] ss:$48 sps:$4 sm:$0xff]  }
 0xfa6   : > { %v22045_v31 = vld [vmem:[%s23737_s17 + $0x1280] ss:$48 sps:$4 sm:$0xff]   ;;  %v22089_v14 = vld [vmem:[%s23737_s17 + $0x1524] ss:$48 sps:$4 sm:$0xff]   ;;  %v22084_v25 = vld [vmem:[%s23737_s17 + $0x1508] ss:$48 sps:$4 sm:$0xff]  }
 0xfa7   : > { %12656 = vmatprep.mubr.bf16.mxu1 %v25554_v51  ;;  %12828 = vmatprep.mubr.bf16.mxu0 %v25554_v51  ;;  %v25605_v8 = vpack.c.bf16 %v10825_v29, %v10822_v56  ;;  %v22093_v41 = vld [vmem:[%s23737_s17 + $0x1580] ss:$48 sps:$4 sm:$0xff]   ;;  %v22098_v57 = vld [vmem:[%s23737_s17 + $0x15cc] ss:$48 sps:$4 sm:$0xff]   ;;  %v22101_v36 = vld [vmem:[%s23737_s17 + $0x15e4] ss:$48 sps:$4 sm:$0xff]  }
 0xfa8   : > { %12657 = vmatmul.mubr.bf16.vlgmr.msra.gmra.mrb[80].mxu1 %v25558_v43  ;;  %12829 = vmatmul.mubr.bf16.vlgmr.msra.gmra.mrb[24].mxu0 %v25558_v43  ;;  %v22104_v29 = vld [vmem:[%s23737_s17 + $0x162c] ss:$48 sps:$4 sm:$0xff]   ;;  %v22105_v56 = vld [vmem:[%s23737_s17 + $0x1640] ss:$48 sps:$4 sm:$0xff]  }
 0xfa9   : > { %12668 = vmatpush1.bf16.msra.mxu1 %v21988_v37  ;;  %12840 = vmatpush1.bf16.msra.mxu0 %v21991_v26  ;;  %v22050_v37 = vld [vmem:[%s23737_s17 + $0x12cc] ss:$48 sps:$4 sm:$0xff]   ;;  %v22053_v26 = vld [vmem:[%s23737_s17 + $0x12e4] ss:$48 sps:$4 sm:$0xff]  }
 0xfaa   : > { %12669 = vmatprep.subr.bf16.mxu1 %v21996_v39  ;;  %12841 = vmatprep.subr.bf16.mxu0 %v21999_v40  ;;  %v22048_v39 = vld [vmem:[%s23737_s17 + $0x12c8] ss:$48 sps:$4 sm:$0xff]   ;;  %v22051_v40 = vld [vmem:[%s23737_s17 + $0x12e0] ss:$48 sps:$4 sm:$0xff]  }
 0xfab   : > { %12699 = vmatprep.mubr.bf16.mxu1 %v23246_v49  ;;  %12871 = vmatprep.mubr.bf16.mxu0 %v23246_v49 }
 0xfad   : > { %12670 = vmatpush1.bf16.msra.mxu1 %v21994_v32  ;;  %12842 = vmatpush1.bf16.msra.mxu0 %v21997_v6  ;;  %v22056_v32 = vld [vmem:[%s23737_s17 + $0x132c] ss:$48 sps:$4 sm:$0xff]   ;;  %v22059_v6 = vld [vmem:[%s23737_s17 + $0x1344] ss:$48 sps:$4 sm:$0xff]  }
 0xfae   : > { %12671 = vmatprep.subr.bf16.mxu1 %v22002_v45  ;;  %12843 = vmatprep.subr.bf16.mxu0 %v22005_v19  ;;  %v22054_v45 = vld [vmem:[%s23737_s17 + $0x1328] ss:$48 sps:$4 sm:$0xff]   ;;  %v22057_v19 = vld [vmem:[%s23737_s17 + $0x1340] ss:$48 sps:$4 sm:$0xff]  }
 0xfb1   : > { %12672 = vmatpush1.bf16.msra.mxu1 %v22000_v20  ;;  %12844 = vmatpush1.bf16.msra.mxu0 %v22003_v5  ;;  %v22062_v20 = vld [vmem:[%s23737_s17 + $0x138c] ss:$48 sps:$4 sm:$0xff]   ;;  %v22065_v5 = vld [vmem:[%s23737_s17 + $0x13a4] ss:$48 sps:$4 sm:$0xff]  }
 0xfb2   : > { %12673 = vmatprep.subr.bf16.mxu1 %v22008_v13  ;;  %12845 = vmatprep.subr.bf16.mxu0 %v22011_v4  ;;  %v22060_v13 = vld [vmem:[%s23737_s17 + $0x1388] ss:$48 sps:$4 sm:$0xff]   ;;  %v22063_v4 = vld [vmem:[%s23737_s17 + $0x13a0] ss:$48 sps:$4 sm:$0xff]  }
 0xfb5   : > { %12674 = vmatpush1.bf16.msra.mxu1 %v22006_v50  ;;  %12846 = vmatpush1.bf16.msra.mxu0 %v22009_v53  ;;  %v22068_v50 = vld [vmem:[%s23737_s17 + $0x13ec] ss:$48 sps:$4 sm:$0xff]   ;;  %v22071_v53 = vld [vmem:[%s23737_s17 + $0x1404] ss:$48 sps:$4 sm:$0xff]  }
 0xfb6   : > { %12675 = vmatprep.subr.bf16.mxu1 %v22014_v52  ;;  %12847 = vmatprep.subr.bf16.mxu0 %v22017_v38  ;;  %v22066_v52 = vld [vmem:[%s23737_s17 + $0x13e8] ss:$48 sps:$4 sm:$0xff]   ;;  %v22069_v38 = vld [vmem:[%s23737_s17 + $0x1400] ss:$48 sps:$4 sm:$0xff]  }
 0xfb9   : > { %12676 = vmatpush1.bf16.msra.mxu1 %v22012_v3  ;;  %12848 = vmatpush1.bf16.msra.mxu0 %v22015_v54  ;;  %v22074_v3 = vld [vmem:[%s23737_s17 + $0x144c] ss:$48 sps:$4 sm:$0xff]   ;;  %v22077_v54 = vld [vmem:[%s23737_s17 + $0x1464] ss:$48 sps:$4 sm:$0xff]  }
 0xfba   : > { %12677 = vmatprep.subr.bf16.mxu1 %v22020_v63  ;;  %12849 = vmatprep.subr.bf16.mxu0 %v22023_v16  ;;  %v22072_v63 = vld [vmem:[%s23737_s17 + $0x1448] ss:$48 sps:$4 sm:$0xff]   ;;  %v22075_v16 = vld [vmem:[%s23737_s17 + $0x1460] ss:$48 sps:$4 sm:$0xff]  }
 0xfbd   : > { %12678 = vmatpush1.bf16.msra.mxu1 %v22018_v24  ;;  %12850 = vmatpush1.bf16.msra.mxu0 %v22021_v58  ;;  %v22080_v24 = vld [vmem:[%s23737_s17 + $0x14ac] ss:$48 sps:$4 sm:$0xff]   ;;  %v22083_v58 = vld [vmem:[%s23737_s17 + $0x14c4] ss:$48 sps:$4 sm:$0xff]  }
 0xfbe   : > { %12679 = vmatprep.subr.bf16.mxu1 %v22026_v7  ;;  %12851 = vmatprep.subr.bf16.mxu0 %v22029_v17  ;;  %v22078_v7 = vld [vmem:[%s23737_s17 + $0x14a8] ss:$48 sps:$4 sm:$0xff]   ;;  %v22081_v17 = vld [vmem:[%s23737_s17 + $0x14c0] ss:$48 sps:$4 sm:$0xff]  }
 0xfc1   : > { %12680 = vmatpush1.bf16.msra.mxu1 %v22024_v55  ;;  %12852 = vmatpush1.bf16.msra.mxu0 %v22027_v27  ;;  %v22087_v55 = vld [vmem:[%s23737_s17 + $0x1520] ss:$48 sps:$4 sm:$0xff]   ;;  %v22092_v27 = vld [vmem:[%s23737_s17 + $0x156c] ss:$48 sps:$4 sm:$0xff]  }
 0xfc2   : > { %12681 = vmatprep.subr.bf16.mxu1 %v22032_v9  ;;  %12853 = vmatprep.subr.bf16.mxu0 %v22035_v28  ;;  %v22095_v9 = vld [vmem:[%s23737_s17 + $0x1584] ss:$48 sps:$4 sm:$0xff]   ;;  %v22090_v28 = vld [vmem:[%s23737_s17 + $0x1568] ss:$48 sps:$4 sm:$0xff]  }
 0xfc5   : > { %12682 = vmatpush1.bf16.msra.mxu1 %v22030_v59  ;;  %12854 = vmatpush1.bf16.msra.mxu0 %v22033_v42  ;;  %v22096_v59 = vld [vmem:[%s23737_s17 + $0x15c8] ss:$48 sps:$4 sm:$0xff]   ;;  %v22099_v42 = vld [vmem:[%s23737_s17 + $0x15e0] ss:$48 sps:$4 sm:$0xff]  }
 0xfc6   : > { %12710 = vmatprep.subr.bf16.mxu1 %v22038_v12  ;;  %12968 = vmatprep.subr.bf16.mxu0 %v22041_v33  ;;  %v22107_v12 = vld [vmem:[%s23737_s17 + $0x1644] ss:$48 sps:$4 sm:$0xff]   ;;  %v22102_v33 = vld [vmem:[%s23737_s17 + $0x1628] ss:$48 sps:$4 sm:$0xff]  }
 0xfc8   : > { %12700 = vmatmul.mubr.bf16.vlgmr.msra.gmra.mrb[80].mxu1 %v25605_v8  ;;  %12872 = vmatmul.mubr.bf16.vlgmr.msra.gmra.mrb[24].mxu0 %v25605_v8 }
 0xfc9   : > { %12711 = vmatpush1.bf16.msra.mxu1 %v22036_v22  ;;  %12742 = vmatprep.mubr.bf16.mxu1 %v25554_v51  ;;  %v22110_v22 = vld [vmem:[%s23737_s17 + $0x168c] ss:$48 sps:$4 sm:$0xff]  }
 0xfca   : > { %12969 = vmatpush1.bf16.msra.mxu0 %v22039_v1  ;;  %13000 = vmatprep.mubr.bf16.mxu0 %v25554_v51  ;;  %v22113_v1 = vld [vmem:[%s23737_s17 + $0x16a4] ss:$48 sps:$4 sm:$0xff]  }
 0xfcb   : > { %12712 = vmatprep.subr.bf16.mxu1 %v22044_v35  ;;  %12970 = vmatprep.subr.bf16.mxu0 %v22047_v60  ;;  %v22108_v35 = vld [vmem:[%s23737_s17 + $0x1688] ss:$48 sps:$4 sm:$0xff]   ;;  %v22111_v60 = vld [vmem:[%s23737_s17 + $0x16a0] ss:$48 sps:$4 sm:$0xff]  }
 0xfcd   : > { %12713 = vmatpush1.bf16.msra.mxu1 %v22042_v61  ;;  %v22116_v61 = vld [vmem:[%s23737_s17 + $0x16ec] ss:$48 sps:$4 sm:$0xff]  }
 0xfce   : > { %12971 = vmatpush1.bf16.msra.mxu0 %v22045_v31  ;;  %12714 = vmatprep.subr.bf16.mxu1 %v22050_v37  ;;  %v22119_v31 = vld [vmem:[%s23737_s17 + $0x1704] ss:$48 sps:$4 sm:$0xff]   ;;  %v22114_v37 = vld [vmem:[%s23737_s17 + $0x16e8] ss:$48 sps:$4 sm:$0xff]  }
 0xfcf   : > { %12972 = vmatprep.subr.bf16.mxu0 %v22053_v26  ;;  %v22117_v26 = vld [vmem:[%s23737_s17 + $0x1700] ss:$48 sps:$4 sm:$0xff]  }
 0xfd1   : > { %12715 = vmatpush1.bf16.msra.mxu1 %v22048_v39  ;;  %v22122_v39 = vld [vmem:[%s23737_s17 + $0x174c] ss:$48 sps:$4 sm:$0xff]  }
 0xfd2   : > { %12973 = vmatpush1.bf16.msra.mxu0 %v22051_v40  ;;  %12716 = vmatprep.subr.bf16.mxu1 %v22056_v32  ;;  %v22125_v40 = vld [vmem:[%s23737_s17 + $0x1764] ss:$48 sps:$4 sm:$0xff]   ;;  %v22120_v32 = vld [vmem:[%s23737_s17 + $0x1748] ss:$48 sps:$4 sm:$0xff]  }
 0xfd3   : > { %12974 = vmatprep.subr.bf16.mxu0 %v22059_v6  ;;  %v22123_v6 = vld [vmem:[%s23737_s17 + $0x1760] ss:$48 sps:$4 sm:$0xff]  }
 0xfd5   : > { %12717 = vmatpush1.bf16.msra.mxu1 %v22054_v45  ;;  %v22128_v45 = vld [vmem:[%s23737_s17 + $0x17ac] ss:$48 sps:$4 sm:$0xff]  }
 0xfd6   : > { %12975 = vmatpush1.bf16.msra.mxu0 %v22057_v19  ;;  %12718 = vmatprep.subr.bf16.mxu1 %v22062_v20  ;;  %v22131_v19 = vld [vmem:[%s23737_s17 + $0x17c4] ss:$48 sps:$4 sm:$0xff]   ;;  %v22126_v20 = vld [vmem:[%s23737_s17 + $0x17a8] ss:$48 sps:$4 sm:$0xff]  }
 0xfd7   : > { %12976 = vmatprep.subr.bf16.mxu0 %v22065_v5  ;;  %v22129_v5 = vld [vmem:[%s23737_s17 + $0x17c0] ss:$48 sps:$4 sm:$0xff]  }
 0xfd9   : > { %12719 = vmatpush1.bf16.msra.mxu1 %v22060_v13  ;;  %v22134_v13 = vld [vmem:[%s23737_s17 + $0x180c] ss:$48 sps:$4 sm:$0xff]  }
 0xfda   : > { %12977 = vmatpush1.bf16.msra.mxu0 %v22063_v4  ;;  %12720 = vmatprep.subr.bf16.mxu1 %v22068_v50  ;;  %v22137_v4 = vld [vmem:[%s23737_s17 + $0x1824] ss:$48 sps:$4 sm:$0xff]   ;;  %v22132_v50 = vld [vmem:[%s23737_s17 + $0x1808] ss:$48 sps:$4 sm:$0xff]  }
 0xfdb   : > { %12978 = vmatprep.subr.bf16.mxu0 %v22071_v53  ;;  %v22135_v53 = vld [vmem:[%s23737_s17 + $0x1820] ss:$48 sps:$4 sm:$0xff]  }
 0xfdd   : > { %12721 = vmatpush1.bf16.msra.mxu1 %v22066_v52  ;;  %v22140_v52 = vld [vmem:[%s23737_s17 + $0x186c] ss:$48 sps:$4 sm:$0xff]  }
 0xfde   : > { %12979 = vmatpush1.bf16.msra.mxu0 %v22069_v38  ;;  %12722 = vmatprep.subr.bf16.mxu1 %v22074_v3  ;;  %v22143_v38 = vld [vmem:[%s23737_s17 + $0x1884] ss:$48 sps:$4 sm:$0xff]   ;;  %v22138_v3 = vld [vmem:[%s23737_s17 + $0x1868] ss:$48 sps:$4 sm:$0xff]  }
 0xfdf   : > { %12980 = vmatprep.subr.bf16.mxu0 %v22077_v54  ;;  %v22141_v54 = vld [vmem:[%s23737_s17 + $0x1880] ss:$48 sps:$4 sm:$0xff]  }
 0xfe1   : > { %12723 = vmatpush1.bf16.msra.mxu1 %v22072_v63  ;;  %v22146_v63 = vld [vmem:[%s23737_s17 + $0x18cc] ss:$48 sps:$4 sm:$0xff]  }
 0xfe2   : > { %12981 = vmatpush1.bf16.msra.mxu0 %v22075_v16  ;;  %12724 = vmatprep.subr.bf16.mxu1 %v22080_v24  ;;  %v22149_v16 = vld [vmem:[%s23737_s17 + $0x18e4] ss:$48 sps:$4 sm:$0xff]   ;;  %v22144_v24 = vld [vmem:[%s23737_s17 + $0x18c8] ss:$48 sps:$4 sm:$0xff]  }
 0xfe3   : > { %12982 = vmatprep.subr.bf16.mxu0 %v22083_v58  ;;  %v22147_v58 = vld [vmem:[%s23737_s17 + $0x18e0] ss:$48 sps:$4 sm:$0xff]  }
 0xfe5   : > { %12725 = vmatpush1.bf16.msra.mxu1 %v22078_v7  ;;  %v22152_v7 = vld [vmem:[%s23737_s17 + $0x192c] ss:$48 sps:$4 sm:$0xff]  }
 0xfe6   : > { %12983 = vmatpush1.bf16.msra.mxu0 %v22081_v17  ;;  %12726 = vmatprep.subr.bf16.mxu1 %v22086_v11  ;;  %v22155_v17 = vld [vmem:[%s23737_s17 + $0x1944] ss:$48 sps:$4 sm:$0xff]   ;;  %v22150_v11 = vld [vmem:[%s23737_s17 + $0x1928] ss:$48 sps:$4 sm:$0xff]  }
 0xfe7   : > { %12984 = vmatprep.subr.bf16.mxu0 %v22089_v14  ;;  %v22153_v14 = vld [vmem:[%s23737_s17 + $0x1940] ss:$48 sps:$4 sm:$0xff]  }
 0xfe9   : > { %12727 = vmatpush1.bf16.msra.mxu1 %v22084_v25  ;;  %v22158_v25 = vld [vmem:[%s23737_s17 + $0x198c] ss:$48 sps:$4 sm:$0xff]  }
 0xfea   : > { %12985 = vmatpush1.bf16.msra.mxu0 %v22087_v55  ;;  %12728 = vmatprep.subr.bf16.mxu1 %v22092_v27  ;;  %v22161_v55 = vld [vmem:[%s23737_s17 + $0x19a4] ss:$48 sps:$4 sm:$0xff]   ;;  %v22156_v27 = vld [vmem:[%s23737_s17 + $0x1988] ss:$48 sps:$4 sm:$0xff]  }
 0xfeb   : > { %12986 = vmatprep.subr.bf16.mxu0 %v22095_v9  ;;  %v22159_v9 = vld [vmem:[%s23737_s17 + $0x19a0] ss:$48 sps:$4 sm:$0xff]  }
 0xfed   : > { %12729 = vmatpush1.bf16.msra.mxu1 %v22090_v28  ;;  %v22164_v28 = vld [vmem:[%s23737_s17 + $0x19ec] ss:$48 sps:$4 sm:$0xff]  }
 0xfee   : > { %12987 = vmatpush1.bf16.msra.mxu0 %v22093_v41  ;;  %12730 = vmatprep.subr.bf16.mxu1 %v22098_v57  ;;  %v22167_v41 = vld [vmem:[%s23737_s17 + $0x1a04] ss:$48 sps:$4 sm:$0xff]   ;;  %v22162_v57 = vld [vmem:[%s23737_s17 + $0x19e8] ss:$48 sps:$4 sm:$0xff]  }
 0xfef   : > { %12988 = vmatprep.subr.bf16.mxu0 %v22101_v36  ;;  %v22165_v36 = vld [vmem:[%s23737_s17 + $0x1a00] ss:$48 sps:$4 sm:$0xff]  }
 0xff1   : > { %12731 = vmatpush1.bf16.msra.mxu1 %v22096_v59  ;;  %v22170_v59 = vld [vmem:[%s23737_s17 + $0x1a4c] ss:$48 sps:$4 sm:$0xff]  }
 0xff2   : > { %12989 = vmatpush1.bf16.msra.mxu0 %v22099_v42  ;;  %12732 = vmatprep.subr.bf16.mxu1 %v22104_v29  ;;  %v22173_v42 = vld [vmem:[%s23737_s17 + $0x1a64] ss:$48 sps:$4 sm:$0xff]   ;;  %v22168_v29 = vld [vmem:[%s23737_s17 + $0x1a48] ss:$48 sps:$4 sm:$0xff]  }
 0xff3   : > { %12990 = vmatprep.subr.bf16.mxu0 %v22107_v12  ;;  %v22171_v12 = vld [vmem:[%s23737_s17 + $0x1a60] ss:$48 sps:$4 sm:$0xff]  }
 0xff5   : > { %12733 = vmatpush1.bf16.msra.mxu1 %v22102_v33  ;;  %v22176_v33 = vld [vmem:[%s23737_s17 + $0x1aac] ss:$48 sps:$4 sm:$0xff]  }
 0xff6   : > { %12991 = vmatpush1.bf16.msra.mxu0 %v22105_v56  ;;  %12734 = vmatprep.subr.bf16.mxu1 %v22110_v22  ;;  %v22179_v56 = vld [vmem:[%s23737_s17 + $0x1ac4] ss:$48 sps:$4 sm:$0xff]   ;;  %v22174_v22 = vld [vmem:[%s23737_s17 + $0x1aa8] ss:$48 sps:$4 sm:$0xff]  }
 0xff7   : > { %12992 = vmatprep.subr.bf16.mxu0 %v22113_v1  ;;  %v22177_v1 = vld [vmem:[%s23737_s17 + $0x1ac0] ss:$48 sps:$4 sm:$0xff]  }
 0xff9   : > { %12735 = vmatpush1.bf16.msra.mxu1 %v22108_v35  ;;  %v22182_v35 = vld [vmem:[%s23737_s17 + $0x121c] ss:$48 sps:$4 sm:$0xff]  }
 0xffa   : > { %12993 = vmatpush1.bf16.msra.mxu0 %v22111_v60  ;;  %12736 = vmatprep.subr.bf16.mxu1 %v22116_v61  ;;  %v22230_v60 = vld [vmem:[%s23743_s13 + $0x1204] ss:$12 sps:$4 sm:$0xff]   ;;  %v22180_v61 = vld [vmem:[%s23737_s17 + $0x1218] ss:$48 sps:$4 sm:$0xff]  }
 0xffb   : > { %12994 = vmatprep.subr.bf16.mxu0 %v22119_v31  ;;  %v22185_v31 = vld [vmem:[%s23737_s17 + $0x127c] ss:$48 sps:$4 sm:$0xff]  }
 0xffd   : > { %12737 = vmatpush1.bf16.msra.mxu1 %v22114_v37  ;;  %v22228_v37 = vld [vmem:[%s23743_s13 + $0x1200] ss:$12 sps:$4 sm:$0xff]  }
 0xffe   : > { %12995 = vmatpush1.bf16.msra.mxu0 %v22117_v26  ;;  %12738 = vmatprep.subr.bf16.mxu1 %v22122_v39  ;;  %v22236_v26 = vld [vmem:[%s23743_s13 + $0x121c] ss:$12 sps:$4 sm:$0xff]  }
 0xfff   : > { %12996 = vmatprep.subr.bf16.mxu0 %v22125_v40  ;;  %v22183_v39 = vld [vmem:[%s23737_s17 + $0x1278] ss:$48 sps:$4 sm:$0xff]   ;;  %v22188_v40 = vld [vmem:[%s23737_s17 + $0x12dc] ss:$48 sps:$4 sm:$0xff]  }
0x1001   : > { %12739 = vmatpush1.bf16.msra.mxu1 %v22120_v32  ;;  %v22234_v32 = vld [vmem:[%s23743_s13 + $0x1218] ss:$12 sps:$4 sm:$0xff]  }
0x1002   : > { %12997 = vmatpush1.bf16.msra.mxu0 %v22123_v6  ;;  %12740 = vmatprep.subr.bf16.mxu1 %v22128_v45  ;;  %v22242_v6 = vld [vmem:[%s23743_s13 + $0x1234] ss:$12 sps:$4 sm:$0xff]   ;;  %v22186_v45 = vld [vmem:[%s23737_s17 + $0x12d8] ss:$48 sps:$4 sm:$0xff]  }
0x1003   : > { %12998 = vmatprep.subr.bf16.mxu0 %v22131_v19  ;;  %v22191_v19 = vld [vmem:[%s23737_s17 + $0x133c] ss:$48 sps:$4 sm:$0xff]  }
0x1005   : > { %12741 = vmatpush1.bf16.msra.mxu1 %v22126_v20  ;;  %v22240_v20 = vld [vmem:[%s23743_s13 + $0x1230] ss:$12 sps:$4 sm:$0xff]  }
0x1006   : > { %12999 = vmatpush1.bf16.msra.mxu0 %v22129_v5  ;;  %12753 = vmatprep.subr.bf16.mxu1 %v22134_v13  ;;  %v22248_v5 = vld [vmem:[%s23743_s13 + $0x124c] ss:$12 sps:$4 sm:$0xff]  }
0x1007   : > { %13011 = vmatprep.subr.bf16.mxu0 %v22137_v4  ;;  %v22189_v13 = vld [vmem:[%s23737_s17 + $0x1338] ss:$48 sps:$4 sm:$0xff]   ;;  %v22194_v4 = vld [vmem:[%s23737_s17 + $0x139c] ss:$48 sps:$4 sm:$0xff]  }
0x1008   : > { %12743 = vmatmul.mubr.bf16.vlgmr.msra.gmra.mrb[84].mxu1 %v25558_v43 }
0x1009   : > { %13001 = vmatmul.mubr.bf16.vlgmr.msra.gmra.mrb[28].mxu0 %v25558_v43  ;;  %12754 = vmatpush1.bf16.msra.mxu1 %v22132_v50  ;;  %v22246_v50 = vld [vmem:[%s23743_s13 + $0x1248] ss:$12 sps:$4 sm:$0xff]  }
0x100a   : > { %13012 = vmatpush1.bf16.msra.mxu0 %v22135_v53  ;;  %12755 = vmatprep.subr.bf16.mxu1 %v22140_v52  ;;  %v22254_v53 = vld [vmem:[%s23743_s13 + $0x1264] ss:$12 sps:$4 sm:$0xff]   ;;  %v22192_v52 = vld [vmem:[%s23737_s17 + $0x1398] ss:$48 sps:$4 sm:$0xff]  }
0x100b   : > { %13013 = vmatprep.subr.bf16.mxu0 %v22143_v38  ;;  %12785 = vmatprep.mubr.bf16.mxu1 %v23246_v49  ;;  %v22197_v38 = vld [vmem:[%s23737_s17 + $0x13fc] ss:$48 sps:$4 sm:$0xff]  }
0x100c   : > { %13043 = vmatprep.mubr.bf16.mxu0 %v23246_v49 }
0x100d   : > { %12756 = vmatpush1.bf16.msra.mxu1 %v22138_v3  ;;  %v22252_v3 = vld [vmem:[%s23743_s13 + $0x1260] ss:$12 sps:$4 sm:$0xff]  }
0x100e   : > { %13014 = vmatpush1.bf16.msra.mxu0 %v22141_v54  ;;  %12757 = vmatprep.subr.bf16.mxu1 %v22146_v63  ;;  %v22260_v54 = vld [vmem:[%s23743_s13 + $0x127c] ss:$12 sps:$4 sm:$0xff]  }
0x100f   : > { %13015 = vmatprep.subr.bf16.mxu0 %v22149_v16  ;;  %v22195_v63 = vld [vmem:[%s23737_s17 + $0x13f8] ss:$48 sps:$4 sm:$0xff]   ;;  %v22200_v16 = vld [vmem:[%s23737_s17 + $0x145c] ss:$48 sps:$4 sm:$0xff]  }
0x1011   : > { %12758 = vmatpush1.bf16.msra.mxu1 %v22144_v24  ;;  %v22258_v24 = vld [vmem:[%s23743_s13 + $0x1278] ss:$12 sps:$4 sm:$0xff]  }
0x1012   : > { %13016 = vmatpush1.bf16.msra.mxu0 %v22147_v58  ;;  %12759 = vmatprep.subr.bf16.mxu1 %v22152_v7  ;;  %v22266_v58 = vld [vmem:[%s23743_s13 + $0x1294] ss:$12 sps:$4 sm:$0xff]   ;;  %v22198_v7 = vld [vmem:[%s23737_s17 + $0x1458] ss:$48 sps:$4 sm:$0xff]  }
0x1013   : > { %13017 = vmatprep.subr.bf16.mxu0 %v22155_v17  ;;  %v22203_v17 = vld [vmem:[%s23737_s17 + $0x14bc] ss:$48 sps:$4 sm:$0xff]  }
0x1015   : > { %12760 = vmatpush1.bf16.msra.mxu1 %v22150_v11  ;;  %v22264_v11 = vld [vmem:[%s23743_s13 + $0x1290] ss:$12 sps:$4 sm:$0xff]  }
0x1016   : > { %13018 = vmatpush1.bf16.msra.mxu0 %v22153_v14  ;;  %12761 = vmatprep.subr.bf16.mxu1 %v22158_v25  ;;  %v22272_v14 = vld [vmem:[%s23743_s13 + $0x12ac] ss:$12 sps:$4 sm:$0xff]  }
0x1017   : > { %13019 = vmatprep.subr.bf16.mxu0 %v22161_v55  ;;  %v22201_v25 = vld [vmem:[%s23737_s17 + $0x14b8] ss:$48 sps:$4 sm:$0xff]   ;;  %v22206_v55 = vld [vmem:[%s23737_s17 + $0x151c] ss:$48 sps:$4 sm:$0xff]  }
0x1019   : > { %12762 = vmatpush1.bf16.msra.mxu1 %v22156_v27  ;;  %v22270_v27 = vld [vmem:[%s23743_s13 + $0x12a8] ss:$12 sps:$4 sm:$0xff]  }
0x101a   : > { %13020 = vmatpush1.bf16.msra.mxu0 %v22159_v9  ;;  %12763 = vmatprep.subr.bf16.mxu1 %v22164_v28  ;;  %v22278_v9 = vld [vmem:[%s23743_s13 + $0x12c4] ss:$12 sps:$4 sm:$0xff]   ;;  %v22204_v28 = vld [vmem:[%s23737_s17 + $0x1518] ss:$48 sps:$4 sm:$0xff]  }
0x101b   : > { %13021 = vmatprep.subr.bf16.mxu0 %v22167_v41  ;;  %v22209_v41 = vld [vmem:[%s23737_s17 + $0x157c] ss:$48 sps:$4 sm:$0xff]  }
0x101d   : > { %12764 = vmatpush1.bf16.msra.mxu1 %v22162_v57  ;;  %v22276_v57 = vld [vmem:[%s23743_s13 + $0x12c0] ss:$12 sps:$4 sm:$0xff]  }
0x101e   : > { %13022 = vmatpush1.bf16.msra.mxu0 %v22165_v36  ;;  %12765 = vmatprep.subr.bf16.mxu1 %v22170_v59  ;;  %v22284_v36 = vld [vmem:[%s23743_s13 + $0x12dc] ss:$12 sps:$4 sm:$0xff]  }
0x101f   : > { %13023 = vmatprep.subr.bf16.mxu0 %v22173_v42  ;;  %v22207_v59 = vld [vmem:[%s23737_s17 + $0x1578] ss:$48 sps:$4 sm:$0xff]   ;;  %v22212_v42 = vld [vmem:[%s23737_s17 + $0x15dc] ss:$48 sps:$4 sm:$0xff]  }
0x1021   : > { %12766 = vmatpush1.bf16.msra.mxu1 %v22168_v29  ;;  %v22282_v29 = vld [vmem:[%s23743_s13 + $0x12d8] ss:$12 sps:$4 sm:$0xff]  }
0x1022   : > { %13024 = vmatpush1.bf16.msra.mxu0 %v22171_v12  ;;  %12767 = vmatprep.subr.bf16.mxu1 %v22176_v33  ;;  %v22290_v12 = vld [vmem:[%s23743_s13 + $0x12f4] ss:$12 sps:$4 sm:$0xff]   ;;  %v22210_v33 = vld [vmem:[%s23737_s17 + $0x15d8] ss:$48 sps:$4 sm:$0xff]  }
0x1023   : > { %13025 = vmatprep.subr.bf16.mxu0 %v22179_v56  ;;  %v22215_v56 = vld [vmem:[%s23737_s17 + $0x163c] ss:$48 sps:$4 sm:$0xff]  }
0x1025   : > { %12768 = vmatpush1.bf16.msra.mxu1 %v22174_v22  ;;  %v22288_v22 = vld [vmem:[%s23743_s13 + $0x12f0] ss:$12 sps:$4 sm:$0xff]  }
0x1026   : > { %13026 = vmatpush1.bf16.msra.mxu0 %v22177_v1  ;;  %12882 = vmatprep.subr.bf16.mxu1 %v22182_v35  ;;  %v22296_v1 = vld [vmem:[%s23743_s13 + $0x130c] ss:$12 sps:$4 sm:$0xff]  }
0x1027   : > { %15115 = vmatprep.subr.bf16.mxu0 %v22230_v60  ;;  %v22213_v35 = vld [vmem:[%s23737_s17 + $0x1638] ss:$48 sps:$4 sm:$0xff]   ;;  %v22218_v60 = vld [vmem:[%s23737_s17 + $0x169c] ss:$48 sps:$4 sm:$0xff]  }
0x1028   : > { %12786 = vmatmul.mubr.bf16.vlgmr.msra.gmra.mrb[84].mxu1 %v25605_v8 }
0x1029   : > { %13044 = vmatmul.mubr.bf16.vlgmr.msra.gmra.mrb[28].mxu0 %v25605_v8  ;;  %12883 = vmatpush1.bf16.msra.mxu1 %v22180_v61  ;;  %v22294_v61 = vld [vmem:[%s23743_s13 + $0x1308] ss:$12 sps:$4 sm:$0xff]  }
0x102a   : > { %12914 = vmatprep.mubr.bf16.mxu1 %v25554_v51  ;;  %12884 = vmatprep.subr.bf16.mxu1 %v22185_v31  ;;  %v22302_v31 = vld [vmem:[%s23743_s13 + $0x1324] ss:$12 sps:$4 sm:$0xff]  }
0x102b   : > { %15116 = vmatpush1.bf16.msra.mxu0 %v22228_v37  ;;  %v22216_v37 = vld [vmem:[%s23737_s17 + $0x1698] ss:$48 sps:$4 sm:$0xff]  }
0x102c   : > { %15117 = vmatprep.subr.bf16.mxu0 %v22236_v26  ;;  %v22221_v26 = vld [vmem:[%s23737_s17 + $0x16fc] ss:$48 sps:$4 sm:$0xff]  }
0x102d   : > { %12885 = vmatpush1.bf16.msra.mxu1 %v22183_v39  ;;  %v22300_v39 = vld [vmem:[%s23743_s13 + $0x1320] ss:$12 sps:$4 sm:$0xff]  }
0x102e   : > { %12886 = vmatprep.subr.bf16.mxu1 %v22188_v40  ;;  %v22308_v40 = vld [vmem:[%s23743_s13 + $0x133c] ss:$12 sps:$4 sm:$0xff]  }
0x102f   : > { %15118 = vmatpush1.bf16.msra.mxu0 %v22234_v32  ;;  %v22219_v32 = vld [vmem:[%s23737_s17 + $0x16f8] ss:$48 sps:$4 sm:$0xff]  }
0x1030   : > { %15119 = vmatprep.subr.bf16.mxu0 %v22242_v6  ;;  %v22224_v6 = vld [vmem:[%s23737_s17 + $0x175c] ss:$48 sps:$4 sm:$0xff]  }
0x1031   : > { %12887 = vmatpush1.bf16.msra.mxu1 %v22186_v45  ;;  %v22306_v45 = vld [vmem:[%s23743_s13 + $0x1338] ss:$12 sps:$4 sm:$0xff]  }
0x1032   : > { %12888 = vmatprep.subr.bf16.mxu1 %v22191_v19  ;;  %v22314_v19 = vld [vmem:[%s23743_s13 + $0x1354] ss:$12 sps:$4 sm:$0xff]  }
0x1033   : > { %15120 = vmatpush1.bf16.msra.mxu0 %v22240_v20  ;;  %v22222_v20 = vld [vmem:[%s23737_s17 + $0x1758] ss:$48 sps:$4 sm:$0xff]  }
0x1034   : > { %15121 = vmatprep.subr.bf16.mxu0 %v22248_v5  ;;  %v22227_v5 = vld [vmem:[%s23737_s17 + $0x17bc] ss:$48 sps:$4 sm:$0xff]  }
0x1035   : > { %12889 = vmatpush1.bf16.msra.mxu1 %v22189_v13  ;;  %v22312_v13 = vld [vmem:[%s23743_s13 + $0x1350] ss:$12 sps:$4 sm:$0xff]  }
0x1036   : > { %12890 = vmatprep.subr.bf16.mxu1 %v22194_v4  ;;  %v22320_v4 = vld [vmem:[%s23743_s13 + $0x136c] ss:$12 sps:$4 sm:$0xff]  }
0x1037   : > { %15122 = vmatpush1.bf16.msra.mxu0 %v22246_v50  ;;  %v22225_v50 = vld [vmem:[%s23737_s17 + $0x17b8] ss:$48 sps:$4 sm:$0xff]  }
0x1038   : > { %15123 = vmatprep.subr.bf16.mxu0 %v22254_v53  ;;  %v22233_v53 = vld [vmem:[%s23737_s17 + $0x181c] ss:$48 sps:$4 sm:$0xff]  }
0x1039   : > { %12891 = vmatpush1.bf16.msra.mxu1 %v22192_v52  ;;  %v22318_v52 = vld [vmem:[%s23743_s13 + $0x1368] ss:$12 sps:$4 sm:$0xff]  }
0x103a   : > { %12892 = vmatprep.subr.bf16.mxu1 %v22197_v38  ;;  %v22350_v38 = vld [vmem:[%s23743_s13 + $0x1384] ss:$12 sps:$4 sm:$0xff]  }
0x103b   : > { %15124 = vmatpush1.bf16.msra.mxu0 %v22252_v3  ;;  %v22231_v3 = vld [vmem:[%s23737_s17 + $0x1818] ss:$48 sps:$4 sm:$0xff]  }
0x103c   : > { %15125 = vmatprep.subr.bf16.mxu0 %v22260_v54  ;;  %v22239_v54 = vld [vmem:[%s23737_s17 + $0x187c] ss:$48 sps:$4 sm:$0xff]  }
0x103d   : > { %12893 = vmatpush1.bf16.msra.mxu1 %v22195_v63  ;;  %v22237_v63 = vld [vmem:[%s23737_s17 + $0x1878] ss:$48 sps:$4 sm:$0xff]  }
0x103e   : > { %12894 = vmatprep.subr.bf16.mxu1 %v22200_v16  ;;  %v22245_v16 = vld [vmem:[%s23737_s17 + $0x18dc] ss:$48 sps:$4 sm:$0xff]  }
0x103f   : > { %15126 = vmatpush1.bf16.msra.mxu0 %v22258_v24  ;;  %v22243_v24 = vld [vmem:[%s23737_s17 + $0x18d8] ss:$48 sps:$4 sm:$0xff]  }
0x1040   : > { %15127 = vmatprep.subr.bf16.mxu0 %v22266_v58  ;;  %v22251_v58 = vld [vmem:[%s23737_s17 + $0x193c] ss:$48 sps:$4 sm:$0xff]  }
0x1041   : > { %12895 = vmatpush1.bf16.msra.mxu1 %v22198_v7  ;;  %v22249_v7 = vld [vmem:[%s23737_s17 + $0x1938] ss:$48 sps:$4 sm:$0xff]  }
0x1042   : > { %12896 = vmatprep.subr.bf16.mxu1 %v22203_v17  ;;  %v22257_v17 = vld [vmem:[%s23737_s17 + $0x199c] ss:$48 sps:$4 sm:$0xff]  }
0x1043   : > { %15128 = vmatpush1.bf16.msra.mxu0 %v22264_v11  ;;  %v22255_v11 = vld [vmem:[%s23737_s17 + $0x1998] ss:$48 sps:$4 sm:$0xff]  }
0x1044   : > { %15129 = vmatprep.subr.bf16.mxu0 %v22272_v14  ;;  %v22263_v14 = vld [vmem:[%s23737_s17 + $0x19fc] ss:$48 sps:$4 sm:$0xff]  }
0x1045   : > { %12897 = vmatpush1.bf16.msra.mxu1 %v22201_v25  ;;  %v22261_v25 = vld [vmem:[%s23737_s17 + $0x19f8] ss:$48 sps:$4 sm:$0xff]  }
0x1046   : > { %12898 = vmatprep.subr.bf16.mxu1 %v22206_v55  ;;  %v22269_v55 = vld [vmem:[%s23737_s17 + $0x1a5c] ss:$48 sps:$4 sm:$0xff]  }
0x1047   : > { %15130 = vmatpush1.bf16.msra.mxu0 %v22270_v27  ;;  %v22267_v27 = vld [vmem:[%s23737_s17 + $0x1a58] ss:$48 sps:$4 sm:$0xff]  }
0x1048   : > { %15131 = vmatprep.subr.bf16.mxu0 %v22278_v9  ;;  %v22275_v9 = vld [vmem:[%s23737_s17 + $0x1abc] ss:$48 sps:$4 sm:$0xff]  }
0x1049   : > { %12899 = vmatpush1.bf16.msra.mxu1 %v22204_v28  ;;  %v22273_v28 = vld [vmem:[%s23737_s17 + $0x1ab8] ss:$48 sps:$4 sm:$0xff]  }
0x104a   : > { %12900 = vmatprep.subr.bf16.mxu1 %v22209_v41  ;;  %v22281_v41 = vld [vmem:[%s23737_s17 + $0x122c] ss:$48 sps:$4 sm:$0xff]  }
0x104b   : > { %15132 = vmatpush1.bf16.msra.mxu0 %v22276_v57  ;;  %v22279_v57 = vld [vmem:[%s23737_s17 + $0x1228] ss:$48 sps:$4 sm:$0xff]  }
0x104c   : > { %15133 = vmatprep.subr.bf16.mxu0 %v22284_v36  ;;  %v22287_v36 = vld [vmem:[%s23737_s17 + $0x128c] ss:$48 sps:$4 sm:$0xff]  }
0x104d   : > { %12901 = vmatpush1.bf16.msra.mxu1 %v22207_v59  ;;  %v22285_v59 = vld [vmem:[%s23737_s17 + $0x1288] ss:$48 sps:$4 sm:$0xff]  }
0x104e   : > { %12902 = vmatprep.subr.bf16.mxu1 %v22212_v42  ;;  %v22293_v42 = vld [vmem:[%s23737_s17 + $0x12ec] ss:$48 sps:$4 sm:$0xff]  }
0x104f   : > { %15134 = vmatpush1.bf16.msra.mxu0 %v22282_v29  ;;  %v22291_v29 = vld [vmem:[%s23737_s17 + $0x12e8] ss:$48 sps:$4 sm:$0xff]  }
0x1050   : > { %15135 = vmatprep.subr.bf16.mxu0 %v22290_v12  ;;  %v22299_v12 = vld [vmem:[%s23737_s17 + $0x134c] ss:$48 sps:$4 sm:$0xff]  }
0x1051   : > { %12903 = vmatpush1.bf16.msra.mxu1 %v22210_v33  ;;  %v22297_v33 = vld [vmem:[%s23737_s17 + $0x1348] ss:$48 sps:$4 sm:$0xff]  }
0x1052   : > { %12904 = vmatprep.subr.bf16.mxu1 %v22215_v56  ;;  %v22305_v56 = vld [vmem:[%s23737_s17 + $0x13ac] ss:$48 sps:$4 sm:$0xff]  }
0x1053   : > { %15136 = vmatpush1.bf16.msra.mxu0 %v22288_v22  ;;  %v22303_v22 = vld [vmem:[%s23737_s17 + $0x13a8] ss:$48 sps:$4 sm:$0xff]  }
0x1054   : > { %15137 = vmatprep.subr.bf16.mxu0 %v22296_v1  ;;  %v25807_v1 = vld [vmem:[%s24185_s7 + $0x18] sm:$0xff] }
0x1055   : > { %12905 = vmatpush1.bf16.msra.mxu1 %v22213_v35  ;;  %v11127_v35 = vrot.slane %v25807_v1, %v23769_v46 }
0x1056   : > { %12906 = vmatprep.subr.bf16.mxu1 %v22218_v60  ;;  %v11143_v60 = vrot.slane %v25807_v1, %v24182_v0 }
0x1057   : > { %15138 = vmatpush1.bf16.msra.mxu0 %v22294_v61  ;;  %v11131_v61 = vrot.slane %v25807_v1, %v23772_v47 }
0x1058   : > { %15139 = vmatprep.subr.bf16.mxu0 %v22302_v31  ;;  %v11147_v31 = vrot.slane %v25807_v1, %v24191_v2 }
0x1059   : > { %12907 = vmatpush1.bf16.msra.mxu1 %v22216_v37  ;;  %v22309_v37 = vld [vmem:[%s23737_s17 + $0x1408] ss:$48 sps:$4 sm:$0xff]  }
0x105a   : > { %12908 = vmatprep.subr.bf16.mxu1 %v22221_v26  ;;  %v22317_v26 = vld [vmem:[%s23737_s17 + $0x146c] ss:$48 sps:$4 sm:$0xff]  }
0x105b   : > { %15140 = vmatpush1.bf16.msra.mxu0 %v22300_v39 }
0x105c   : > { %15141 = vmatprep.subr.bf16.mxu0 %v22308_v40 }
0x105d   : > { %12909 = vmatpush1.bf16.msra.mxu1 %v22219_v32 }
0x105e   : > { %12910 = vmatprep.subr.bf16.mxu1 %v22224_v6 }
0x105f   : > { %15142 = vmatpush1.bf16.msra.mxu0 %v22306_v45 }
0x1060   : > { %15143 = vmatprep.subr.bf16.mxu0 %v22314_v19 }
0x1061   : > { %12911 = vmatpush1.bf16.msra.mxu1 %v22222_v20 }
0x1062   : > { %12912 = vmatprep.subr.bf16.mxu1 %v22227_v5 }
0x1063   : > { %15144 = vmatpush1.bf16.msra.mxu0 %v22312_v13 }
0x1064   : > { %15145 = vmatprep.subr.bf16.mxu0 %v22320_v4  ;;  %v22315_v4 = vld [vmem:[%s23737_s17 + $0x1468] ss:$48 sps:$4 sm:$0xff]  }
0x1065   : > { %12913 = vmatpush1.bf16.msra.mxu1 %v22225_v50 }
0x1066   : > { %12925 = vmatprep.subr.bf16.mxu1 %v22233_v53 }
0x1067   : > { %15146 = vmatpush1.bf16.msra.mxu0 %v22318_v52 }
0x1068   : > { %12915 = vmatmul.mubr.bf16.vlgmr.msra.gmra.mrb[88].mxu1 %v25558_v43  ;;  %15158 = vmatprep.subr.bf16.mxu0 %v22350_v38  ;;  %v22323_v38 = vld [vmem:[%s23737_s17 + $0x14cc] ss:$48 sps:$4 sm:$0xff]  }
0x1069   : > { %12926 = vmatpush1.bf16.msra.mxu1 %v22231_v3  ;;  %12957 = vmatprep.mubr.bf16.mxu1 %v23246_v49 }
0x106a   : > { %12927 = vmatprep.subr.bf16.mxu1 %v22239_v54 }
0x106d   : > { %12928 = vmatpush1.bf16.msra.mxu1 %v22237_v63 }
0x106e   : > { %12929 = vmatprep.subr.bf16.mxu1 %v22245_v16 }
0x1071   : > { %12930 = vmatpush1.bf16.msra.mxu1 %v22243_v24 }
0x1072   : > { %12931 = vmatprep.subr.bf16.mxu1 %v22251_v58 }
0x1075   : > { %12932 = vmatpush1.bf16.msra.mxu1 %v22249_v7 }
0x1076   : > { %12933 = vmatprep.subr.bf16.mxu1 %v22257_v17 }
0x1079   : > { %12934 = vmatpush1.bf16.msra.mxu1 %v22255_v11 }
0x107a   : > { %12935 = vmatprep.subr.bf16.mxu1 %v22263_v14 }
0x107d   : > { %12936 = vmatpush1.bf16.msra.mxu1 %v22261_v25  ;;  %v22321_v25 = vld [vmem:[%s23737_s17 + $0x14c8] ss:$48 sps:$4 sm:$0xff]  }
0x107e   : > { %12937 = vmatprep.subr.bf16.mxu1 %v22269_v55 }
0x1081   : > { %12938 = vmatpush1.bf16.msra.mxu1 %v22267_v27 }
0x1082   : > { %12939 = vmatprep.subr.bf16.mxu1 %v22275_v9  ;;  %v22326_v9 = vld [vmem:[%s23737_s17 + $0x152c] ss:$48 sps:$4 sm:$0xff]  }
0x1085   : > { %12940 = vmatpush1.bf16.msra.mxu1 %v22273_v28 }
0x1086   : > { %13054 = vmatprep.subr.bf16.mxu1 %v22281_v41 }
0x1088   : > { %12958 = vmatmul.mubr.bf16.vlgmr.msra.gmra.mrb[88].mxu1 %v25605_v8 }
0x1089   : > { %13055 = vmatpush1.bf16.msra.mxu1 %v22279_v57  ;;  %13086 = vmatprep.mubr.bf16.mxu1 %v25554_v51  ;;  %v22311_v51 = vld [vmem:[%s23737_s17 + $0x140c] ss:$48 sps:$4 sm:$0xff]  }
0x108a   : > { %13056 = vmatprep.subr.bf16.mxu1 %v22287_v36  ;;  %v22348_v57 = vld [vmem:[%s23743_s13 + $0x1380] ss:$12 sps:$4 sm:$0xff]   ;;  %v22356_v36 = vld [vmem:[%s23743_s13 + $0x139c] ss:$12 sps:$4 sm:$0xff]  }
0x108d   : > { %13057 = vmatpush1.bf16.msra.mxu1 %v22285_v59  ;;  %v22324_v59 = vld [vmem:[%s23737_s17 + $0x1528] ss:$48 sps:$4 sm:$0xff]  }
0x108e   : > { %13058 = vmatprep.subr.bf16.mxu1 %v22293_v42  ;;  %v22329_v42 = vld [vmem:[%s23737_s17 + $0x158c] ss:$48 sps:$4 sm:$0xff]  }
0x1091   : > { %13059 = vmatpush1.bf16.msra.mxu1 %v22291_v29  ;;  %v22354_v29 = vld [vmem:[%s23743_s13 + $0x1398] ss:$12 sps:$4 sm:$0xff]  }
0x1092   : > { %13060 = vmatprep.subr.bf16.mxu1 %v22299_v12  ;;  %v22362_v12 = vld [vmem:[%s23743_s13 + $0x13b4] ss:$12 sps:$4 sm:$0xff]  }
0x1095   : > { %13061 = vmatpush1.bf16.msra.mxu1 %v22297_v33  ;;  %v22327_v33 = vld [vmem:[%s23737_s17 + $0x1588] ss:$48 sps:$4 sm:$0xff]  }
0x1096   : > { %13062 = vmatprep.subr.bf16.mxu1 %v22305_v56  ;;  %v22332_v56 = vld [vmem:[%s23737_s17 + $0x15ec] ss:$48 sps:$4 sm:$0xff]  }
0x1099   : > { %13063 = vmatpush1.bf16.msra.mxu1 %v22303_v22  ;;  %v22360_v22 = vld [vmem:[%s23743_s13 + $0x13b0] ss:$12 sps:$4 sm:$0xff]  }
0x109a   : > { %13064 = vmatprep.subr.bf16.mxu1 %v22311_v51  ;;  %v22368_v51 = vld [vmem:[%s23743_s13 + $0x13cc] ss:$12 sps:$4 sm:$0xff]  }
0x109b   : > { %v12701_v39 = vpop.f32.mrb[80].mxu1  ;;  %v12873_v40 = vpop.f32.mrb[24].mxu0 }
0x109c   : > { %v19917_v32 = vadd.f32 %v12701_v39, %v11127_v35  ;;  %v19925_v6 = vadd.f32 %v12873_v40, %v11143_v60  ;;  %v12703_v45 = vpop.f32.mrb[81].mxu1  ;;  %v12875_v19 = vpop.f32.mrb[25].mxu0  ;;  %v22372_v39 = vld [vmem:[%s23743_s13 + $0x13e0] ss:$12 sps:$4 sm:$0xff]   ;;  %v22380_v40 = vld [vmem:[%s23743_s13 + $0x13fc] ss:$12 sps:$4 sm:$0xff]  }
0x109d   : > { %v19918_v20 = vadd.f32 %v12703_v45, %v11131_v61  ;;  %v19926_v0 = vadd.f32 %v12875_v19, %v11147_v31  ;;  %v12705_v5 = vpop.f32.mrb[82].mxu1  ;;  %v12877_v13 = vpop.f32.mrb[26].mxu0  ;;  %13065 = vmatpush1.bf16.msra.mxu1 %v22309_v37  ;;  %v22333_v37 = vld [vmem:[%s23737_s17 + $0x1648] ss:$48 sps:$4 sm:$0xff]   ;;  %v22386_v19 = vld [vmem:[%s23743_s13 + $0x1414] ss:$12 sps:$4 sm:$0xff]  }
0x109e   : > { %v19919_v50 = vadd.f32 %v12705_v5, %v11127_v35  ;;  %v19927_v53 = vadd.f32 %v12877_v13, %v11143_v60  ;;  %v12707_v2 = vpop.f32.mrb[83].mxu1  ;;  %v12879_v52 = vpop.f32.mrb[27].mxu0  ;;  %13066 = vmatprep.subr.bf16.mxu1 %v22317_v26  ;;  %v13140_v63 = vmax.f32 %v19917_v32, 0.0  ;;  %v13144_v16 = vmax.f32 %v19925_v6, 0.0  ;;  %v22330_v35 = vld [vmem:[%s23737_s17 + $0x15e8] ss:$48 sps:$4 sm:$0xff]  }
0x109f   : > { %v19920_v3 = vadd.f32 %v12707_v2, %v11131_v61  ;;  %v19928_v54 = vadd.f32 %v12879_v52, %v11147_v31  ;;  %v13141_v7 = vmax.f32 %v19918_v20, 0.0  ;;  %v13145_v17 = vmax.f32 %v19926_v0, 0.0  ;;  %v22335_v60 = vld [vmem:[%s23737_s17 + $0x164c] ss:$48 sps:$4 sm:$0xff]   ;;  %v22366_v61 = vld [vmem:[%s23743_s13 + $0x13c8] ss:$12 sps:$4 sm:$0xff]  }
0x10a0   : > { %v13152_v24 = vmax.f32 %v19919_v50, 0.0  ;;  %v13156_v58 = vmax.f32 %v19927_v53, 0.0  ;;  %v22374_v31 = vld [vmem:[%s23743_s13 + $0x13e4] ss:$12 sps:$4 sm:$0xff]   ;;  %v22338_v26 = vld [vmem:[%s23737_s17 + $0x16ac] ss:$48 sps:$4 sm:$0xff]  }
0x10a1   : > { %v13153_v11 = vmax.f32 %v19920_v3, 0.0  ;;  %v13157_v14 = vmax.f32 %v19928_v54, 0.0  ;;  %13067 = vmatpush1.bf16.msra.mxu1 %v22315_v4  ;;  %v22336_v32 = vld [vmem:[%s23737_s17 + $0x16a8] ss:$48 sps:$4 sm:$0xff]   ;;  %v22341_v6 = vld [vmem:[%s23737_s17 + $0x170c] ss:$48 sps:$4 sm:$0xff]  }
0x10a2   : > { %v25823_v55 = vpack.c.bf16 %v13152_v24, %v13140_v63  ;;  %v25825_v27 = vpack.c.bf16 %v13156_v58, %v13144_v16  ;;  %13068 = vmatprep.subr.bf16.mxu1 %v22323_v38  ;;  %v22378_v45 = vld [vmem:[%s23743_s13 + $0x13f8] ss:$12 sps:$4 sm:$0xff]   ;;  %v22344_v0 = vld [vmem:[%s23737_s17 + $0x176c] ss:$48 sps:$4 sm:$0xff]   ;;  %v22390_v53 = vld [vmem:[%s23743_s13 + $0x1428] ss:$12 sps:$4 sm:$0xff]  }
0x10a3   : > { %v25828_v28 = vpack.c.bf16 %v13153_v11, %v13141_v7  ;;  %v25830_v41 = vpack.c.bf16 %v13157_v14, %v13145_v17  ;;  %v22339_v20 = vld [vmem:[%s23737_s17 + $0x1708] ss:$48 sps:$4 sm:$0xff]   ;;  %v22384_v5 = vld [vmem:[%s23743_s13 + $0x1410] ss:$12 sps:$4 sm:$0xff]   ;;  %v22396_v3 = vld [vmem:[%s23743_s13 + $0x1440] ss:$12 sps:$4 sm:$0xff]  }
0x10a4   : > { %v22392_v13 = vld [vmem:[%s23743_s13 + $0x142c] ss:$12 sps:$4 sm:$0xff]   ;;  %v22398_v2 = vld [vmem:[%s23743_s13 + $0x1444] ss:$12 sps:$4 sm:$0xff]   ;;  %v22402_v54 = vld [vmem:[%s23743_s13 + $0x145c] ss:$12 sps:$4 sm:$0xff]  }
0x10a5   : > { %13069 = vmatpush1.bf16.msra.mxu1 %v22321_v25  ;;  %15147 = vmatprep.mubr.bf16.mxu0 %v25828_v28  ;;  %v22342_v4 = vld [vmem:[%s23737_s17 + $0x1768] ss:$48 sps:$4 sm:$0xff]   ;;  %v22347_v50 = vld [vmem:[%s23737_s17 + $0x17cc] ss:$48 sps:$4 sm:$0xff]   ;;  %v22407_v58 = vld [vmem:[%s23743_s13 + $0x1474] ss:$12 sps:$4 sm:$0xff]  }
0x10a6   : > { %15148 = vmatmul.mubr.bf16.vlgmr.msra.gmra.mrb[32].mxu0 %v25823_v55  ;;  %13070 = vmatprep.subr.bf16.mxu1 %v22326_v9  ;;  %v22345_v52 = vld [vmem:[%s23737_s17 + $0x17c8] ss:$48 sps:$4 sm:$0xff]   ;;  %v22353_v38 = vld [vmem:[%s23737_s17 + $0x182c] ss:$48 sps:$4 sm:$0xff]  }
0x10a7   : > { %15159 = vmatpush1.bf16.msra.mxu0 %v22348_v57  ;;  %v22351_v63 = vld [vmem:[%s23737_s17 + $0x1828] ss:$48 sps:$4 sm:$0xff]   ;;  %v22359_v16 = vld [vmem:[%s23737_s17 + $0x188c] ss:$48 sps:$4 sm:$0xff]  }
0x10a8   : > { %15160 = vmatprep.subr.bf16.mxu0 %v22356_v36  ;;  %v22400_v24 = vld [vmem:[%s23743_s13 + $0x1458] ss:$12 sps:$4 sm:$0xff]   ;;  %v22365_v17 = vld [vmem:[%s23737_s17 + $0x18ec] ss:$48 sps:$4 sm:$0xff]   ;;  %v22410_v9 = vld [vmem:[%s23743_s13 + $0x1488] ss:$12 sps:$4 sm:$0xff]  }
0x10a9   : > { %13071 = vmatpush1.bf16.msra.mxu1 %v22324_v59  ;;  %v22357_v7 = vld [vmem:[%s23737_s17 + $0x1888] ss:$48 sps:$4 sm:$0xff]   ;;  %v22405_v11 = vld [vmem:[%s23743_s13 + $0x1470] ss:$12 sps:$4 sm:$0xff]   ;;  %v22415_v59 = vld [vmem:[%s23743_s13 + $0x14a0] ss:$12 sps:$4 sm:$0xff]  }
0x10aa   : > { %13072 = vmatprep.subr.bf16.mxu1 %v22329_v42  ;;  %v22412_v14 = vld [vmem:[%s23743_s13 + $0x148c] ss:$12 sps:$4 sm:$0xff]   ;;  %v22422_v42 = vld [vmem:[%s23743_s13 + $0x14bc] ss:$12 sps:$4 sm:$0xff]  }
0x10ab   : > { %15161 = vmatpush1.bf16.msra.mxu0 %v22354_v29  ;;  %v22371_v25 = vld [vmem:[%s23737_s17 + $0x194c] ss:$48 sps:$4 sm:$0xff]   ;;  %v22369_v57 = vld [vmem:[%s23737_s17 + $0x1948] ss:$48 sps:$4 sm:$0xff]  }
0x10ac   : > { %15162 = vmatprep.subr.bf16.mxu0 %v22362_v12  ;;  %v22377_v36 = vld [vmem:[%s23737_s17 + $0x19ac] ss:$48 sps:$4 sm:$0xff]   ;;  %v22375_v29 = vld [vmem:[%s23737_s17 + $0x19a8] ss:$48 sps:$4 sm:$0xff]  }
0x10ad   : > { %13073 = vmatpush1.bf16.msra.mxu1 %v22327_v33  ;;  %v22383_v12 = vld [vmem:[%s23737_s17 + $0x1a0c] ss:$48 sps:$4 sm:$0xff]   ;;  %v22420_v33 = vld [vmem:[%s23743_s13 + $0x14b8] ss:$12 sps:$4 sm:$0xff]  }
0x10ae   : > { %13074 = vmatprep.subr.bf16.mxu1 %v22332_v56  ;;  %v22427_v56 = vld [vmem:[%s23743_s13 + $0x14d4] ss:$12 sps:$4 sm:$0xff]  }
0x10af   : > { %15163 = vmatpush1.bf16.msra.mxu0 %v22360_v22  ;;  %v22381_v22 = vld [vmem:[%s23737_s17 + $0x1a08] ss:$48 sps:$4 sm:$0xff]  }
0x10b0   : > { %15164 = vmatprep.subr.bf16.mxu0 %v22368_v51  ;;  %v22389_v51 = vld [vmem:[%s23737_s17 + $0x1a6c] ss:$48 sps:$4 sm:$0xff]  }
0x10b1   : > { %13075 = vmatpush1.bf16.msra.mxu1 %v22330_v35  ;;  %v22425_v35 = vld [vmem:[%s23743_s13 + $0x14d0] ss:$12 sps:$4 sm:$0xff]  }
0x10b2   : > { %13076 = vmatprep.subr.bf16.mxu1 %v22335_v60  ;;  %v22432_v60 = vld [vmem:[%s23743_s13 + $0x14ec] ss:$12 sps:$4 sm:$0xff]  }
0x10b3   : > { %15165 = vmatpush1.bf16.msra.mxu0 %v22366_v61  ;;  %v22387_v61 = vld [vmem:[%s23737_s17 + $0x1a68] ss:$48 sps:$4 sm:$0xff]  }
0x10b4   : > { %15166 = vmatprep.subr.bf16.mxu0 %v22374_v31  ;;  %v22395_v31 = vld [vmem:[%s23737_s17 + $0x1acc] ss:$48 sps:$4 sm:$0xff]  }
0x10b5   : > { %13077 = vmatpush1.bf16.msra.mxu1 %v22333_v37  ;;  %v22430_v37 = vld [vmem:[%s23743_s13 + $0x14e8] ss:$12 sps:$4 sm:$0xff]  }
0x10b6   : > { %13078 = vmatprep.subr.bf16.mxu1 %v22338_v26  ;;  %v22437_v26 = vld [vmem:[%s23743_s13 + $0x1504] ss:$12 sps:$4 sm:$0xff]  }
0x10b7   : > { %15167 = vmatpush1.bf16.msra.mxu0 %v22372_v39  ;;  %v22393_v39 = vld [vmem:[%s23737_s17 + $0x1ac8] ss:$48 sps:$4 sm:$0xff]  }
0x10b8   : > { %15168 = vmatprep.subr.bf16.mxu0 %v22380_v40  ;;  %v22399_v40 = vld [vmem:[%s23743_s13 + $0x12c8] ss:$12 sps:$4 sm:$0xff]  }
0x10b9   : > { %13079 = vmatpush1.bf16.msra.mxu1 %v22336_v32  ;;  %v22403_v32 = vld [vmem:[%s23743_s13 + $0x1208] ss:$12 sps:$4 sm:$0xff]  }
0x10ba   : > { %13080 = vmatprep.subr.bf16.mxu1 %v22341_v6  ;;  %v22404_v6 = vld [vmem:[%s23743_s13 + $0x12e0] ss:$12 sps:$4 sm:$0xff]  }
0x10bb   : > { %15169 = vmatpush1.bf16.msra.mxu0 %v22378_v45  ;;  %v22408_v45 = vld [vmem:[%s23743_s13 + $0x1220] ss:$12 sps:$4 sm:$0xff]  }
0x10bc   : > { %15170 = vmatprep.subr.bf16.mxu0 %v22386_v19  ;;  %v22409_v19 = vld [vmem:[%s23743_s13 + $0x12f8] ss:$12 sps:$4 sm:$0xff]  }
0x10bd   : > { %13081 = vmatpush1.bf16.msra.mxu1 %v22339_v20  ;;  %v22413_v20 = vld [vmem:[%s23743_s13 + $0x1238] ss:$12 sps:$4 sm:$0xff]  }
0x10be   : > { %13082 = vmatprep.subr.bf16.mxu1 %v22344_v0  ;;  %v22414_v0 = vld [vmem:[%s23743_s13 + $0x1310] ss:$12 sps:$4 sm:$0xff]  }
0x10bf   : > { %15171 = vmatpush1.bf16.msra.mxu0 %v22384_v5  ;;  %v22418_v5 = vld [vmem:[%s23743_s13 + $0x1250] ss:$12 sps:$4 sm:$0xff]  }
0x10c0   : > { %15172 = vmatprep.subr.bf16.mxu0 %v22392_v13  ;;  %v22419_v13 = vld [vmem:[%s23743_s13 + $0x1328] ss:$12 sps:$4 sm:$0xff]  }
0x10c1   : > { %13083 = vmatpush1.bf16.msra.mxu1 %v22342_v4  ;;  %v25912_v4 = vld [vmem:[%s24185_s7 + $0x20] sm:$0xf] }
0x10c2   : > { %13084 = vmatprep.subr.bf16.mxu1 %v22347_v50  ;;  %v11135_v50 = vrot.slane %v25807_v1, %v23775_v48 }
0x10c3   : > { %15173 = vmatpush1.bf16.msra.mxu0 %v22390_v53  ;;  %v11159_v53 = vrot.slane %v25912_v4, %v23769_v46 }
0x10c4   : > { %15174 = vmatprep.subr.bf16.mxu0 %v22398_v2  ;;  %v11139_v2 = vrot.slane %v25807_v1, %v24296_v30 }
0x10c5   : > { %13085 = vmatpush1.bf16.msra.mxu1 %v22345_v52  ;;  %v22428_v52 = vld [vmem:[%s23743_s13 + $0x1280] ss:$12 sps:$4 sm:$0xff]  }
0x10c6   : > { %13097 = vmatprep.subr.bf16.mxu1 %v22353_v38  ;;  %v11163_v38 = vrot.slane %v25912_v4, %v23772_v47 }
0x10c7   : > { %15175 = vmatpush1.bf16.msra.mxu0 %v22396_v3  ;;  %v22429_v3 = vld [vmem:[%s23743_s13 + $0x1358] ss:$12 sps:$4 sm:$0xff]  }
0x10c8   : > { %13087 = vmatmul.mubr.bf16.vlgmr.msra.gmra.mrb[92].mxu1 %v25558_v43  ;;  %15176 = vmatprep.subr.bf16.mxu0 %v22402_v54  ;;  %v22363_v43 = vld [vmem:[%s23737_s17 + $0x18e8] ss:$48 sps:$4 sm:$0xff]  }
0x10c9   : > { %13098 = vmatpush1.bf16.msra.mxu1 %v22351_v63  ;;  %13129 = vmatprep.mubr.bf16.mxu1 %v23246_v49  ;;  %v22417_v49 = vld [vmem:[%s23743_s13 + $0x14a4] ss:$12 sps:$4 sm:$0xff]  }
0x10ca   : > { %13099 = vmatprep.subr.bf16.mxu1 %v22359_v16 }
0x10cb   : > { %15177 = vmatpush1.bf16.msra.mxu0 %v22400_v24 }
0x10cc   : > { %15178 = vmatprep.subr.bf16.mxu0 %v22407_v58 }
0x10cd   : > { %13100 = vmatpush1.bf16.msra.mxu1 %v22357_v7 }
0x10ce   : > { %13101 = vmatprep.subr.bf16.mxu1 %v22365_v17 }
0x10cf   : > { %15179 = vmatpush1.bf16.msra.mxu0 %v22405_v11 }
0x10d0   : > { %15180 = vmatprep.subr.bf16.mxu0 %v22412_v14  ;;  %v22433_v14 = vld [vmem:[%s23743_s13 + $0x1298] ss:$12 sps:$4 sm:$0xff]  }
0x10d1   : > { %13102 = vmatpush1.bf16.msra.mxu1 %v22363_v43 }
0x10d2   : > { %13103 = vmatprep.subr.bf16.mxu1 %v22371_v25 }
0x10d3   : > { %15181 = vmatpush1.bf16.msra.mxu0 %v22410_v9 }
0x10d4   : > { %15182 = vmatprep.subr.bf16.mxu0 %v22417_v49 }
0x10d5   : > { %13104 = vmatpush1.bf16.msra.mxu1 %v22369_v57  ;;  %v22434_v57 = vld [vmem:[%s23743_s13 + $0x1370] ss:$12 sps:$4 sm:$0xff]  }
0x10d6   : > { %13105 = vmatprep.subr.bf16.mxu1 %v22377_v36 }
0x10d7   : > { %15183 = vmatpush1.bf16.msra.mxu0 %v22415_v59 }
0x10d8   : > { %15184 = vmatprep.subr.bf16.mxu0 %v22422_v42 }
0x10d9   : > { %13106 = vmatpush1.bf16.msra.mxu1 %v22375_v29 }
0x10da   : > { %13107 = vmatprep.subr.bf16.mxu1 %v22383_v12 }
0x10db   : > { %15185 = vmatpush1.bf16.msra.mxu0 %v22420_v33 }
0x10dc   : > { %15186 = vmatprep.subr.bf16.mxu0 %v22427_v56 }
0x10dd   : > { %13108 = vmatpush1.bf16.msra.mxu1 %v22381_v22 }
0x10de   : > { %13109 = vmatprep.subr.bf16.mxu1 %v22389_v51 }
0x10df   : > { %15187 = vmatpush1.bf16.msra.mxu0 %v22425_v35 }
0x10e0   : > { %15188 = vmatprep.subr.bf16.mxu0 %v22432_v60  ;;  %v22438_v60 = vld [vmem:[%s23743_s13 + $0x12b0] ss:$12 sps:$4 sm:$0xff]  }
0x10e1   : > { %13110 = vmatpush1.bf16.msra.mxu1 %v22387_v61 }
0x10e2   : > { %13111 = vmatprep.subr.bf16.mxu1 %v22395_v31 }
0x10e3   : > { %15189 = vmatpush1.bf16.msra.mxu0 %v22430_v37 }
0x10e4   : > { %15201 = vmatprep.subr.bf16.mxu0 %v22437_v26  ;;  %v22439_v26 = vld [vmem:[%s23743_s13 + $0x1448] ss:$12 sps:$4 sm:$0xff]  }
0x10e5   : > { %13112 = vmatpush1.bf16.msra.mxu1 %v22393_v39 }
0x10e6   : > { %19678 = vmatprep.subr.bf16.mxu1 %v22399_v40 }
0x10e8   : > { %13130 = vmatmul.mubr.bf16.vlgmr.msra.gmra.mrb[92].mxu1 %v25605_v8  ;;  %v22423_v8 = vld [vmem:[%s23743_s13 + $0x1268] ss:$12 sps:$4 sm:$0xff]  }
0x10e9   : > { %19679 = vmatpush3.bf16.msra.mxu1 %v22403_v32  ;;  %15405 = vmatprep.mubr.bf16.mxu1 %v25828_v28  ;;  %v22424_v28 = vld [vmem:[%s23743_s13 + $0x1340] ss:$12 sps:$4 sm:$0xff]  }
0x10ea   : > { %19680 = vmatprep.subr.bf16.mxu1 %v22404_v6  ;;  %v22435_v32 = vld [vmem:[%s23743_s13 + $0x1500] ss:$12 sps:$4 sm:$0xff]  }
0x10ed   : > { %19681 = vmatpush3.bf16.msra.mxu1 %v22408_v45  ;;  %v22442_v45 = vld [vmem:[%s23743_s13 + $0x151c] ss:$12 sps:$4 sm:$0xff]  }
0x10ee   : > { %19682 = vmatprep.subr.bf16.mxu1 %v22409_v19  ;;  %v22443_v19 = vld [vmem:[%s23743_s13 + $0x1388] ss:$12 sps:$4 sm:$0xff]  }
0x10f1   : > { %19683 = vmatpush3.bf16.msra.mxu1 %v22413_v20  ;;  %v22444_v20 = vld [vmem:[%s23743_s13 + $0x1460] ss:$12 sps:$4 sm:$0xff]  }
0x10f2   : > { %19684 = vmatprep.subr.bf16.mxu1 %v22414_v0  ;;  %v22440_v0 = vld [vmem:[%s23743_s13 + $0x1518] ss:$12 sps:$4 sm:$0xff]  }
0x10f5   : > { %19685 = vmatpush3.bf16.msra.mxu1 %v22418_v5  ;;  %v22447_v5 = vld [vmem:[%s23743_s13 + $0x1534] ss:$12 sps:$4 sm:$0xff]  }
0x10f6   : > { %19686 = vmatprep.subr.bf16.mxu1 %v22419_v13  ;;  %v22448_v13 = vld [vmem:[%s23743_s13 + $0x13a0] ss:$12 sps:$4 sm:$0xff]  }
0x10f9   : > { %19687 = vmatpush3.bf16.msra.mxu1 %v22423_v8  ;;  %v22449_v8 = vld [vmem:[%s23743_s13 + $0x1478] ss:$12 sps:$4 sm:$0xff]  }
0x10fa   : > { %19688 = vmatprep.subr.bf16.mxu1 %v22424_v28  ;;  %v22445_v28 = vld [vmem:[%s23743_s13 + $0x1530] ss:$12 sps:$4 sm:$0xff]  }
0x10fb   : > { %v12787_v54 = vpop.f32.mrb[84].mxu1 }
0x10fc   : > { %v19921_v63 = vadd.f32 %v12787_v54, %v11135_v50  ;;  %v13045_v16 = vpop.f32.mrb[28].mxu0  ;;  %v12789_v24 = vpop.f32.mrb[85].mxu1  ;;  %v22455_v54 = vld [vmem:[%s23743_s13 + $0x1560] ss:$12 sps:$4 sm:$0xff]  }
0x10fd   : > { %v19933_v58 = vadd.f32 %v13045_v16, %v11159_v53  ;;  %v19922_v7 = vadd.f32 %v12789_v24, %v11139_v2  ;;  %v13047_v17 = vpop.f32.mrb[29].mxu0  ;;  %v12791_v11 = vpop.f32.mrb[86].mxu1  ;;  %19689 = vmatpush3.bf16.msra.mxu1 %v22428_v52  ;;  %v22457_v52 = vld [vmem:[%s23743_s13 + $0x1564] ss:$12 sps:$4 sm:$0xff]   ;;  %v22463_v16 = vld [vmem:[%s23743_s13 + $0x13e8] ss:$12 sps:$4 sm:$0xff]  }
0x10fe   : > { %v19934_v43 = vadd.f32 %v13047_v17, %v11163_v38  ;;  %v19923_v25 = vadd.f32 %v12791_v11, %v11135_v50  ;;  %v13049_v9 = vpop.f32.mrb[30].mxu0  ;;  %v12793_v49 = vpop.f32.mrb[87].mxu1  ;;  %19690 = vmatprep.subr.bf16.mxu1 %v22429_v3  ;;  %v13142_v29 = vmax.f32 %v19921_v63, 0.0  ;;  %v22452_v50 = vld [vmem:[%s23743_s13 + $0x154c] ss:$12 sps:$4 sm:$0xff]  }
0x10ff   : > { %v19935_v36 = vadd.f32 %v13049_v9, %v11159_v53  ;;  %v19924_v59 = vadd.f32 %v12793_v49, %v11139_v2  ;;  %v13051_v42 = vpop.f32.mrb[31].mxu0  ;;  %v13148_v56 = vmax.f32 %v19933_v58, 0.0  ;;  %v13143_v22 = vmax.f32 %v19922_v7, 0.0  ;;  %v22453_v53 = vld [vmem:[%s23743_s13 + $0x13b8] ss:$12 sps:$4 sm:$0xff]  }
0x1100   : > { %v13154_v12 = vmax.f32 %v19923_v25, 0.0  ;;  %v19936_v33 = vadd.f32 %v13051_v42, %v11163_v38  ;;  %v13149_v61 = vmax.f32 %v19934_v43, 0.0  ;;  %v22450_v2 = vld [vmem:[%s23743_s13 + $0x1548] ss:$12 sps:$4 sm:$0xff]   ;;  %v22458_v38 = vld [vmem:[%s23743_s13 + $0x13d0] ss:$12 sps:$4 sm:$0xff]  }
0x1101   : > { %v13160_v51 = vmax.f32 %v19935_v36, 0.0  ;;  %v13155_v35 = vmax.f32 %v19924_v59, 0.0  ;;  %19691 = vmatpush3.bf16.msra.mxu1 %v22433_v14  ;;  %v22459_v3 = vld [vmem:[%s23743_s13 + $0x14a8] ss:$12 sps:$4 sm:$0xff]   ;;  %v22464_v24 = vld [vmem:[%s23743_s13 + $0x14c0] ss:$12 sps:$4 sm:$0xff]  }
0x1102   : > { %v25928_v31 = vpack.c.bf16 %v13154_v12, %v13142_v29  ;;  %v13161_v37 = vmax.f32 %v19936_v33, 0.0  ;;  %19692 = vmatprep.subr.bf16.mxu1 %v22434_v57  ;;  %v22462_v63 = vld [vmem:[%s23743_s13 + $0x157c] ss:$12 sps:$4 sm:$0xff]   ;;  %v22460_v58 = vld [vmem:[%s23743_s13 + $0x1578] ss:$12 sps:$4 sm:$0xff]  }
0x1103   : > { %v25931_v39 = vpack.c.bf16 %v13160_v51, %v13148_v56  ;;  %v13167_v40 = vpack.c.bf16 %v13155_v35, %v13143_v22  ;;  %v22467_v7 = vld [vmem:[%s23743_s13 + $0x1594] ss:$12 sps:$4 sm:$0xff]   ;;  %v22469_v11 = vld [vmem:[%s23743_s13 + $0x14d8] ss:$12 sps:$4 sm:$0xff]   ;;  %v22465_v14 = vld [vmem:[%s23743_s13 + $0x1590] ss:$12 sps:$4 sm:$0xff]  }
0x1104   : > { %v25934_v6 = vpack.c.bf16 %v13161_v37, %v13149_v61  ;;  %v22468_v17 = vld [vmem:[%s23743_s13 + $0x1400] ss:$12 sps:$4 sm:$0xff]   ;;  %v22473_v25 = vld [vmem:[%s23743_s13 + $0x1418] ss:$12 sps:$4 sm:$0xff]   ;;  %v22474_v9 = vld [vmem:[%s23743_s13 + $0x14f0] ss:$12 sps:$4 sm:$0xff]  }
0x1105   : > { %15190 = vmatprep.mubr.bf16.mxu0 %v13167_v40  ;;  %19693 = vmatpush3.bf16.msra.mxu1 %v22438_v60  ;;  %v22472_v43 = vld [vmem:[%s23743_s13 + $0x15ac] ss:$12 sps:$4 sm:$0xff]   ;;  %v22470_v49 = vld [vmem:[%s23743_s13 + $0x15a8] ss:$12 sps:$4 sm:$0xff]   ;;  %v22477_v57 = vld [vmem:[%s23743_s13 + $0x15c4] ss:$12 sps:$4 sm:$0xff]  }
0x1106   : > { %15191 = vmatmul.mubr.bf16.vlgmr.msra.gmra.mrb[32].mxu0 %v25928_v31  ;;  %19700 = vmatprep.subr.bf16.mxu1 %v22439_v26  ;;  %v22478_v36 = vld [vmem:[%s23743_s13 + $0x1430] ss:$12 sps:$4 sm:$0xff]   ;;  %v22479_v59 = vld [vmem:[%s23743_s13 + $0x15c8] ss:$12 sps:$4 sm:$0xff]   ;;  %v22475_v42 = vld [vmem:[%s23743_s13 + $0x15c0] ss:$12 sps:$4 sm:$0xff]  }
0x1107   : > { %15202 = vmatpush1.bf16.msra.mxu0 %v22435_v32  ;;  %15233 = vmatprep.mubr.bf16.mxu0 %v25830_v41  ;;  %v22482_v29 = vld [vmem:[%s23743_s13 + $0x15dc] ss:$12 sps:$4 sm:$0xff]   ;;  %v22484_v33 = vld [vmem:[%s23743_s13 + $0x15e0] ss:$12 sps:$4 sm:$0xff]   ;;  %v22480_v56 = vld [vmem:[%s23743_s13 + $0x15d8] ss:$12 sps:$4 sm:$0xff]  }
0x1108   : > { %15406 = vmatmul.mubr.bf16.vlgmr.msra.gmra.mrb[96].mxu1 %v25823_v55  ;;  %15203 = vmatprep.subr.bf16.mxu0 %v22442_v45  ;;  %v22454_v55 = vld [vmem:[%s23743_s13 + $0x1490] ss:$12 sps:$4 sm:$0xff]   ;;  %v22483_v12 = vld [vmem:[%s23743_s13 + $0x1508] ss:$12 sps:$4 sm:$0xff]   ;;  %v22488_v51 = vld [vmem:[%s23743_s13 + $0x1520] ss:$12 sps:$4 sm:$0xff]  }
0x1109   : > { %19701 = vmatpush3.bf16.msra.mxu1 %v22443_v19  ;;  %15446 = vmatprep.mubr.bf16.mxu1 %v13167_v40  ;;  %v22487_v22 = vld [vmem:[%s23743_s13 + $0x15f4] ss:$12 sps:$4 sm:$0xff]   ;;  %v22489_v35 = vld [vmem:[%s23743_s13 + $0x15f8] ss:$12 sps:$4 sm:$0xff]   ;;  %v22485_v60 = vld [vmem:[%s23743_s13 + $0x15f0] ss:$12 sps:$4 sm:$0xff]  }
0x110a   : > { %19702 = vmatprep.subr.bf16.mxu1 %v22444_v20  ;;  %v22492_v61 = vld [vmem:[%s23743_s13 + $0x160c] ss:$12 sps:$4 sm:$0xff]   ;;  %v22494_v37 = vld [vmem:[%s23743_s13 + $0x1610] ss:$12 sps:$4 sm:$0xff]   ;;  %v22490_v26 = vld [vmem:[%s23743_s13 + $0x1608] ss:$12 sps:$4 sm:$0xff]  }
0x110b   : > { %15204 = vmatpush1.bf16.msra.mxu0 %v22440_v0  ;;  %v22498_v40 = vld [vmem:[%s23743_s13 + $0x1550] ss:$12 sps:$4 sm:$0xff]   ;;  %v22499_v32 = vld [vmem:[%s23743_s13 + $0x1628] ss:$12 sps:$4 sm:$0xff]   ;;  %v22495_v45 = vld [vmem:[%s23743_s13 + $0x1620] ss:$12 sps:$4 sm:$0xff]  }
0x110c   : > { %15205 = vmatprep.subr.bf16.mxu0 %v22447_v5  ;;  %v22502_v19 = vld [vmem:[%s23743_s13 + $0x163c] ss:$12 sps:$4 sm:$0xff]   ;;  %v22504_v0 = vld [vmem:[%s23743_s13 + $0x1640] ss:$12 sps:$4 sm:$0xff]   ;;  %v22500_v5 = vld [vmem:[%s23743_s13 + $0x1638] ss:$12 sps:$4 sm:$0xff]  }
0x110d   : > { %19703 = vmatpush3.bf16.msra.mxu1 %v22448_v13  ;;  %v22503_v20 = vld [vmem:[%s23743_s13 + $0x1568] ss:$12 sps:$4 sm:$0xff]  }
0x110e   : > { %19704 = vmatprep.subr.bf16.mxu1 %v22449_v8  ;;  %v22507_v13 = vld [vmem:[%s23743_s13 + $0x1654] ss:$12 sps:$4 sm:$0xff]  }
0x110f   : > { %15206 = vmatpush1.bf16.msra.mxu0 %v22445_v28  ;;  %v22508_v8 = vld [vmem:[%s23743_s13 + $0x1580] ss:$12 sps:$4 sm:$0xff]   ;;  %v22509_v28 = vld [vmem:[%s23743_s13 + $0x1658] ss:$12 sps:$4 sm:$0xff]  }
0x1110   : > { %15207 = vmatprep.subr.bf16.mxu0 %v22452_v50  ;;  %v22505_v50 = vld [vmem:[%s23743_s13 + $0x1650] ss:$12 sps:$4 sm:$0xff]  }
0x1111   : > { %19705 = vmatpush3.bf16.msra.mxu1 %v22453_v53  ;;  %v22512_v53 = vld [vmem:[%s23743_s13 + $0x166c] ss:$12 sps:$4 sm:$0xff]  }
0x1112   : > { %19706 = vmatprep.subr.bf16.mxu1 %v22454_v55  ;;  %v22513_v55 = vld [vmem:[%s23743_s13 + $0x1598] ss:$12 sps:$4 sm:$0xff]  }
0x1113   : > { %15208 = vmatpush1.bf16.msra.mxu0 %v22450_v2  ;;  %v22514_v2 = vld [vmem:[%s23743_s13 + $0x1670] ss:$12 sps:$4 sm:$0xff]  }
0x1114   : > { %15209 = vmatprep.subr.bf16.mxu0 %v22457_v52  ;;  %v22510_v52 = vld [vmem:[%s23743_s13 + $0x1668] ss:$12 sps:$4 sm:$0xff]  }
0x1115   : > { %19707 = vmatpush3.bf16.msra.mxu1 %v22458_v38  ;;  %v22517_v38 = vld [vmem:[%s23743_s13 + $0x1684] ss:$12 sps:$4 sm:$0xff]  }
0x1116   : > { %19708 = vmatprep.subr.bf16.mxu1 %v22459_v3  ;;  %v22518_v3 = vld [vmem:[%s23743_s13 + $0x15b0] ss:$12 sps:$4 sm:$0xff]  }
0x1117   : > { %15210 = vmatpush1.bf16.msra.mxu0 %v22455_v54  ;;  %v22519_v54 = vld [vmem:[%s23743_s13 + $0x1748] ss:$12 sps:$4 sm:$0xff]  }
0x1118   : > { %15211 = vmatprep.subr.bf16.mxu0 %v22462_v63  ;;  %v22515_v63 = vld [vmem:[%s23743_s13 + $0x1680] ss:$12 sps:$4 sm:$0xff]  }
0x1119   : > { %19709 = vmatpush3.bf16.msra.mxu1 %v22463_v16  ;;  %v22522_v16 = vld [vmem:[%s23743_s13 + $0x169c] ss:$12 sps:$4 sm:$0xff]  }
0x111a   : > { %19710 = vmatprep.subr.bf16.mxu1 %v22464_v24  ;;  %v22523_v24 = vld [vmem:[%s23743_s13 + $0x1688] ss:$12 sps:$4 sm:$0xff]  }
0x111b   : > { %15212 = vmatpush1.bf16.msra.mxu0 %v22460_v58  ;;  %v22524_v58 = vld [vmem:[%s23743_s13 + $0x1760] ss:$12 sps:$4 sm:$0xff]  }
0x111c   : > { %15213 = vmatprep.subr.bf16.mxu0 %v22467_v7  ;;  %v22520_v7 = vld [vmem:[%s23743_s13 + $0x1698] ss:$12 sps:$4 sm:$0xff]  }
0x111d   : > { %19711 = vmatpush3.bf16.msra.mxu1 %v22468_v17  ;;  %v22527_v17 = vld [vmem:[%s23743_s13 + $0x16b4] ss:$12 sps:$4 sm:$0xff]  }
0x111e   : > { %19712 = vmatprep.subr.bf16.mxu1 %v22469_v11  ;;  %v22528_v11 = vld [vmem:[%s23743_s13 + $0x16a0] ss:$12 sps:$4 sm:$0xff]  }
0x111f   : > { %15214 = vmatpush1.bf16.msra.mxu0 %v22465_v14  ;;  %v22529_v14 = vld [vmem:[%s23743_s13 + $0x1778] ss:$12 sps:$4 sm:$0xff]  }
0x1120   : > { %15215 = vmatprep.subr.bf16.mxu0 %v22472_v43  ;;  %v22525_v43 = vld [vmem:[%s23743_s13 + $0x16b0] ss:$12 sps:$4 sm:$0xff]  }
0x1121   : > { %19713 = vmatpush3.bf16.msra.mxu1 %v22473_v25  ;;  %v22532_v25 = vld [vmem:[%s23743_s13 + $0x16cc] ss:$12 sps:$4 sm:$0xff]  }
0x1122   : > { %19714 = vmatprep.subr.bf16.mxu1 %v22474_v9  ;;  %v22533_v9 = vld [vmem:[%s23743_s13 + $0x16b8] ss:$12 sps:$4 sm:$0xff]  }
0x1123   : > { %15216 = vmatpush1.bf16.msra.mxu0 %v22470_v49  ;;  %v22530_v49 = vld [vmem:[%s23743_s13 + $0x16c8] ss:$12 sps:$4 sm:$0xff]  }
0x1124   : > { %15217 = vmatprep.subr.bf16.mxu0 %v22477_v57  ;;  %v22537_v57 = vld [vmem:[%s23743_s13 + $0x16e4] ss:$12 sps:$4 sm:$0xff]  }
0x1125   : > { %19715 = vmatpush3.bf16.msra.mxu1 %v22478_v36  ;;  %v22538_v36 = vld [vmem:[%s23743_s13 + $0x16d0] ss:$12 sps:$4 sm:$0xff]  }
0x1126   : > { %19722 = vmatprep.subr.bf16.mxu1 %v22479_v59  ;;  %v22539_v59 = vld [vmem:[%s23743_s13 + $0x17a8] ss:$12 sps:$4 sm:$0xff]  }
0x1127   : > { %15218 = vmatpush1.bf16.msra.mxu0 %v22475_v42  ;;  %v22535_v42 = vld [vmem:[%s23743_s13 + $0x16e0] ss:$12 sps:$4 sm:$0xff]  }
0x1128   : > { %15447 = vmatmul.mubr.bf16.vlgmr.msra.gmra.mrb[100].mxu1 %v25928_v31  ;;  %15219 = vmatprep.subr.bf16.mxu0 %v22482_v29  ;;  %v22493_v31 = vld [vmem:[%s23743_s13 + $0x1538] ss:$12 sps:$4 sm:$0xff]   ;;  %v22542_v29 = vld [vmem:[%s23743_s13 + $0x16fc] ss:$12 sps:$4 sm:$0xff]  }
0x1129   : > { %19723 = vmatpush3.bf16.msra.mxu1 %v22483_v12  ;;  %15487 = vmatprep.mubr.bf16.mxu1 %v25830_v41  ;;  %v22497_v41 = vld [vmem:[%s23743_s13 + $0x1624] ss:$12 sps:$4 sm:$0xff]   ;;  %v22543_v12 = vld [vmem:[%s23743_s13 + $0x16e8] ss:$12 sps:$4 sm:$0xff]  }
0x112a   : > { %19724 = vmatprep.subr.bf16.mxu1 %v22484_v33  ;;  %v22544_v33 = vld [vmem:[%s23743_s13 + $0x17c0] ss:$12 sps:$4 sm:$0xff]  }
0x112b   : > { %15220 = vmatpush1.bf16.msra.mxu0 %v22480_v56  ;;  %v22540_v56 = vld [vmem:[%s23743_s13 + $0x16f8] ss:$12 sps:$4 sm:$0xff]  }
0x112c   : > { %15221 = vmatprep.subr.bf16.mxu0 %v22487_v22  ;;  %v11151_v22 = vrot.slane %v25807_v1, %v24412_v15 }
0x112d   : > { %19725 = vmatpush3.bf16.msra.mxu1 %v22488_v51  ;;  %v22547_v51 = vld [vmem:[%s23743_s13 + $0x1714] ss:$12 sps:$4 sm:$0xff]  }
0x112e   : > { %19726 = vmatprep.subr.bf16.mxu1 %v22489_v35  ;;  %v11155_v35 = vrot.slane %v25807_v1, %v24416_v23  ;;  %v22554_v1 = vld [vmem:[%s23743_s13 + $0x17f0] ss:$12 sps:$4 sm:$0xff]  }
0x112f   : > { %15222 = vmatpush1.bf16.msra.mxu0 %v22485_v60  ;;  %v22548_v60 = vld [vmem:[%s23743_s13 + $0x1700] ss:$12 sps:$4 sm:$0xff]  }
0x1130   : > { %15223 = vmatprep.subr.bf16.mxu0 %v22492_v61  ;;  %v22549_v61 = vld [vmem:[%s23743_s13 + $0x17d8] ss:$12 sps:$4 sm:$0xff]  }
0x1131   : > { %19727 = vmatpush3.bf16.msra.mxu1 %v22493_v31 }
0x1132   : > { %19728 = vmatprep.subr.bf16.mxu1 %v22494_v37  ;;  %v22545_v37 = vld [vmem:[%s23743_s13 + $0x1710] ss:$12 sps:$4 sm:$0xff]  }
0x1133   : > { %15224 = vmatpush1.bf16.msra.mxu0 %v22490_v26 }
0x1134   : > { %15225 = vmatprep.subr.bf16.mxu0 %v22497_v41 }
0x1135   : > { %19729 = vmatpush3.bf16.msra.mxu1 %v22498_v40  ;;  %v22552_v40 = vld [vmem:[%s23743_s13 + $0x172c] ss:$12 sps:$4 sm:$0xff]  }
0x1136   : > { %19730 = vmatprep.subr.bf16.mxu1 %v22499_v32 }
0x1137   : > { %15226 = vmatpush1.bf16.msra.mxu0 %v22495_v45  ;;  %v22553_v45 = vld [vmem:[%s23743_s13 + $0x1718] ss:$12 sps:$4 sm:$0xff]  }
0x1138   : > { %15227 = vmatprep.subr.bf16.mxu0 %v22502_v19 }
0x1139   : > { %19731 = vmatpush3.bf16.msra.mxu1 %v22503_v20 }
0x113a   : > { %19732 = vmatprep.subr.bf16.mxu1 %v22504_v0  ;;  %v22550_v0 = vld [vmem:[%s23743_s13 + $0x1728] ss:$12 sps:$4 sm:$0xff]  }
0x113b   : > { %15228 = vmatpush1.bf16.msra.mxu0 %v22500_v5 }
0x113c   : > { %15229 = vmatprep.subr.bf16.mxu0 %v22507_v13 }
0x113d   : > { %19733 = vmatpush3.bf16.msra.mxu1 %v22508_v8  ;;  %v22557_v8 = vld [vmem:[%s23743_s13 + $0x1744] ss:$12 sps:$4 sm:$0xff]  }
0x113e   : > { %19734 = vmatprep.subr.bf16.mxu1 %v22509_v28 }
0x113f   : > { %15230 = vmatpush1.bf16.msra.mxu0 %v22505_v50 }
0x1140   : > { %15231 = vmatprep.subr.bf16.mxu0 %v22512_v53  ;;  %v22558_v53 = vld [vmem:[%s23743_s13 + $0x1730] ss:$12 sps:$4 sm:$0xff]  }
0x1141   : > { %19735 = vmatpush3.bf16.msra.mxu1 %v22513_v55 }
0x1142   : > { %19736 = vmatprep.subr.bf16.mxu1 %v22514_v2  ;;  %v22559_v2 = vld [vmem:[%s23743_s13 + $0x18c8] ss:$12 sps:$4 sm:$0xff]  }
0x1143   : > { %15232 = vmatpush1.bf16.msra.mxu0 %v22510_v52 }
0x1144   : > { %15244 = vmatprep.subr.bf16.mxu0 %v22517_v38  ;;  %v22555_v38 = vld [vmem:[%s23743_s13 + $0x1740] ss:$12 sps:$4 sm:$0xff]  }
0x1145   : > { %19737 = vmatpush3.bf16.msra.mxu1 %v22518_v3  ;;  %v22562_v3 = vld [vmem:[%s23743_s13 + $0x175c] ss:$12 sps:$4 sm:$0xff]  }
0x1146   : > { %15234 = vmatmul.mubr.bf16.vlgmr.msra.gmra.mrb[32].mxu0 %v25825_v27  ;;  %19744 = vmatprep.subr.bf16.mxu1 %v22519_v54  ;;  %v22563_v54 = vld [vmem:[%s23743_s13 + $0x1808] ss:$12 sps:$4 sm:$0xff]  }
0x1147   : > { %15245 = vmatpush1.bf16.msra.mxu0 %v22515_v63  ;;  %v22564_v63 = vld [vmem:[%s23743_s13 + $0x18e0] ss:$12 sps:$4 sm:$0xff]  }
0x1148   : > { %15488 = vmatmul.mubr.bf16.vlgmr.msra.gmra.mrb[104].mxu1 %v25825_v27  ;;  %15246 = vmatprep.subr.bf16.mxu0 %v22522_v16  ;;  %v22534_v27 = vld [vmem:[%s23743_s13 + $0x1790] ss:$12 sps:$4 sm:$0xff]   ;;  %v22560_v16 = vld [vmem:[%s23743_s13 + $0x1758] ss:$12 sps:$4 sm:$0xff]  }
0x1149   : > { %19745 = vmatpush3.bf16.msra.mxu1 %v22523_v24  ;;  %v22567_v24 = vld [vmem:[%s23743_s13 + $0x1774] ss:$12 sps:$4 sm:$0xff]  }
0x114a   : > { %19746 = vmatprep.subr.bf16.mxu1 %v22524_v58  ;;  %v22568_v58 = vld [vmem:[%s23743_s13 + $0x1820] ss:$12 sps:$4 sm:$0xff]  }
0x114b   : > { %15247 = vmatpush1.bf16.msra.mxu0 %v22520_v7  ;;  %v22569_v7 = vld [vmem:[%s23743_s13 + $0x18f8] ss:$12 sps:$4 sm:$0xff]  }
0x114c   : > { %15248 = vmatprep.subr.bf16.mxu0 %v22527_v17  ;;  %v22565_v17 = vld [vmem:[%s23743_s13 + $0x1770] ss:$12 sps:$4 sm:$0xff]  }
0x114d   : > { %19747 = vmatpush3.bf16.msra.mxu1 %v22528_v11  ;;  %v22572_v11 = vld [vmem:[%s23743_s13 + $0x178c] ss:$12 sps:$4 sm:$0xff]  }
0x114e   : > { %19748 = vmatprep.subr.bf16.mxu1 %v22529_v14  ;;  %v22573_v14 = vld [vmem:[%s23743_s13 + $0x1838] ss:$12 sps:$4 sm:$0xff]  }
0x114f   : > { %15249 = vmatpush1.bf16.msra.mxu0 %v22525_v43  ;;  %v22574_v43 = vld [vmem:[%s23743_s13 + $0x1910] ss:$12 sps:$4 sm:$0xff]  }
0x1150   : > { %15250 = vmatprep.subr.bf16.mxu0 %v22532_v25  ;;  %v22570_v25 = vld [vmem:[%s23743_s13 + $0x1788] ss:$12 sps:$4 sm:$0xff]  }
0x1151   : > { %19749 = vmatpush3.bf16.msra.mxu1 %v22533_v9  ;;  %v22577_v9 = vld [vmem:[%s23743_s13 + $0x17a4] ss:$12 sps:$4 sm:$0xff]  }
0x1152   : > { %19750 = vmatprep.subr.bf16.mxu1 %v22534_v27  ;;  %v22578_v27 = vld [vmem:[%s23743_s13 + $0x1850] ss:$12 sps:$4 sm:$0xff]  }
0x1153   : > { %15251 = vmatpush1.bf16.msra.mxu0 %v22530_v49  ;;  %v22579_v49 = vld [vmem:[%s23743_s13 + $0x1928] ss:$12 sps:$4 sm:$0xff]  }
0x1154   : > { %15252 = vmatprep.subr.bf16.mxu0 %v22537_v57  ;;  %v22575_v57 = vld [vmem:[%s23743_s13 + $0x17a0] ss:$12 sps:$4 sm:$0xff]  }
0x1155   : > { %19751 = vmatpush3.bf16.msra.mxu1 %v22538_v36  ;;  %v22582_v36 = vld [vmem:[%s23743_s13 + $0x17bc] ss:$12 sps:$4 sm:$0xff]  }
0x1156   : > { %19752 = vmatprep.subr.bf16.mxu1 %v22539_v59  ;;  %v22583_v59 = vld [vmem:[%s23743_s13 + $0x1868] ss:$12 sps:$4 sm:$0xff]  }
0x1157   : > { %15253 = vmatpush1.bf16.msra.mxu0 %v22535_v42  ;;  %v22584_v42 = vld [vmem:[%s23743_s13 + $0x1940] ss:$12 sps:$4 sm:$0xff]  }
0x1158   : > { %15254 = vmatprep.subr.bf16.mxu0 %v22542_v29  ;;  %v22580_v29 = vld [vmem:[%s23743_s13 + $0x17b8] ss:$12 sps:$4 sm:$0xff]  }
0x1159   : > { %19753 = vmatpush3.bf16.msra.mxu1 %v22543_v12  ;;  %v22587_v12 = vld [vmem:[%s23743_s13 + $0x17d4] ss:$12 sps:$4 sm:$0xff]  }
0x115a   : > { %19754 = vmatprep.subr.bf16.mxu1 %v22544_v33  ;;  %v22588_v33 = vld [vmem:[%s23743_s13 + $0x1880] ss:$12 sps:$4 sm:$0xff]  }
0x115b   : > { %15255 = vmatpush1.bf16.msra.mxu0 %v22540_v56  ;;  %v12959_v31 = vpop.f32.mrb[88].mxu1  ;;  %v22589_v56 = vld [vmem:[%s23743_s13 + $0x1958] ss:$12 sps:$4 sm:$0xff]  }
0x115c   : > { %v19929_v26 = vadd.f32 %v12959_v31, %v11151_v22  ;;  %v12961_v41 = vpop.f32.mrb[89].mxu1  ;;  %15256 = vmatprep.subr.bf16.mxu0 %v22547_v51  ;;  %v22592_v51 = vld [vmem:[%s23743_s13 + $0x17ec] ss:$12 sps:$4 sm:$0xff]   ;;  %v22597_v31 = vld [vmem:[%s23743_s13 + $0x1804] ss:$12 sps:$4 sm:$0xff]  }
0x115d   : > { %v19930_v15 = vadd.f32 %v12961_v41, %v11155_v35  ;;  %v12963_v32 = vpop.f32.mrb[90].mxu1  ;;  %19755 = vmatpush3.bf16.msra.mxu1 %v22548_v60  ;;  %v22594_v60 = vld [vmem:[%s23743_s13 + $0x1970] ss:$12 sps:$4 sm:$0xff]   ;;  %v22595_v41 = vld [vmem:[%s23743_s13 + $0x1800] ss:$12 sps:$4 sm:$0xff]  }
0x115e   : > { %v19931_v19 = vadd.f32 %v12963_v32, %v11151_v22  ;;  %v12965_v23 = vpop.f32.mrb[91].mxu1  ;;  %19756 = vmatprep.subr.bf16.mxu1 %v22549_v61  ;;  %v13146_v5 = vmax.f32 %v19929_v26, 0.0  ;;  %v22585_v22 = vld [vmem:[%s23743_s13 + $0x17d0] ss:$12 sps:$4 sm:$0xff]   ;;  %v22590_v61 = vld [vmem:[%s23743_s13 + $0x17e8] ss:$12 sps:$4 sm:$0xff]  }
0x115f   : > { %v19932_v20 = vadd.f32 %v12965_v23, %v11155_v35  ;;  %15257 = vmatpush1.bf16.msra.mxu0 %v22545_v37  ;;  %v13147_v28 = vmax.f32 %v19930_v15, 0.0  ;;  %v22593_v35 = vld [vmem:[%s23743_s13 + $0x1898] ss:$12 sps:$4 sm:$0xff]   ;;  %v22598_v37 = vld [vmem:[%s23743_s13 + $0x18b0] ss:$12 sps:$4 sm:$0xff]  }
0x1160   : > { %v13158_v13 = vmax.f32 %v19931_v19, 0.0  ;;  %15258 = vmatprep.subr.bf16.mxu0 %v22552_v40  ;;  %v22623_v26 = vld [vmem:[%s23743_s13 + $0x1a48] ss:$12 sps:$4 sm:$0xff]   ;;  %v22628_v32 = vld [vmem:[%s23743_s13 + $0x1a60] ss:$12 sps:$4 sm:$0xff]  }
0x1161   : > { %v13159_v50 = vmax.f32 %v19932_v20, 0.0  ;;  %19757 = vmatpush3.bf16.msra.mxu1 %v22553_v45  ;;  %v22601_v40 = vld [vmem:[%s23743_s13 + $0x181c] ss:$12 sps:$4 sm:$0xff]   ;;  %v22599_v45 = vld [vmem:[%s23743_s13 + $0x1818] ss:$12 sps:$4 sm:$0xff]  }
0x1162   : > { %v26041_v55 = vpack.c.bf16 %v13158_v13, %v13146_v5  ;;  %19758 = vmatprep.subr.bf16.mxu1 %v22554_v1  ;;  %v22624_v15 = vld [vmem:[%s23743_s13 + $0x1988] ss:$12 sps:$4 sm:$0xff]   ;;  %v22629_v23 = vld [vmem:[%s23743_s13 + $0x19a0] ss:$12 sps:$4 sm:$0xff]   ;;  %v22633_v1 = vld [vmem:[%s23743_s13 + $0x1a78] ss:$12 sps:$4 sm:$0xff]  }
0x1163   : > { %v13171_v52 = vpack.c.bf16 %v13159_v50, %v13147_v28  ;;  %15259 = vmatpush1.bf16.msra.mxu0 %v22550_v0  ;;  %v22604_v19 = vld [vmem:[%s23743_s13 + $0x1834] ss:$12 sps:$4 sm:$0xff]   ;;  %v22602_v20 = vld [vmem:[%s23743_s13 + $0x1830] ss:$12 sps:$4 sm:$0xff]   ;;  %v22607_v0 = vld [vmem:[%s23743_s13 + $0x184c] ss:$12 sps:$4 sm:$0xff]  }
0x1164   : > { %15260 = vmatprep.subr.bf16.mxu0 %v22557_v8  ;;  %v22638_v5 = vld [vmem:[%s23743_s13 + $0x1a90] ss:$12 sps:$4 sm:$0xff]   ;;  %v22605_v13 = vld [vmem:[%s23743_s13 + $0x1848] ss:$12 sps:$4 sm:$0xff]  }
0x1165   : > { %15276 = vmatprep.mubr.bf16.mxu0 %v13171_v52  ;;  %19759 = vmatpush3.bf16.msra.mxu1 %v22558_v53  ;;  %v22610_v8 = vld [vmem:[%s23743_s13 + $0x1864] ss:$12 sps:$4 sm:$0xff]   ;;  %v22643_v50 = vld [vmem:[%s23743_s13 + $0x1aa8] ss:$12 sps:$4 sm:$0xff]   ;;  %v22608_v53 = vld [vmem:[%s23743_s13 + $0x1860] ss:$12 sps:$4 sm:$0xff]  }
0x1166   : > { %15528 = vmatprep.mubr.bf16.mxu1 %v13171_v52  ;;  %19766 = vmatprep.subr.bf16.mxu1 %v22559_v2  ;;  %v22639_v28 = vld [vmem:[%s23743_s13 + $0x19d0] ss:$12 sps:$4 sm:$0xff]   ;;  %v22644_v2 = vld [vmem:[%s23743_s13 + $0x19e8] ss:$12 sps:$4 sm:$0xff]   ;;  %v22648_v52 = vld [vmem:[%s23743_s13 + $0x1ac0] ss:$12 sps:$4 sm:$0xff]  }
0x1167   : > { %15261 = vmatpush1.bf16.msra.mxu0 %v22555_v38  ;;  %v22611_v38 = vld [vmem:[%s23743_s13 + $0x1878] ss:$12 sps:$4 sm:$0xff]  }
0x1168   : > { %15529 = vmatmul.mubr.bf16.vlgmr.msra.gmra.mrb[108].mxu1 %v26041_v55  ;;  %15262 = vmatprep.subr.bf16.mxu0 %v22562_v3  ;;  %v22616_v3 = vld [vmem:[%s23743_s13 + $0x1894] ss:$12 sps:$4 sm:$0xff]  }
0x1169   : > { %19767 = vmatpush3.bf16.msra.mxu1 %v22563_v54  ;;  %15569 = vmatprep.mubr.bf16.mxu1 %v25934_v6  ;;  %v22649_v54 = vld [vmem:[%s23743_s13 + $0x1a00] ss:$12 sps:$4 sm:$0xff]  }
0x116a   : > { %19768 = vmatprep.subr.bf16.mxu1 %v22564_v63  ;;  %v22653_v63 = vld [vmem:[%s23743_s13 + $0x1ad8] ss:$12 sps:$4 sm:$0xff]  }
0x116b   : > { %15263 = vmatpush1.bf16.msra.mxu0 %v22560_v16  ;;  %v22614_v16 = vld [vmem:[%s23743_s13 + $0x1890] ss:$12 sps:$4 sm:$0xff]  }
0x116c   : > { %15264 = vmatprep.subr.bf16.mxu0 %v22567_v24  ;;  %v22619_v24 = vld [vmem:[%s23743_s13 + $0x18ac] ss:$12 sps:$4 sm:$0xff]  }
0x116d   : > { %19769 = vmatpush3.bf16.msra.mxu1 %v22568_v58  ;;  %v22654_v58 = vld [vmem:[%s23743_s13 + $0x1a18] ss:$12 sps:$4 sm:$0xff]  }
0x116e   : > { %19770 = vmatprep.subr.bf16.mxu1 %v22569_v7  ;;  %v22658_v7 = vld [vmem:[%s23743_s13 + $0x1af0] ss:$12 sps:$4 sm:$0xff]  }
0x116f   : > { %15265 = vmatpush1.bf16.msra.mxu0 %v22565_v17  ;;  %v22617_v17 = vld [vmem:[%s23743_s13 + $0x18a8] ss:$12 sps:$4 sm:$0xff]  }
0x1170   : > { %15266 = vmatprep.subr.bf16.mxu0 %v22572_v11  ;;  %v22622_v11 = vld [vmem:[%s23743_s13 + $0x18c4] ss:$12 sps:$4 sm:$0xff]  }
0x1171   : > { %19771 = vmatpush3.bf16.msra.mxu1 %v22573_v14  ;;  %v22659_v14 = vld [vmem:[%s23743_s13 + $0x1a30] ss:$12 sps:$4 sm:$0xff]  }
0x1172   : > { %19772 = vmatprep.subr.bf16.mxu1 %v22574_v43  ;;  %v22620_v43 = vld [vmem:[%s23743_s13 + $0x18c0] ss:$12 sps:$4 sm:$0xff]  }
0x1173   : > { %15267 = vmatpush1.bf16.msra.mxu0 %v22570_v25  ;;  %v22627_v25 = vld [vmem:[%s23743_s13 + $0x18dc] ss:$12 sps:$4 sm:$0xff]  }
0x1174   : > { %15268 = vmatprep.subr.bf16.mxu0 %v22577_v9  ;;  %v22625_v9 = vld [vmem:[%s23743_s13 + $0x18d8] ss:$12 sps:$4 sm:$0xff]  }
0x1175   : > { %19773 = vmatpush3.bf16.msra.mxu1 %v22578_v27  ;;  %v22632_v27 = vld [vmem:[%s23743_s13 + $0x18f4] ss:$12 sps:$4 sm:$0xff]  }
0x1176   : > { %19774 = vmatprep.subr.bf16.mxu1 %v22579_v49  ;;  %v22630_v49 = vld [vmem:[%s23743_s13 + $0x18f0] ss:$12 sps:$4 sm:$0xff]  }
0x1177   : > { %15269 = vmatpush1.bf16.msra.mxu0 %v22575_v57  ;;  %v22637_v57 = vld [vmem:[%s23743_s13 + $0x190c] ss:$12 sps:$4 sm:$0xff]  }
0x1178   : > { %15270 = vmatprep.subr.bf16.mxu0 %v22582_v36  ;;  %v22635_v36 = vld [vmem:[%s23743_s13 + $0x1908] ss:$12 sps:$4 sm:$0xff]  }
0x1179   : > { %19775 = vmatpush3.bf16.msra.mxu1 %v22583_v59  ;;  %v22642_v59 = vld [vmem:[%s23743_s13 + $0x1924] ss:$12 sps:$4 sm:$0xff]  }
0x117a   : > { %19776 = vmatprep.subr.bf16.mxu1 %v22584_v42  ;;  %v22640_v42 = vld [vmem:[%s23743_s13 + $0x1920] ss:$12 sps:$4 sm:$0xff]  }
0x117b   : > { %15271 = vmatpush1.bf16.msra.mxu0 %v22580_v29  ;;  %v22647_v29 = vld [vmem:[%s23743_s13 + $0x193c] ss:$12 sps:$4 sm:$0xff]  }
0x117c   : > { %15272 = vmatprep.subr.bf16.mxu0 %v22587_v12  ;;  %v22645_v12 = vld [vmem:[%s23743_s13 + $0x1938] ss:$12 sps:$4 sm:$0xff]  }
0x117d   : > { %19777 = vmatpush3.bf16.msra.mxu1 %v22588_v33  ;;  %v11167_v33 = vrot.slane %v25912_v4, %v23775_v48 }
0x117e   : > { %19778 = vmatprep.subr.bf16.mxu1 %v22589_v56  ;;  %v22652_v56 = vld [vmem:[%s23743_s13 + $0x1954] ss:$12 sps:$4 sm:$0xff]  }
0x117f   : > { %15273 = vmatpush1.bf16.msra.mxu0 %v22585_v22  ;;  %v11171_v22 = vrot.slane %v25912_v4, %v24296_v30  ;;  %v22662_v30 = vld [vmem:[%s23743_s13 + $0x1984] ss:$12 sps:$4 sm:$0xff]  }
0x1180   : > { %15274 = vmatprep.subr.bf16.mxu0 %v22592_v51 }
0x1181   : > { %19779 = vmatpush3.bf16.msra.mxu1 %v22593_v35  ;;  %v22650_v35 = vld [vmem:[%s23743_s13 + $0x1950] ss:$12 sps:$4 sm:$0xff]  }
0x1182   : > { %19780 = vmatprep.subr.bf16.mxu1 %v22594_v60 }
0x1183   : > { %15275 = vmatpush1.bf16.msra.mxu0 %v22590_v61 }
0x1184   : > { %15287 = vmatprep.subr.bf16.mxu0 %v22597_v31  ;;  %v22657_v31 = vld [vmem:[%s23743_s13 + $0x196c] ss:$12 sps:$4 sm:$0xff]  }
0x1185   : > { %19781 = vmatpush3.bf16.msra.mxu1 %v22598_v37 }
0x1186   : > { %15277 = vmatmul.mubr.bf16.vlgmr.msra.gmra.mrb[32].mxu0 %v26041_v55  ;;  %19788 = vmatprep.subr.bf16.mxu1 %v22623_v26  ;;  %v22613_v55 = vld [vmem:[%s23743_s13 + $0x187c] ss:$12 sps:$4 sm:$0xff]  }
0x1187   : > { %15288 = vmatpush1.bf16.msra.mxu0 %v22595_v41  ;;  %15319 = vmatprep.mubr.bf16.mxu0 %v25934_v6  ;;  %v22634_v6 = vld [vmem:[%s23743_s13 + $0x19b8] ss:$12 sps:$4 sm:$0xff]  }
0x1188   : > { %15570 = vmatmul.mubr.bf16.vlgmr.msra.gmra.mrb[112].mxu1 %v25931_v39  ;;  %15289 = vmatprep.subr.bf16.mxu0 %v22601_v40 }
0x1189   : > { %19789 = vmatpush3.bf16.msra.mxu1 %v22624_v15 }
0x118a   : > { %19790 = vmatprep.subr.bf16.mxu1 %v22628_v32  ;;  %v22655_v32 = vld [vmem:[%s23743_s13 + $0x1968] ss:$12 sps:$4 sm:$0xff]  }
0x118b   : > { %15290 = vmatpush1.bf16.msra.mxu0 %v22599_v45 }
0x118c   : > { %15291 = vmatprep.subr.bf16.mxu0 %v22604_v19 }
0x118d   : > { %19791 = vmatpush3.bf16.msra.mxu1 %v22629_v23 }
0x118e   : > { %19792 = vmatprep.subr.bf16.mxu1 %v22633_v1 }
0x118f   : > { %15292 = vmatpush1.bf16.msra.mxu0 %v22602_v20 }
0x1190   : > { %15293 = vmatprep.subr.bf16.mxu0 %v22607_v0  ;;  %v22660_v0 = vld [vmem:[%s23743_s13 + $0x1980] ss:$12 sps:$4 sm:$0xff]  }
0x1191   : > { %19793 = vmatpush3.bf16.msra.mxu1 %v22634_v6  ;;  %v22665_v6 = vld [vmem:[%s23743_s13 + $0x199c] ss:$12 sps:$4 sm:$0xff]  }
0x1192   : > { %19794 = vmatprep.subr.bf16.mxu1 %v22638_v5  ;;  %v22663_v5 = vld [vmem:[%s23743_s13 + $0x1998] ss:$12 sps:$4 sm:$0xff]  }
0x1193   : > { %15294 = vmatpush1.bf16.msra.mxu0 %v22605_v13  ;;  %v22668_v13 = vld [vmem:[%s23743_s13 + $0x19b4] ss:$12 sps:$4 sm:$0xff]  }
0x1194   : > { %15295 = vmatprep.subr.bf16.mxu0 %v22610_v8  ;;  %v22666_v8 = vld [vmem:[%s23743_s13 + $0x19b0] ss:$12 sps:$4 sm:$0xff]  }
0x1195   : > { %19795 = vmatpush3.bf16.msra.mxu1 %v22639_v28  ;;  %v22671_v28 = vld [vmem:[%s23743_s13 + $0x19cc] ss:$12 sps:$4 sm:$0xff]  }
0x1196   : > { %19796 = vmatprep.subr.bf16.mxu1 %v22643_v50  ;;  %v22669_v50 = vld [vmem:[%s23743_s13 + $0x19c8] ss:$12 sps:$4 sm:$0xff]  }
0x1197   : > { %15296 = vmatpush1.bf16.msra.mxu0 %v22608_v53  ;;  %v22672_v53 = vld [vmem:[%s23743_s13 + $0x19e0] ss:$12 sps:$4 sm:$0xff]  }
0x1198   : > { %15297 = vmatprep.subr.bf16.mxu0 %v22613_v55  ;;  %v22677_v55 = vld [vmem:[%s23743_s13 + $0x19fc] ss:$12 sps:$4 sm:$0xff]  }
0x1199   : > { %19797 = vmatpush3.bf16.msra.mxu1 %v22644_v2  ;;  %v22675_v2 = vld [vmem:[%s23743_s13 + $0x19f8] ss:$12 sps:$4 sm:$0xff]  }
0x119a   : > { %19798 = vmatprep.subr.bf16.mxu1 %v22648_v52  ;;  %v22680_v52 = vld [vmem:[%s23743_s13 + $0x1a14] ss:$12 sps:$4 sm:$0xff]  }
0x119b   : > { %15298 = vmatpush1.bf16.msra.mxu0 %v22611_v38 }
0x119c   : > { %15299 = vmatprep.subr.bf16.mxu0 %v22616_v3  ;;  %v22678_v3 = vld [vmem:[%s23743_s13 + $0x1a10] ss:$12 sps:$4 sm:$0xff]  }
0x119d   : > { %19799 = vmatpush3.bf16.msra.mxu1 %v22649_v54 }
0x119e   : > { %19800 = vmatprep.subr.bf16.mxu1 %v22653_v63  ;;  %v22683_v63 = vld [vmem:[%s23743_s13 + $0x1a2c] ss:$12 sps:$4 sm:$0xff]  }
0x119f   : > { %15300 = vmatpush1.bf16.msra.mxu0 %v22614_v16 }
0x11a0   : > { %15301 = vmatprep.subr.bf16.mxu0 %v22619_v24 }
0x11a1   : > { %19801 = vmatpush3.bf16.msra.mxu1 %v22654_v58 }
0x11a2   : > { %19802 = vmatprep.subr.bf16.mxu1 %v22658_v7 }
0x11a3   : > { %15302 = vmatpush1.bf16.msra.mxu0 %v22617_v17  ;;  %v22681_v17 = vld [vmem:[%s23743_s13 + $0x1a28] ss:$12 sps:$4 sm:$0xff]  }
0x11a4   : > { %15303 = vmatprep.subr.bf16.mxu0 %v22622_v11  ;;  %v22686_v11 = vld [vmem:[%s23743_s13 + $0x1a44] ss:$12 sps:$4 sm:$0xff]  }
0x11a5   : > { %19803 = vmatpush3.bf16.msra.mxu1 %v22659_v14  ;;  %v22684_v14 = vld [vmem:[%s23743_s13 + $0x1a40] ss:$12 sps:$4 sm:$0xff]  }
0x11a7   : > { %15304 = vmatpush1.bf16.msra.mxu0 %v22620_v43  ;;  %v22689_v43 = vld [vmem:[%s23743_s13 + $0x1a5c] ss:$12 sps:$4 sm:$0xff]  }
0x11a8   : > { %15305 = vmatprep.subr.bf16.mxu0 %v22627_v25  ;;  %v22687_v25 = vld [vmem:[%s23743_s13 + $0x1a58] ss:$12 sps:$4 sm:$0xff]  }
0x11ab   : > { %15306 = vmatpush1.bf16.msra.mxu0 %v22625_v9  ;;  %v22692_v9 = vld [vmem:[%s23743_s13 + $0x1a74] ss:$12 sps:$4 sm:$0xff]  }
0x11ac   : > { %15307 = vmatprep.subr.bf16.mxu0 %v22632_v27  ;;  %v22690_v27 = vld [vmem:[%s23743_s13 + $0x1a70] ss:$12 sps:$4 sm:$0xff]  }
0x11af   : > { %15308 = vmatpush1.bf16.msra.mxu0 %v22630_v49  ;;  %v22695_v49 = vld [vmem:[%s23743_s13 + $0x1a8c] ss:$12 sps:$4 sm:$0xff]  }
0x11b0   : > { %15309 = vmatprep.subr.bf16.mxu0 %v22637_v57  ;;  %v22693_v57 = vld [vmem:[%s23743_s13 + $0x1a88] ss:$12 sps:$4 sm:$0xff]  }
0x11b3   : > { %15310 = vmatpush1.bf16.msra.mxu0 %v22635_v36  ;;  %v22698_v36 = vld [vmem:[%s23743_s13 + $0x1aa4] ss:$12 sps:$4 sm:$0xff]  }
0x11b4   : > { %15311 = vmatprep.subr.bf16.mxu0 %v22642_v59  ;;  %v22696_v59 = vld [vmem:[%s23743_s13 + $0x1aa0] ss:$12 sps:$4 sm:$0xff]  }
0x11b7   : > { %15312 = vmatpush1.bf16.msra.mxu0 %v22640_v42  ;;  %v22701_v42 = vld [vmem:[%s23743_s13 + $0x1abc] ss:$12 sps:$4 sm:$0xff]  }
0x11b8   : > { %15313 = vmatprep.subr.bf16.mxu0 %v22647_v29  ;;  %v19095_v29 = vld [vmem:[%s24556_s30 + $0x6] sm:$0x7] }
0x11bb   : > { %15314 = vmatpush1.bf16.msra.mxu0 %v22645_v12  ;;  %v13131_v51 = vpop.f32.mrb[92].mxu1  ;;  %v22699_v12 = vld [vmem:[%s23743_s13 + $0x1ab8] ss:$12 sps:$4 sm:$0xff]  }
0x11bc   : > { %v19937_v60 = vadd.f32 %v13131_v51, %v11167_v33  ;;  %v13133_v61 = vpop.f32.mrb[93].mxu1  ;;  %15315 = vmatprep.subr.bf16.mxu0 %v22652_v56  ;;  %v13575_v56 = vrot.slane %v19095_v29, %v23775_v48  ;;  %v22702_v51 = vld [vmem:[%s23743_s13 + $0x1ad0] ss:$12 sps:$4 sm:$0xff]  }
0x11bd   : > { %v19938_v37 = vadd.f32 %v13133_v61, %v11171_v22  ;;  %v13135_v26 = vpop.f32.mrb[94].mxu1 }
0x11be   : > { %v19939_v41 = vadd.f32 %v13135_v26, %v11167_v33  ;;  %v13137_v40 = vpop.f32.mrb[95].mxu1  ;;  %v13150_v45 = vmax.f32 %v19937_v60, 0.0  ;;  %v22704_v33 = vld [vmem:[%s23743_s13 + $0x1ad4] ss:$12 sps:$4 sm:$0xff]   ;;  %v22707_v60 = vld [vmem:[%s23743_s13 + $0x1aec] ss:$12 sps:$4 sm:$0xff]  }
0x11bf   : > { %v19940_v15 = vadd.f32 %v13137_v40, %v11171_v22  ;;  %15316 = vmatpush1.bf16.msra.mxu0 %v22650_v35  ;;  %v13151_v4 = vmax.f32 %v19938_v37, 0.0 }
0x11c0   : > { %v13162_v19 = vmax.f32 %v19939_v41, 0.0  ;;  %15317 = vmatprep.subr.bf16.mxu0 %v22657_v31 }
0x11c1   : > { %v13163_v23 = vmax.f32 %v19940_v15, 0.0 }
0x11c2   : > { %v26132_v1 = vpack.c.bf16 %v13162_v19, %v13150_v45 }
0x11c3   : > { %v13175_v20 = vpack.c.bf16 %v13163_v23, %v13151_v4  ;;  %15318 = vmatpush1.bf16.msra.mxu0 %v22655_v32  ;;  %v22705_v32 = vld [vmem:[%s23743_s13 + $0x1ae8] ss:$12 sps:$4 sm:$0xff]  }
0x11c4   : > { %15330 = vmatprep.subr.bf16.mxu0 %v22662_v30 }
0x11c5   : > { %15610 = vmatprep.mubr.bf16.mxu1 %v13175_v20 }
0x11c6   : > { %15320 = vmatmul.mubr.bf16.vlgmr.msra.gmra.mrb[32].mxu0 %v25931_v39  ;;  %15611 = vmatmul.mubr.bf16.vlgmr.msra.gmra.mrb[116].mxu1 %v26132_v1  ;;  %v22674_v39 = vld [vmem:[%s23743_s13 + $0x19e4] ss:$12 sps:$4 sm:$0xff]  }
0x11c7   : > { %15331 = vmatpush1.bf16.msra.mxu0 %v22660_v0  ;;  %15362 = vmatprep.mubr.bf16.mxu0 %v13175_v20 }
0x11c8   : > { %15332 = vmatprep.subr.bf16.mxu0 %v22665_v6 }
0x11cb   : > { %15333 = vmatpush1.bf16.msra.mxu0 %v22663_v5 }
0x11cc   : > { %15334 = vmatprep.subr.bf16.mxu0 %v22668_v13 }
0x11cf   : > { %15335 = vmatpush1.bf16.msra.mxu0 %v22666_v8 }
0x11d0   : > { %15336 = vmatprep.subr.bf16.mxu0 %v22671_v28 }
0x11d3   : > { %15337 = vmatpush1.bf16.msra.mxu0 %v22669_v50 }
0x11d4   : > { %15338 = vmatprep.subr.bf16.mxu0 %v22674_v39 }
0x11d7   : > { %15339 = vmatpush1.bf16.msra.mxu0 %v22672_v53 }
0x11d8   : > { %15340 = vmatprep.subr.bf16.mxu0 %v22677_v55 }
0x11db   : > { %15341 = vmatpush1.bf16.msra.mxu0 %v22675_v2  ;;  %v19694_v38 = vpop.f32.mrb[96].mxu1 }
0x11dc   : > { %v19695_v54 = vpop.f32.mrb[97].mxu1  ;;  %15342 = vmatprep.subr.bf16.mxu0 %v22680_v52 }
0x11dd   : > { %v19696_v16 = vadd.f32 %v19695_v54, %v19694_v38  ;;  %v19697_v24 = vpop.f32.mrb[98].mxu1 }
0x11de   : > { %v19698_v58 = vpop.f32.mrb[99].mxu1 }
0x11df   : > { %15343 = vmatpush1.bf16.msra.mxu0 %v22678_v3  ;;  %v19699_v7 = vadd.f32 %v19698_v58, %v19697_v24  ;;  %v15408_v61 = vadd.f32 %v19696_v16, %v13575_v56 }
0x11e0   : > { %15344 = vmatprep.subr.bf16.mxu0 %v22683_v63 }
0x11e1   : > { %v15411_v41 = vadd.f32 %v19699_v7, %v13575_v56 }
0x11e3   : > { %15345 = vmatpush1.bf16.msra.mxu0 %v22681_v17 }
0x11e4   : > { %15346 = vmatprep.subr.bf16.mxu0 %v22686_v11 }
0x11e7   : > { %15347 = vmatpush1.bf16.msra.mxu0 %v22684_v14 }
0x11e8   : > { %15348 = vmatprep.subr.bf16.mxu0 %v22689_v43 }
0x11eb   : > { %15349 = vmatpush1.bf16.msra.mxu0 %v22687_v25 }
0x11ec   : > { %15350 = vmatprep.subr.bf16.mxu0 %v22692_v9 }
0x11ef   : > { %15351 = vmatpush1.bf16.msra.mxu0 %v22690_v27 }
0x11f0   : > { %15352 = vmatprep.subr.bf16.mxu0 %v22695_v49 }
0x11f3   : > { %15353 = vmatpush1.bf16.msra.mxu0 %v22693_v57  ;;  %v13567_v57 = vrot.slane %v19095_v29, %v23769_v46 }
0x11f4   : > { %15354 = vmatprep.subr.bf16.mxu0 %v22698_v36  ;;  %v13571_v36 = vrot.slane %v19095_v29, %v23772_v47 }
0x11f7   : > { %15355 = vmatpush1.bf16.msra.mxu0 %v22696_v59 }
0x11f8   : > { %15356 = vmatprep.subr.bf16.mxu0 %v22701_v42 }
0x11fb   : > { %15357 = vmatpush1.bf16.msra.mxu0 %v22699_v12  ;;  %v19716_v22 = vpop.f32.mrb[100].mxu1 }
0x11fc   : > { %v19717_v35 = vpop.f32.mrb[101].mxu1  ;;  %15358 = vmatprep.subr.bf16.mxu0 %v22704_v33 }
0x11fd   : > { %v19718_v31 = vadd.f32 %v19717_v35, %v19716_v22  ;;  %v19719_v37 = vpop.f32.mrb[102].mxu1 }
0x11fe   : > { %v19720_v26 = vpop.f32.mrb[103].mxu1 }
0x11ff   : > { %v15449_v40 = vadd.f32 %v19718_v31, %v15408_v61  ;;  %15359 = vmatpush1.bf16.msra.mxu0 %v22702_v51  ;;  %v19721_v15 = vadd.f32 %v19720_v26, %v19719_v37  ;;  %v22738_v26 = vld [vmem:[#allocation21 + $0x40] sm:$0xff] (!%p19384_p6)  }
0x1200   : > { %15360 = vmatprep.subr.bf16.mxu0 %v22707_v60 }
0x1201   : > { %v15452_v45 = vadd.f32 %v19721_v15, %v15411_v41  ;;  %v22740_v41 = vld [vmem:[#allocation21] sm:$0xff] (!%p19384_p6)  }
0x1203   : > { %15361 = vmatpush1.bf16.msra.mxu0 %v22705_v32 }
0x1204   : > { %19810 = vmatprep.subr.bf16.mxu0 (!%p19384_p6), %v22738_v26 }
0x1206   : > { %15363 = vmatmul.mubr.bf16.vlgmr.msra.gmra.mrb[32].mxu0 %v26132_v1 }
0x1207   : > { %19811 = vmatpush3.bf16.msra.mxu0 (!%p19384_p6), %v22740_v41 }
0x121b   : > { %v19738_v19 = vpop.f32.mrb[104].mxu1 }
0x121c   : > { %v19739_v30 = vpop.f32.mrb[105].mxu1 }
0x121d   : > { %v19740_v4 = vadd.f32 %v19739_v30, %v19738_v19  ;;  %v19741_v23 = vpop.f32.mrb[106].mxu1 }
0x121e   : > { %v19742_v20 = vpop.f32.mrb[107].mxu1 }
0x121f   : > { %v15490_v0 = vadd.f32 %v19740_v4, %v15449_v40  ;;  %v19743_v6 = vadd.f32 %v19742_v20, %v19741_v23  ;;  %v23247_v40 = vmov (!%p19384_p6), 0.0  }
0x1220   : > { %19841 = vmatprep.subr.bf16.mxu1 (!%p19384_p6), %v23247_v40  ;;  %19857 = vmatprep.mubr.msk.bf16.mxu1 (!%p19384_p6), %vm23248_vm0, %v23247_v40 }
0x1221   : > { %v15493_v5 = vadd.f32 %v19743_v6, %v15452_v45 }
0x123b   : > { %v19760_v13 = vpop.f32.mrb[108].mxu1 }
0x123c   : > { %v19761_v8 = vpop.f32.mrb[109].mxu1 }
0x123d   : > { %v19762_v28 = vadd.f32 %v19761_v8, %v19760_v13  ;;  %v19763_v50 = vpop.f32.mrb[110].mxu1 }
0x123e   : > { %v19764_v39 = vpop.f32.mrb[111].mxu1 }
0x123f   : > { %v15531_v53 = vadd.f32 %v19762_v28, %v15490_v0  ;;  %v19765_v55 = vadd.f32 %v19764_v39, %v19763_v50 }
0x1241   : > { %v15534_v2 = vadd.f32 %v19765_v55, %v15493_v5 }
0x125b   : > { %v19782_v52 = vpop.f32.mrb[112].mxu1 }
0x125c   : > { %v19783_v38 = vpop.f32.mrb[113].mxu1 }
0x125d   : > { %v19784_v3 = vadd.f32 %v19783_v38, %v19782_v52  ;;  %v19785_v1 = vpop.f32.mrb[114].mxu1  ;;  %v22742_v52 = vld [vmem:[#allocation21 + $0x88] sm:$0xff] (!%p19384_p6)  }
0x125e   : > { %v19786_v54 = vpop.f32.mrb[115].mxu1  ;;  %v22743_v38 = vld [vmem:[#allocation21 + $0x8] sm:$0xff] (!%p19384_p6)  }
0x125f   : > { %v15572_v63 = vadd.f32 %v19784_v3, %v15531_v53  ;;  %v19787_v16 = vadd.f32 %v19786_v54, %v19785_v1  ;;  %v22744_v3 = vld [vmem:[#allocation21 + $0x50] sm:$0xff] (!%p19384_p6)  }
0x1260   : > { %v22745_v1 = vld [vmem:[#allocation21 + $0x90] sm:$0xff] (!%p19384_p6)  }
0x1261   : > { %v15575_v24 = vadd.f32 %v19787_v16, %v15534_v2  ;;  %v22741_v2 = vld [vmem:[#allocation21 + $0x48] sm:$0xff] (!%p19384_p6)   ;;  %v22746_v54 = vld [vmem:[#allocation21 + $0x10] sm:$0xff] (!%p19384_p6)   ;;  %v22748_v16 = vld [vmem:[#allocation21 + $0x98] sm:$0xff] (!%p19384_p6)  }
0x1262   : > { %19812 = vmatprep.subr.bf16.mxu0 (!%p19384_p6), %v22741_v2 }
0x1263   : > { %19813 = vmatpush3.bf16.msra.mxu0 (!%p19384_p6), %v22743_v38 }
0x1264   : > { %19814 = vmatprep.subr.bf16.mxu0 (!%p19384_p6), %v22744_v3 }
0x1267   : > { %19815 = vmatpush3.bf16.msra.mxu0 (!%p19384_p6), %v22746_v54 }
0x1299   : > { %v19804_v58 = vpop.f32.mrb[116].mxu1 }
0x129a   : > { %v19805_v7 = vpop.f32.mrb[117].mxu1 }
0x129b   : > { %v19806_v17 = vadd.f32 %v19805_v7, %v19804_v58  ;;  %v19807_v11 = vpop.f32.mrb[118].mxu1  ;;  %v22750_v58 = vld [vmem:[#allocation21 + $0x60] sm:$0xff] (!%p19384_p6)  }
0x129c   : > { %v19808_v14 = vpop.f32.mrb[119].mxu1  ;;  %v22751_v7 = vld [vmem:[#allocation21 + $0xa0] sm:$0xff] (!%p19384_p6)  }
0x129d   : > { %v15613_v43 = vadd.f32 %v19806_v17, %v15572_v63  ;;  %v19809_v25 = vadd.f32 %v19808_v14, %v19807_v11  ;;  %v22747_v63 = vld [vmem:[#allocation21 + $0x58] sm:$0xff] (!%p19384_p6)   ;;  %v22752_v17 = vld [vmem:[#allocation21 + $0x20] sm:$0xff] (!%p19384_p6)   ;;  %v22753_v11 = vld [vmem:[#allocation21 + $0x68] sm:$0xff] (!%p19384_p6)  }
0x129e   : > { %19816 = vmatprep.subr.bf16.mxu0 (!%p19384_p6), %v22747_v63  ;;  %v22754_v14 = vld [vmem:[#allocation21 + $0xa8] sm:$0xff] (!%p19384_p6)  }
0x129f   : > { %v15621_v9 = vadd.f32 %v15613_v43, %v25421_v34  ;;  %v15616_v27 = vadd.f32 %v19809_v25, %v15575_v24  ;;  %v22749_v24 = vld [vmem:[#allocation21 + $0x18] sm:$0xff] (!%p19384_p6)   ;;  %v22755_v43 = vld [vmem:[#allocation21 + $0x28] sm:$0xff] (!%p19384_p6)   ;;  %v22756_v25 = vld [vmem:[#allocation21 + $0x70] sm:$0xff] (!%p19384_p6)  }
0x12a0   : > { %19817 = vmatpush3.bf16.msra.mxu0 (!%p19384_p6), %v22749_v24 }
0x12a1   : > { %15627 = vst [vmem:[#allocation2 + $0x10] sm:$0xff] %v15621_v9  ;;  %v15624_v49 = vadd.f32 %v15616_v27, %v25426_v62  ;;  %19818 = vmatprep.subr.bf16.mxu0 (!%p19384_p6), %v22750_v58  ;;  %v22758_v27 = vld [vmem:[#allocation21 + $0x30] sm:$0xff] (!%p19384_p6)  }
0x12a3   : > { %15630 = vst [vmem:[#allocation2 + $0x28] sm:$0xff] %v15624_v49 }
0x12a4   : > { %19819 = vmatpush3.bf16.msra.mxu0 (!%p19384_p6), %v22752_v17 }
0x12a5   : > { %19820 = vmatprep.subr.bf16.mxu0 (!%p19384_p6), %v22753_v11 }
0x12a8   : > { %19821 = vmatpush3.bf16.msra.mxu0 (!%p19384_p6), %v22755_v43 }
0x12a9   : > { %19822 = vmatprep.subr.bf16.mxu0 (!%p19384_p6), %v22756_v25 }
0x12ac   : > { %19823 = vmatpush3.bf16.msra.mxu0 (!%p19384_p6), %v22758_v27 }
0x12d9   : > { %v15364_v59 = vpop.f32.mrb[32].mxu0 }
0x12da   : > { %v19941_v42 = vadd.f32 %v15364_v59, %v13567_v57  ;;  %v15366_v12 = vpop.f32.mrb[33].mxu0 }
0x12db   : > { %v19942_v33 = vadd.f32 %v15366_v12, %v13571_v36  ;;  %v15368_v56 = vpop.f32.mrb[34].mxu0  ;;  %15634 = sbr.rel (%p19384_p6) target bundleno = 5379 (0x1503), region = 132 }
0x12dc   : > { %v15619_v22 = vadd.f32 %v19941_v42, %v25409_v44  ;;  %v19943_v51 = vadd.f32 %v15368_v56, %v13567_v57  ;;  %v15370_v35 = vpop.f32.mrb[35].mxu0  ;;  %v22760_v57 = vld [vmem:[#allocation21 + $0xb8] sm:$0xff] (!%p19384_p6)  }
0x12dd   : > { %v15620_v34 = vadd.f32 %v19942_v33, %v25412_v21  ;;  %v19944_v60 = vadd.f32 %v15370_v35, %v13571_v36  ;;  %v22739_v21 = vld [vmem:[#allocation21 + $0x80] sm:$0xff] (!%p19384_p6)   ;;  %v22761_v36 = vld [vmem:[#allocation21 + $0x38] sm:$0xff] (!%p19384_p6)  }
0x12de   : > { %15625 = vst [vmem:[#allocation2] sm:$0xff] %v15619_v22  ;;  %v15622_v62 = vadd.f32 %v19943_v51, %v25415_v10  ;;  %19842 = vmatpush3.bf16.msra.mxu1 (!%p19384_p6), %v22739_v21  ;;  %v15635_v51 = vld [vmem:[#allocation18] sm:$0x7] (!%p19384_p6) }
0x12df   : > { %15626 = vst [vmem:[#allocation2 + $0x8] sm:$0xff] %v15620_v34  ;;  %v15623_v61 = vadd.f32 %v19944_v60, %v25418_v18  ;;  %v15637_v29 = vadd.f32 (!%p19384_p6), %v15620_v34, %v15619_v22  ;;  %19843 = vmatprep.subr.bf16.mxu1 (!%p19384_p6), %v23247_v40 }
0x12e0   : > { %15628 = vst [vmem:[#allocation2 + $0x18] sm:$0xff] %v15622_v62 }
0x12e1   : > { %15629 = vst [vmem:[#allocation2 + $0x20] sm:$0xff] %v15623_v61  ;;  %v15641_v31 = vadd.f32 (!%p19384_p6), %v15623_v61, %v15622_v62  ;;  %v15638_v37 = vadd.f32 (!%p19384_p6), %v15637_v29, %v15621_v9  ;;  %v15691_v29 = vrot.slane (!%p19384_p6), %v15635_v51, %v23775_v48 }
0x12e2   : > { %19844 = vmatpush3.bf16.msra.mxu1 %v22742_v52 }
0x12e3   : > { %15639 = vadd.xlane.f32.xlu0 %v15638_v37  ;;  %v15642_v44 = vadd.f32 %v15641_v31, %v15624_v49  ;;  %19845 = vmatprep.subr.bf16.mxu1 %v23247_v40  ;;  %v15683_v37 = vrot.slane %v15635_v51, %v23769_v46 }
0x12e6   : > { %19846 = vmatpush3.bf16.msra.mxu1 %v22745_v1 }
0x12e7   : > { %15643 = vadd.xlane.f32.xlu0 %v15642_v44  ;;  %19847 = vmatprep.subr.bf16.mxu1 %v23247_v40 }
0x12ea   : > { %19848 = vmatpush3.bf16.msra.mxu1 %v22748_v16 }
0x12eb   : > { %19849 = vmatprep.subr.bf16.mxu1 %v23247_v40 }
0x12ee   : > { %19850 = vmatpush3.bf16.msra.mxu1 %v22751_v7 }
0x12ef   : > { %19851 = vmatprep.subr.bf16.mxu1 %v23247_v40 }
0x12f2   : > { %19852 = vmatpush3.bf16.msra.mxu1 %v22754_v14 }
0x12f3   : > { %19853 = vmatprep.subr.bf16.mxu1 %v23247_v40 }
0x1370   : > { %v15640_v10 = vpop.xlane.xlu0 %15639 }
0x1371   : > { %v15645_v18 = vmul.f32 0.0026041667, %v15640_v10 }
0x1373   : > { %v26181_v15 = vsub.f32 %v15619_v22, %v15645_v18  ;;  %v26183_v32 = vsub.f32 %v15620_v34, %v15645_v18  ;;  %v26185_v45 = vsub.f32 %v15621_v9, %v15645_v18  ;;  %v22757_v9 = vld [vmem:[#allocation21 + $0xb0] sm:$0xff]   ;;  %v15636_v34 = vld [vmem:[#allocation20] sm:$0x7] }
0x1374   : > { %v15644_v19 = vpop.xlane.xlu0 %15643  ;;  %19854 = vmatpush3.bf16.msra.mxu1 %v22757_v9  ;;  %v15709_v26 = vrot.slane %v15636_v34, %v23772_v47  ;;  %v15713_v21 = vrot.slane %v15636_v34, %v23775_v48 }
0x1375   : > { %v15646_v30 = vmul.f32 0.0026041667, %v15644_v19  ;;  %v15653_v4 = vmul.f32 %v26181_v15, %v26181_v15  ;;  %v15654_v23 = vmul.f32 %v26183_v32, %v26183_v32  ;;  %v15655_v20 = vmul.f32 %v26185_v45, %v26185_v45  ;;  %19855 = vmatprep.subr.bf16.mxu1 %v23247_v40 }
0x1376   : > { %v15705_v19 = vrot.slane %v15636_v34, %v23769_v46 }
0x1377   : > { %v26193_v0 = vsub.f32 %v15622_v62, %v15646_v30  ;;  %v26195_v6 = vsub.f32 %v15623_v61, %v15646_v30  ;;  %v26197_v5 = vsub.f32 %v15624_v49, %v15646_v30  ;;  %v15659_v13 = vadd.f32 %v15654_v23, %v15653_v4  ;;  %v22759_v49 = vld [vmem:[#allocation21 + $0x78] sm:$0xff]  }
0x1378   : > { %19824 = vmatprep.subr.bf16.mxu0 %v22759_v49  ;;  %19856 = vmatpush3.bf16.msra.mxu1 %v22760_v57  ;;  %v15687_v62 = vrot.slane %v15635_v51, %v23772_v47 }
0x1379   : > { %v15660_v8 = vadd.f32 %v15659_v13, %v15655_v20  ;;  %v15656_v28 = vmul.f32 %v26193_v0, %v26193_v0  ;;  %v15657_v50 = vmul.f32 %v26195_v6, %v26195_v6  ;;  %v15658_v39 = vmul.f32 %v26197_v5, %v26197_v5  ;;  %19825 = vmatpush3.bf16.msra.mxu0 %v22761_v36 }
0x137b   : > { %15661 = vadd.xlane.f32.xlu1 %v15660_v8  ;;  %v15663_v53 = vadd.f32 %v15657_v50, %v15656_v28 }
0x137d   : > { %v15664_v55 = vadd.f32 %v15663_v53, %v15658_v39  ;;  %v19385_v53 = vld [vmem:[#allocation23] ss:$0 sm:$0xff] }
0x137f   : > { %15665 = vadd.xlane.f32.xlu1 %v15664_v55 }
0x1408   : > { %v15662_v59 = vpop.xlane.xlu1 %15661 }
0x1409   : > { %v15667_v42 = vmul.f32 0.0026041667, %v15662_v59 }
0x140b   : > { %v15669_v12 = vadd.f32 1e-05, %v15667_v42 }
0x140c   : > { %v15666_v33 = vpop.xlane.xlu1 %15665 }
0x140d   : > { %22762 = vrsqrt.f32 %v15669_v12  ;;  %v15668_v56 = vmul.f32 0.0026041667, %v15666_v33 }
0x140f   : > { %v15670_v22 = vadd.f32 1e-05, %v15668_v56 }
0x1411   : > { %22764 = vrsqrt.f32 %v15670_v22 }
0x1417   : > { %v22763_v35 = vpop.eup %22762 }
0x1418   : > { %v15674_v60 = vmul.f32 %v22763_v35, %v26183_v32  ;;  %v15675_v61 = vmul.f32 %v22763_v35, %v26185_v45  ;;  %v15673_v31 = vmul.f32 %v22763_v35, %v26181_v15 }
0x141a   : > { %v15696_v40 = vmul.f32 %v15687_v62, %v15674_v60  ;;  %v15697_v18 = vmul.f32 %v15691_v29, %v15675_v61  ;;  %v15695_v45 = vmul.f32 %v15683_v37, %v15673_v31 }
0x141b   : > { %v22765_v44 = vpop.eup %22764 }
0x141c   : > { %v15677_v41 = vmul.f32 %v22765_v44, %v26195_v6  ;;  %v15678_v10 = vmul.f32 %v22765_v44, %v26197_v5  ;;  %v15676_v32 = vmul.f32 %v22765_v44, %v26193_v0  ;;  %v15718_v23 = vadd.f32 %v15709_v26, %v15696_v40 }
0x141d   : > { %v15719_v13 = vadd.f32 %v15713_v21, %v15697_v18  ;;  %v15717_v8 = vadd.f32 %v15705_v19, %v15695_v45 }
0x141e   : > { %v15699_v30 = vmul.f32 %v15687_v62, %v15677_v41  ;;  %v15700_v15 = vmul.f32 %v15691_v29, %v15678_v10  ;;  %v15698_v4 = vmul.f32 %v15683_v37, %v15676_v32 }
0x1420   : > { %v15721_v20 = vadd.f32 %v15709_v26, %v15699_v30  ;;  %v15722_v47 = vadd.f32 %v15713_v21, %v15700_v15  ;;  %v15720_v48 = vadd.f32 %v15705_v19, %v15698_v4 }
0x1422   : > { %v15724_v28 = vpack.c.bf16 %v15721_v20, %v15718_v23  ;;  %v15725_v6 = vpack.c.bf16 %v15722_v47, %v15719_v13  ;;  %v15723_v50 = vpack.c.bf16 %v15720_v48, %v15717_v8 }
0x1424   : > { %15957 = vmatprep.mubr.bf16.mxu0 %v15724_v28  ;;  %19858 = vmatmul.mubr.bf16.vlgmr.msra.gmra.mrb[0].mxu1 %v15725_v6 }
0x1425   : > { %15958 = vmatmul.mubr.bf16.vlgmr.msra.gmra.mrb[0].mxu0 %v15723_v50 }
0x14f7   : > { %v16000_v5 = vpop.f32.mrb[0].mxu1 }
0x14f8   : > { %v19826_v0 = vpop.f32.mrb[0].mxu0  ;;  %v19859_v39 = vpop.f32.mrb[1].mxu1 }
0x14f9   : > { %v19827_v46 = vpop.f32.mrb[1].mxu0  ;;  %v16003_v55 = vpop.f32.mrb[2].mxu1 }
0x14fa   : > { %v19828_v2 = vadd.f32 %v19827_v46, %v19826_v0  ;;  %v19829_v52 = vpop.f32.mrb[2].mxu0  ;;  %v19860_v38 = vpop.f32.mrb[3].mxu1 }
0x14fb   : > { %v19830_v3 = vpop.f32.mrb[3].mxu0 }
0x14fc   : > { %v15960_v1 = vadd.f32 %v19828_v2, %v19385_v53  ;;  %v19831_v54 = vadd.f32 %v19830_v3, %v19829_v52 }
0x14fe   : > { %v16001_v63 = vadd.f32 %v16000_v5, %v15960_v1  ;;  %v15963_v16 = vadd.f32 %v19831_v54, %v19385_v53 }
0x1500   : > { %16007 = vst [vmem:[#allocation24] sm:$0xff] %v16001_v63  ;;  %v16004_v24 = vadd.f32 %v16003_v55, %v15963_v16 }
0x1502   : > { %16008 = vst [vmem:[#allocation24 + $0x8] sm:$0xff] %v16004_v24 }
0x1503 PF: > { %p20200_p7 = scmp.eq.s32.totalorder %s23343_s14, 1  ;;  %s23249_s24 = smov [#allocation24]  }
0x1504   : > { %s16015_s25 = sshll.u32 %s23249_s24, 4  ;;  %s16016_s25 = int_to_ptr.vmem [resolvable:$true] %s16015_s25 }
0x1505   : > { %s23134_s8 = scalar_lea.vmem %s16016_s25, 256  ;;  %p23141_p11 = scmp.lt.s32.totalorder %s16016_s25, %s16016_s25 }
0x1506   : > { %p23135_p10 = scmp.ne.s32.totalorder %s16016_s25, %s23134_s8  ;;  %p23142_p2 = scmp.lt.s32.totalorder %s23134_s8, %s23134_s8 }
0x1508   : > { %p23136_p12 = pnand %p23135_p10, %p20200_p7  ;;  %p23143_p1 = por %p23142_p2, %p23141_p11 }
0x150a   : > { %p23137_p0 = pneg %p23136_p12 }
0x150c   : > { %p23144_p8 = pnand %p23143_p1, %p23137_p0 }
0x150e   : > { %23147 = shalt.err (!%p23144_p8)
}
0x150f   : > { %s26348_s28 = sld [smem:[#allocation45_spill]] }
0x1515   : > { %s26349_s23 = smov %s26348_s28  ;;  %s23148_s22 = scalar_lea.hbm %s26348_s28, 256 }
0x1516   : > { %p23149_p3 = scmp.ne.s32.totalorder %s26349_s23, %s23148_s22  ;;  %p23154_p5 = scmp.lt.u32.totalorder %s23148_s22, %s26349_s23 }
0x1518   : > { %p23150_p9 = pnand %p23149_p3, %p20200_p7 }
0x151a   : > { %p23151_p4 = pneg %p23150_p9 }
0x151c   : > { %p23156_p13 = pnand %p23154_p5, %p23151_p4 }
0x151e   : > { %23159 = shalt.err (!%p23156_p13)
}
0x151f   : > { %s23250_s13 = smov 128   ;;  %s23251_s20 = smov 8  }
0x1520   : > { %20131 = dma.vmem_to_hbm [thread:$0]  (%p20200_p7), %s16016_s25, 256, %s26349_s23, [#allocation5], %s23250_s13, %s23250_s13, %s23251_s20  }
0x1521   : > { %23205 = dma.done.wait (%p20200_p7), [#allocation5], 256  }
0x1522   : > { %23207 = vsyncadd (%p20200_p7), [#allocation5], 4294967040 }
0x1523 PF: > { %s26350_s16 = sld [smem:[#allocation33_spill]]  ;;  %s26351_s27 = sld [smem:[#allocation35_spill]] }
0x1524   : > { %p30_p6 = scmp.ge.s32.totalorder %s23495_s19, 4   ;;  %s26352_s25 = smov %s23214_s26 }
0x1525   : > { %s26354_s28 = smov %s23495_s19 }
0x1526   :  { %32 = sbr.rel (!%p30_p6) target bundleno = 21 (0x15), region = 195 }
0x1529   : > { %s26353_s26 = smov %s26350_s16 }
0x152d   :  { %16031 = vsyncpa [#allocation4], 1 }
0x152e   :  { %16033 = vsyncpa [#allocation4 + $0x1], 1 }
0x152f   :  { %16034 = vsyncpa [#allocation7], 1 }
0x1530   :  { %16035 = vsyncpa [#allocation10], 1 }
0x1531   :  { %16036 = vsyncpa [#allocation13], 1 }
0x1532   :  { %16037 = vsyncpa [#allocation16], 1 }
0x1533   :  { %16039 = vsyncpa [#allocation16 + $0x1], 1 }
0x1534   :  { %16040 = vsyncpa [#allocation19], 1 }
0x1535   :  { %16041 = vsyncpa [#allocation22], 1 }
0x1536   :  { %16042 = vsyncpa [#allocation5], 1 }
0x1537   :  { %16044 = vsyncpa [#allocation5 + $0x1], 1 }

</bundles_post_ra>
